<compile_context>
chip_gen: v5e
topology: v5e:2x2
jax: 0.10.0
libtpu: 0.0.40
codegen_flags: <defaults>
</compile_context>

<pallas_src>
import functools

import jax
import jax.numpy as jnp
import numpy as np
from jax.experimental import pallas as pl
from jax.experimental.pallas import tpu as pltpu

# Architecture from the PyTorch module:
#   Conv2d(3,32,8,s4) -> Conv2d(32,64,4,s2) -> Conv2d(64,64,3,s1)
#   -> Linear(conv_out, 512) -> Linear(512, action_dim + 1)
_CONV_SPECS = ((32, 8, 4), (64, 4, 2), (64, 3, 1))   # (Cout, K, stride)
_IN_CH = 3
_FC_HIDDEN = 512


def _conv_out(n, k, s):
    return (n - k) // s + 1


def _round_up(x, m):
    return ((x + m - 1) // m) * m


# ----------------------------------------------------------------------------
# Fused kernel: one grid step = `bt` images.  Weights are VMEM-resident
# (constant block index across the grid); activations never leave VMEM.
# Row dimension everywhere is ordered (conv-row, image) so all lhs slices are
# contiguous and 8-aligned (offsets are multiples of bt).
# ----------------------------------------------------------------------------
def _fused_forward_kernel(x_ref, w1_ref, b1_ref, w2_ref, b2_ref, w3_ref, b3_ref,
                          fc1w_ref, fc1b_ref, fc2w_ref, fc2b_ref, out_ref, *,
                          bt, P, s1, s2, kh1, kh2, kh3, oh2, oh3, rows_res):
    f32, bf16 = jnp.float32, jnp.bfloat16

    def conv(lhs_fn, w_ref, b_ref, kh):
        # relu( sum_ki lhs(ki) @ W_toeplitz[ki] + b ), f32 accumulate/epilogue,
        # cast to bf16 exactly once for the next MXU stage.
        acc = None
        for ki in range(kh):                                   # static, unrolled
            t = jnp.dot(lhs_fn(ki), w_ref[ki], preferred_element_type=f32)
            acc = t if acc is None else acc + t
        return jnp.maximum(acc + b_ref[...], 0.0).astype(bf16)

    # ---- conv1 (8x8 / stride 4): computed in s2 groups keyed by the output-row
    # residue (mod s2) so conv2's H-stride becomes contiguous slices.  Input row
    # needed for (residue p, sub-row j, kernel row ki) is P*j + (p*s1 + ki).
    h1 = []
    for p in range(s2):
        nrp = rows_res[p]

        def lhs1(ki, p=p, nrp=nrp):
            q = p * s1 + ki
            return x_ref[q % P, (q // P) * bt:((q // P) + nrp) * bt, :]

        h1.append(conv(lhs1, w1_ref, b1_ref, kh1))       # [nrp*bt, OW1*C1p] bf16

    # ---- conv2 (4x4 / stride 2): h1 row s2*h2 + ki lives in group ki % s2 at
    # sub-row h2 + ki // s2 -> contiguous slice per ki.
    def lhs2(ki):
        return h1[ki % s2][(ki // s2) * bt:((ki // s2) + oh2) * bt, :]

    h2 = conv(lhs2, w2_ref, b2_ref, kh2)                 # [oh2*bt, OW2*C2] bf16

    # ---- conv3 (3x3 / stride 1): contiguous row bands of h2.
    def lhs3(ki):
        return h2[ki * bt:(ki + oh3) * bt, :]

    h3 = conv(lhs3, w3_ref, b3_ref, kh3)                 # [oh3*bt, OW3*C3] bf16

    # ---- fc1 (+ReLU): fc1 weights pre-permuted so each conv3 output-row block
    # multiplies its own [OW3*C3, 512] slab (== torch.flatten on NCHW).
    acc = None
    for h in range(oh3):
        t = jnp.dot(h3[h * bt:(h + 1) * bt, :], fc1w_ref[h],
                    preferred_element_type=f32)
        acc = t if acc is None else acc + t
    z1 = jnp.maximum(acc + fc1b_ref[...], 0.0).astype(bf16)        # [bt, 512]

    # ---- fc2 (head lane-padded to 128 outputs -> dense [bt, 128] store).
    out_ref[...] = jnp.dot(z1, fc2w_ref[...],
                           preferred_element_type=f32) + fc2b_ref[...]


# ----------------------------------------------------------------------------
# One-time re-layout of the PyTorch-style parameters into kernel-friendly form.
# ----------------------------------------------------------------------------
def prepare_params(params, input_hw):
    H, W = input_hw
    (c1o, k1, s1), (c2o, k2, s2), (c3o, k3, s3) = _CONV_SPECS
    assert s3 == 1
    assert (H - k1) % s1 == 0 and (W - k1) % s1 == 0, "spatial dims must divide"
    oh1, ow1 = _conv_out(H, k1, s1), _conv_out(W, k1, s1)
    assert (oh1 - k2) % s2 == 0 and (ow1 - k2) % s2 == 0
    oh2, ow2 = _conv_out(oh1, k2, s2), _conv_out(ow1, k2, s2)
    oh3, ow3 = _conv_out(oh2, k3, 1), _conv_out(ow2, k3, 1)

    # Lane-padded slab widths (multiples of 128 -> dense vld/vst, full MXU K).
    iwc = W * _IN_CH
    iwc_pad = _round_up(iwc, 128)
    cols1p = _round_up(ow1 * c1o, 128)
    cols2p = _round_up(ow2 * c2o, 128)
    cols3p = _round_up(ow3 * c3o, 128)

    def toeplitz(w, b, cin, ow, stride, in_pad, out_pad):
        # Toeplitz-along-width weights [K, in_pad, out_pad]: the width/stride
        # structure lives in a (mostly-zero) matrix so the kernel only does clean
        # 2-D matmuls on row slabs.  Rows/cols beyond the real widths stay zero.
        cout, _, k, _ = w.shape
        wt = np.zeros((k, in_pad, out_pad), np.float32)
        for ki in range(k):
            for kj in range(k):
                blk = w[:, :, ki, kj].T                        # [Cin, Cout]
                for o in range(ow):
                    col = o * stride + kj
                    wt[ki, col * cin:(col + 1) * cin,
                       o * cout:(o + 1) * cout] = blk
        bias = np.zeros((1, out_pad), np.float32)
        bias[0, :ow * cout] = np.tile(b, ow)
        return jnp.asarray(wt, jnp.bfloat16), jnp.asarray(bias)

    prep = {"hw": (H, W)}
    prep["c1_wt"], prep["c1_bt"] = toeplitz(
        np.asarray(params["c1_w"], np.float32),
        np.asarray(params["c1_b"], np.float32), _IN_CH, ow1, s1, iwc_pad, cols1p)
    prep["c2_wt"], prep["c2_bt"] = toeplitz(
        np.asarray(params["c2_w"], np.float32),
        np.asarray(params["c2_b"], np.float32), c1o, ow2, s2, cols1p, cols2p)
    prep["c3_wt"], prep["c3_bt"] = toeplitz(
        np.asarray(params["c3_w"], np.float32),
        np.asarray(params["c3_b"], np.float32), c2o, ow3, 1, cols2p, cols3p)

    # H-phase partition parameters: conv1 output rows computed per residue
    # (mod s2); the input is partitioned along H by P = s1*s2 phases.
    P = s1 * s2
    rows_res = tuple(-(-(oh1 - p) // s2) for p in range(s2))
    need_sub = max((p * s1 + ki) // P + rows_res[p]
                   for p in range(s2) for ki in range(k1))
    Rp = max(-(-H // P), need_sub)
    for ki in range(k2):  # conv2 must find every h1 row it needs in its group
        assert ki // s2 + oh2 <= rows_res[ki % s2]

    # fc1: permute torch NCHW-flatten rows into per-conv3-output-row blocks.
    fc1_w = np.asarray(params["fc1_w"], np.float32)            # [conv_out, 512]
    assert fc1_w.shape[0] == oh3 * ow3 * c3o
    fc1_wp = np.zeros((oh3, cols3p, _FC_HIDDEN), np.float32)
    for hh in range(oh3):
        for ww in range(ow3):
            for cc in range(c3o):
                fc1_wp[hh, ww * c3o + cc] = fc1_w[cc * oh3 * ow3 + hh * ow3 + ww]
    prep["fc1_wp"] = jnp.asarray(fc1_wp, jnp.bfloat16)
    prep["fc1_bt"] = jnp.asarray(np.asarray(params["fc1_b"], np.float32)[None, :])

    # fc2: zero-pad the (action_dim+1)-wide head to lane-dense 128 columns.
    fc2_w = np.asarray(params["fc2_w"], np.float32)            # [512, n_out]
    fc2_b = np.asarray(params["fc2_b"], np.float32)
    n_out = fc2_w.shape[1]
    npad = _round_up(n_out, 128)
    wpad = np.zeros((fc2_w.shape[0], npad), np.float32)
    wpad[:, :n_out] = fc2_w
    bpad = np.zeros((1, npad), np.float32)
    bpad[0, :n_out] = fc2_b
    prep["fc2_wp"] = jnp.asarray(wpad, jnp.bfloat16)
    prep["fc2_bp"] = jnp.asarray(bpad)

    prep["meta"] = dict(P=P, Rp=Rp, iwc=iwc, iwc_pad=iwc_pad, s1=s1, s2=s2,
                        kh1=k1, kh2=k2, kh3=k3, oh2=oh2, oh3=oh3,
                        rows_res=rows_res)
    prep["n_out"] = n_out
    prep["npad"] = npad
    return prep


# ----------------------------------------------------------------------------
# Fused forward wrapper (single pallas_call, grid over batch tiles).
# ----------------------------------------------------------------------------
def ppo_forward(prep, x_nchw, batch_tile=128):
    """x_nchw: [N, 3, H, W] f32 -> logits_and_values [N, action_dim+1] f32.

    batch_tile: images per grid step.  128 fills the v5e MXU; use 256 on
    v6e/v7x (and keep >=2 grid steps on v7x so the "parallel" axis splits
    across the two TensorCores).
    """
    N, C, H, W = x_nchw.shape
    assert (H, W) == prep["hw"] and C == _IN_CH
    m = prep["meta"]
    P, Rp = m["P"], m["Rp"]
    iwc, iwc_pad = m["iwc"], m["iwc_pad"]
    npad = prep["npad"]

    bt = _round_up(max(1, min(batch_tile, N)), 8)
    n_pad = _round_up(N, bt)
    G = n_pad // bt

    # NCHW -> NHWC row slabs [H, W*C]; zero-pad lanes to iwc_pad, H to Rp*P and
    # the batch to G*bt; partition H by phase (h % P) and interleave each batch
    # tile's rows as (sub-row, image).  Pure layout work on the tiny input; the
    # pad rows are never read by the kernel (checked at prep time).
    x = jnp.transpose(x_nchw, (0, 2, 3, 1)).reshape(N, H, iwc)
    x = jnp.pad(x, ((0, n_pad - N), (0, Rp * P - H), (0, iwc_pad - iwc)))
    x = x.reshape(G, bt, Rp, P, iwc_pad)
    x = jnp.transpose(x, (0, 3, 2, 1, 4)).reshape(G, P, Rp * bt, iwc_pad)
    x = x.astype(jnp.bfloat16)

    def resident(arr):
        zeros = (0,) * arr.ndim

        def idx(g):
            return zeros

        return pl.BlockSpec(arr.shape, idx)

    kernel = functools.partial(
        _fused_forward_kernel,
        bt=bt, P=P, s1=m["s1"], s2=m["s2"], kh1=m["kh1"], kh2=m["kh2"],
        kh3=m["kh3"], oh2=m["oh2"], oh3=m["oh3"], rows_res=m["rows_res"])

    out = pl.pallas_call(
        kernel,
        out_shape=jax.ShapeDtypeStruct((n_pad, npad), jnp.float32),
        grid=(G,),
        in_specs=[
            pl.BlockSpec((None, P, Rp * bt, iwc_pad), lambda g: (g, 0, 0, 0)),
            resident(prep["c1_wt"]), resident(prep["c1_bt"]),
            resident(prep["c2_wt"]), resident(prep["c2_bt"]),
            resident(prep["c3_wt"]), resident(prep["c3_bt"]),
            resident(prep["fc1_wp"]), resident(prep["fc1_bt"]),
            resident(prep["fc2_wp"]), resident(prep["fc2_bp"]),
        ],
        out_specs=pl.BlockSpec((bt, npad), lambda g: (g, 0)),
        compiler_params=pltpu.CompilerParams(
            dimension_semantics=("parallel",),
            vmem_limit_bytes=32 * 1024 * 1024),
    )(x, prep["c1_wt"], prep["c1_bt"], prep["c2_wt"], prep["c2_bt"],
      prep["c3_wt"], prep["c3_bt"], prep["fc1_wp"], prep["fc1_bt"],
      prep["fc2_wp"], prep["fc2_bp"])
    return out[:N, :prep["n_out"]]


# ----------------------------------------------------------------------------
# Independent plain-JAX reference (exact PyTorch semantics, f32 everywhere).
# ----------------------------------------------------------------------------
def reference_forward(params, x):
    h = x
    for name, s in (("c1", 4), ("c2", 2), ("c3", 1)):
        h = jax.lax.conv_general_dilated(
            h, params[f"{name}_w"], window_strides=(s, s), padding="VALID",
            dimension_numbers=("NCHW", "OIHW", "NCHW"))
        h = jnp.maximum(h + params[f"{name}_b"][None, :, None, None], 0.0)
    flat = h.reshape(h.shape[0], -1)                  # torch.flatten(x, 1) on NCHW
    z = jnp.maximum(flat @ params["fc1_w"] + params["fc1_b"], 0.0)
    return z @ params["fc2_w"] + params["fc2_b"]


def init_params(key, input_hw, action_dim):
    """PyTorch-default-style uniform(-1/sqrt(fan_in)) init, f32."""
    H, W = input_hw
    oh, ow = H, W
    for _, k, s in _CONV_SPECS:
        oh, ow = _conv_out(oh, k, s), _conv_out(ow, k, s)
    conv_out = _CONV_SPECS[-1][0] * oh * ow

    def uni(k_, shape, fan_in):
        bound = 1.0 / np.sqrt(fan_in)
        return jax.random.uniform(k_, shape, jnp.float32, -bound, bound)

    keys = jax.random.split(key, 10)
    p = {}
    p["c1_w"] = uni(keys[0], (32, 3, 8, 8), 3 * 8 * 8)
    p["c1_b"] = uni(keys[1], (32,), 3 * 8 * 8)
    p["c2_w"] = uni(keys[2], (64, 32, 4, 4), 32 * 4 * 4)
    p["c2_b"] = uni(keys[3], (64,), 32 * 4 * 4)
    p["c3_w"] = uni(keys[4], (64, 64, 3, 3), 64 * 3 * 3)
    p["c3_b"] = uni(keys[5], (64,), 64 * 3 * 3)
    p["fc1_w"] = uni(keys[6], (conv_out, _FC_HIDDEN), conv_out)
    p["fc1_b"] = uni(keys[7], (_FC_HIDDEN,), conv_out)
    p["fc2_w"] = uni(keys[8], (_FC_HIDDEN, action_dim + 1), _FC_HIDDEN)
    p["fc2_b"] = uni(keys[9], (action_dim + 1,), _FC_HIDDEN)
    return p


if __name__ == "__main__":
    # 44x44 RGB -> conv outputs 10x10 -> 4x4 -> 2x2 -> conv_out = 256;
    # action_dim = 6 -> fc head emits 7 values (6 logits + 1 value).
    N, H, W = 2, 44, 44
    ACTION_DIM = 6

    key = jax.random.PRNGKey(0)
    k_param, k_x = jax.random.split(key)
    params = init_params(k_param, (H, W), ACTION_DIM)
    x = jax.random.normal(k_x, (N, 3, H, W), jnp.float32)

    prep = prepare_params(params, (H, W))
    fwd = jax.jit(lambda xx: ppo_forward(prep, xx))

    out = jax.block_until_ready(fwd(x))
    assert out.shape == (N, ACTION_DIM + 1), out.shape
    assert bool(jnp.all(jnp.isfinite(out))), "non-finite output"

    ref = jax.block_until_ready(jax.jit(lambda xx: reference_forward(params, xx))(x))
    denom = float(jnp.max(jnp.abs(ref))) + 1e-6
    rel_err = float(jnp.max(jnp.abs(out - ref))) / denom
    # bf16 MXU operands with f32 accumulation/epilogues: ~1e-3..1e-2 relative expected.
    assert rel_err < 5e-2, f"mismatch vs reference: rel_err={rel_err}"

    print("KERNEL_OK")
</pallas_src>

<mosaic_0001>
module attributes {stable_mosaic.version = 11 : i64} {
  func.func @_fused_forward_kernel(%arg0: i32, %arg1: memref<1x8x48x256xbf16, #tpu.memory_space<vmem>>, %arg2: memref<8x256x384xbf16, #tpu.memory_space<vmem>>, %arg3: memref<1x384xf32, #tpu.memory_space<vmem>>, %arg4: memref<4x384x256xbf16, #tpu.memory_space<vmem>>, %arg5: memref<1x256xf32, #tpu.memory_space<vmem>>, %arg6: memref<3x256x128xbf16, #tpu.memory_space<vmem>>, %arg7: memref<1x128xf32, #tpu.memory_space<vmem>>, %arg8: memref<2x128x512xbf16, #tpu.memory_space<vmem>>, %arg9: memref<1x512xf32, #tpu.memory_space<vmem>>, %arg10: memref<512x128xbf16, #tpu.memory_space<vmem>>, %arg11: memref<1x128xf32, #tpu.memory_space<vmem>>, %arg12: memref<8x128xf32, #tpu.memory_space<vmem>>) attributes {dimension_semantics = [#tpu.dimension_semantics<parallel>], iteration_bounds = array<i64: 1>, scalar_prefetch = 0 : i64, scratch_operands = 0 : i64, tpu.core_type = #tpu.core_type<tc>, window_params = [{transform_indices = @transform_0, window_bounds = array<i64: 1, 8, 48, 256>}, {pipeline_mode = #tpu.pipeline_mode<synchronous>, transform_indices = @transform_1, window_bounds = array<i64: 8, 256, 384>}, {pipeline_mode = #tpu.pipeline_mode<synchronous>, transform_indices = @transform_2, window_bounds = array<i64: 1, 384>}, {pipeline_mode = #tpu.pipeline_mode<synchronous>, transform_indices = @transform_3, window_bounds = array<i64: 4, 384, 256>}, {pipeline_mode = #tpu.pipeline_mode<synchronous>, transform_indices = @transform_4, window_bounds = array<i64: 1, 256>}, {pipeline_mode = #tpu.pipeline_mode<synchronous>, transform_indices = @transform_5, window_bounds = array<i64: 3, 256, 128>}, {pipeline_mode = #tpu.pipeline_mode<synchronous>, transform_indices = @transform_6, window_bounds = array<i64: 1, 128>}, {pipeline_mode = #tpu.pipeline_mode<synchronous>, transform_indices = @transform_7, window_bounds = array<i64: 2, 128, 512>}, {pipeline_mode = #tpu.pipeline_mode<synchronous>, transform_indices = @transform_8, window_bounds = array<i64: 1, 512>}, {pipeline_mode = #tpu.pipeline_mode<synchronous>, transform_indices = @transform_9, window_bounds = array<i64: 512, 128>}, {pipeline_mode = #tpu.pipeline_mode<synchronous>, transform_indices = @transform_10, window_bounds = array<i64: 1, 128>}, {transform_indices = @transform_11, window_bounds = array<i64: 8, 128>}]} {
    %c0 = arith.constant 0 : index
    %c0_0 = arith.constant 0 : index
    %c0_1 = arith.constant 0 : index
    %c0_2 = arith.constant 0 : index
    %0 = vector.load %arg1[%c0, %c0_0, %c0_1, %c0_2] : memref<1x8x48x256xbf16, #tpu.memory_space<vmem>>, vector<1x1x40x256xbf16>
    %1 = vector.shape_cast %0 : vector<1x1x40x256xbf16> to vector<40x256xbf16>
    %c0_3 = arith.constant 0 : index
    %c0_4 = arith.constant 0 : index
    %c0_5 = arith.constant 0 : index
    %2 = vector.load %arg2[%c0_3, %c0_4, %c0_5] : memref<8x256x384xbf16, #tpu.memory_space<vmem>>, vector<1x256x384xbf16>
    %3 = vector.shape_cast %2 : vector<1x256x384xbf16> to vector<256x384xbf16>
    %cst = arith.constant dense<0.000000e+00> : vector<40x384xf32>
    %4 = tpu.matmul %1, %3, %cst {dimension_numbers = #tpu.dot_dimension_numbers<[1], [0], [0], [1], [0, 0, 1, 1], [], []>} : vector<40x256xbf16>, vector<256x384xbf16>, vector<40x384xf32> -> vector<40x384xf32>
    %c0_6 = arith.constant 0 : index
    %c1 = arith.constant 1 : index
    %c0_7 = arith.constant 0 : index
    %c0_8 = arith.constant 0 : index
    %5 = vector.load %arg1[%c0_6, %c1, %c0_7, %c0_8] : memref<1x8x48x256xbf16, #tpu.memory_space<vmem>>, vector<1x1x40x256xbf16>
    %6 = vector.shape_cast %5 : vector<1x1x40x256xbf16> to vector<40x256xbf16>
    %c1_9 = arith.constant 1 : index
    %c0_10 = arith.constant 0 : index
    %c0_11 = arith.constant 0 : index
    %7 = vector.load %arg2[%c1_9, %c0_10, %c0_11] : memref<8x256x384xbf16, #tpu.memory_space<vmem>>, vector<1x256x384xbf16>
    %8 = vector.shape_cast %7 : vector<1x256x384xbf16> to vector<256x384xbf16>
    %cst_12 = arith.constant dense<0.000000e+00> : vector<40x384xf32>
    %9 = tpu.matmul %6, %8, %cst_12 {dimension_numbers = #tpu.dot_dimension_numbers<[1], [0], [0], [1], [0, 0, 1, 1], [], []>} : vector<40x256xbf16>, vector<256x384xbf16>, vector<40x384xf32> -> vector<40x384xf32>
    %10 = arith.addf %4, %9 : vector<40x384xf32>
    %c0_13 = arith.constant 0 : index
    %c2 = arith.constant 2 : index
    %c0_14 = arith.constant 0 : index
    %c0_15 = arith.constant 0 : index
    %11 = vector.load %arg1[%c0_13, %c2, %c0_14, %c0_15] : memref<1x8x48x256xbf16, #tpu.memory_space<vmem>>, vector<1x1x40x256xbf16>
    %12 = vector.shape_cast %11 : vector<1x1x40x256xbf16> to vector<40x256xbf16>
    %c2_16 = arith.constant 2 : index
    %c0_17 = arith.constant 0 : index
    %c0_18 = arith.constant 0 : index
    %13 = vector.load %arg2[%c2_16, %c0_17, %c0_18] : memref<8x256x384xbf16, #tpu.memory_space<vmem>>, vector<1x256x384xbf16>
    %14 = vector.shape_cast %13 : vector<1x256x384xbf16> to vector<256x384xbf16>
    %cst_19 = arith.constant dense<0.000000e+00> : vector<40x384xf32>
    %15 = tpu.matmul %12, %14, %cst_19 {dimension_numbers = #tpu.dot_dimension_numbers<[1], [0], [0], [1], [0, 0, 1, 1], [], []>} : vector<40x256xbf16>, vector<256x384xbf16>, vector<40x384xf32> -> vector<40x384xf32>
    %16 = arith.addf %10, %15 : vector<40x384xf32>
    %c0_20 = arith.constant 0 : index
    %c3 = arith.constant 3 : index
    %c0_21 = arith.constant 0 : index
    %c0_22 = arith.constant 0 : index
    %17 = vector.load %arg1[%c0_20, %c3, %c0_21, %c0_22] : memref<1x8x48x256xbf16, #tpu.memory_space<vmem>>, vector<1x1x40x256xbf16>
    %18 = vector.shape_cast %17 : vector<1x1x40x256xbf16> to vector<40x256xbf16>
    %c3_23 = arith.constant 3 : index
    %c0_24 = arith.constant 0 : index
    %c0_25 = arith.constant 0 : index
    %19 = vector.load %arg2[%c3_23, %c0_24, %c0_25] : memref<8x256x384xbf16, #tpu.memory_space<vmem>>, vector<1x256x384xbf16>
    %20 = vector.shape_cast %19 : vector<1x256x384xbf16> to vector<256x384xbf16>
    %cst_26 = arith.constant dense<0.000000e+00> : vector<40x384xf32>
    %21 = tpu.matmul %18, %20, %cst_26 {dimension_numbers = #tpu.dot_dimension_numbers<[1], [0], [0], [1], [0, 0, 1, 1], [], []>} : vector<40x256xbf16>, vector<256x384xbf16>, vector<40x384xf32> -> vector<40x384xf32>
    %22 = arith.addf %16, %21 : vector<40x384xf32>
    %c0_27 = arith.constant 0 : index
    %c4 = arith.constant 4 : index
    %c0_28 = arith.constant 0 : index
    %c0_29 = arith.constant 0 : index
    %23 = vector.load %arg1[%c0_27, %c4, %c0_28, %c0_29] : memref<1x8x48x256xbf16, #tpu.memory_space<vmem>>, vector<1x1x40x256xbf16>
    %24 = vector.shape_cast %23 : vector<1x1x40x256xbf16> to vector<40x256xbf16>
    %c4_30 = arith.constant 4 : index
    %c0_31 = arith.constant 0 : index
    %c0_32 = arith.constant 0 : index
    %25 = vector.load %arg2[%c4_30, %c0_31, %c0_32] : memref<8x256x384xbf16, #tpu.memory_space<vmem>>, vector<1x256x384xbf16>
    %26 = vector.shape_cast %25 : vector<1x256x384xbf16> to vector<256x384xbf16>
    %cst_33 = arith.constant dense<0.000000e+00> : vector<40x384xf32>
    %27 = tpu.matmul %24, %26, %cst_33 {dimension_numbers = #tpu.dot_dimension_numbers<[1], [0], [0], [1], [0, 0, 1, 1], [], []>} : vector<40x256xbf16>, vector<256x384xbf16>, vector<40x384xf32> -> vector<40x384xf32>
    %28 = arith.addf %22, %27 : vector<40x384xf32>
    %c0_34 = arith.constant 0 : index
    %c5 = arith.constant 5 : index
    %c0_35 = arith.constant 0 : index
    %c0_36 = arith.constant 0 : index
    %29 = vector.load %arg1[%c0_34, %c5, %c0_35, %c0_36] : memref<1x8x48x256xbf16, #tpu.memory_space<vmem>>, vector<1x1x40x256xbf16>
    %30 = vector.shape_cast %29 : vector<1x1x40x256xbf16> to vector<40x256xbf16>
    %c5_37 = arith.constant 5 : index
    %c0_38 = arith.constant 0 : index
    %c0_39 = arith.constant 0 : index
    %31 = vector.load %arg2[%c5_37, %c0_38, %c0_39] : memref<8x256x384xbf16, #tpu.memory_space<vmem>>, vector<1x256x384xbf16>
    %32 = vector.shape_cast %31 : vector<1x256x384xbf16> to vector<256x384xbf16>
    %cst_40 = arith.constant dense<0.000000e+00> : vector<40x384xf32>
    %33 = tpu.matmul %30, %32, %cst_40 {dimension_numbers = #tpu.dot_dimension_numbers<[1], [0], [0], [1], [0, 0, 1, 1], [], []>} : vector<40x256xbf16>, vector<256x384xbf16>, vector<40x384xf32> -> vector<40x384xf32>
    %34 = arith.addf %28, %33 : vector<40x384xf32>
    %c0_41 = arith.constant 0 : index
    %c6 = arith.constant 6 : index
    %c0_42 = arith.constant 0 : index
    %c0_43 = arith.constant 0 : index
    %35 = vector.load %arg1[%c0_41, %c6, %c0_42, %c0_43] : memref<1x8x48x256xbf16, #tpu.memory_space<vmem>>, vector<1x1x40x256xbf16>
    %36 = vector.shape_cast %35 : vector<1x1x40x256xbf16> to vector<40x256xbf16>
    %c6_44 = arith.constant 6 : index
    %c0_45 = arith.constant 0 : index
    %c0_46 = arith.constant 0 : index
    %37 = vector.load %arg2[%c6_44, %c0_45, %c0_46] : memref<8x256x384xbf16, #tpu.memory_space<vmem>>, vector<1x256x384xbf16>
    %38 = vector.shape_cast %37 : vector<1x256x384xbf16> to vector<256x384xbf16>
    %cst_47 = arith.constant dense<0.000000e+00> : vector<40x384xf32>
    %39 = tpu.matmul %36, %38, %cst_47 {dimension_numbers = #tpu.dot_dimension_numbers<[1], [0], [0], [1], [0, 0, 1, 1], [], []>} : vector<40x256xbf16>, vector<256x384xbf16>, vector<40x384xf32> -> vector<40x384xf32>
    %40 = arith.addf %34, %39 : vector<40x384xf32>
    %c0_48 = arith.constant 0 : index
    %c7 = arith.constant 7 : index
    %c0_49 = arith.constant 0 : index
    %c0_50 = arith.constant 0 : index
    %41 = vector.load %arg1[%c0_48, %c7, %c0_49, %c0_50] : memref<1x8x48x256xbf16, #tpu.memory_space<vmem>>, vector<1x1x40x256xbf16>
    %42 = vector.shape_cast %41 : vector<1x1x40x256xbf16> to vector<40x256xbf16>
    %c7_51 = arith.constant 7 : index
    %c0_52 = arith.constant 0 : index
    %c0_53 = arith.constant 0 : index
    %43 = vector.load %arg2[%c7_51, %c0_52, %c0_53] : memref<8x256x384xbf16, #tpu.memory_space<vmem>>, vector<1x256x384xbf16>
    %44 = vector.shape_cast %43 : vector<1x256x384xbf16> to vector<256x384xbf16>
    %cst_54 = arith.constant dense<0.000000e+00> : vector<40x384xf32>
    %45 = tpu.matmul %42, %44, %cst_54 {dimension_numbers = #tpu.dot_dimension_numbers<[1], [0], [0], [1], [0, 0, 1, 1], [], []>} : vector<40x256xbf16>, vector<256x384xbf16>, vector<40x384xf32> -> vector<40x384xf32>
    %46 = arith.addf %40, %45 : vector<40x384xf32>
    %c0_55 = arith.constant 0 : index
    %c0_56 = arith.constant 0 : index
    %47 = vector.load %arg3[%c0_55, %c0_56] : memref<1x384xf32, #tpu.memory_space<vmem>>, vector<1x384xf32>
    %48 = vector.broadcast %47 : vector<1x384xf32> to vector<40x384xf32>
    %49 = arith.addf %46, %48 : vector<40x384xf32>
    %cst_57 = arith.constant 0.000000e+00 : f32
    %50 = vector.broadcast %cst_57 : f32 to vector<40x384xf32>
    %51 = arith.maximumf %49, %50 : vector<40x384xf32>
    %52 = arith.truncf %51 : vector<40x384xf32> to vector<40x384xbf16>
    %c0_58 = arith.constant 0 : index
    %c4_59 = arith.constant 4 : index
    %c0_60 = arith.constant 0 : index
    %c0_61 = arith.constant 0 : index
    %53 = vector.load %arg1[%c0_58, %c4_59, %c0_60, %c0_61] : memref<1x8x48x256xbf16, #tpu.memory_space<vmem>>, vector<1x1x40x256xbf16>
    %54 = vector.shape_cast %53 : vector<1x1x40x256xbf16> to vector<40x256xbf16>
    %c0_62 = arith.constant 0 : index
    %c0_63 = arith.constant 0 : index
    %c0_64 = arith.constant 0 : index
    %55 = vector.load %arg2[%c0_62, %c0_63, %c0_64] : memref<8x256x384xbf16, #tpu.memory_space<vmem>>, vector<1x256x384xbf16>
    %56 = vector.shape_cast %55 : vector<1x256x384xbf16> to vector<256x384xbf16>
    %cst_65 = arith.constant dense<0.000000e+00> : vector<40x384xf32>
    %57 = tpu.matmul %54, %56, %cst_65 {dimension_numbers = #tpu.dot_dimension_numbers<[1], [0], [0], [1], [0, 0, 1, 1], [], []>} : vector<40x256xbf16>, vector<256x384xbf16>, vector<40x384xf32> -> vector<40x384xf32>
    %c0_66 = arith.constant 0 : index
    %c5_67 = arith.constant 5 : index
    %c0_68 = arith.constant 0 : index
    %c0_69 = arith.constant 0 : index
    %58 = vector.load %arg1[%c0_66, %c5_67, %c0_68, %c0_69] : memref<1x8x48x256xbf16, #tpu.memory_space<vmem>>, vector<1x1x40x256xbf16>
    %59 = vector.shape_cast %58 : vector<1x1x40x256xbf16> to vector<40x256xbf16>
    %c1_70 = arith.constant 1 : index
    %c0_71 = arith.constant 0 : index
    %c0_72 = arith.constant 0 : index
    %60 = vector.load %arg2[%c1_70, %c0_71, %c0_72] : memref<8x256x384xbf16, #tpu.memory_space<vmem>>, vector<1x256x384xbf16>
    %61 = vector.shape_cast %60 : vector<1x256x384xbf16> to vector<256x384xbf16>
    %cst_73 = arith.constant dense<0.000000e+00> : vector<40x384xf32>
    %62 = tpu.matmul %59, %61, %cst_73 {dimension_numbers = #tpu.dot_dimension_numbers<[1], [0], [0], [1], [0, 0, 1, 1], [], []>} : vector<40x256xbf16>, vector<256x384xbf16>, vector<40x384xf32> -> vector<40x384xf32>
    %63 = arith.addf %57, %62 : vector<40x384xf32>
    %c0_74 = arith.constant 0 : index
    %c6_75 = arith.constant 6 : index
    %c0_76 = arith.constant 0 : index
    %c0_77 = arith.constant 0 : index
    %64 = vector.load %arg1[%c0_74, %c6_75, %c0_76, %c0_77] : memref<1x8x48x256xbf16, #tpu.memory_space<vmem>>, vector<1x1x40x256xbf16>
    %65 = vector.shape_cast %64 : vector<1x1x40x256xbf16> to vector<40x256xbf16>
    %c2_78 = arith.constant 2 : index
    %c0_79 = arith.constant 0 : index
    %c0_80 = arith.constant 0 : index
    %66 = vector.load %arg2[%c2_78, %c0_79, %c0_80] : memref<8x256x384xbf16, #tpu.memory_space<vmem>>, vector<1x256x384xbf16>
    %67 = vector.shape_cast %66 : vector<1x256x384xbf16> to vector<256x384xbf16>
    %cst_81 = arith.constant dense<0.000000e+00> : vector<40x384xf32>
    %68 = tpu.matmul %65, %67, %cst_81 {dimension_numbers = #tpu.dot_dimension_numbers<[1], [0], [0], [1], [0, 0, 1, 1], [], []>} : vector<40x256xbf16>, vector<256x384xbf16>, vector<40x384xf32> -> vector<40x384xf32>
    %69 = arith.addf %63, %68 : vector<40x384xf32>
    %c0_82 = arith.constant 0 : index
    %c7_83 = arith.constant 7 : index
    %c0_84 = arith.constant 0 : index
    %c0_85 = arith.constant 0 : index
    %70 = vector.load %arg1[%c0_82, %c7_83, %c0_84, %c0_85] : memref<1x8x48x256xbf16, #tpu.memory_space<vmem>>, vector<1x1x40x256xbf16>
    %71 = vector.shape_cast %70 : vector<1x1x40x256xbf16> to vector<40x256xbf16>
    %c3_86 = arith.constant 3 : index
    %c0_87 = arith.constant 0 : index
    %c0_88 = arith.constant 0 : index
    %72 = vector.load %arg2[%c3_86, %c0_87, %c0_88] : memref<8x256x384xbf16, #tpu.memory_space<vmem>>, vector<1x256x384xbf16>
    %73 = vector.shape_cast %72 : vector<1x256x384xbf16> to vector<256x384xbf16>
    %cst_89 = arith.constant dense<0.000000e+00> : vector<40x384xf32>
    %74 = tpu.matmul %71, %73, %cst_89 {dimension_numbers = #tpu.dot_dimension_numbers<[1], [0], [0], [1], [0, 0, 1, 1], [], []>} : vector<40x256xbf16>, vector<256x384xbf16>, vector<40x384xf32> -> vector<40x384xf32>
    %75 = arith.addf %69, %74 : vector<40x384xf32>
    %c0_90 = arith.constant 0 : index
    %c0_91 = arith.constant 0 : index
    %c8 = arith.constant 8 : index
    %c0_92 = arith.constant 0 : index
    %76 = vector.load %arg1[%c0_90, %c0_91, %c8, %c0_92] : memref<1x8x48x256xbf16, #tpu.memory_space<vmem>>, vector<1x1x40x256xbf16>
    %77 = vector.shape_cast %76 : vector<1x1x40x256xbf16> to vector<40x256xbf16>
    %c4_93 = arith.constant 4 : index
    %c0_94 = arith.constant 0 : index
    %c0_95 = arith.constant 0 : index
    %78 = vector.load %arg2[%c4_93, %c0_94, %c0_95] : memref<8x256x384xbf16, #tpu.memory_space<vmem>>, vector<1x256x384xbf16>
    %79 = vector.shape_cast %78 : vector<1x256x384xbf16> to vector<256x384xbf16>
    %cst_96 = arith.constant dense<0.000000e+00> : vector<40x384xf32>
    %80 = tpu.matmul %77, %79, %cst_96 {dimension_numbers = #tpu.dot_dimension_numbers<[1], [0], [0], [1], [0, 0, 1, 1], [], []>} : vector<40x256xbf16>, vector<256x384xbf16>, vector<40x384xf32> -> vector<40x384xf32>
    %81 = arith.addf %75, %80 : vector<40x384xf32>
    %c0_97 = arith.constant 0 : index
    %c1_98 = arith.constant 1 : index
    %c8_99 = arith.constant 8 : index
    %c0_100 = arith.constant 0 : index
    %82 = vector.load %arg1[%c0_97, %c1_98, %c8_99, %c0_100] : memref<1x8x48x256xbf16, #tpu.memory_space<vmem>>, vector<1x1x40x256xbf16>
    %83 = vector.shape_cast %82 : vector<1x1x40x256xbf16> to vector<40x256xbf16>
    %c5_101 = arith.constant 5 : index
    %c0_102 = arith.constant 0 : index
    %c0_103 = arith.constant 0 : index
    %84 = vector.load %arg2[%c5_101, %c0_102, %c0_103] : memref<8x256x384xbf16, #tpu.memory_space<vmem>>, vector<1x256x384xbf16>
    %85 = vector.shape_cast %84 : vector<1x256x384xbf16> to vector<256x384xbf16>
    %cst_104 = arith.constant dense<0.000000e+00> : vector<40x384xf32>
    %86 = tpu.matmul %83, %85, %cst_104 {dimension_numbers = #tpu.dot_dimension_numbers<[1], [0], [0], [1], [0, 0, 1, 1], [], []>} : vector<40x256xbf16>, vector<256x384xbf16>, vector<40x384xf32> -> vector<40x384xf32>
    %87 = arith.addf %81, %86 : vector<40x384xf32>
    %c0_105 = arith.constant 0 : index
    %c2_106 = arith.constant 2 : index
    %c8_107 = arith.constant 8 : index
    %c0_108 = arith.constant 0 : index
    %88 = vector.load %arg1[%c0_105, %c2_106, %c8_107, %c0_108] : memref<1x8x48x256xbf16, #tpu.memory_space<vmem>>, vector<1x1x40x256xbf16>
    %89 = vector.shape_cast %88 : vector<1x1x40x256xbf16> to vector<40x256xbf16>
    %c6_109 = arith.constant 6 : index
    %c0_110 = arith.constant 0 : index
    %c0_111 = arith.constant 0 : index
    %90 = vector.load %arg2[%c6_109, %c0_110, %c0_111] : memref<8x256x384xbf16, #tpu.memory_space<vmem>>, vector<1x256x384xbf16>
    %91 = vector.shape_cast %90 : vector<1x256x384xbf16> to vector<256x384xbf16>
    %cst_112 = arith.constant dense<0.000000e+00> : vector<40x384xf32>
    %92 = tpu.matmul %89, %91, %cst_112 {dimension_numbers = #tpu.dot_dimension_numbers<[1], [0], [0], [1], [0, 0, 1, 1], [], []>} : vector<40x256xbf16>, vector<256x384xbf16>, vector<40x384xf32> -> vector<40x384xf32>
    %93 = arith.addf %87, %92 : vector<40x384xf32>
    %c0_113 = arith.constant 0 : index
    %c3_114 = arith.constant 3 : index
    %c8_115 = arith.constant 8 : index
    %c0_116 = arith.constant 0 : index
    %94 = vector.load %arg1[%c0_113, %c3_114, %c8_115, %c0_116] : memref<1x8x48x256xbf16, #tpu.memory_space<vmem>>, vector<1x1x40x256xbf16>
    %95 = vector.shape_cast %94 : vector<1x1x40x256xbf16> to vector<40x256xbf16>
    %c7_117 = arith.constant 7 : index
    %c0_118 = arith.constant 0 : index
    %c0_119 = arith.constant 0 : index
    %96 = vector.load %arg2[%c7_117, %c0_118, %c0_119] : memref<8x256x384xbf16, #tpu.memory_space<vmem>>, vector<1x256x384xbf16>
    %97 = vector.shape_cast %96 : vector<1x256x384xbf16> to vector<256x384xbf16>
    %cst_120 = arith.constant dense<0.000000e+00> : vector<40x384xf32>
    %98 = tpu.matmul %95, %97, %cst_120 {dimension_numbers = #tpu.dot_dimension_numbers<[1], [0], [0], [1], [0, 0, 1, 1], [], []>} : vector<40x256xbf16>, vector<256x384xbf16>, vector<40x384xf32> -> vector<40x384xf32>
    %99 = arith.addf %93, %98 : vector<40x384xf32>
    %c0_121 = arith.constant 0 : index
    %c0_122 = arith.constant 0 : index
    %100 = vector.load %arg3[%c0_121, %c0_122] : memref<1x384xf32, #tpu.memory_space<vmem>>, vector<1x384xf32>
    %101 = vector.broadcast %100 : vector<1x384xf32> to vector<40x384xf32>
    %102 = arith.addf %99, %101 : vector<40x384xf32>
    %cst_123 = arith.constant 0.000000e+00 : f32
    %103 = vector.broadcast %cst_123 : f32 to vector<40x384xf32>
    %104 = arith.maximumf %102, %103 : vector<40x384xf32>
    %105 = arith.truncf %104 : vector<40x384xf32> to vector<40x384xbf16>
    %106 = vector.extract_strided_slice %52 {offsets = [0, 0], sizes = [32, 384], strides = [1, 1]} : vector<40x384xbf16> to vector<32x384xbf16>
    %c0_124 = arith.constant 0 : index
    %c0_125 = arith.constant 0 : index
    %c0_126 = arith.constant 0 : index
    %107 = vector.load %arg4[%c0_124, %c0_125, %c0_126] : memref<4x384x256xbf16, #tpu.memory_space<vmem>>, vector<1x384x256xbf16>
    %108 = vector.shape_cast %107 : vector<1x384x256xbf16> to vector<384x256xbf16>
    %cst_127 = arith.constant dense<0.000000e+00> : vector<32x256xf32>
    %109 = tpu.matmul %106, %108, %cst_127 {dimension_numbers = #tpu.dot_dimension_numbers<[1], [0], [0], [1], [0, 0, 1, 1], [], []>} : vector<32x384xbf16>, vector<384x256xbf16>, vector<32x256xf32> -> vector<32x256xf32>
    %110 = vector.extract_strided_slice %105 {offsets = [0, 0], sizes = [32, 384], strides = [1, 1]} : vector<40x384xbf16> to vector<32x384xbf16>
    %c1_128 = arith.constant 1 : index
    %c0_129 = arith.constant 0 : index
    %c0_130 = arith.constant 0 : index
    %111 = vector.load %arg4[%c1_128, %c0_129, %c0_130] : memref<4x384x256xbf16, #tpu.memory_space<vmem>>, vector<1x384x256xbf16>
    %112 = vector.shape_cast %111 : vector<1x384x256xbf16> to vector<384x256xbf16>
    %cst_131 = arith.constant dense<0.000000e+00> : vector<32x256xf32>
    %113 = tpu.matmul %110, %112, %cst_131 {dimension_numbers = #tpu.dot_dimension_numbers<[1], [0], [0], [1], [0, 0, 1, 1], [], []>} : vector<32x384xbf16>, vector<384x256xbf16>, vector<32x256xf32> -> vector<32x256xf32>
    %114 = arith.addf %109, %113 : vector<32x256xf32>
    %115 = vector.extract_strided_slice %52 {offsets = [8, 0], sizes = [32, 384], strides = [1, 1]} : vector<40x384xbf16> to vector<32x384xbf16>
    %c2_132 = arith.constant 2 : index
    %c0_133 = arith.constant 0 : index
    %c0_134 = arith.constant 0 : index
    %116 = vector.load %arg4[%c2_132, %c0_133, %c0_134] : memref<4x384x256xbf16, #tpu.memory_space<vmem>>, vector<1x384x256xbf16>
    %117 = vector.shape_cast %116 : vector<1x384x256xbf16> to vector<384x256xbf16>
    %cst_135 = arith.constant dense<0.000000e+00> : vector<32x256xf32>
    %118 = tpu.matmul %115, %117, %cst_135 {dimension_numbers = #tpu.dot_dimension_numbers<[1], [0], [0], [1], [0, 0, 1, 1], [], []>} : vector<32x384xbf16>, vector<384x256xbf16>, vector<32x256xf32> -> vector<32x256xf32>
    %119 = arith.addf %114, %118 : vector<32x256xf32>
    %120 = vector.extract_strided_slice %105 {offsets = [8, 0], sizes = [32, 384], strides = [1, 1]} : vector<40x384xbf16> to vector<32x384xbf16>
    %c3_136 = arith.constant 3 : index
    %c0_137 = arith.constant 0 : index
    %c0_138 = arith.constant 0 : index
    %121 = vector.load %arg4[%c3_136, %c0_137, %c0_138] : memref<4x384x256xbf16, #tpu.memory_space<vmem>>, vector<1x384x256xbf16>
    %122 = vector.shape_cast %121 : vector<1x384x256xbf16> to vector<384x256xbf16>
    %cst_139 = arith.constant dense<0.000000e+00> : vector<32x256xf32>
    %123 = tpu.matmul %120, %122, %cst_139 {dimension_numbers = #tpu.dot_dimension_numbers<[1], [0], [0], [1], [0, 0, 1, 1], [], []>} : vector<32x384xbf16>, vector<384x256xbf16>, vector<32x256xf32> -> vector<32x256xf32>
    %124 = arith.addf %119, %123 : vector<32x256xf32>
    %c0_140 = arith.constant 0 : index
    %c0_141 = arith.constant 0 : index
    %125 = vector.load %arg5[%c0_140, %c0_141] : memref<1x256xf32, #tpu.memory_space<vmem>>, vector<1x256xf32>
    %126 = vector.broadcast %125 : vector<1x256xf32> to vector<32x256xf32>
    %127 = arith.addf %124, %126 : vector<32x256xf32>
    %cst_142 = arith.constant 0.000000e+00 : f32
    %128 = vector.broadcast %cst_142 : f32 to vector<32x256xf32>
    %129 = arith.maximumf %127, %128 : vector<32x256xf32>
    %130 = arith.truncf %129 : vector<32x256xf32> to vector<32x256xbf16>
    %131 = vector.extract_strided_slice %130 {offsets = [0, 0], sizes = [16, 256], strides = [1, 1]} : vector<32x256xbf16> to vector<16x256xbf16>
    %c0_143 = arith.constant 0 : index
    %c0_144 = arith.constant 0 : index
    %c0_145 = arith.constant 0 : index
    %132 = vector.load %arg6[%c0_143, %c0_144, %c0_145] : memref<3x256x128xbf16, #tpu.memory_space<vmem>>, vector<1x256x128xbf16>
    %133 = vector.shape_cast %132 : vector<1x256x128xbf16> to vector<256x128xbf16>
    %cst_146 = arith.constant dense<0.000000e+00> : vector<16x128xf32>
    %134 = tpu.matmul %131, %133, %cst_146 {dimension_numbers = #tpu.dot_dimension_numbers<[1], [0], [0], [1], [0, 0, 1, 1], [], []>} : vector<16x256xbf16>, vector<256x128xbf16>, vector<16x128xf32> -> vector<16x128xf32>
    %135 = vector.extract_strided_slice %130 {offsets = [8, 0], sizes = [16, 256], strides = [1, 1]} : vector<32x256xbf16> to vector<16x256xbf16>
    %c1_147 = arith.constant 1 : index
    %c0_148 = arith.constant 0 : index
    %c0_149 = arith.constant 0 : index
    %136 = vector.load %arg6[%c1_147, %c0_148, %c0_149] : memref<3x256x128xbf16, #tpu.memory_space<vmem>>, vector<1x256x128xbf16>
    %137 = vector.shape_cast %136 : vector<1x256x128xbf16> to vector<256x128xbf16>
    %cst_150 = arith.constant dense<0.000000e+00> : vector<16x128xf32>
    %138 = tpu.matmul %135, %137, %cst_150 {dimension_numbers = #tpu.dot_dimension_numbers<[1], [0], [0], [1], [0, 0, 1, 1], [], []>} : vector<16x256xbf16>, vector<256x128xbf16>, vector<16x128xf32> -> vector<16x128xf32>
    %139 = arith.addf %134, %138 : vector<16x128xf32>
    %140 = vector.extract_strided_slice %130 {offsets = [16, 0], sizes = [16, 256], strides = [1, 1]} : vector<32x256xbf16> to vector<16x256xbf16>
    %c2_151 = arith.constant 2 : index
    %c0_152 = arith.constant 0 : index
    %c0_153 = arith.constant 0 : index
    %141 = vector.load %arg6[%c2_151, %c0_152, %c0_153] : memref<3x256x128xbf16, #tpu.memory_space<vmem>>, vector<1x256x128xbf16>
    %142 = vector.shape_cast %141 : vector<1x256x128xbf16> to vector<256x128xbf16>
    %cst_154 = arith.constant dense<0.000000e+00> : vector<16x128xf32>
    %143 = tpu.matmul %140, %142, %cst_154 {dimension_numbers = #tpu.dot_dimension_numbers<[1], [0], [0], [1], [0, 0, 1, 1], [], []>} : vector<16x256xbf16>, vector<256x128xbf16>, vector<16x128xf32> -> vector<16x128xf32>
    %144 = arith.addf %139, %143 : vector<16x128xf32>
    %c0_155 = arith.constant 0 : index
    %c0_156 = arith.constant 0 : index
    %145 = vector.load %arg7[%c0_155, %c0_156] : memref<1x128xf32, #tpu.memory_space<vmem>>, vector<1x128xf32>
    %146 = vector.broadcast %145 : vector<1x128xf32> to vector<16x128xf32>
    %147 = arith.addf %144, %146 : vector<16x128xf32>
    %cst_157 = arith.constant 0.000000e+00 : f32
    %148 = vector.broadcast %cst_157 : f32 to vector<16x128xf32>
    %149 = arith.maximumf %147, %148 : vector<16x128xf32>
    %150 = arith.truncf %149 : vector<16x128xf32> to vector<16x128xbf16>
    %151 = vector.extract_strided_slice %150 {offsets = [0, 0], sizes = [8, 128], strides = [1, 1]} : vector<16x128xbf16> to vector<8x128xbf16>
    %c0_158 = arith.constant 0 : index
    %c0_159 = arith.constant 0 : index
    %c0_160 = arith.constant 0 : index
    %152 = vector.load %arg8[%c0_158, %c0_159, %c0_160] : memref<2x128x512xbf16, #tpu.memory_space<vmem>>, vector<1x128x512xbf16>
    %153 = vector.shape_cast %152 : vector<1x128x512xbf16> to vector<128x512xbf16>
    %cst_161 = arith.constant dense<0.000000e+00> : vector<8x512xf32>
    %154 = tpu.matmul %151, %153, %cst_161 {dimension_numbers = #tpu.dot_dimension_numbers<[1], [0], [0], [1], [0, 0, 1, 1], [], []>} : vector<8x128xbf16>, vector<128x512xbf16>, vector<8x512xf32> -> vector<8x512xf32>
    %155 = vector.extract_strided_slice %150 {offsets = [8, 0], sizes = [8, 128], strides = [1, 1]} : vector<16x128xbf16> to vector<8x128xbf16>
    %c1_162 = arith.constant 1 : index
    %c0_163 = arith.constant 0 : index
    %c0_164 = arith.constant 0 : index
    %156 = vector.load %arg8[%c1_162, %c0_163, %c0_164] : memref<2x128x512xbf16, #tpu.memory_space<vmem>>, vector<1x128x512xbf16>
    %157 = vector.shape_cast %156 : vector<1x128x512xbf16> to vector<128x512xbf16>
    %cst_165 = arith.constant dense<0.000000e+00> : vector<8x512xf32>
    %158 = tpu.matmul %155, %157, %cst_165 {dimension_numbers = #tpu.dot_dimension_numbers<[1], [0], [0], [1], [0, 0, 1, 1], [], []>} : vector<8x128xbf16>, vector<128x512xbf16>, vector<8x512xf32> -> vector<8x512xf32>
    %159 = arith.addf %154, %158 : vector<8x512xf32>
    %c0_166 = arith.constant 0 : index
    %c0_167 = arith.constant 0 : index
    %160 = vector.load %arg9[%c0_166, %c0_167] : memref<1x512xf32, #tpu.memory_space<vmem>>, vector<1x512xf32>
    %161 = vector.broadcast %160 : vector<1x512xf32> to vector<8x512xf32>
    %162 = arith.addf %159, %161 : vector<8x512xf32>
    %cst_168 = arith.constant 0.000000e+00 : f32
    %163 = vector.broadcast %cst_168 : f32 to vector<8x512xf32>
    %164 = arith.maximumf %162, %163 : vector<8x512xf32>
    %165 = arith.truncf %164 : vector<8x512xf32> to vector<8x512xbf16>
    %c0_169 = arith.constant 0 : index
    %c0_170 = arith.constant 0 : index
    %166 = vector.load %arg10[%c0_169, %c0_170] : memref<512x128xbf16, #tpu.memory_space<vmem>>, vector<512x128xbf16>
    %cst_171 = arith.constant dense<0.000000e+00> : vector<8x128xf32>
    %167 = tpu.matmul %165, %166, %cst_171 {dimension_numbers = #tpu.dot_dimension_numbers<[1], [0], [0], [1], [0, 0, 1, 1], [], []>} : vector<8x512xbf16>, vector<512x128xbf16>, vector<8x128xf32> -> vector<8x128xf32>
    %c0_172 = arith.constant 0 : index
    %c0_173 = arith.constant 0 : index
    %168 = vector.load %arg11[%c0_172, %c0_173] : memref<1x128xf32, #tpu.memory_space<vmem>>, vector<1x128xf32>
    %169 = vector.broadcast %168 : vector<1x128xf32> to vector<8x128xf32>
    %170 = arith.addf %167, %169 : vector<8x128xf32>
    %c0_174 = arith.constant 0 : index
    %c0_175 = arith.constant 0 : index
    %171 = vector.load %arg12[%c0_174, %c0_175] : memref<8x128xf32, #tpu.memory_space<vmem>>, vector<8x128xf32>
    tpu.vector_store %arg12[%c0_174, %c0_175], %170 {strides = array<i32>} : memref<8x128xf32, #tpu.memory_space<vmem>>, vector<8x128xf32>,
    return
  }
  func.func @transform_0(%arg0: i32) -> (i32, i32, i32, i32) {
    %c0_i32 = arith.constant 0 : i32
    %c0_i32_0 = arith.constant 0 : i32
    %c0_i32_1 = arith.constant 0 : i32
    %c0_i32_2 = arith.constant 0 : i32
    return %arg0, %c0_i32, %c0_i32_0, %c0_i32_1 : i32, i32, i32, i32
  }
  func.func @transform_1(%arg0: i32) -> (i32, i32, i32) {
    %c0_i32 = arith.constant 0 : i32
    %c0_i32_0 = arith.constant 0 : i32
    %c0_i32_1 = arith.constant 0 : i32
    %c0_i32_2 = arith.constant 0 : i32
    return %c0_i32, %c0_i32_0, %c0_i32_1 : i32, i32, i32
  }
  func.func @transform_2(%arg0: i32) -> (i32, i32) {
    %c0_i32 = arith.constant 0 : i32
    %c0_i32_0 = arith.constant 0 : i32
    %c0_i32_1 = arith.constant 0 : i32
    return %c0_i32, %c0_i32_0 : i32, i32
  }
  func.func @transform_3(%arg0: i32) -> (i32, i32, i32) {
    %c0_i32 = arith.constant 0 : i32
    %c0_i32_0 = arith.constant 0 : i32
    %c0_i32_1 = arith.constant 0 : i32
    %c0_i32_2 = arith.constant 0 : i32
    return %c0_i32, %c0_i32_0, %c0_i32_1 : i32, i32, i32
  }
  func.func @transform_4(%arg0: i32) -> (i32, i32) {
    %c0_i32 = arith.constant 0 : i32
    %c0_i32_0 = arith.constant 0 : i32
    %c0_i32_1 = arith.constant 0 : i32
    return %c0_i32, %c0_i32_0 : i32, i32
  }
  func.func @transform_5(%arg0: i32) -> (i32, i32, i32) {
    %c0_i32 = arith.constant 0 : i32
    %c0_i32_0 = arith.constant 0 : i32
    %c0_i32_1 = arith.constant 0 : i32
    %c0_i32_2 = arith.constant 0 : i32
    return %c0_i32, %c0_i32_0, %c0_i32_1 : i32, i32, i32
  }
  func.func @transform_6(%arg0: i32) -> (i32, i32) {
    %c0_i32 = arith.constant 0 : i32
    %c0_i32_0 = arith.constant 0 : i32
    %c0_i32_1 = arith.constant 0 : i32
    return %c0_i32, %c0_i32_0 : i32, i32
  }
  func.func @transform_7(%arg0: i32) -> (i32, i32, i32) {
    %c0_i32 = arith.constant 0 : i32
    %c0_i32_0 = arith.constant 0 : i32
    %c0_i32_1 = arith.constant 0 : i32
    %c0_i32_2 = arith.constant 0 : i32
    return %c0_i32, %c0_i32_0, %c0_i32_1 : i32, i32, i32
  }
  func.func @transform_8(%arg0: i32) -> (i32, i32) {
    %c0_i32 = arith.constant 0 : i32
    %c0_i32_0 = arith.constant 0 : i32
    %c0_i32_1 = arith.constant 0 : i32
    return %c0_i32, %c0_i32_0 : i32, i32
  }
  func.func @transform_9(%arg0: i32) -> (i32, i32) {
    %c0_i32 = arith.constant 0 : i32
    %c0_i32_0 = arith.constant 0 : i32
    %c0_i32_1 = arith.constant 0 : i32
    return %c0_i32, %c0_i32_0 : i32, i32
  }
  func.func @transform_10(%arg0: i32) -> (i32, i32) {
    %c0_i32 = arith.constant 0 : i32
    %c0_i32_0 = arith.constant 0 : i32
    %c0_i32_1 = arith.constant 0 : i32
    return %c0_i32, %c0_i32_0 : i32, i32
  }
  func.func @transform_11(%arg0: i32) -> (i32, i32) {
    %c0_i32 = arith.constant 0 : i32
    %c0_i32_0 = arith.constant 0 : i32
    return %arg0, %c0_i32 : i32, i32
  }
}

</mosaic_0001>

<bundles_post_ra>
// kernel: _lambda_.1
= control target key start
LH: loop header
LB: loop body
LE: loop exit
PB: predicated region body
PF: predicated region fallthrough
CT: control target
= control target key end

     0   :  { %16 = vsyncpa [#allocation3], 0  ;;  %s16263_s0 = inlined_call_operand.vmem [shape: bf16[1,8,48,256], index: 0, kind: input, shape index: {}]   ;;  %s16264_s1 = inlined_call_operand.hbm [shape: bf16[8,256,384], index: 1, kind: input, shape index: {}]   ;;  %s16265_s2 = inlined_call_operand.hbm [shape: f32[1,384], index: 2, kind: input, shape index: {}]   ;;  %s16266_s3 = inlined_call_operand.hbm [shape: bf16[4,384,256], index: 3, kind: input, shape index: {}]   ;;  %s16267_s4 = inlined_call_operand.hbm [shape: f32[1,256], index: 4, kind: input, shape index: {}]   ;;  %s16268_s5 = inlined_call_operand.hbm [shape: bf16[3,256,128], index: 5, kind: input, shape index: {}]   ;;  %s16269_s6 = inlined_call_operand.hbm [shape: f32[1,128], index: 6, kind: input, shape index: {}]   ;;  %s16270_s7 = inlined_call_operand.hbm [shape: bf16[2,128,512], index: 7, kind: input, shape index: {}]   ;;  %s16271_s8 = inlined_call_operand.hbm [shape: f32[1,512], index: 8, kind: input, shape index: {}]   ;;  %s16272_s9 = inlined_call_operand.hbm [shape: bf16[512,128], index: 9, kind: input, shape index: {}]   ;;  %s16273_s10 = inlined_call_operand.hbm [shape: f32[1,128], index: 10, kind: input, shape index: {}]   ;;  %s16274_s11 = inlined_call_operand.vmem [shape: f32[8,128], index: 11, kind: output, shape index: {}]  }
   0x1   :  { %17 = vsyncpa [#allocation5], 0 }
   0x2   :  { %18 = vsyncpa [#allocation8], 0 }
   0x3   :  { %19 = vsyncpa [#allocation11], 0 }
   0x4   :  { %20 = vsyncpa [#allocation14], 0  ;;  %s42_s19 = sshll.u32 %s16265_s2, 4  ;;  %s43_s19 = int_to_ptr.hbm [resolvable:$true] %s42_s19 }
   0x5   :  { %21 = vsyncpa [#allocation17], 0  ;;  %s12871_s20 = smov [#allocation4]   ;;  %s66_s24 = sshll.u32 %s16267_s4, 4  ;;  %s67_s24 = int_to_ptr.hbm [resolvable:$true] %s66_s24 }
   0x6   :  { %s44_s21 = sshll.u32 %s12871_s20, 4  ;;  %s12872_s25 = smov [#allocation7]   ;;  %s45_s21 = int_to_ptr.vmem [resolvable:$true] %s44_s21 }
   0x7   :  { %47 = dma.hbm_to_vmem [thread:$0]  %s43_s19, 48, %s45_s21, [#allocation5]  }
   0x8   :  { %s68_s26 = sshll.u32 %s12872_s25, 4  ;;  %s90_s29 = sshll.u32 %s16269_s6, 4  ;;  %s69_s26 = int_to_ptr.vmem [resolvable:$true] %s68_s26  ;;  %s91_s29 = int_to_ptr.hbm [resolvable:$true] %s90_s29 }
   0x9   :  { %71 = dma.hbm_to_vmem [thread:$0]  %s67_s24, 32, %s69_s26, [#allocation8]  }
   0xa   :  { %s114_s12 = sshll.u32 %s16271_s8, 4  ;;  %s12873_s13 = smov [#allocation10]   ;;  %s115_s12 = int_to_ptr.hbm [resolvable:$true] %s114_s12 }
   0xb   :  { %s92_s14 = sshll.u32 %s12873_s13, 4  ;;  %s12874_s4 = smov [#allocation13]   ;;  %s93_s14 = int_to_ptr.vmem [resolvable:$true] %s92_s14 }
   0xc   :  { %95 = dma.hbm_to_vmem [thread:$0]  %s91_s29, 16, %s93_s14, [#allocation11]  }
   0xd   :  { %s116_s15 = sshll.u32 %s12874_s4, 4  ;;  %s28_s18 = sshll.u32 %s16264_s1, 4  ;;  %s117_s15 = int_to_ptr.vmem [resolvable:$true] %s116_s15  ;;  %s29_s18 = int_to_ptr.hbm [resolvable:$true] %s28_s18 }
   0xe   :  { %119 = dma.hbm_to_vmem [thread:$0]  %s115_s12, 64, %s117_s15, [#allocation14]  }
   0xf   :  { %s12875_s6 = smov [#allocation2]   ;;  %s52_s8 = sshll.u32 %s16266_s3, 4  ;;  %s53_s8 = int_to_ptr.hbm [resolvable:$true] %s52_s8 }
  0x10   :  { %s30_s19 = sshll.u32 %s12875_s6, 4  ;;  %s12876_s22 = smov 192   ;;  %s31_s19 = int_to_ptr.vmem [resolvable:$true] %s30_s19 }
  0x11   :  { %s12877_s23 = smov 12   ;;  %s12878_s24 = smov [#allocation6]  }
  0x12   :  { %36 = dma.hbm_to_vmem [thread:$0]  %s29_s18, 49152, %s31_s19, [#allocation3], %s12876_s22, %s12876_s22, %s12877_s23  }
  0x13   :  { %s54_s25 = sshll.u32 %s12878_s24, 4  ;;  %s12879_s26 = smov 128   ;;  %s55_s25 = int_to_ptr.vmem [resolvable:$true] %s54_s25 }
  0x14   :  { %s12880_s27 = smov 8   ;;  %s76_s29 = sshll.u32 %s16268_s5, 4  ;;  %s77_s29 = int_to_ptr.hbm [resolvable:$true] %s76_s29 }
  0x15   :  { %60 = dma.hbm_to_vmem [thread:$0]  %s53_s8, 24576, %s55_s25, [#allocation5], %s12879_s26, %s12879_s26, %s12880_s27  }
  0x16   :  { %s12881_s2 = smov [#allocation9]   ;;  %s100_s13 = sshll.u32 %s16270_s7, 4  ;;  %s101_s13 = int_to_ptr.hbm [resolvable:$true] %s100_s13 }
  0x17   :  { %s78_s30 = sshll.u32 %s12881_s2, 4  ;;  %s12882_s14 = smov 64   ;;  %s79_s30 = int_to_ptr.vmem [resolvable:$true] %s78_s30 }
  0x18   :  { %s12883_s4 = smov 4   ;;  %s12884_s15 = smov [#allocation12]  }
  0x19   :  { %84 = dma.hbm_to_vmem [thread:$0]  %s77_s29, 6144, %s79_s30, [#allocation8], %s12882_s14, %s12882_s14, %s12883_s4  }
  0x1a   :  { %s102_s16 = sshll.u32 %s12884_s15, 4  ;;  %s12885_s17 = smov 256   ;;  %s103_s16 = int_to_ptr.vmem [resolvable:$true] %s102_s16 }
  0x1b   :  { %s12886_s18 = smov 16   ;;  %s124_s19 = sshll.u32 %s16272_s9, 4  ;;  %s125_s19 = int_to_ptr.hbm [resolvable:$true] %s124_s19 }
  0x1c   :  { %108 = dma.hbm_to_vmem [thread:$0]  %s101_s13, 8192, %s103_s16, [#allocation11], %s12885_s17, %s12885_s17, %s12886_s18  }
  0x1d   :  { %s12887_s20 = smov [#allocation15]   ;;  %s138_s22 = sshll.u32 %s16273_s10, 4  ;;  %s139_s22 = int_to_ptr.hbm [resolvable:$true] %s138_s22 }
  0x1e   :  { %s126_s21 = sshll.u32 %s12887_s20, 4  ;;  %s12888_s23 = smov [#allocation16]   ;;  %s127_s21 = int_to_ptr.vmem [resolvable:$true] %s126_s21 }
  0x1f   :  { %132 = dma.hbm_to_vmem [thread:$0]  %s125_s19, 4096, %s127_s21, [#allocation14], %s12882_s14, %s12882_s14, %s12883_s4  }
  0x20   :  { %s140_s24 = sshll.u32 %s12888_s23, 4  ;;  %s141_s24 = int_to_ptr.vmem [resolvable:$true] %s140_s24 }
  0x21   :  { %143 = dma.hbm_to_vmem [thread:$0]  %s139_s22, 16, %s141_s24, [#allocation17]  }
  0x22   :  { %12859 = dma.done.wait [#allocation3], 49152  }
  0x23   :  { %12860 = vsyncadd [#allocation3], 4294918144 }
  0x24   :  { %12861 = dma.done.wait [#allocation5], 24624  }
  0x25   :  { %12862 = vsyncadd [#allocation5], 4294942672 }
  0x26   :  { %12863 = dma.done.wait [#allocation8], 6176  }
  0x27   :  { %12864 = vsyncadd [#allocation8], 4294961120 }
  0x28   :  { %12865 = dma.done.wait [#allocation11], 8208  }
  0x29   :  { %12866 = vsyncadd [#allocation11], 4294959088 }
  0x2a   :  { %12867 = dma.done.wait [#allocation14], 4160  }
  0x2b   :  { %12868 = vsyncadd [#allocation14], 4294963136 }
  0x2c   :  { %12869 = dma.done.wait [#allocation17], 16  }
  0x2d   :  { %12870 = vsyncadd [#allocation17], 4294967280  ;;  %v8816_v0 = vld [vmem:[#allocation2 + $0x228] sm:$0xf]  ;;  %v11909_v1 = vld [vmem:[#allocation2 + $0x230] sm:$0xf0] }
  0x2e   :  { %v8912_v2 = vld [vmem:[#allocation2 + $0x2e8] sm:$0xf]  ;;  %v12979_v3 = vor.u32 %v11909_v1, %v8816_v0  ;;  %v11933_v4 = vld [vmem:[#allocation2 + $0x2f0] sm:$0xf0]  ;;  %v11908_v5 = vld [vmem:[#allocation2 + $0x22c] sm:$0xf] }
  0x2f   :  { %v8818_v6 = vld [vmem:[#allocation2 + $0x234] sm:$0xf0]  ;;  %v12981_v7 = vor.u32 %v11933_v4, %v8912_v2  ;;  %v11932_v9 = vld [vmem:[#allocation2 + $0x2ec] sm:$0xf]  ;;  %v8804_v11 = vld [vmem:[#allocation2 + $0x210] sm:$0xf] }
  0x30   :  { %v12983_v8 = vor.u32 %v11908_v5, %v8818_v6  ;;  %v8914_v10 = vld [vmem:[#allocation2 + $0x2f4] sm:$0xf0]  ;;  %607 = vmatpush.bf16.msra.mxu0 %v12979_v3  ;;  %v11906_v13 = vld [vmem:[#allocation2 + $0x218] sm:$0xf0]  ;;  %v8900_v14 = vld [vmem:[#allocation2 + $0x2d0] sm:$0xf] }
  0x31   :  { %v12986_v12 = vor.u32 %v11932_v9, %v8914_v10  ;;  %v11930_v15 = vld [vmem:[#allocation2 + $0x2d8] sm:$0xf0]  ;;  %630 = vmatpush.bf16.msra.mxu1 %v12981_v7  ;;  %v12990_v16 = vor.u32 %v11906_v13, %v8804_v11  ;;  %v11905_v18 = vld [vmem:[#allocation2 + $0x214] sm:$0xf]  ;;  %v8806_v19 = vld [vmem:[#allocation2 + $0x21c] sm:$0xf0] }
  0x32   :  { %653 = vmatpush.bf16.msra.mxu2 %v12983_v8  ;;  %v12992_v17 = vor.u32 %v11930_v15, %v8900_v14  ;;  %v11929_v20 = vld [vmem:[#allocation2 + $0x2d4] sm:$0xf]  ;;  %v12995_v21 = vor.u32 %v11905_v18, %v8806_v19  ;;  %v8902_v22 = vld [vmem:[#allocation2 + $0x2dc] sm:$0xf0]  ;;  %v8792_v23 = vld [vmem:[#allocation2 + $0x1f8] sm:$0xf] }
  0x33   :  { %676 = vmatpush.bf16.msra.mxu3 %v12986_v12  ;;  %v11903_v24 = vld [vmem:[#allocation2 + $0x200] sm:$0xf0]  ;;  %v12997_v25 = vor.u32 %v11929_v20, %v8902_v22  ;;  %v8888_v26 = vld [vmem:[#allocation2 + $0x2b8] sm:$0xf]  ;;  %v11902_v28 = vld [vmem:[#allocation2 + $0x1fc] sm:$0xf] }
  0x34   :  { %v11927_v27 = vld [vmem:[#allocation2 + $0x2c0] sm:$0xf0]  ;;  %608 = vmatpush.bf16.msra.mxu0 %v12990_v16  ;;  %v13000_v29 = vor.u32 %v11903_v24, %v8792_v23  ;;  %v8794_v30 = vld [vmem:[#allocation2 + $0x204] sm:$0xf0]  ;;  %v11926_v31 = vld [vmem:[#allocation2 + $0x2bc] sm:$0xf] }
  0x35   :  { %v8890_v32 = vld [vmem:[#allocation2 + $0x2c4] sm:$0xf0]  ;;  %631 = vmatpush.bf16.msra.mxu1 %v12992_v17  ;;  %v13004_v33 = vor.u32 %v11927_v27, %v8888_v26  ;;  %v13006_v34 = vor.u32 %v11902_v28, %v8794_v30  ;;  %v8780_v35 = vld [vmem:[#allocation2 + $0x1e0] sm:$0xf]  ;;  %v11900_v36 = vld [vmem:[#allocation2 + $0x1e8] sm:$0xf0] }
  0x36   :  { %654 = vmatpush.bf16.msra.mxu2 %v12995_v21  ;;  %v8876_v37 = vld [vmem:[#allocation2 + $0x2a0] sm:$0xf]  ;;  %v13009_v38 = vor.u32 %v11926_v31, %v8890_v32  ;;  %v11924_v39 = vld [vmem:[#allocation2 + $0x2a8] sm:$0xf0]  ;;  %v11899_v40 = vld [vmem:[#allocation2 + $0x1e4] sm:$0xf]  ;;  %v13012_v44 = vor.u32 %v11900_v36, %v8780_v35 }
  0x37   :  { %677 = vmatpush.bf16.msra.mxu3 %v12997_v25  ;;  %v8782_v41 = vld [vmem:[#allocation2 + $0x1ec] sm:$0xf0]  ;;  %v11923_v42 = vld [vmem:[#allocation2 + $0x2a4] sm:$0xf]  ;;  %v13016_v45 = vor.u32 %v11924_v39, %v8876_v37  ;;  %v8768_v47 = vld [vmem:[#allocation2 + $0x1c8] sm:$0xf] }
  0x38   :  { %v8878_v43 = vld [vmem:[#allocation2 + $0x2ac] sm:$0xf0]  ;;  %609 = vmatpush.bf16.msra.mxu0 %v13000_v29  ;;  %v13018_v46 = vor.u32 %v11899_v40, %v8782_v41  ;;  %v11897_v48 = vld [vmem:[#allocation2 + $0x1d0] sm:$0xf0]  ;;  %v8864_v49 = vld [vmem:[#allocation2 + $0x288] sm:$0xf] }
  0x39   :  { %632 = vmatpush.bf16.msra.mxu1 %v13004_v33  ;;  %v13021_v50 = vor.u32 %v11923_v42, %v8878_v43  ;;  %v11921_v51 = vld [vmem:[#allocation2 + $0x290] sm:$0xf0]  ;;  %v11896_v52 = vld [vmem:[#allocation2 + $0x1cc] sm:$0xf]  ;;  %v8770_v53 = vld [vmem:[#allocation2 + $0x1d4] sm:$0xf0]  ;;  %v13024_v56 = vor.u32 %v11897_v48, %v8768_v47 }
  0x3a   :  { %655 = vmatpush.bf16.msra.mxu2 %v13006_v34  ;;  %v11920_v54 = vld [vmem:[#allocation2 + $0x28c] sm:$0xf]  ;;  %v8866_v55 = vld [vmem:[#allocation2 + $0x294] sm:$0xf0]  ;;  %v13028_v57 = vor.u32 %v11921_v51, %v8864_v49  ;;  %v13030_v58 = vor.u32 %v11896_v52, %v8770_v53  ;;  %v8756_v59 = vld [vmem:[#allocation2 + $0x1b0] sm:$0xf] }
  0x3b   :  { %678 = vmatpush.bf16.msra.mxu3 %v13009_v38  ;;  %v11894_v60 = vld [vmem:[#allocation2 + $0x1b8] sm:$0xf0]  ;;  %v8852_v61 = vld [vmem:[#allocation2 + $0x270] sm:$0xf]  ;;  %v13033_v62 = vor.u32 %v11920_v54, %v8866_v55  ;;  %v11893_v0 = vld [vmem:[#allocation2 + $0x1b4] sm:$0xf] }
  0x3c   :  { %610 = vmatpush.bf16.msra.mxu0 %v13012_v44  ;;  %16672 = vst [vmem:[#allocation24_spill] sm:$0xff] %v13028_v57  ;;  %v11918_v63 = vld [vmem:[#allocation2 + $0x278] sm:$0xf0]  ;;  %v8758_v1 = vld [vmem:[#allocation2 + $0x1bc] sm:$0xf0]  ;;  %v13036_v5 = vor.u32 %v11894_v60, %v8756_v59 }
  0x3d   :  { %633 = vmatpush.bf16.msra.mxu1 %v13016_v45  ;;  %v11917_v2 = vld [vmem:[#allocation2 + $0x274] sm:$0xf]  ;;  %v8854_v4 = vld [vmem:[#allocation2 + $0x27c] sm:$0xf0]  ;;  %v13040_v6 = vor.u32 %v11918_v63, %v8852_v61  ;;  %v13042_v9 = vor.u32 %v11893_v0, %v8758_v1  ;;  %v8744_v10 = vld [vmem:[#allocation2 + $0x198] sm:$0xf] }
  0x3e   :  { %656 = vmatpush.bf16.msra.mxu2 %v13018_v46  ;;  %16673 = vst [vmem:[#allocation25_spill] sm:$0xff] %v13036_v5  ;;  %v11891_v11 = vld [vmem:[#allocation2 + $0x1a0] sm:$0xf0]  ;;  %v8840_v13 = vld [vmem:[#allocation2 + $0x258] sm:$0xf]  ;;  %v13045_v14 = vor.u32 %v11917_v2, %v8854_v4 }
  0x3f   :  { %679 = vmatpush.bf16.msra.mxu3 %v13021_v50  ;;  %16674 = vst [vmem:[#allocation26_spill] sm:$0xff] %v13040_v6  ;;  %v11915_v15 = vld [vmem:[#allocation2 + $0x260] sm:$0xf0]  ;;  %v11890_v18 = vld [vmem:[#allocation2 + $0x19c] sm:$0xf]  ;;  %v13048_v23 = vor.u32 %v11891_v11, %v8744_v10 }
  0x40   :  { %611 = vmatpush.bf16.msra.mxu0 %v13024_v56  ;;  %16675 = vst [vmem:[#allocation27_spill] sm:$0xff] %v13042_v9  ;;  %v8746_v19 = vld [vmem:[#allocation2 + $0x1a4] sm:$0xf0]  ;;  %v11914_v20 = vld [vmem:[#allocation2 + $0x25c] sm:$0xf]  ;;  %v13052_v27 = vor.u32 %v11915_v15, %v8840_v13 }
  0x41   :  { %634 = vmatpush.bf16.msra.mxu1 %v13028_v57  ;;  %16676 = vst [vmem:[#allocation28_spill] sm:$0xff] %v13045_v14  ;;  %v8842_v22 = vld [vmem:[#allocation2 + $0x264] sm:$0xf0]  ;;  %v8732_v24 = vld [vmem:[#allocation2 + $0x180] sm:$0xf]  ;;  %v13054_v28 = vor.u32 %v11890_v18, %v8746_v19 }
  0x42   :  { %657 = vmatpush.bf16.msra.mxu2 %v13030_v58  ;;  %16677 = vst [vmem:[#allocation29_spill] sm:$0xff] %v13048_v23  ;;  %v11888_v26 = vld [vmem:[#allocation2 + $0x188] sm:$0xf0]  ;;  %v8828_v30 = vld [vmem:[#allocation2 + $0x240] sm:$0xf]  ;;  %v13057_v35 = vor.u32 %v11914_v20, %v8842_v22 }
  0x43   :  { %680 = vmatpush.bf16.msra.mxu3 %v13033_v62  ;;  %16678 = vst [vmem:[#allocation30_spill] sm:$0xff] %v13052_v27  ;;  %v11912_v31 = vld [vmem:[#allocation2 + $0x248] sm:$0xf0]  ;;  %v11887_v32 = vld [vmem:[#allocation2 + $0x184] sm:$0xf]  ;;  %v13063_v43 = vor.u32 %v11888_v26, %v8732_v24 }
  0x44   :  { %612 = vmatpush.bf16.msra.mxu0 %v13036_v5  ;;  %16679 = vst [vmem:[#allocation31_spill] sm:$0xff] %v13054_v28  ;;  %v8734_v36 = vld [vmem:[#allocation2 + $0x18c] sm:$0xf0]  ;;  %v11911_v37 = vld [vmem:[#allocation2 + $0x244] sm:$0xf]  ;;  %v13070_v51 = vor.u32 %v11912_v31, %v8828_v30 }
  0x45   :  { %635 = vmatpush.bf16.msra.mxu1 %v13040_v6  ;;  %16680 = vst [vmem:[#allocation32_spill] sm:$0xff] %v13057_v35  ;;  %v8830_v39 = vld [vmem:[#allocation2 + $0x24c] sm:$0xf0]  ;;  %v9024_v41 = vld [vmem:[#allocation2 + $0xa8] sm:$0xf]  ;;  %v13072_v52 = vor.u32 %v11887_v32, %v8734_v36 }
  0x46   :  { %658 = vmatpush.bf16.msra.mxu2 %v13042_v9  ;;  %v8716_v40 = vld [vmem:[%s16263_s0 + $0x30] sm:$0xf]  ;;  %v11857_v42 = vld [vmem:[#allocation2 + $0xb0] sm:$0xf0]  ;;  %16681 = vst [vmem:[#allocation33_spill] sm:$0xff] %v13063_v43  ;;  %v13081_v55 = vor.u32 %v11911_v37, %v8830_v39 }
  0x47   :  { %681 = vmatpush.bf16.msra.mxu3 %v13045_v14  ;;  %v11884_v47 = vld [vmem:[%s16263_s0 + $0x34] sm:$0xf0]  ;;  %v9120_v48 = vld [vmem:[#allocation2 + $0x168] sm:$0xf]  ;;  %v11881_v49 = vld [vmem:[#allocation2 + $0x170] sm:$0xf0]  ;;  %v13083_v59 = vor.u32 %v11857_v42, %v9024_v41 }
  0x48   :  { %613 = vmatpush.bf16.msra.mxu0 %v13048_v23  ;;  %16682 = vst [vmem:[#allocation34_spill] sm:$0xff] %v13070_v51  ;;  %v11883_v53 = vld [vmem:[%s16263_s0 + $0x34] sm:$0xf]  ;;  %v8718_v54 = vld [vmem:[%s16263_s0 + $0x38] sm:$0xf0]  ;;  %v13085_v0 = vor.u32 %v11884_v47, %v8716_v40  ;;  %v13087_v1 = vor.u32 %v11881_v49, %v9120_v48 }
  0x49   :  { %636 = vmatpush.bf16.msra.mxu1 %v13052_v27  ;;  %16683 = vst [vmem:[#allocation35_spill] sm:$0xff] %v13072_v52  ;;  %v9012_v60 = vld [vmem:[#allocation2 + $0x90] sm:$0xf]  ;;  %v11910_v63 = vld [vmem:[#allocation2 + $0x238] sm:$0xf0]  ;;  %v13090_v11 = vor.u32 %v11883_v53, %v8718_v54 }
  0x4a   :  { %659 = vmatpush.bf16.msra.mxu2 %v13054_v28  ;;  %16684 = vst [vmem:[#allocation36_spill] sm:$0xff] %v13081_v55  ;;  %v8824_v61 = vld [vmem:[#allocation2 + $0x230] sm:$0xf]  ;;  %v11854_v2 = vld [vmem:[#allocation2 + $0x98] sm:$0xf0] }
  0x4b   :  { %682 = vmatpush.bf16.msra.mxu3 %v13057_v35  ;;  %16685 = vst [vmem:[#allocation37_spill] sm:$0xff] %v13083_v59  ;;  %v8920_v4 = vld [vmem:[#allocation2 + $0x2f0] sm:$0xf]  ;;  %v11934_v10 = vld [vmem:[#allocation2 + $0x2f8] sm:$0xf0]  ;;  %v13094_v18 = vor.u32 %v11910_v63, %v8824_v61  ;;  %v13098_v19 = vor.u32 %v11854_v2, %v9012_v60 }
  0x4c   :  { %16686 = vst [vmem:[#allocation38_spill] sm:$0xff] %v13087_v1  ;;  %614 = vmatpush.bf16.msra.mxu0 %v13063_v43  ;;  %v9108_v13 = vld [vmem:[#allocation2 + $0x150] sm:$0xf]  ;;  %v11878_v15 = vld [vmem:[#allocation2 + $0x158] sm:$0xf0]  ;;  %v13100_v20 = vor.u32 %v11934_v10, %v8920_v4 }
  0x4d   :  { %637 = vmatpush.bf16.msra.mxu1 %v13070_v51  ;;  %16687 = vst [vmem:[#allocation39_spill] sm:$0xff] %v13094_v18  ;;  %v9000_v22 = vld [vmem:[#allocation2 + $0x78] sm:$0xf]  ;;  %v11907_v26 = vld [vmem:[#allocation2 + $0x220] sm:$0xf0]  ;;  %v13104_v30 = vor.u32 %v11878_v15, %v9108_v13 }
  0x4e   :  { %660 = vmatpush.bf16.msra.mxu2 %v13072_v52  ;;  %16688 = vst [vmem:[#allocation40_spill] sm:$0xff] %v13098_v19  ;;  %v8812_v24 = vld [vmem:[#allocation2 + $0x218] sm:$0xf]  ;;  %v11851_v31 = vld [vmem:[#allocation2 + $0x80] sm:$0xf0] }
  0x4f   :  { %683 = vmatpush.bf16.msra.mxu3 %v13081_v55  ;;  %16689 = vst [vmem:[#allocation41_spill] sm:$0xff] %v13100_v20  ;;  %615 = vmatmul.bf16.vlgmr.msra.gmra.mxu0 %v13085_v0  ;;  %v8908_v32 = vld [vmem:[#allocation2 + $0x2d8] sm:$0xf]  ;;  %v11931_v36 = vld [vmem:[#allocation2 + $0x2e0] sm:$0xf0]  ;;  %v13110_v40 = vor.u32 %v11907_v26, %v8812_v24  ;;  %v13114_v41 = vor.u32 %v11851_v31, %v9000_v22 }
  0x50   :  { %16690 = vst [vmem:[#allocation42_spill] sm:$0xff] %v13104_v30  ;;  %638 = vmatmul.bf16.vlgmr.msra.gmra.mxu1 %v13090_v11  ;;  %v9096_v37 = vld [vmem:[#allocation2 + $0x138] sm:$0xf]  ;;  %v11875_v39 = vld [vmem:[#allocation2 + $0x140] sm:$0xf0]  ;;  %699 = vmatpush.bf16.msrb.mxu0 %v13094_v18  ;;  %v13116_v42 = vor.u32 %v11931_v36, %v8908_v32 }
  0x51   :  { %661 = vmatmul.bf16.vlgmr.msra.gmra.mxu2 %v13085_v0  ;;  %16691 = vst [vmem:[#allocation43_spill] sm:$0xff] %v13110_v40  ;;  %722 = vmatpush.bf16.msrb.mxu1 %v13100_v20  ;;  %v8988_v47 = vld [vmem:[#allocation2 + $0x60] sm:$0xf]  ;;  %v11904_v49 = vld [vmem:[#allocation2 + $0x208] sm:$0xf0]  ;;  %v13119_v53 = vor.u32 %v11875_v39, %v9096_v37 }
  0x52   :  { %1028 = vmatpush.bf16.msrb.mxu2 %v13083_v59  ;;  %684 = vmatmul.bf16.vlgmr.msra.gmra.mxu3 %v13090_v11  ;;  %16692 = vst [vmem:[#allocation44_spill] sm:$0xff] %v13114_v41  ;;  %v8800_v48 = vld [vmem:[#allocation2 + $0x200] sm:$0xf]  ;;  %v11848_v54 = vld [vmem:[#allocation2 + $0x68] sm:$0xf0] }
  0x53   :  { %1051 = vmatpush.bf16.msrb.mxu3 %v13087_v1  ;;  %16693 = vst [vmem:[#allocation45_spill] sm:$0xff] %v13116_v42  ;;  %v8896_v60 = vld [vmem:[#allocation2 + $0x2c0] sm:$0xf]  ;;  %v11928_v61 = vld [vmem:[#allocation2 + $0x2c8] sm:$0xf0]  ;;  %v13122_v4 = vor.u32 %v11904_v49, %v8800_v48  ;;  %v13132_v15 = vor.u32 %v11848_v54, %v8988_v47 }
  0x54   :  { %16694 = vst [vmem:[#allocation46_spill] sm:$0xff] %v13119_v53  ;;  %v9084_v63 = vld [vmem:[#allocation2 + $0x120] sm:$0xf]  ;;  %v11872_v2 = vld [vmem:[#allocation2 + $0x128] sm:$0xf0]  ;;  %700 = vmatpush.bf16.msrb.mxu0 %v13110_v40  ;;  %v13134_v22 = vor.u32 %v11928_v61, %v8896_v60 }
  0x55   :  { %16695 = vst [vmem:[#allocation47_spill] sm:$0xff] %v13122_v4  ;;  %723 = vmatpush.bf16.msrb.mxu1 %v13116_v42  ;;  %v8724_v10 = vld [vmem:[%s16263_s0 + $0x40] sm:$0xf]  ;;  %v11886_v13 = vld [vmem:[%s16263_s0 + $0x44] sm:$0xf0]  ;;  %v13137_v32 = vor.u32 %v11872_v2, %v9084_v63 }
  0x56   :  { %1029 = vmatpush.bf16.msrb.mxu2 %v13098_v19  ;;  %16696 = vst [vmem:[#allocation48_spill] sm:$0xff] %v13132_v15  ;;  %v8976_v24 = vld [vmem:[#allocation2 + $0x48] sm:$0xf]  ;;  %v11901_v31 = vld [vmem:[#allocation2 + $0x1f0] sm:$0xf0]  ;;  %v13154_v40 = vor.u32 %v11886_v13, %v8724_v10 }
  0x57   :  { %1052 = vmatpush.bf16.msrb.mxu3 %v13104_v30  ;;  %16697 = vst [vmem:[#allocation49_spill] sm:$0xff] %v13134_v22  ;;  %v8788_v26 = vld [vmem:[#allocation2 + $0x1e8] sm:$0xf]  ;;  %v11845_v36 = vld [vmem:[#allocation2 + $0x50] sm:$0xf0] }
  0x58   :  { %16698 = vst [vmem:[#allocation50_spill] sm:$0xff] %v13137_v32  ;;  %v8884_v37 = vld [vmem:[#allocation2 + $0x2a8] sm:$0xf]  ;;  %v11925_v39 = vld [vmem:[#allocation2 + $0x2b0] sm:$0xf0]  ;;  %701 = vmatpush.bf16.msrb.mxu0 %v13122_v4  ;;  %v13146_v54 = vor.u32 %v11901_v31, %v8788_v26  ;;  %v13150_v63 = vor.u32 %v11845_v36, %v8976_v24 }
  0x59   :  { %v11885_v48 = vld [vmem:[%s16263_s0 + $0x44] sm:$0xf]  ;;  %v9072_v49 = vld [vmem:[#allocation2 + $0x108] sm:$0xf]  ;;  %v8726_v47 = vld [vmem:[%s16263_s0 + $0x48] sm:$0xf0]  ;;  %724 = vmatpush.bf16.msrb.mxu1 %v13134_v22  ;;  %v13152_v2 = vor.u32 %v11925_v39, %v8884_v37 }
  0x5a   :  { %1030 = vmatpush.bf16.msrb.mxu2 %v13114_v41  ;;  %v11869_v41 = vld [vmem:[#allocation2 + $0x110] sm:$0xf0]  ;;  %16699 = vst [vmem:[#allocation51_spill] sm:$0xff] %v13146_v54  ;;  %v8964_v60 = vld [vmem:[#allocation2 + $0x30] sm:$0xf]  ;;  %v13159_v4 = vor.u32 %v11885_v48, %v8726_v47 }
  0x5b   :  { %1053 = vmatpush.bf16.msrb.mxu3 %v13119_v53  ;;  %v11842_v61 = vld [vmem:[#allocation2 + $0x38] sm:$0xf0]  ;;  %16700 = vst [vmem:[#allocation52_spill] sm:$0xff] %v13150_v63  ;;  %v8776_v53 = vld [vmem:[#allocation2 + $0x1d0] sm:$0xf]  ;;  %v13157_v30 = vor.u32 %v11869_v41, %v9072_v49 }
  0x5c   :  { %16701 = vst [vmem:[#allocation53_spill] sm:$0xff] %v13152_v2  ;;  %v11898_v42 = vld [vmem:[#allocation2 + $0x1d8] sm:$0xf0]  ;;  %v8872_v26 = vld [vmem:[#allocation2 + $0x290] sm:$0xf]  ;;  %702 = vmatpush.bf16.msrb.mxu0 %v13146_v54  ;;  %v13166_v10 = vor.u32 %v11842_v61, %v8964_v60 }
  0x5d   :  { %16702 = vst [vmem:[#allocation54_spill] sm:$0xff] %v13157_v30  ;;  %v11922_v31 = vld [vmem:[#allocation2 + $0x298] sm:$0xf0]  ;;  %v9060_v19 = vld [vmem:[#allocation2 + $0xf0] sm:$0xf]  ;;  %v13162_v24 = vor.u32 %v11898_v42, %v8776_v53  ;;  %725 = vmatpush.bf16.msrb.mxu1 %v13152_v2 }
  0x5e   :  { %1031 = vmatpush.bf16.msrb.mxu2 %v13132_v15  ;;  %v11866_v15 = vld [vmem:[#allocation2 + $0xf8] sm:$0xf0]  ;;  %16704 = vst [vmem:[#allocation56_spill] sm:$0xff] %v13166_v10  ;;  %v13168_v13 = vor.u32 %v11922_v31, %v8872_v26  ;;  %v8952_v41 = vld [vmem:[#allocation2 + $0x18] sm:$0xf] }
  0x5f   :  { %1054 = vmatpush.bf16.msrb.mxu3 %v13137_v32  ;;  %16703 = vst [vmem:[#allocation55_spill] sm:$0xff] %v13162_v24  ;;  %v8764_v36 = vld [vmem:[#allocation2 + $0x1b8] sm:$0xf]  ;;  %v11895_v37 = vld [vmem:[#allocation2 + $0x1c0] sm:$0xf0]  ;;  %620 = vmatmul.bf16.gmra.mxu0 %v13154_v40  ;;  %v13172_v39 = vor.u32 %v11866_v15, %v9060_v19  ;;  %v8713_v19 = vld [vmem:[%s16263_s0 + $0x50] sm:$0xff] }
  0x60   :  { %16705 = vst [vmem:[#allocation57_spill] sm:$0xff] %v13168_v13  ;;  %v11839_v48 = vld [vmem:[#allocation2 + $0x20] sm:$0xf0]  ;;  %v8860_v42 = vld [vmem:[#allocation2 + $0x278] sm:$0xf]  ;;  %643 = vmatmul.bf16.gmra.mxu1 %v13159_v4  ;;  %703 = vmatpush.bf16.msrb.mxu0 %v13162_v24  ;;  %v13178_v60 = vor.u32 %v11895_v37, %v8764_v36  ;;  %v337_v22 = vunpack.c.l.b16 %v8713_v19 }
  0x61   :  { %16706 = vst [vmem:[#allocation58_spill] sm:$0xff] %v13172_v39  ;;  %v11919_v53 = vld [vmem:[#allocation2 + $0x280] sm:$0xf0]  ;;  %666 = vmatmul.bf16.gmra.mxu2 %v13154_v40  ;;  %v9048_v49 = vld [vmem:[#allocation2 + $0xd8] sm:$0xf]  ;;  %726 = vmatpush.bf16.msrb.mxu1 %v13168_v13  ;;  %v13185_v15 = vor.u32 %v11839_v48, %v8952_v41 }
  0x62   :  { %1032 = vmatpush.bf16.msrb.mxu2 %v13150_v63  ;;  %v11863_v47 = vld [vmem:[#allocation2 + $0xe0] sm:$0xf0]  ;;  %689 = vmatmul.bf16.gmra.mxu3 %v13159_v4  ;;  %16707 = vst [vmem:[#allocation59_spill] sm:$0xff] %v13178_v60  ;;  %v8752_v61 = vld [vmem:[#allocation2 + $0x1a0] sm:$0xf]  ;;  %v13187_v26 = vor.u32 %v11919_v53, %v8860_v42 }
  0x63   :  { %1055 = vmatpush.bf16.msrb.mxu3 %v13157_v30  ;;  %16708 = vst [vmem:[#allocation60_spill] sm:$0xff] %v13185_v15  ;;  %v11892_v31 = vld [vmem:[#allocation2 + $0x1a8] sm:$0xf0]  ;;  %v8848_v30 = vld [vmem:[#allocation2 + $0x260] sm:$0xf]  ;;  %v13190_v36 = vor.u32 %v11863_v47, %v9048_v49 }
  0x64   :  { %16709 = vst [vmem:[#allocation61_spill] sm:$0xff] %v13187_v26  ;;  %v11916_v2 = vld [vmem:[#allocation2 + $0x268] sm:$0xf0]  ;;  %v8940_v37 = vld [vmem:[#allocation2] sm:$0xf]  ;;  %704 = vmatpush.bf16.msrb.mxu0 %v13178_v60  ;;  %v13193_v13 = vor.u32 %v11892_v31, %v8752_v61 }
  0x65   :  { %16710 = vst [vmem:[#allocation62_spill] sm:$0xff] %v13190_v36  ;;  %v11836_v24 = vld [vmem:[#allocation2 + $0x8] sm:$0xf0]  ;;  %v9032_v54 = vld [vmem:[#allocation2 + $0xb0] sm:$0xf]  ;;  %727 = vmatpush.bf16.msrb.mxu1 %v13187_v26  ;;  %v13197_v42 = vor.u32 %v11916_v2, %v8848_v30 }
  0x66   :  { %1033 = vmatpush.bf16.msrb.mxu2 %v13166_v10  ;;  %v9036_v10 = vld [vmem:[#allocation2 + $0xc0] sm:$0xf]  ;;  %v11860_v63 = vld [vmem:[#allocation2 + $0xc8] sm:$0xf0]  ;;  %v11858_v32 = vld [vmem:[#allocation2 + $0xb8] sm:$0xf0]  ;;  %v13199_v53 = vor.u32 %v11836_v24, %v8940_v37 }
  0x67   :  { %1056 = vmatpush.bf16.msrb.mxu3 %v13172_v39  ;;  %16711 = vst [vmem:[#allocation63_spill] sm:$0xff] %v13193_v13  ;;  %v9128_v41 = vld [vmem:[#allocation2 + $0x170] sm:$0xf]  ;;  %v11882_v48 = vld [vmem:[#allocation2 + $0x178] sm:$0xf0]  ;;  %v13202_v20 = vor.u32 %v11860_v63, %v9036_v10  ;;  %v13204_v31 = vor.u32 %v11858_v32, %v9032_v54 }
  0x68   :  { %16712 = vst [vmem:[#allocation64_spill] sm:$0xff] %v13197_v42  ;;  %v8740_v49 = vld [vmem:[#allocation2 + $0x188] sm:$0xf]  ;;  %v11889_v47 = vld [vmem:[#allocation2 + $0x190] sm:$0xf0]  ;;  %v13206_v1 = vor.u32 %v11882_v48, %v9128_v41  ;;  %705 = vmatpush.bf16.msrb.mxu0 %v13193_v13 }
  0x69   :  { %16713 = vst [vmem:[#allocation65_spill] sm:$0xff] %v13199_v53  ;;  %v8836_v39 = vld [vmem:[#allocation2 + $0x248] sm:$0xf]  ;;  %v11913_v61 = vld [vmem:[#allocation2 + $0x250] sm:$0xf0]  ;;  %v13209_v24 = vor.u32 %v11889_v47, %v8740_v49  ;;  %728 = vmatpush.bf16.msrb.mxu1 %v13197_v42 }
  0x6a   :  { %1034 = vmatpush.bf16.msrb.mxu2 %v13185_v15  ;;  %16714 = vst [vmem:[#allocation66_spill] sm:$0xff] %v13202_v20  ;;  %v11856_v60 = vld [vmem:[#allocation2 + $0xac] sm:$0xf]  ;;  %v9026_v18 = vld [vmem:[#allocation2 + $0xb4] sm:$0xf0]  ;;  %v338_v15 = vunpack.c.h.b16 %v8713_v19  ;;  %v13213_v63 = vor.u32 %v11913_v61, %v8836_v39  ;;  %v13217_v19 = vpack.c.b16 %v337_v22, %v337_v22 }
  0x6b   :  { %1057 = vmatpush.bf16.msrb.mxu3 %v13190_v36  ;;  %16715 = vst [vmem:[#allocation67_spill] sm:$0xff] %v13204_v31  ;;  %v9020_v30 = vld [vmem:[#allocation2 + $0x98] sm:$0xf]  ;;  %v11855_v2 = vld [vmem:[#allocation2 + $0xa0] sm:$0xf0]  ;;  %v13215_v32 = vor.u32 %v11856_v60, %v9026_v18 }
  0x6c   :  { %16716 = vst [vmem:[#allocation68_spill] sm:$0xff] %v13206_v1  ;;  %v9116_v10 = vld [vmem:[#allocation2 + $0x158] sm:$0xf]  ;;  %v11880_v54 = vld [vmem:[#allocation2 + $0x16c] sm:$0xf]  ;;  %v13221_v41 = vor.u32 %v11855_v2, %v9020_v30  ;;  %v13223_v42 = vpack.c.b16 %v338_v15, %v338_v15  ;;  %706 = vmatpush.bf16.msrb.mxu0 %v13209_v24 }
  0x6d   :  { %16717 = vst [vmem:[#allocation69_spill] sm:$0xff] %v13209_v24  ;;  %v9122_v37 = vld [vmem:[#allocation2 + $0x174] sm:$0xf0]  ;;  %v11879_v48 = vld [vmem:[#allocation2 + $0x160] sm:$0xf0]  ;;  %729 = vmatpush.bf16.msrb.mxu1 %v13213_v63 }
  0x6e   :  { %1035 = vmatpush.bf16.msrb.mxu2 %v13199_v53  ;;  %16718 = vst [vmem:[#allocation70_spill] sm:$0xff] %v13213_v63  ;;  %v11853_v49 = vld [vmem:[#allocation2 + $0x94] sm:$0xf]  ;;  %v9014_v47 = vld [vmem:[#allocation2 + $0x9c] sm:$0xf0]  ;;  %v13227_v60 = vor.u32 %v11880_v54, %v9122_v37  ;;  %v13230_v22 = vor.u32 %v11879_v48, %v9116_v10 }
  0x6f   :  { %16719 = vst [vmem:[#allocation71_spill] sm:$0xff] %v13215_v32  ;;  %1058 = vmatpush.bf16.msrb.mxu3 %v13202_v20  ;;  %v9008_v39 = vld [vmem:[#allocation2 + $0x80] sm:$0xf]  ;;  %v11852_v18 = vld [vmem:[#allocation2 + $0x88] sm:$0xf0]  ;;  %v13233_v61 = vor.u32 %v11853_v49, %v9014_v47  ;;  %625 = vmatmul.bf16.gmra.mxu0 %v13217_v19 }
  0x70   :  { %16720 = vst [vmem:[#allocation72_spill] sm:$0xff] %v13221_v41  ;;  %1074 = vmatpush.bf16.msra.mxu0 %v13215_v32  ;;  %v11877_v30 = vld [vmem:[#allocation2 + $0x154] sm:$0xf]  ;;  %v9110_v2 = vld [vmem:[#allocation2 + $0x15c] sm:$0xf0]  ;;  %v13237_v15 = vor.u32 %v11852_v18, %v9008_v39  ;;  %648 = vmatmul.bf16.gmra.mxu1 %v13223_v42 }
  0x71   :  { %16721 = vst [vmem:[#allocation73_spill] sm:$0xff] %v13227_v60  ;;  %671 = vmatmul.bf16.gmra.mxu2 %v13217_v19  ;;  %1097 = vmatpush.bf16.msra.mxu1 %v13227_v60  ;;  %v13243_v10 = vor.u32 %v11877_v30, %v9110_v2  ;;  %v8996_v54 = vld [vmem:[#allocation2 + $0x68] sm:$0xf]  ;;  %v11849_v37 = vld [vmem:[#allocation2 + $0x70] sm:$0xf0] }
  0x72   :  { %1120 = vmatpush.bf16.msra.mxu2 %v13204_v31  ;;  %16722 = vst [vmem:[#allocation74_spill] sm:$0xff] %v13230_v22  ;;  %v11876_v31 = vld [vmem:[#allocation2 + $0x148] sm:$0xf0]  ;;  %694 = vmatmul.bf16.gmra.mxu3 %v13223_v42  ;;  %v9092_v49 = vld [vmem:[#allocation2 + $0x128] sm:$0xf]  ;;  %v13250_v18 = vor.u32 %v11849_v37, %v8996_v54 }
  0x73   :  { %1143 = vmatpush.bf16.msra.mxu3 %v13206_v1  ;;  %16723 = vst [vmem:[#allocation75_spill] sm:$0xff] %v13233_v61  ;;  %v9104_v1 = vld [vmem:[#allocation2 + $0x140] sm:$0xf]  ;;  %v11850_v47 = vld [vmem:[#allocation2 + $0x7c] sm:$0xf] }
  0x74   :  { %16724 = vst [vmem:[#allocation76_spill] sm:$0xff] %v13237_v15  ;;  %v13246_v48 = vor.u32 %v11876_v31, %v9104_v1  ;;  %1075 = vmatpush.bf16.msra.mxu0 %v13233_v61  ;;  %v9002_v39 = vld [vmem:[#allocation2 + $0x84] sm:$0xf0]  ;;  %v11874_v30 = vld [vmem:[#allocation2 + $0x13c] sm:$0xf] }
  0x75   :  { %16725 = vst [vmem:[#allocation77_spill] sm:$0xff] %v13243_v10  ;;  %v13252_v32 = vor.u32 %v11850_v47, %v9002_v39  ;;  %v9098_v2 = vld [vmem:[#allocation2 + $0x144] sm:$0xf0]  ;;  %v8984_v60 = vld [vmem:[#allocation2 + $0x50] sm:$0xf]  ;;  %1098 = vmatpush.bf16.msra.mxu1 %v13243_v10 }
  0x76   :  { %1121 = vmatpush.bf16.msra.mxu2 %v13221_v41  ;;  %16726 = vst [vmem:[#allocation78_spill] sm:$0xff] %v13246_v48  ;;  %v11873_v41 = vld [vmem:[#allocation2 + $0x130] sm:$0xf0]  ;;  %v11846_v63 = vld [vmem:[#allocation2 + $0x58] sm:$0xf0]  ;;  %v13255_v1 = vor.u32 %v11874_v30, %v9098_v2 }
  0x77   :  { %1144 = vmatpush.bf16.msra.mxu3 %v13230_v22  ;;  %16727 = vst [vmem:[#allocation79_spill] sm:$0xff] %v13250_v18  ;;  %v11847_v31 = vld [vmem:[#allocation2 + $0x64] sm:$0xf]  ;;  %v8990_v61 = vld [vmem:[#allocation2 + $0x6c] sm:$0xf0]  ;;  %v13258_v22 = vor.u32 %v11873_v41, %v9092_v49  ;;  %v13264_v39 = vor.u32 %v11846_v63, %v8984_v60 }
  0x78   :  { %16728 = vst [vmem:[#allocation80_spill] sm:$0xff] %v13252_v32  ;;  %1076 = vmatpush.bf16.msra.mxu0 %v13252_v32  ;;  %v13261_v54 = vor.u32 %v11847_v31, %v8990_v61  ;;  %v11871_v37 = vld [vmem:[#allocation2 + $0x124] sm:$0xf]  ;;  %v9086_v47 = vld [vmem:[#allocation2 + $0x12c] sm:$0xf0] }
  0x79   :  { %16729 = vst [vmem:[#allocation81_spill] sm:$0xff] %v13255_v1  ;;  %v11870_v10 = vld [vmem:[#allocation2 + $0x118] sm:$0xf0]  ;;  %v8972_v30 = vld [vmem:[#allocation2 + $0x38] sm:$0xf]  ;;  %1099 = vmatpush.bf16.msra.mxu1 %v13255_v1  ;;  %v13273_v61 = vor.u32 %v11871_v37, %v9086_v47 }
  0x7a   :  { %1122 = vmatpush.bf16.msra.mxu2 %v13237_v15  ;;  %16730 = vst [vmem:[#allocation82_spill] sm:$0xff] %v13258_v22  ;;  %v9080_v15 = vld [vmem:[#allocation2 + $0x110] sm:$0xf]  ;;  %v11843_v2 = vld [vmem:[#allocation2 + $0x40] sm:$0xf0] }
  0x7b   :  { %1145 = vmatpush.bf16.msra.mxu3 %v13246_v48  ;;  %16731 = vst [vmem:[#allocation83_spill] sm:$0xff] %v13261_v54  ;;  %v8924_v48 = vld [vmem:[%s16263_s0] sm:$0xf]  ;;  %v11832_v41 = vld [vmem:[%s16263_s0 + $0x4] sm:$0xf0]  ;;  %v13282_v49 = vor.u32 %v11870_v10, %v9080_v15  ;;  %v13286_v31 = vor.u32 %v11843_v2, %v8972_v30 }
  0x7c   :  { %16732 = vst [vmem:[#allocation84_spill] sm:$0xff] %v13264_v39  ;;  %v11831_v63 = vld [vmem:[%s16263_s0 + $0x4] sm:$0xf]  ;;  %v8926_v60 = vld [vmem:[%s16263_s0 + $0x8] sm:$0xf0]  ;;  %1077 = vmatpush.bf16.msra.mxu0 %v13261_v54 }
  0x7d   :  { %16733 = vst [vmem:[#allocation85_spill] sm:$0xff] %v13273_v61  ;;  %v9068_v37 = vld [vmem:[#allocation2 + $0xf8] sm:$0xf]  ;;  %v11867_v47 = vld [vmem:[#allocation2 + $0x100] sm:$0xf0]  ;;  %v13290_v1 = vor.u32 %v11831_v63, %v8926_v60  ;;  %1100 = vmatpush.bf16.msra.mxu1 %v13273_v61 }
  0x7e   :  { %1123 = vmatpush.bf16.msra.mxu2 %v13250_v18  ;;  %16734 = vst [vmem:[#allocation86_spill] sm:$0xff] %v13282_v49  ;;  %v13288_v18 = vor.u32 %v11832_v41, %v8924_v48  ;;  %v13294_v32 = vor.u32 %v11867_v47, %v9068_v37  ;;  %v11844_v15 = vld [vmem:[#allocation2 + $0x4c] sm:$0xf]  ;;  %v8978_v10 = vld [vmem:[#allocation2 + $0x54] sm:$0xf0] }
  0x7f   :  { %1146 = vmatpush.bf16.msra.mxu3 %v13258_v22  ;;  %16735 = vst [vmem:[#allocation87_spill] sm:$0xff] %v13286_v31  ;;  %707 = vmatmul.bf16.vlgmr.msrb.gmra.mxu0 %v13085_v0  ;;  %v11868_v30 = vld [vmem:[#allocation2 + $0x10c] sm:$0xf]  ;;  %v13300_v48 = vor.u32 %v11844_v15, %v8978_v10  ;;  %v9074_v2 = vld [vmem:[#allocation2 + $0x114] sm:$0xf0] }
  0x80   :  { %16736 = vst [vmem:[#allocation88_spill] sm:$0xff] %v13294_v32  ;;  %730 = vmatmul.bf16.vlgmr.msrb.gmra.mxu1 %v13090_v11  ;;  %v13303_v41 = vor.u32 %v11868_v30, %v9074_v2  ;;  %v8960_v63 = vld [vmem:[#allocation2 + $0x20] sm:$0xf]  ;;  %v11840_v60 = vld [vmem:[#allocation2 + $0x28] sm:$0xf0] }
  0x81   :  { %1036 = vmatmul.bf16.vlgmr.msrb.gmra.mxu2 %v13288_v18  ;;  %16737 = vst [vmem:[#allocation89_spill] sm:$0xff] %v13300_v48  ;;  %v9056_v37 = vld [vmem:[#allocation2 + $0xe0] sm:$0xf]  ;;  %1078 = vmatpush.bf16.msra.mxu0 %v13300_v48  ;;  %v13307_v0 = vor.u32 %v11840_v60, %v8960_v63  ;;  %v11864_v47 = vld [vmem:[#allocation2 + $0xe8] sm:$0xf0] }
  0x82   :  { %1124 = vmatpush.bf16.msra.mxu2 %v13264_v39  ;;  %1059 = vmatmul.bf16.vlgmr.msrb.gmra.mxu3 %v13290_v1  ;;  %16738 = vst [vmem:[#allocation90_spill] sm:$0xff] %v13303_v41  ;;  %v11841_v11 = vld [vmem:[#allocation2 + $0x34] sm:$0xf]  ;;  %v13310_v15 = vor.u32 %v11864_v47, %v9056_v37  ;;  %v9062_v2 = vld [vmem:[#allocation2 + $0xfc] sm:$0xf0] }
  0x83   :  { %1147 = vmatpush.bf16.msra.mxu3 %v13282_v49  ;;  %16739 = vst [vmem:[#allocation91_spill] sm:$0xff] %v13307_v0  ;;  %1101 = vmatpush.bf16.msra.mxu1 %v13303_v41  ;;  %v11865_v30 = vld [vmem:[#allocation2 + $0xf4] sm:$0xf]  ;;  %v11838_v49 = vld [vmem:[#allocation2 + $0x1c] sm:$0xf] }
  0x84   :  { %16740 = vst [vmem:[#allocation92_spill] sm:$0xff] %v13310_v15  ;;  %v13315_v39 = vor.u32 %v11865_v30, %v9062_v2  ;;  %v11862_v48 = vld [vmem:[#allocation2 + $0xdc] sm:$0xf]  ;;  %v9050_v63 = vld [vmem:[#allocation2 + $0xe4] sm:$0xf0] }
  0x85   :  { %v8948_v60 = vld [vmem:[#allocation2 + $0x8] sm:$0xf]  ;;  %v11837_v61 = vld [vmem:[#allocation2 + $0x10] sm:$0xf0]  ;;  %v11835_v2 = vld [vmem:[#allocation2 + $0x4] sm:$0xf] }
  0x86   :  { %1125 = vmatpush.bf16.msra.mxu2 %v13286_v31  ;;  %v8966_v31 = vld [vmem:[#allocation2 + $0x3c] sm:$0xf0]  ;;  %16742 = vst [vmem:[#allocation94_spill] sm:$0xff] %v13315_v39  ;;  %v9044_v54 = vld [vmem:[#allocation2 + $0xc8] sm:$0xf] }
  0x87   :  { %1148 = vmatpush.bf16.msra.mxu3 %v13294_v32  ;;  %v13312_v10 = vor.u32 %v11841_v11, %v8966_v31  ;;  %v8954_v32 = vld [vmem:[#allocation2 + $0x24] sm:$0xf0]  ;;  %v13321_v31 = vor.u32 %v11837_v61, %v8948_v60  ;;  %v11861_v47 = vld [vmem:[#allocation2 + $0xd0] sm:$0xf0]  ;;  %1102 = vmatpush.bf16.msra.mxu1 %v13315_v39  ;;  %v13324_v11 = vor.u32 %v11862_v48, %v9050_v63  ;;  %v11859_v41 = vld [vmem:[#allocation2 + $0xc4] sm:$0xf] }
  0x88   :  { %v13319_v37 = vor.u32 %v11838_v49, %v8954_v32  ;;  %v13326_v30 = vor.u32 %v11861_v47, %v9044_v54  ;;  %v9038_v22 = vld [vmem:[#allocation2 + $0xcc] sm:$0xf0]  ;;  %v11834_v61 = vld [vmem:[%s16263_s0 + $0x14] sm:$0xf0]  ;;  %v11833_v49 = vld [vmem:[%s16263_s0 + $0x14] sm:$0xf] }
  0x89   :  { %16741 = vst [vmem:[#allocation93_spill] sm:$0xff] %v13312_v10  ;;  %1079 = vmatpush.bf16.msra.mxu0 %v13312_v10  ;;  %v8932_v32 = vld [vmem:[%s16263_s0 + $0x10] sm:$0xf]  ;;  %v8934_v54 = vld [vmem:[%s16263_s0 + $0x18] sm:$0xf0]  ;;  %v13346_v63 = vor.u32 %v11859_v41, %v9038_v22 }
  0x8a   :  { %1126 = vmatpush.bf16.msra.mxu2 %v13307_v0  ;;  %16743 = vst [vmem:[#allocation95_spill] sm:$0xff] %v13319_v37  ;;  %v8942_v0 = vld [vmem:[#allocation2 + $0xc] sm:$0xf0]  ;;  %v13348_v60 = vor.u32 %v11834_v61, %v8932_v32  ;;  %v13350_v47 = vor.u32 %v11833_v49, %v8934_v54  ;;  %v11984_v22 = vld [vmem:[#allocation2 + $0x46c] sm:$0xf] }
  0x8b   :  { %1149 = vmatpush.bf16.msra.mxu3 %v13310_v15  ;;  %16744 = vst [vmem:[#allocation96_spill] sm:$0xff] %v13321_v31  ;;  %v13343_v48 = vor.u32 %v11835_v2, %v8942_v0  ;;  %1103 = vmatpush.bf16.msra.mxu1 %v13324_v11  ;;  %v11960_v0 = vld [vmem:[#allocation2 + $0x3ac] sm:$0xf]  ;;  %v9239_v2 = vld [vmem:[#allocation2 + $0x3b4] sm:$0xf0] }
  0x8c   :  { %16745 = vst [vmem:[#allocation97_spill] sm:$0xff] %v13324_v11  ;;  %v13358_v41 = vor.u32 %v11960_v0, %v9239_v2  ;;  %v9335_v32 = vld [vmem:[#allocation2 + $0x474] sm:$0xf0]  ;;  %v11957_v61 = vld [vmem:[#allocation2 + $0x394] sm:$0xf] }
  0x8d   :  { %16746 = vst [vmem:[#allocation98_spill] sm:$0xff] %v13326_v30  ;;  %1080 = vmatpush.bf16.msra.mxu0 %v13319_v37  ;;  %v9227_v49 = vld [vmem:[#allocation2 + $0x39c] sm:$0xf0]  ;;  %v13363_v54 = vor.u32 %v11984_v22, %v9335_v32  ;;  %v9333_v11 = vld [vmem:[#allocation2 + $0x468] sm:$0xf] }
  0x8e   :  { %1127 = vmatpush.bf16.msra.mxu2 %v13321_v31  ;;  %16747 = vst [vmem:[#allocation99_spill] sm:$0xff] %v13343_v48  ;;  %v11961_v31 = vld [vmem:[#allocation2 + $0x3b0] sm:$0xf0]  ;;  %v11954_v22 = vld [vmem:[#allocation2 + $0x37c] sm:$0xf] }
  0x8f   :  { %1150 = vmatpush.bf16.msra.mxu3 %v13326_v30  ;;  %16748 = vst [vmem:[#allocation100_spill] sm:$0xff] %v13346_v63  ;;  %712 = vmatmul.bf16.gmra.mxu0 %v13154_v40  ;;  %v188_v40 = vld [vmem:[%s16263_s0 + $0x20] sm:$0xff]  ;;  %v13366_v30 = vor.u32 %v11957_v61, %v9227_v49  ;;  %v11985_v0 = vld [vmem:[#allocation2 + $0x470] sm:$0xf0]  ;;  %v9215_v32 = vld [vmem:[#allocation2 + $0x384] sm:$0xf0] }
  0x90   :  { %1104 = vmatpush.bf16.msra.mxu1 %v13346_v63  ;;  %16749 = vst [vmem:[#allocation101_spill] sm:$0xff] %v13358_v41  ;;  %v11981_v63 = vld [vmem:[#allocation2 + $0x454] sm:$0xf]  ;;  %v13373_v15 = vor.u32 %v11985_v0, %v9333_v11  ;;  %v11978_v39 = vld [vmem:[#allocation2 + $0x43c] sm:$0xf] }
  0x91   :  { %1081 = vmatpush.bf16.msra.mxu0 %v13343_v48  ;;  %735 = vmatmul.bf16.gmra.mxu1 %v13159_v4  ;;  %16750 = vst [vmem:[#allocation102_spill] sm:$0xff] %v13363_v54  ;;  %v9323_v4 = vld [vmem:[#allocation2 + $0x45c] sm:$0xf0]  ;;  %v9237_v48 = vld [vmem:[#allocation2 + $0x3a8] sm:$0xf] }
  0x92   :  { %1041 = vmatmul.bf16.gmra.mxu2 %v13348_v60  ;;  %1064 = vmatmul.bf16.gmra.mxu3 %v13350_v47  ;;  %16751 = vst [vmem:[#allocation103_spill] sm:$0xff] %v13366_v30  ;;  %v13369_v2 = vor.u32 %v11981_v63, %v9323_v4  ;;  %v13371_v37 = vor.u32 %v11961_v31, %v9237_v48  ;;  %v9311_v10 = vld [vmem:[#allocation2 + $0x444] sm:$0xf0]  ;;  %v9225_v24 = vld [vmem:[#allocation2 + $0x390] sm:$0xf]  ;;  %v758_v63 = vunpack.c.l.b16 %v188_v40  ;;  %v759_v48 = vunpack.c.h.b16 %v188_v40 }
  0x93   :  { %1566 = vmatpush.bf16.msrb.mxu2 %v13358_v41  ;;  %1589 = vmatpush.bf16.msrb.mxu3 %v13363_v54  ;;  %16754 = vst [vmem:[#allocation106_spill] sm:$0xff] %v13373_v15  ;;  %v11958_v20 = vld [vmem:[#allocation2 + $0x398] sm:$0xf0]  ;;  %v9321_v49 = vld [vmem:[#allocation2 + $0x450] sm:$0xf]  ;;  %v13380_v31 = vor.u32 %v11954_v22, %v9215_v32  ;;  %v13385_v4 = vor.u32 %v11978_v39, %v9311_v10 }
  0x94   :  { %16752 = vst [vmem:[#allocation104_spill] sm:$0xff] %v13369_v2  ;;  %1543 = vmatpush.bf16.msrb.mxu1 %v13373_v15  ;;  %v13377_v61 = vor.u32 %v11958_v20, %v9225_v24  ;;  %v11982_v54 = vld [vmem:[#allocation2 + $0x458] sm:$0xf0]  ;;  %v13389_v20 = vpack.c.b16 %v758_v63, %v758_v63  ;;  %v13392_v24 = vpack.c.b16 %v759_v48, %v759_v48  ;;  %v11951_v39 = vld [vmem:[#allocation2 + $0x364] sm:$0xf] }
  0x95   :  { %16753 = vst [vmem:[#allocation105_spill] sm:$0xff] %v13371_v37  ;;  %1520 = vmatpush.bf16.msrb.mxu0 %v13371_v37  ;;  %v13382_v11 = vor.u32 %v11982_v54, %v9321_v49  ;;  %v9203_v10 = vld [vmem:[#allocation2 + $0x36c] sm:$0xf0]  ;;  %v11975_v40 = vld [vmem:[#allocation2 + $0x424] sm:$0xf] }
  0x96   :  { %16755 = vst [vmem:[#allocation107_spill] sm:$0xff] %v13377_v61  ;;  %v13399_v54 = vor.u32 %v11951_v39, %v9203_v10  ;;  %v9299_v0 = vld [vmem:[#allocation2 + $0x42c] sm:$0xf0]  ;;  %v9213_v22 = vld [vmem:[#allocation2 + $0x378] sm:$0xf] }
  0x97   :  { %1567 = vmatpush.bf16.msrb.mxu2 %v13366_v30  ;;  %16756 = vst [vmem:[#allocation108_spill] sm:$0xff] %v13380_v31  ;;  %1590 = vmatpush.bf16.msrb.mxu3 %v13369_v2  ;;  %v11955_v32 = vld [vmem:[#allocation2 + $0x380] sm:$0xf0]  ;;  %v13401_v49 = vor.u32 %v11975_v40, %v9299_v0  ;;  %v9309_v48 = vld [vmem:[#allocation2 + $0x438] sm:$0xf] }
  0x98   :  { %16757 = vst [vmem:[#allocation109_spill] sm:$0xff] %v13382_v11  ;;  %1544 = vmatpush.bf16.msrb.mxu1 %v13382_v11  ;;  %v13403_v63 = vor.u32 %v11955_v32, %v9213_v22  ;;  %v11972_v11 = vld [vmem:[#allocation2 + $0x40c] sm:$0xf]  ;;  %v9201_v40 = vld [vmem:[#allocation2 + $0x360] sm:$0xf] }
  0x99   :  { %16758 = vst [vmem:[#allocation110_spill] sm:$0xff] %v13385_v4  ;;  %1521 = vmatpush.bf16.msrb.mxu0 %v13377_v61  ;;  %v9287_v61 = vld [vmem:[#allocation2 + $0x414] sm:$0xf0]  ;;  %v11952_v0 = vld [vmem:[#allocation2 + $0x368] sm:$0xf0] }
  0x9a   :  { %16759 = vst [vmem:[#allocation111_spill] sm:$0xff] %v13399_v54  ;;  %v13412_v10 = vor.u32 %v11972_v11, %v9287_v61  ;;  %v9297_v22 = vld [vmem:[#allocation2 + $0x420] sm:$0xf]  ;;  %v13415_v32 = vor.u32 %v11952_v0, %v9201_v40  ;;  %v11945_v61 = vld [vmem:[#allocation2 + $0x334] sm:$0xf] }
  0x9b   :  { %1568 = vmatpush.bf16.msrb.mxu2 %v13380_v31  ;;  %1591 = vmatpush.bf16.msrb.mxu3 %v13385_v4  ;;  %16760 = vst [vmem:[#allocation112_spill] sm:$0xff] %v13401_v49  ;;  %v11948_v4 = vld [vmem:[#allocation2 + $0x34c] sm:$0xf]  ;;  %v9191_v31 = vld [vmem:[#allocation2 + $0x354] sm:$0xf0] }
  0x9c   :  { %16761 = vst [vmem:[#allocation113_spill] sm:$0xff] %v13403_v63  ;;  %v13410_v39 = vor.u32 %v11948_v4, %v9191_v31  ;;  %v9179_v31 = vld [vmem:[#allocation2 + $0x33c] sm:$0xf0]  ;;  %v11969_v11 = vld [vmem:[#allocation2 + $0x3f4] sm:$0xf] }
  0x9d   :  { %1522 = vmatpush.bf16.msrb.mxu0 %v13403_v63  ;;  %16764 = vst [vmem:[#allocation116_spill] sm:$0xff] %v13412_v10  ;;  %v13424_v4 = vor.u32 %v11945_v61, %v9179_v31  ;;  %v9275_v40 = vld [vmem:[#allocation2 + $0x3fc] sm:$0xf0]  ;;  %v9189_v0 = vld [vmem:[#allocation2 + $0x348] sm:$0xf] }
  0x9e   :  { %16763 = vst [vmem:[#allocation115_spill] sm:$0xff] %v13410_v39  ;;  %v9177_v61 = vld [vmem:[#allocation2 + $0x330] sm:$0xf]  ;;  %v11977_v63 = vld [vmem:[#allocation2 + $0x430] sm:$0xf0] }
  0x9f   :  { %717 = vmatmul.bf16.gmra.mxu0 %v13217_v19  ;;  %v11979_v19 = vld [vmem:[#allocation2 + $0x440] sm:$0xf0]  ;;  %1569 = vmatpush.bf16.msrb.mxu2 %v13399_v54  ;;  %16765 = vst [vmem:[#allocation117_spill] sm:$0xff] %v13415_v32  ;;  %v9273_v31 = vld [vmem:[#allocation2 + $0x3f0] sm:$0xf] }
  0xa0   :  { %1592 = vmatpush.bf16.msrb.mxu3 %v13401_v49  ;;  %16767 = vst [vmem:[#allocation119_spill] sm:$0xff] %v13424_v4  ;;  %v11949_v49 = vld [vmem:[#allocation2 + $0x350] sm:$0xf0]  ;;  %v11939_v54 = vld [vmem:[#allocation2 + $0x304] sm:$0xf] }
  0xa1   :  { %740 = vmatmul.bf16.gmra.mxu1 %v13223_v42  ;;  %v13406_v42 = vor.u32 %v11979_v19, %v9309_v48  ;;  %v11976_v48 = vld [vmem:[#allocation2 + $0x428] sm:$0xf0]  ;;  %1523 = vmatpush.bf16.msrb.mxu0 %v13415_v32  ;;  %v11966_v32 = vld [vmem:[#allocation2 + $0x3dc] sm:$0xf]  ;;  %v11995_v2 = vld [vmem:[#allocation2 + $0x4a0] sm:$0xf0] }
  0xa2   :  { %1046 = vmatmul.bf16.gmra.mxu2 %v13389_v20  ;;  %1069 = vmatmul.bf16.gmra.mxu3 %v13392_v24  ;;  %v13417_v19 = vor.u32 %v11976_v48, %v9297_v22  ;;  %v13428_v22 = vor.u32 %v11969_v11, %v9275_v40  ;;  %v13430_v48 = vor.u32 %v11949_v49, %v9189_v0  ;;  %v11970_v49 = vld [vmem:[#allocation2 + $0x3f8] sm:$0xf0]  ;;  %v9167_v0 = vld [vmem:[#allocation2 + $0x324] sm:$0xf0]  ;;  %v11968_v15 = vld [vmem:[#allocation2 + $0x3e8] sm:$0xf0] }
  0xa3   :  { %16762 = vst [vmem:[#allocation114_spill] sm:$0xff] %v13406_v42  ;;  %1545 = vmatpush.bf16.msrb.mxu1 %v13406_v42  ;;  %1570 = vmatpush.bf16.msrb.mxu2 %v13410_v39  ;;  %v11973_v39 = vld [vmem:[#allocation2 + $0x410] sm:$0xf0]  ;;  %v11942_v40 = vld [vmem:[#allocation2 + $0x31c] sm:$0xf] }
  0xa4   :  { %16766 = vst [vmem:[#allocation118_spill] sm:$0xff] %v13417_v19  ;;  %1593 = vmatpush.bf16.msrb.mxu3 %v13412_v10  ;;  %v9285_v10 = vld [vmem:[#allocation2 + $0x408] sm:$0xf]  ;;  %v9366_v37 = vld [vmem:[#allocation2 + $0x480] sm:$0xf] }
  0xa5   :  { %16768 = vst [vmem:[#allocation120_spill] sm:$0xff] %v13428_v22  ;;  %1524 = vmatpush.bf16.msrb.mxu0 %v13430_v48  ;;  %v9305_v42 = vld [vmem:[#allocation2 + $0x428] sm:$0xf]  ;;  %v11992_v53 = vld [vmem:[#allocation2 + $0x488] sm:$0xf0] }
  0xa6   :  { %16769 = vst [vmem:[#allocation121_spill] sm:$0xff] %v13430_v48  ;;  %v9462_v13 = vld [vmem:[#allocation2 + $0x540] sm:$0xf]  ;;  %v9416_v43 = vld [vmem:[#allocation2 + $0x4ec] sm:$0xf0] }
  0xa7   :  { %1546 = vmatpush.bf16.msrb.mxu1 %v13417_v19  ;;  %1571 = vmatpush.bf16.msrb.mxu2 %v13424_v4  ;;  %v13434_v19 = vor.u32 %v11973_v39, %v9285_v10  ;;  %v13443_v4 = vor.u32 %v11942_v40, %v9167_v0  ;;  %v9263_v39 = vld [vmem:[#allocation2 + $0x3e4] sm:$0xf0]  ;;  %v9165_v10 = vld [vmem:[#allocation2 + $0x318] sm:$0xf]  ;;  %v11963_v40 = vld [vmem:[#allocation2 + $0x3c4] sm:$0xf] }
  0xa8   :  { %1594 = vmatpush.bf16.msrb.mxu3 %v13428_v22  ;;  %v11943_v22 = vld [vmem:[#allocation2 + $0x320] sm:$0xf0]  ;;  %v13446_v48 = vor.u32 %v11966_v32, %v9263_v39  ;;  %v9251_v0 = vld [vmem:[#allocation2 + $0x3cc] sm:$0xf0]  ;;  %v11940_v39 = vld [vmem:[#allocation2 + $0x308] sm:$0xf0] }
  0xa9   :  { %16770 = vst [vmem:[#allocation122_spill] sm:$0xff] %v13434_v19  ;;  %v13457_v32 = vor.u32 %v11963_v40, %v9251_v0  ;;  %v9546_v40 = vld [vmem:[#allocation2 + $0x5e8] sm:$0xf]  ;;  %v12027_v55 = vld [vmem:[#allocation2 + $0x5a4] sm:$0xf] }
  0xaa   :  { %16773 = vst [vmem:[#allocation125_spill] sm:$0xff] %v13443_v4  ;;  %v9512_v52 = vld [vmem:[#allocation2 + $0x5ac] sm:$0xf0] }
  0xab   :  { %1547 = vmatpush.bf16.msrb.mxu1 %v13434_v19  ;;  %16774 = vst [vmem:[#allocation126_spill] sm:$0xff] %v13446_v48  ;;  %v13449_v19 = vor.u32 %v11943_v22, %v9165_v10  ;;  %1572 = vmatpush.bf16.msrb.mxu2 %v13443_v4  ;;  %v9153_v22 = vld [vmem:[#allocation2 + $0x300] sm:$0xf]  ;;  %v9464_v5 = vld [vmem:[#allocation2 + $0x54c] sm:$0xf0] }
  0xac   :  { %1595 = vmatpush.bf16.msrb.mxu3 %v13446_v48  ;;  %16778 = vst [vmem:[#allocation130_spill] sm:$0xff] %v13457_v32  ;;  %v9249_v10 = vld [vmem:[#allocation2 + $0x3c0] sm:$0xf] }
  0xad   :  { %16775 = vst [vmem:[#allocation127_spill] sm:$0xff] %v13449_v19 }
  0xaf   :  { %1082 = vmatmul.bf16.vlgmr.msra.gmra.mxu0 %v13288_v18 }
  0xb0   :  { %1596 = vmatpush.bf16.msrb.mxu3 %v13457_v32  ;;  %v9245_v32 = vld [vmem:[#allocation2 + $0x3b0] sm:$0xf] }
  0xb1   :  { %1105 = vmatmul.bf16.vlgmr.msra.gmra.mxu1 %v13290_v1 }
  0xb2   :  { %1128 = vmatmul.bf16.vlgmr.msra.gmra.mxu2 %v13288_v18  ;;  %1151 = vmatmul.bf16.vlgmr.msra.gmra.mxu3 %v13290_v1  ;;  %v11946_v18 = vld [vmem:[#allocation2 + $0x338] sm:$0xf0]  ;;  %v13441_v1 = vor.u32 %v11970_v49, %v9273_v31  ;;  %v9155_v49 = vld [vmem:[#allocation2 + $0x30c] sm:$0xf0] }
  0xb3   :  { %v13439_v11 = vor.u32 %v11946_v18, %v9177_v61  ;;  %v9261_v61 = vld [vmem:[#allocation2 + $0x3d8] sm:$0xf]  ;;  %v11967_v18 = vld [vmem:[#allocation2 + $0x3e0] sm:$0xf0] }
  0xb4   :  { %16772 = vst [vmem:[#allocation124_spill] sm:$0xff] %v13441_v1  ;;  %1548 = vmatpush.bf16.msrb.mxu1 %v13441_v1  ;;  %v13452_v31 = vor.u32 %v11967_v18, %v9261_v61  ;;  %v13462_v61 = vor.u32 %v11940_v39, %v9153_v22  ;;  %v11964_v18 = vld [vmem:[#allocation2 + $0x3c8] sm:$0xf0]  ;;  %v12037_v22 = vld [vmem:[#allocation2 + $0x5f0] sm:$0xf0] }
  0xb5   :  { %16771 = vst [vmem:[#allocation123_spill] sm:$0xff] %v13439_v11  ;;  %1525 = vmatpush.bf16.msrb.mxu0 %v13439_v11  ;;  %v13455_v11 = vor.u32 %v11939_v54, %v9155_v49  ;;  %v13465_v4 = vor.u32 %v11964_v18, %v9249_v10  ;;  %v9450_v54 = vld [vmem:[#allocation2 + $0x528] sm:$0xf]  ;;  %v12013_v49 = vld [vmem:[#allocation2 + $0x530] sm:$0xf0]  ;;  %v13475_v39 = vor.u32 %v12037_v22, %v9546_v40 }
  0xb6   :  { %16776 = vst [vmem:[#allocation128_spill] sm:$0xff] %v13452_v31  ;;  %v13473_v0 = vor.u32 %v12013_v49, %v9450_v54  ;;  %v9438_v10 = vld [vmem:[#allocation2 + $0x510] sm:$0xf]  ;;  %v12010_v18 = vld [vmem:[#allocation2 + $0x518] sm:$0xf0] }
  0xb7   :  { %16777 = vst [vmem:[#allocation129_spill] sm:$0xff] %v13455_v11  ;;  %1573 = vmatpush.bf16.msrb.mxu2 %v13455_v11  ;;  %2050 = vmatpush.bf16.msra.mxu3 %v13475_v39  ;;  %v9341_v54 = vld [vmem:[#allocation2 + $0x470] sm:$0xf]  ;;  %v11986_v49 = vld [vmem:[#allocation2 + $0x478] sm:$0xf0] }
  0xb8   :  { %1549 = vmatpush.bf16.msrb.mxu1 %v13452_v31  ;;  %16779 = vst [vmem:[#allocation131_spill] sm:$0xff] %v13462_v61  ;;  %v13486_v40 = vor.u32 %v11986_v49, %v9341_v54  ;;  %v11953_v1 = vld [vmem:[#allocation2 + $0x370] sm:$0xf0] }
  0xb9   :  { %1526 = vmatpush.bf16.msrb.mxu0 %v13449_v19  ;;  %16780 = vst [vmem:[#allocation132_spill] sm:$0xff] %v13465_v4 }
  0xba   :  { %16781 = vst [vmem:[#allocation133_spill] sm:$0xff] %v13473_v0 }
  0xbb   :  { %16782 = vst [vmem:[#allocation134_spill] sm:$0xff] %v13475_v39  ;;  %2027 = vmatpush.bf16.msra.mxu2 %v13473_v0  ;;  %v12007_v39 = vld [vmem:[#allocation2 + $0x500] sm:$0xf0]  ;;  %v9233_v0 = vld [vmem:[#allocation2 + $0x398] sm:$0xf] }
  0xbc   :  { %1550 = vmatpush.bf16.msrb.mxu1 %v13465_v4  ;;  %v9534_v4 = vld [vmem:[#allocation2 + $0x5d0] sm:$0xf]  ;;  %16786 = vst [vmem:[#allocation138_spill] sm:$0xff] %v13486_v40 }
  0xbd   :  { %1527 = vmatpush.bf16.msrb.mxu0 %v13462_v61  ;;  %v13479_v61 = vor.u32 %v12010_v18, %v9438_v10  ;;  %v9426_v18 = vld [vmem:[#allocation2 + $0x4f8] sm:$0xf] }
  0xbf   :  { %1087 = vmatmul.bf16.gmra.mxu0 %v13348_v60  ;;  %16783 = vst [vmem:[#allocation135_spill] sm:$0xff] %v13479_v61  ;;  %2028 = vmatpush.bf16.msra.mxu2 %v13479_v61  ;;  %v11959_v61 = vld [vmem:[#allocation2 + $0x3a0] sm:$0xf0] }
  0xc0   :  { %1635 = vmatpush.bf16.msra.mxu1 %v13486_v40  ;;  %v13498_v49 = vor.u32 %v11959_v61, %v9233_v0  ;;  %v11983_v40 = vld [vmem:[#allocation2 + $0x460] sm:$0xf0]  ;;  %v12028_v0 = vld [vmem:[#allocation2 + $0x5a8] sm:$0xf0] }
  0xc1   :  { %1110 = vmatmul.bf16.gmra.mxu1 %v13350_v47 }
  0xc2   :  { %1133 = vmatmul.bf16.gmra.mxu2 %v13348_v60  ;;  %1156 = vmatmul.bf16.gmra.mxu3 %v13350_v47  ;;  %v12034_v60 = vld [vmem:[#allocation2 + $0x5d8] sm:$0xf0]  ;;  %16789 = vst [vmem:[#allocation141_spill] sm:$0xff] %v13498_v49 }
  0xc3   :  { %v11962_v47 = vld [vmem:[#allocation2 + $0x3b8] sm:$0xf0]  ;;  %v13481_v11 = vor.u32 %v12034_v60, %v9534_v4  ;;  %v9522_v4 = vld [vmem:[#allocation2 + $0x5b8] sm:$0xf] }
  0xc4   :  { %v13483_v31 = vor.u32 %v11962_v47, %v9245_v32  ;;  %v13493_v32 = vor.u32 %v12007_v39, %v9426_v18  ;;  %v12031_v47 = vld [vmem:[#allocation2 + $0x5c0] sm:$0xf0]  ;;  %v9414_v39 = vld [vmem:[#allocation2 + $0x4e0] sm:$0xf] }
  0xc5   :  { %16784 = vst [vmem:[#allocation136_spill] sm:$0xff] %v13481_v11  ;;  %2051 = vmatpush.bf16.msra.mxu3 %v13481_v11  ;;  %v13496_v54 = vor.u32 %v12031_v47, %v9522_v4  ;;  %v9329_v11 = vld [vmem:[#allocation2 + $0x458] sm:$0xf]  ;;  %v9221_v47 = vld [vmem:[#allocation2 + $0x380] sm:$0xf] }
  0xc6   :  { %16785 = vst [vmem:[#allocation137_spill] sm:$0xff] %v13483_v31  ;;  %1612 = vmatpush.bf16.msra.mxu0 %v13483_v31  ;;  %v13502_v31 = vor.u32 %v11983_v40, %v9329_v11  ;;  %2029 = vmatpush.bf16.msra.mxu2 %v13493_v32 }
  0xc7   :  { %16787 = vst [vmem:[#allocation139_spill] sm:$0xff] %v13493_v32  ;;  %v11956_v32 = vld [vmem:[#allocation2 + $0x388] sm:$0xf0] }
  0xc8   :  { %16788 = vst [vmem:[#allocation140_spill] sm:$0xff] %v13496_v54  ;;  %1636 = vmatpush.bf16.msra.mxu1 %v13502_v31 }
  0xc9   :  { %16790 = vst [vmem:[#allocation142_spill] sm:$0xff] %v13502_v31  ;;  %2052 = vmatpush.bf16.msra.mxu3 %v13496_v54  ;;  %v9317_v54 = vld [vmem:[#allocation2 + $0x440] sm:$0xf] }
  0xca   :  { %1613 = vmatpush.bf16.msra.mxu0 %v13498_v49  ;;  %v9209_v49 = vld [vmem:[#allocation2 + $0x368] sm:$0xf] }
  0xcc   :  { %v616_v22 = vpop.f32.mrf.mxu0 }
  0xcd   :  { %v639_v10 = vpop.f32.mrf.mxu1 }
  0xce   :  { %v13491_v60 = vadd.f32 %v639_v10, %v616_v22  ;;  %v12004_v22 = vld [vmem:[#allocation2 + $0x4e8] sm:$0xf0]  ;;  %v9510_v10 = vld [vmem:[#allocation2 + $0x5a0] sm:$0xf] }
  0xcf   :  { %1092 = vmatmul.bf16.gmra.mxu0 %v13389_v20  ;;  %v13508_v61 = vor.u32 %v12004_v22, %v9414_v39  ;;  %v9137_v39 = vld [vmem:[%s16263_s0 + $0x60] sm:$0xf]  ;;  %v11936_v22 = vld [vmem:[%s16263_s0 + $0x64] sm:$0xf0] }
  0xd1   :  { %1115 = vmatmul.bf16.gmra.mxu1 %v13392_v24  ;;  %16791 = vst [vmem:[#allocation143_spill] sm:$0xff] %v13508_v61  ;;  %2030 = vmatpush.bf16.msra.mxu2 %v13508_v61 }
  0xd2   :  { %1138 = vmatmul.bf16.gmra.mxu2 %v13389_v20  ;;  %1161 = vmatmul.bf16.gmra.mxu3 %v13392_v24  ;;  %v13511_v20 = vor.u32 %v12028_v0, %v9510_v10  ;;  %v13525_v10 = vor.u32 %v11956_v32, %v9221_v47  ;;  %v11980_v0 = vld [vmem:[#allocation2 + $0x448] sm:$0xf0]  ;;  %v11935_v32 = vld [vmem:[%s16263_s0 + $0x64] sm:$0xf]  ;;  %v13542_v47 = vor.u32 %v11953_v1, %v9209_v49  ;;  %v9486_v49 = vld [vmem:[#allocation2 + $0x570] sm:$0xf] }
  0xd3   :  { %v13527_v61 = vor.u32 %v11980_v0, %v9317_v54  ;;  %v9139_v54 = vld [vmem:[%s16263_s0 + $0x68] sm:$0xf0]  ;;  %v13544_v0 = vor.u32 %v11977_v63, %v9305_v42  ;;  %v9390_v63 = vld [vmem:[#allocation2 + $0x4b0] sm:$0xf]  ;;  %v11998_v42 = vld [vmem:[#allocation2 + $0x4b8] sm:$0xf0] }
  0xd4   :  { %v662_v18 = vpop.f32.mrf.mxu2  ;;  %16792 = vst [vmem:[#allocation144_spill] sm:$0xff] %v13511_v20  ;;  %v618_v40 = vpop.f32.mrf.mxu0  ;;  %2053 = vmatpush.bf16.msra.mxu3 %v13511_v20  ;;  %1614 = vmatpush.bf16.msra.mxu0 %v13525_v10  ;;  %v13549_v20 = vor.u32 %v11935_v32, %v9139_v54  ;;  %v11950_v32 = vld [vmem:[#allocation2 + $0x358] sm:$0xf0] }
  0xd5   :  { %v685_v11 = vpop.f32.mrf.mxu3  ;;  %v641_v4 = vpop.f32.mrf.mxu1  ;;  %16793 = vst [vmem:[#allocation145_spill] sm:$0xff] %v13525_v10  ;;  %1637 = vmatpush.bf16.msra.mxu1 %v13527_v61 }
  0xd6   :  { %v13513_v24 = vadd.f32 %v685_v11, %v662_v18  ;;  %v13516_v19 = vadd.f32 %v641_v4, %v618_v40  ;;  %v9402_v18 = vld [vmem:[#allocation2 + $0x4c8] sm:$0xf]  ;;  %v12001_v11 = vld [vmem:[#allocation2 + $0x4d0] sm:$0xf0]  ;;  %16794 = vst [vmem:[#allocation146_spill] sm:$0xff] %v13527_v61 }
  0xd7   :  { %v13529_v31 = vor.u32 %v12001_v11, %v9402_v18  ;;  %v9498_v40 = vld [vmem:[#allocation2 + $0x588] sm:$0xf]  ;;  %v12025_v4 = vld [vmem:[#allocation2 + $0x590] sm:$0xf0]  ;;  %16797 = vst [vmem:[#allocation149_spill] sm:$0xff] %v13542_v47  ;;  %v13547_v11 = vor.u32 %v11936_v22, %v9137_v39  ;;  %v13558_v39 = vor.u32 %v11998_v42, %v9390_v63 }
  0xd8   :  { %v13532_v48 = vor.u32 %v12025_v4, %v9498_v40  ;;  %16798 = vst [vmem:[#allocation150_spill] sm:$0xff] %v13544_v0  ;;  %1615 = vmatpush.bf16.msra.mxu0 %v13542_v47  ;;  %v12022_v22 = vld [vmem:[#allocation2 + $0x578] sm:$0xf0]  ;;  %v9185_v42 = vld [vmem:[#allocation2 + $0x338] sm:$0xf] }
  0xd9   :  { %16795 = vst [vmem:[#allocation147_spill] sm:$0xff] %v13529_v31  ;;  %2031 = vmatpush.bf16.msra.mxu2 %v13529_v31  ;;  %1638 = vmatpush.bf16.msra.mxu1 %v13544_v0  ;;  %v13562_v54 = vor.u32 %v12022_v22, %v9486_v49  ;;  %v11947_v49 = vld [vmem:[#allocation2 + $0x340] sm:$0xf0]  ;;  %v9281_v22 = vld [vmem:[#allocation2 + $0x3f8] sm:$0xf] }
  0xda   :  { %16796 = vst [vmem:[#allocation148_spill] sm:$0xff] %v13532_v48  ;;  %2054 = vmatpush.bf16.msra.mxu3 %v13532_v48  ;;  %v9197_v48 = vld [vmem:[#allocation2 + $0x350] sm:$0xf]  ;;  %v13573_v31 = vor.u32 %v11947_v49, %v9185_v42  ;;  %v11971_v0 = vld [vmem:[#allocation2 + $0x400] sm:$0xf0] }
  0xdb   :  { %16799 = vst [vmem:[#allocation151_spill] sm:$0xff] %v13558_v39  ;;  %v9474_v42 = vld [vmem:[#allocation2 + $0x558] sm:$0xf]  ;;  %v12019_v49 = vld [vmem:[#allocation2 + $0x560] sm:$0xf0] }
  0xdc   :  { %v664_v18 = vpop.f32.mrf.mxu2  ;;  %v621_v4 = vpop.f32.mrf.mxu0  ;;  %16800 = vst [vmem:[#allocation152_spill] sm:$0xff] %v13562_v54 }
  0xdd   :  { %v687_v40 = vpop.f32.mrf.mxu3  ;;  %v644_v61 = vpop.f32.mrf.mxu1  ;;  %2032 = vmatpush.bf16.msra.mxu2 %v13558_v39  ;;  %16803 = vst [vmem:[#allocation155_spill] sm:$0xff] %v13573_v31 }
  0xde   :  { %v13552_v10 = vadd.f32 %v687_v40, %v664_v18  ;;  %v13555_v1 = vadd.f32 %v644_v61, %v621_v4  ;;  %v13564_v18 = vor.u32 %v11950_v32, %v9197_v48  ;;  %v9293_v61 = vld [vmem:[#allocation2 + $0x410] sm:$0xf]  ;;  %v11974_v40 = vld [vmem:[#allocation2 + $0x418] sm:$0xf0]  ;;  %2055 = vmatpush.bf16.msra.mxu3 %v13562_v54 }
  0xdf   :  { %1528 = vmatmul.bf16.vlgmr.msrb.gmra.mxu0 %v13547_v11  ;;  %v13568_v4 = vor.u32 %v11974_v40, %v9293_v61  ;;  %v13577_v61 = vor.u32 %v11971_v0, %v9281_v22  ;;  %v9145_v54 = vld [vmem:[%s16263_s0 + $0x70] sm:$0xf]  ;;  %v11937_v0 = vld [vmem:[%s16263_s0 + $0x74] sm:$0xf]  ;;  %v9173_v22 = vld [vmem:[#allocation2 + $0x320] sm:$0xf] }
  0xe0   :  { %16801 = vst [vmem:[#allocation153_spill] sm:$0xff] %v13564_v18  ;;  %1616 = vmatpush.bf16.msra.mxu0 %v13564_v18  ;;  %v9378_v18 = vld [vmem:[#allocation2 + $0x498] sm:$0xf] }
  0xe1   :  { %1551 = vmatmul.bf16.vlgmr.msrb.gmra.mxu1 %v13549_v20  ;;  %16802 = vst [vmem:[#allocation154_spill] sm:$0xff] %v13568_v4 }
  0xe2   :  { %1574 = vmatmul.bf16.vlgmr.msrb.gmra.mxu2 %v13547_v11  ;;  %1597 = vmatmul.bf16.vlgmr.msrb.gmra.mxu3 %v13549_v20  ;;  %16804 = vst [vmem:[#allocation156_spill] sm:$0xff] %v13577_v61 }
  0xe3   :  { %1639 = vmatpush.bf16.msra.mxu1 %v13568_v4  ;;  %v11938_v4 = vld [vmem:[%s16263_s0 + $0x74] sm:$0xf0] }
  0xe4   :  { %v667_v63 = vpop.f32.mrf.mxu2  ;;  %v623_v32 = vpop.f32.mrf.mxu0  ;;  %1617 = vmatpush.bf16.msra.mxu0 %v13573_v31  ;;  %v9269_v31 = vld [vmem:[#allocation2 + $0x3e0] sm:$0xf] }
  0xe5   :  { %v690_v48 = vpop.f32.mrf.mxu3  ;;  %v646_v39 = vpop.f32.mrf.mxu1  ;;  %v13602_v41 = vor.u32 %v11968_v15, %v9269_v31  ;;  %v9257_v15 = vld [vmem:[#allocation2 + $0x3c8] sm:$0xf] }
  0xe6   :  { %v13575_v47 = vadd.f32 %v690_v48, %v667_v63  ;;  %v13579_v40 = vadd.f32 %v646_v39, %v623_v32  ;;  %v9147_v39 = vld [vmem:[%s16263_s0 + $0x78] sm:$0xf0]  ;;  %v13594_v63 = vor.u32 %v11995_v2, %v9378_v18  ;;  %v11944_v48 = vld [vmem:[#allocation2 + $0x328] sm:$0xf0]  ;;  %v13597_v32 = vor.u32 %v12019_v49, %v9474_v42 }
  0xe7   :  { %1640 = vmatpush.bf16.msra.mxu1 %v13577_v61  ;;  %v13599_v30 = vor.u32 %v11944_v48, %v9173_v22  ;;  %16808 = vst [vmem:[#allocation160_spill] sm:$0xff] %v13602_v41  ;;  %v12016_v2 = vld [vmem:[#allocation2 + $0x548] sm:$0xf0]  ;;  %v13606_v18 = vor.u32 %v11992_v53, %v9366_v37  ;;  %v13610_v22 = vor.u32 %v11938_v4, %v9145_v54  ;;  %v9161_v48 = vld [vmem:[#allocation2 + $0x308] sm:$0xf] }
  0xe8   :  { %16805 = vst [vmem:[#allocation157_spill] sm:$0xff] %v13594_v63  ;;  %2033 = vmatpush.bf16.msra.mxu2 %v13594_v63  ;;  %2056 = vmatpush.bf16.msra.mxu3 %v13597_v32  ;;  %v13608_v42 = vor.u32 %v12016_v2, %v9462_v13  ;;  %v11941_v63 = vld [vmem:[#allocation2 + $0x310] sm:$0xf0]  ;;  %v13613_v36 = vor.u32 %v11937_v0, %v9147_v39  ;;  %v9458_v54 = vld [vmem:[#allocation2 + $0x530] sm:$0xf] }
  0xe9   :  { %16806 = vst [vmem:[#allocation158_spill] sm:$0xff] %v13597_v32  ;;  %1618 = vmatpush.bf16.msra.mxu0 %v13599_v30  ;;  %v13615_v26 = vor.u32 %v11941_v63, %v9161_v48  ;;  %v11965_v32 = vld [vmem:[#allocation2 + $0x3d0] sm:$0xf0]  ;;  %v12014_v4 = vld [vmem:[#allocation2 + $0x538] sm:$0xf0]  ;;  %v9134_v48 = vld [vmem:[%s16263_s0 + $0x80] sm:$0xff] }
  0xea   :  { %16807 = vst [vmem:[#allocation159_spill] sm:$0xff] %v13599_v30  ;;  %v13620_v13 = vor.u32 %v11965_v32, %v9257_v15  ;;  %v9554_v0 = vld [vmem:[#allocation2 + $0x5f0] sm:$0xf]  ;;  %v13631_v39 = vor.u32 %v12014_v4, %v9458_v54  ;;  %v12011_v54 = vld [vmem:[#allocation2 + $0x520] sm:$0xf0] }
  0xeb   :  { %16809 = vst [vmem:[#allocation161_spill] sm:$0xff] %v13606_v18  ;;  %1641 = vmatpush.bf16.msra.mxu1 %v13602_v41  ;;  %v9542_v4 = vld [vmem:[#allocation2 + $0x5d8] sm:$0xf] }
  0xec   :  { %16810 = vst [vmem:[#allocation162_spill] sm:$0xff] %v13608_v42  ;;  %v669_v49 = vpop.f32.mrf.mxu2  ;;  %v626_v61 = vpop.f32.mrf.mxu0  ;;  %2034 = vmatpush.bf16.msra.mxu2 %v13606_v18  ;;  %2057 = vmatpush.bf16.msra.mxu3 %v13608_v42  ;;  %v1251_v42 = vunpack.c.h.b16 %v9134_v48 }
  0xed   :  { %v692_v31 = vpop.f32.mrf.mxu3  ;;  %16811 = vst [vmem:[#allocation163_spill] sm:$0xff] %v13615_v26  ;;  %v649_v53 = vpop.f32.mrf.mxu1  ;;  %1619 = vmatpush.bf16.msra.mxu0 %v13615_v26 }
  0xee   :  { %v13617_v30 = vadd.f32 %v692_v31, %v669_v49  ;;  %16812 = vst [vmem:[#allocation164_spill] sm:$0xff] %v13620_v13  ;;  %v13622_v37 = vadd.f32 %v649_v53, %v626_v61  ;;  %v12038_v61 = vld [vmem:[#allocation2 + $0x5f8] sm:$0xf0]  ;;  %v9446_v53 = vld [vmem:[#allocation2 + $0x518] sm:$0xf] }
  0xef   :  { %1533 = vmatmul.bf16.gmra.mxu0 %v13610_v22  ;;  %1642 = vmatpush.bf16.msra.mxu1 %v13620_v13  ;;  %16813 = vst [vmem:[#allocation165_spill] sm:$0xff] %v13631_v39  ;;  %v13633_v32 = vor.u32 %v12038_v61, %v9554_v0  ;;  %v1250_v13 = vunpack.c.l.b16 %v9134_v48  ;;  %v13642_v26 = vor.u32 %v12011_v54, %v9446_v53  ;;  %v12035_v0 = vld [vmem:[#allocation2 + $0x5e0] sm:$0xf0]  ;;  %v12012_v61 = vld [vmem:[#allocation2 + $0x52c] sm:$0xf] }
  0xf0   :  { %2119 = vmatpush.bf16.msrb.mxu2 %v13631_v39  ;;  %v13644_v18 = vor.u32 %v12035_v0, %v9542_v4  ;;  %v12036_v39 = vld [vmem:[#allocation2 + $0x5ec] sm:$0xf]  ;;  %v13656_v4 = vpack.c.b16 %v1251_v42, %v1251_v42 }
  0xf1   :  { %1556 = vmatmul.bf16.gmra.mxu1 %v13613_v36  ;;  %16814 = vst [vmem:[#allocation166_spill] sm:$0xff] %v13633_v32  ;;  %2142 = vmatpush.bf16.msrb.mxu3 %v13633_v32  ;;  %v13653_v53 = vpack.c.b16 %v1250_v13, %v1250_v13  ;;  %v9440_v13 = vld [vmem:[#allocation2 + $0x51c] sm:$0xf0] }
  0xf2   :  { %1579 = vmatmul.bf16.gmra.mxu2 %v13610_v22  ;;  %1602 = vmatmul.bf16.gmra.mxu3 %v13613_v36  ;;  %16815 = vst [vmem:[#allocation167_spill] sm:$0xff] %v13642_v26 }
  0xf3   :  { %16816 = vst [vmem:[#allocation168_spill] sm:$0xff] %v13644_v18 }
  0xf4   :  { %v672_v63 = vpop.f32.mrf.mxu2  ;;  %v628_v49 = vpop.f32.mrf.mxu0  ;;  %2120 = vmatpush.bf16.msrb.mxu2 %v13642_v26  ;;  %v12008_v26 = vld [vmem:[#allocation2 + $0x508] sm:$0xf0] }
  0xf5   :  { %v695_v2 = vpop.f32.mrf.mxu3  ;;  %v651_v31 = vpop.f32.mrf.mxu1  ;;  %v9452_v49 = vld [vmem:[#allocation2 + $0x534] sm:$0xf0]  ;;  %2143 = vmatpush.bf16.msrb.mxu3 %v13644_v18  ;;  %v12032_v18 = vld [vmem:[#allocation2 + $0x5c8] sm:$0xf0] }
  0xf6   :  { %v13639_v15 = vadd.f32 %v695_v2, %v672_v63  ;;  %v13646_v41 = vor.u32 %v12012_v61, %v9452_v49  ;;  %v9548_v63 = vld [vmem:[#allocation2 + $0x5f4] sm:$0xf0]  ;;  %v9434_v49 = vld [vmem:[#allocation2 + $0x500] sm:$0xf] }
  0xf7   :  { %v13649_v2 = vor.u32 %v12036_v39, %v9548_v63  ;;  %v9530_v39 = vld [vmem:[#allocation2 + $0x5c0] sm:$0xf]  ;;  %v13661_v63 = vor.u32 %v12008_v26, %v9434_v49  ;;  %v9422_v26 = vld [vmem:[#allocation2 + $0x4e8] sm:$0xf]  ;;  %v12005_v49 = vld [vmem:[#allocation2 + $0x4f0] sm:$0xf0] }
  0xf8   :  { %16817 = vst [vmem:[#allocation169_spill] sm:$0xff] %v13646_v41  ;;  %2073 = vmatpush.bf16.msrb.mxu0 %v13646_v41  ;;  %v9518_v41 = vld [vmem:[#allocation2 + $0x5a8] sm:$0xf] }
  0xf9   :  { %16818 = vst [vmem:[#allocation170_spill] sm:$0xff] %v13649_v2  ;;  %2096 = vmatpush.bf16.msrb.mxu1 %v13649_v2  ;;  %2121 = vmatpush.bf16.msrb.mxu2 %v13661_v63 }
  0xfa   :  { %16819 = vst [vmem:[#allocation171_spill] sm:$0xff] %v13661_v63 }
  0xfc   :  { %v674_v31 = vpop.f32.mrf.mxu2  ;;  %v708_v54 = vpop.f32.mrf.mxu0 }
  0xfd   :  { %v697_v48 = vpop.f32.mrf.mxu3  ;;  %v731_v0 = vpop.f32.mrf.mxu1  ;;  %v12009_v31 = vld [vmem:[#allocation2 + $0x514] sm:$0xf] }
  0xfe   :  { %v13658_v61 = vadd.f32 %v731_v0, %v708_v54  ;;  %v13665_v48 = vor.u32 %v12032_v18, %v9530_v39  ;;  %v13667_v42 = vor.u32 %v12009_v31, %v9440_v13  ;;  %v12033_v54 = vld [vmem:[#allocation2 + $0x5d4] sm:$0xf]  ;;  %v9536_v0 = vld [vmem:[#allocation2 + $0x5dc] sm:$0xf0]  ;;  %v13676_v18 = vor.u32 %v12005_v49, %v9422_v26  ;;  %v12030_v26 = vld [vmem:[#allocation2 + $0x5bc] sm:$0xf] }
  0xff   :  { %1538 = vmatmul.bf16.gmra.mxu0 %v13653_v53  ;;  %v13671_v2 = vor.u32 %v12033_v54, %v9536_v0  ;;  %v12029_v39 = vld [vmem:[#allocation2 + $0x5b0] sm:$0xf0]  ;;  %v9524_v49 = vld [vmem:[#allocation2 + $0x5c4] sm:$0xf0] }
 0x100   :  { %16820 = vst [vmem:[#allocation172_spill] sm:$0xff] %v13665_v48  ;;  %2144 = vmatpush.bf16.msrb.mxu3 %v13665_v48  ;;  %2074 = vmatpush.bf16.msrb.mxu0 %v13667_v42  ;;  %v13679_v63 = vor.u32 %v12029_v39, %v9518_v41  ;;  %v11988_v41 = vld [vmem:[%s16263_s0 + $0x94] sm:$0xf0]  ;;  %v9410_v39 = vld [vmem:[#allocation2 + $0x4d0] sm:$0xf] }
 0x101   :  { %1561 = vmatmul.bf16.gmra.mxu1 %v13656_v4  ;;  %16821 = vst [vmem:[#allocation173_spill] sm:$0xff] %v13667_v42  ;;  %2122 = vmatpush.bf16.msrb.mxu2 %v13676_v18  ;;  %v12006_v42 = vld [vmem:[#allocation2 + $0x4fc] sm:$0xf] }
 0x102   :  { %1584 = vmatmul.bf16.gmra.mxu2 %v13653_v53  ;;  %1607 = vmatmul.bf16.gmra.mxu3 %v13656_v4  ;;  %16822 = vst [vmem:[#allocation174_spill] sm:$0xff] %v13671_v2 }
 0x103   :  { %2097 = vmatpush.bf16.msrb.mxu1 %v13671_v2  ;;  %16823 = vst [vmem:[#allocation175_spill] sm:$0xff] %v13676_v18  ;;  %v9428_v2 = vld [vmem:[#allocation2 + $0x504] sm:$0xf0]  ;;  %v12003_v18 = vld [vmem:[#allocation2 + $0x4e4] sm:$0xf] }
 0x104   :  { %v1037_v32 = vpop.f32.mrf.mxu2  ;;  %v710_v59 = vpop.f32.mrf.mxu0  ;;  %16824 = vst [vmem:[#allocation176_spill] sm:$0xff] %v13679_v63  ;;  %2145 = vmatpush.bf16.msrb.mxu3 %v13679_v63  ;;  %v12026_v63 = vld [vmem:[#allocation2 + $0x598] sm:$0xf0] }
 0x105   :  { %v1038_v31 = vadd.f32 %v1037_v32, %v13491_v60  ;;  %v1060_v13 = vpop.f32.mrf.mxu3  ;;  %v733_v54 = vpop.f32.mrf.mxu1  ;;  %v9350_v60 = vld [vmem:[%s16263_s0 + $0x90] sm:$0xf]  ;;  %v13693_v32 = vor.u32 %v12006_v42, %v9428_v2  ;;  %v11987_v2 = vld [vmem:[%s16263_s0 + $0x94] sm:$0xf]  ;;  %v9352_v42 = vld [vmem:[%s16263_s0 + $0x98] sm:$0xf0] }
 0x106   :  { %v13684_v48 = vadd.f32 %v733_v54, %v710_v59  ;;  %v13695_v59 = vor.u32 %v12030_v26, %v9524_v49  ;;  %v9506_v54 = vld [vmem:[#allocation2 + $0x590] sm:$0xf]  ;;  %v13710_v26 = vor.u32 %v12003_v18, %v9416_v43  ;;  %v13712_v49 = vor.u32 %v12027_v55, %v9512_v52  ;;  %v9398_v52 = vld [vmem:[#allocation2 + $0x4b8] sm:$0xf]  ;;  %v11999_v55 = vld [vmem:[#allocation2 + $0x4c0] sm:$0xf0] }
 0x107   :  { %v13682_v0 = vadd.f32 %v1060_v13, %v1038_v31  ;;  %16825 = vst [vmem:[#allocation177_spill] sm:$0xff] %v13693_v32  ;;  %v12002_v31 = vld [vmem:[#allocation2 + $0x4d8] sm:$0xf0]  ;;  %2075 = vmatpush.bf16.msrb.mxu0 %v13693_v32  ;;  %v13700_v51 = vor.u32 %v12026_v63, %v9506_v54  ;;  %v13716_v32 = vor.u32 %v11988_v41, %v9350_v60  ;;  %v12023_v60 = vld [vmem:[#allocation2 + $0x580] sm:$0xf0] }
 0x108   :  { %16826 = vst [vmem:[#allocation178_spill] sm:$0xff] %v13695_v59  ;;  %v13697_v13 = vor.u32 %v12002_v31, %v9410_v39  ;;  %2098 = vmatpush.bf16.msrb.mxu1 %v13695_v59  ;;  %v13718_v23 = vor.u32 %v11987_v2, %v9352_v42  ;;  %v13729_v18 = vor.u32 %v11999_v55, %v9398_v52  ;;  %v12000_v41 = vld [vmem:[#allocation2 + $0x4cc] sm:$0xf]  ;;  %v9404_v2 = vld [vmem:[#allocation2 + $0x4d4] sm:$0xf0] }
 0x109   :  { %16828 = vst [vmem:[#allocation180_spill] sm:$0xff] %v13700_v51  ;;  %2146 = vmatpush.bf16.msrb.mxu3 %v13700_v51  ;;  %v13734_v42 = vor.u32 %v12000_v41, %v9404_v2  ;;  %v12021_v52 = vld [vmem:[#allocation2 + $0x574] sm:$0xf]  ;;  %v9488_v2 = vld [vmem:[#allocation2 + $0x57c] sm:$0xf0] }
 0x10a   :  { %16827 = vst [vmem:[#allocation179_spill] sm:$0xff] %v13697_v13  ;;  %2123 = vmatpush.bf16.msrb.mxu2 %v13697_v13  ;;  %v11996_v51 = vld [vmem:[#allocation2 + $0x4a8] sm:$0xf0]  ;;  %v9482_v13 = vld [vmem:[#allocation2 + $0x560] sm:$0xf] }
 0x10b   :  { %16829 = vst [vmem:[#allocation181_spill] sm:$0xff] %v13710_v26  ;;  %2076 = vmatpush.bf16.msrb.mxu0 %v13710_v26  ;;  %v12017_v26 = vld [vmem:[#allocation2 + $0x550] sm:$0xf0] }
 0x10c   :  { %16830 = vst [vmem:[#allocation182_spill] sm:$0xff] %v13712_v49  ;;  %v1039_v63 = vpop.f32.mrf.mxu2  ;;  %v713_v54 = vpop.f32.mrf.mxu0  ;;  %2099 = vmatpush.bf16.msrb.mxu1 %v13712_v49 }
 0x10d   :  { %v1040_v39 = vadd.f32 %v1039_v63, %v13516_v19  ;;  %v1062_v31 = vpop.f32.mrf.mxu3  ;;  %v9494_v19 = vld [vmem:[#allocation2 + $0x578] sm:$0xf]  ;;  %16831 = vst [vmem:[#allocation183_spill] sm:$0xff] %v13729_v18  ;;  %v12024_v63 = vld [vmem:[#allocation2 + $0x58c] sm:$0xf] }
 0x10e   :  { %v736_v27 = vpop.f32.mrf.mxu1  ;;  %16833 = vst [vmem:[#allocation185_spill] sm:$0xff] %v13734_v42  ;;  %2124 = vmatpush.bf16.msrb.mxu2 %v13729_v18 }
 0x10f   :  { %v13721_v59 = vadd.f32 %v1062_v31, %v1040_v39  ;;  %v13723_v43 = vadd.f32 %v736_v27, %v713_v54  ;;  %1620 = vmatmul.bf16.vlgmr.msra.gmra.mxu0 %v13547_v11  ;;  %v13732_v27 = vor.u32 %v12023_v60, %v9494_v19  ;;  %v9500_v11 = vld [vmem:[#allocation2 + $0x594] sm:$0xf0]  ;;  %v11997_v31 = vld [vmem:[#allocation2 + $0x4b4] sm:$0xf]  ;;  %v9392_v54 = vld [vmem:[#allocation2 + $0x4bc] sm:$0xf0] }
 0x110   :  { %v13737_v39 = vor.u32 %v12024_v63, %v9500_v11  ;;  %2077 = vmatpush.bf16.msrb.mxu0 %v13734_v42  ;;  %v13743_v41 = vor.u32 %v11997_v31, %v9392_v54  ;;  %v13745_v63 = vor.u32 %v12021_v52, %v9488_v2  ;;  %v9386_v42 = vld [vmem:[#allocation2 + $0x4a0] sm:$0xf]  ;;  %v12020_v54 = vld [vmem:[#allocation2 + $0x568] sm:$0xf0]  ;;  %v11994_v52 = vld [vmem:[#allocation2 + $0x49c] sm:$0xf] }
 0x111   :  { %1643 = vmatmul.bf16.vlgmr.msra.gmra.mxu1 %v13549_v20  ;;  %16832 = vst [vmem:[#allocation184_spill] sm:$0xff] %v13732_v27  ;;  %2147 = vmatpush.bf16.msrb.mxu3 %v13732_v27  ;;  %v13757_v31 = vor.u32 %v11996_v51, %v9386_v42  ;;  %v9476_v2 = vld [vmem:[#allocation2 + $0x564] sm:$0xf0]  ;;  %v11993_v51 = vld [vmem:[#allocation2 + $0x490] sm:$0xf0] }
 0x112   :  { %2035 = vmatmul.bf16.vlgmr.msra.gmra.mxu2 %v13716_v32  ;;  %2058 = vmatmul.bf16.vlgmr.msra.gmra.mxu3 %v13718_v23  ;;  %16834 = vst [vmem:[#allocation186_spill] sm:$0xff] %v13737_v39  ;;  %v9470_v42 = vld [vmem:[#allocation2 + $0x548] sm:$0xf] }
 0x113   :  { %2100 = vmatpush.bf16.msrb.mxu1 %v13737_v39  ;;  %16835 = vst [vmem:[#allocation187_spill] sm:$0xff] %v13743_v41  ;;  %v9374_v39 = vld [vmem:[#allocation2 + $0x488] sm:$0xf]  ;;  %2125 = vmatpush.bf16.msrb.mxu2 %v13757_v31 }
 0x114   :  { %v715_v60 = vpop.f32.mrf.mxu0  ;;  %16836 = vst [vmem:[#allocation188_spill] sm:$0xff] %v13745_v63  ;;  %2078 = vmatpush.bf16.msrb.mxu0 %v13743_v41  ;;  %v11989_v41 = vld [vmem:[%s16263_s0 + $0xa4] sm:$0xf] }
 0x115   :  { %v1042_v20 = vpop.f32.mrf.mxu2  ;;  %v1065_v19 = vpop.f32.mrf.mxu3  ;;  %16837 = vst [vmem:[#allocation189_spill] sm:$0xff] %v13757_v31  ;;  %v12015_v31 = vld [vmem:[#allocation2 + $0x544] sm:$0xf] }
 0x116   :  { %v1043_v55 = vadd.f32 %v1042_v20, %v13555_v1  ;;  %v738_v18 = vpop.f32.mrf.mxu1  ;;  %v9358_v1 = vld [vmem:[%s16263_s0 + $0xa0] sm:$0xf]  ;;  %v11990_v20 = vld [vmem:[%s16263_s0 + $0xa4] sm:$0xf0] }
 0x117   :  { %v13749_v27 = vadd.f32 %v738_v18, %v715_v60  ;;  %v13760_v18 = vor.u32 %v12020_v54, %v9482_v13  ;;  %2101 = vmatpush.bf16.msrb.mxu1 %v13745_v63  ;;  %v12018_v60 = vld [vmem:[#allocation2 + $0x55c] sm:$0xf]  ;;  %v9360_v13 = vld [vmem:[%s16263_s0 + $0xa8] sm:$0xf0]  ;;  %v13775_v54 = vor.u32 %v11993_v51, %v9374_v39  ;;  %v13781_v28 = vor.u32 %v11990_v20, %v9358_v1  ;;  %v9665_v1 = vld [vmem:[#allocation2 + $0x6b4] sm:$0xf0] }
 0x118   :  { %v13747_v11 = vadd.f32 %v1065_v19, %v1043_v55  ;;  %v9380_v55 = vld [vmem:[#allocation2 + $0x4a4] sm:$0xf0]  ;;  %v13766_v49 = vor.u32 %v12018_v60, %v9476_v2  ;;  %v11991_v60 = vld [vmem:[#allocation2 + $0x484] sm:$0xf]  ;;  %v9368_v2 = vld [vmem:[#allocation2 + $0x48c] sm:$0xf0]  ;;  %v13784_v39 = vor.u32 %v11989_v41, %v9360_v13 }
 0x119   :  { %16838 = vst [vmem:[#allocation190_spill] sm:$0xff] %v13760_v18  ;;  %v13763_v19 = vor.u32 %v11994_v52, %v9380_v55  ;;  %2148 = vmatpush.bf16.msrb.mxu3 %v13760_v18  ;;  %v13777_v52 = vor.u32 %v12017_v26, %v9470_v42  ;;  %2126 = vmatpush.bf16.msrb.mxu2 %v13775_v54  ;;  %v12064_v41 = vld [vmem:[#allocation2 + $0x6ac] sm:$0xf]  ;;  %v9347_v13 = vld [vmem:[%s16263_s0 + $0xb0] sm:$0xff] }
 0x11a   :  { %16840 = vst [vmem:[#allocation192_spill] sm:$0xff] %v13766_v49  ;;  %v13787_v26 = vor.u32 %v11991_v60, %v9368_v2  ;;  %v12061_v60 = vld [vmem:[#allocation2 + $0x694] sm:$0xf]  ;;  %v9653_v2 = vld [vmem:[#allocation2 + $0x69c] sm:$0xf0] }
 0x11b   :  { %16839 = vst [vmem:[#allocation191_spill] sm:$0xff] %v13763_v19  ;;  %2079 = vmatpush.bf16.msrb.mxu0 %v13763_v19  ;;  %2102 = vmatpush.bf16.msrb.mxu1 %v13766_v49  ;;  %v9938_v49 = vld [vmem:[#allocation2 + $0x8ac] sm:$0xf0] }
 0x11c   :  { %16841 = vst [vmem:[#allocation193_spill] sm:$0xff] %v13775_v54  ;;  %v718_v6 = vpop.f32.mrf.mxu0 }
 0x11d   :  { %16842 = vst [vmem:[#allocation194_spill] sm:$0xff] %v13777_v52  ;;  %v1044_v55 = vpop.f32.mrf.mxu2  ;;  %v1067_v35 = vpop.f32.mrf.mxu3  ;;  %2149 = vmatpush.bf16.msrb.mxu3 %v13777_v52  ;;  %v12069_v52 = vld [vmem:[#allocation2 + $0x6d0] sm:$0xf0] }
 0x11e   :  { %v1045_v63 = vadd.f32 %v1044_v55, %v13579_v40  ;;  %v741_v18 = vpop.f32.mrf.mxu1  ;;  %16843 = vst [vmem:[#allocation195_spill] sm:$0xff] %v13787_v26  ;;  %v13794_v40 = vor.u32 %v12015_v31, %v9464_v5 }
 0x11f   :  { %v13791_v42 = vadd.f32 %v741_v18, %v718_v6  ;;  %1625 = vmatmul.bf16.gmra.mxu0 %v13610_v22  ;;  %v13802_v6 = vor.u32 %v12064_v41, %v9665_v1  ;;  %v12085_v41 = vld [vmem:[#allocation2 + $0x754] sm:$0xf]  ;;  %v1757_v1 = vunpack.c.l.b16 %v9347_v13 }
 0x120   :  { %v13789_v51 = vadd.f32 %v1067_v35, %v1045_v63  ;;  %16844 = vst [vmem:[#allocation196_spill] sm:$0xff] %v13794_v40  ;;  %2080 = vmatpush.bf16.msrb.mxu0 %v13787_v26  ;;  %v12088_v35 = vld [vmem:[#allocation2 + $0x76c] sm:$0xf]  ;;  %2103 = vmatpush.bf16.msrb.mxu1 %v13794_v40  ;;  %v9761_v63 = vld [vmem:[#allocation2 + $0x774] sm:$0xf0] }
 0x121   :  { %1648 = vmatmul.bf16.gmra.mxu1 %v13613_v36  ;;  %16845 = vst [vmem:[#allocation197_spill] sm:$0xff] %v13802_v6  ;;  %v13804_v20 = vor.u32 %v12088_v35, %v9761_v63  ;;  %2580 = vmatpush.bf16.msra.mxu2 %v13802_v6  ;;  %v13814_v35 = vor.u32 %v12061_v60, %v9653_v2  ;;  %v9663_v63 = vld [vmem:[#allocation2 + $0x6a8] sm:$0xf]  ;;  %v12089_v26 = vld [vmem:[#allocation2 + $0x770] sm:$0xf0] }
 0x122   :  { %2040 = vmatmul.bf16.gmra.mxu2 %v13781_v28  ;;  %2063 = vmatmul.bf16.gmra.mxu3 %v13784_v39  ;;  %v9759_v40 = vld [vmem:[#allocation2 + $0x768] sm:$0xf] }
 0x123   :  { %16846 = vst [vmem:[#allocation198_spill] sm:$0xff] %v13804_v20  ;;  %2603 = vmatpush.bf16.msra.mxu3 %v13804_v20  ;;  %v13825_v20 = vpack.c.b16 %v1757_v1, %v1757_v1  ;;  %v12062_v1 = vld [vmem:[#allocation2 + $0x698] sm:$0xf0] }
 0x124   :  { %v720_v31 = vpop.f32.mrf.mxu0  ;;  %16847 = vst [vmem:[#allocation199_spill] sm:$0xff] %v13814_v35 }
 0x125   :  { %v1047_v5 = vpop.f32.mrf.mxu2  ;;  %v1070_v36 = vpop.f32.mrf.mxu3  ;;  %v1758_v31 = vunpack.c.h.b16 %v9347_v13  ;;  %2581 = vmatpush.bf16.msra.mxu2 %v13814_v35  ;;  %v12086_v35 = vld [vmem:[#allocation2 + $0x758] sm:$0xf0] }
 0x126   :  { %v1048_v22 = vadd.f32 %v1047_v5, %v13622_v37  ;;  %v743_v18 = vpop.f32.mrf.mxu1  ;;  %v9749_v37 = vld [vmem:[#allocation2 + $0x75c] sm:$0xf0]  ;;  %v12065_v5 = vld [vmem:[#allocation2 + $0x6b0] sm:$0xf0] }
 0x127   :  { %v13816_v6 = vor.u32 %v12085_v41, %v9749_v37  ;;  %v13818_v18 = vor.u32 %v12065_v5, %v9663_v63  ;;  %v13829_v37 = vpack.c.b16 %v1758_v31, %v1758_v31  ;;  %v12058_v63 = vld [vmem:[#allocation2 + $0x67c] sm:$0xf]  ;;  %v9641_v5 = vld [vmem:[#allocation2 + $0x684] sm:$0xf0] }
 0x128   :  { %v13812_v55 = vadd.f32 %v1070_v36, %v1048_v22  ;;  %v13821_v22 = vor.u32 %v12089_v26, %v9759_v40  ;;  %v12082_v26 = vld [vmem:[#allocation2 + $0x73c] sm:$0xf] }
 0x129   :  { %16848 = vst [vmem:[#allocation200_spill] sm:$0xff] %v13816_v6  ;;  %2604 = vmatpush.bf16.msra.mxu3 %v13816_v6  ;;  %2534 = vmatpush.bf16.msra.mxu0 %v13818_v18  ;;  %v9651_v6 = vld [vmem:[#allocation2 + $0x690] sm:$0xf] }
 0x12a   :  { %16849 = vst [vmem:[#allocation201_spill] sm:$0xff] %v13818_v18  ;;  %2557 = vmatpush.bf16.msra.mxu1 %v13821_v22  ;;  %v13840_v31 = vor.u32 %v12062_v1, %v9651_v6  ;;  %v9723_v18 = vld [vmem:[#allocation2 + $0x720] sm:$0xf] }
 0x12b   :  { %16850 = vst [vmem:[#allocation202_spill] sm:$0xff] %v13821_v22 }
 0x12c   :  { %v1083_v2 = vpop.f32.mrf.mxu0  ;;  %16853 = vst [vmem:[#allocation205_spill] sm:$0xff] %v13840_v31 }
 0x12d   :  { %v1049_v36 = vpop.f32.mrf.mxu2  ;;  %v1072_v60 = vpop.f32.mrf.mxu3  ;;  %v1084_v13 = vadd.f32 %v1083_v2, %v13513_v24  ;;  %v9747_v2 = vld [vmem:[#allocation2 + $0x750] sm:$0xf]  ;;  %2535 = vmatpush.bf16.msra.mxu0 %v13840_v31  ;;  %v9735_v31 = vld [vmem:[#allocation2 + $0x738] sm:$0xf] }
 0x12e   :  { %v1106_v41 = vpop.f32.mrf.mxu1  ;;  %v13834_v36 = vor.u32 %v12058_v63, %v9641_v5  ;;  %v9737_v60 = vld [vmem:[#allocation2 + $0x744] sm:$0xf0]  ;;  %v12079_v63 = vld [vmem:[#allocation2 + $0x724] sm:$0xf]  ;;  %v9725_v5 = vld [vmem:[#allocation2 + $0x72c] sm:$0xf0] }
 0x12f   :  { %v13831_v40 = vadd.f32 %v1106_v41, %v1084_v13  ;;  %1630 = vmatmul.bf16.gmra.mxu0 %v13653_v53  ;;  %v13838_v24 = vor.u32 %v12082_v26, %v9737_v60  ;;  %v13844_v53 = vor.u32 %v12086_v35, %v9747_v2  ;;  %v12055_v13 = vld [vmem:[#allocation2 + $0x664] sm:$0xf]  ;;  %v9629_v41 = vld [vmem:[#allocation2 + $0x66c] sm:$0xf0]  ;;  %v13851_v26 = vor.u32 %v12079_v63, %v9725_v5 }
 0x130   :  { %16851 = vst [vmem:[#allocation203_spill] sm:$0xff] %v13834_v36  ;;  %2582 = vmatpush.bf16.msra.mxu2 %v13834_v36  ;;  %v12083_v5 = vld [vmem:[#allocation2 + $0x740] sm:$0xf0] }
 0x131   :  { %1653 = vmatmul.bf16.gmra.mxu1 %v13656_v4  ;;  %16852 = vst [vmem:[#allocation204_spill] sm:$0xff] %v13838_v24  ;;  %2605 = vmatpush.bf16.msra.mxu3 %v13838_v24  ;;  %v13848_v4 = vor.u32 %v12055_v13, %v9629_v41  ;;  %v9639_v13 = vld [vmem:[#allocation2 + $0x678] sm:$0xf]  ;;  %v12059_v41 = vld [vmem:[#allocation2 + $0x680] sm:$0xf0] }
 0x132   :  { %2045 = vmatmul.bf16.gmra.mxu2 %v13825_v20  ;;  %2068 = vmatmul.bf16.gmra.mxu3 %v13829_v37  ;;  %16854 = vst [vmem:[#allocation206_spill] sm:$0xff] %v13844_v53  ;;  %v13861_v63 = vor.u32 %v12059_v41, %v9639_v13 }
 0x133   :  { %16855 = vst [vmem:[#allocation207_spill] sm:$0xff] %v13848_v4  ;;  %2558 = vmatpush.bf16.msra.mxu1 %v13844_v53  ;;  %v13863_v53 = vor.u32 %v12083_v5, %v9735_v31 }
 0x134   :  { %16856 = vst [vmem:[#allocation208_spill] sm:$0xff] %v13851_v26  ;;  %v1085_v35 = vpop.f32.mrf.mxu0  ;;  %2583 = vmatpush.bf16.msra.mxu2 %v13848_v4  ;;  %v9713_v4 = vld [vmem:[#allocation2 + $0x714] sm:$0xf0]  ;;  %2536 = vmatpush.bf16.msra.mxu0 %v13861_v63 }
 0x135   :  { %v1129_v6 = vpop.f32.mrf.mxu2  ;;  %v1152_v1 = vpop.f32.mrf.mxu3  ;;  %v1086_v2 = vadd.f32 %v1085_v35, %v13552_v10  ;;  %2606 = vmatpush.bf16.msra.mxu3 %v13851_v26  ;;  %16857 = vst [vmem:[#allocation209_spill] sm:$0xff] %v13861_v63  ;;  %v12076_v35 = vld [vmem:[#allocation2 + $0x70c] sm:$0xf] }
 0x136   :  { %v1130_v60 = vadd.f32 %v1129_v6, %v13658_v61  ;;  %v1108_v36 = vpop.f32.mrf.mxu1  ;;  %v12052_v61 = vld [vmem:[#allocation2 + $0x64c] sm:$0xf]  ;;  %v9617_v6 = vld [vmem:[#allocation2 + $0x654] sm:$0xf0]  ;;  %16858 = vst [vmem:[#allocation210_spill] sm:$0xff] %v13863_v53 }
 0x137   :  { %v13859_v22 = vadd.f32 %v1108_v36, %v1086_v2  ;;  %v13865_v10 = vor.u32 %v12052_v61, %v9617_v6  ;;  %v12056_v26 = vld [vmem:[#allocation2 + $0x668] sm:$0xf0]  ;;  %2559 = vmatpush.bf16.msra.mxu1 %v13863_v53 }
 0x138   :  { %v13856_v24 = vadd.f32 %v1152_v1, %v1130_v60  ;;  %v9627_v60 = vld [vmem:[#allocation2 + $0x660] sm:$0xf]  ;;  %v13868_v1 = vor.u32 %v12076_v35, %v9713_v4  ;;  %v12080_v36 = vld [vmem:[#allocation2 + $0x728] sm:$0xf0] }
 0x139   :  { %16859 = vst [vmem:[#allocation211_spill] sm:$0xff] %v13865_v10  ;;  %2584 = vmatpush.bf16.msra.mxu2 %v13865_v10  ;;  %v13872_v2 = vor.u32 %v12056_v26, %v9627_v60  ;;  %v13874_v31 = vor.u32 %v12080_v36, %v9723_v18  ;;  %v9615_v18 = vld [vmem:[#allocation2 + $0x648] sm:$0xf]  ;;  %v12053_v60 = vld [vmem:[#allocation2 + $0x650] sm:$0xf0] }
 0x13a   :  { %16860 = vst [vmem:[#allocation212_spill] sm:$0xff] %v13868_v1  ;;  %2607 = vmatpush.bf16.msra.mxu3 %v13868_v1  ;;  %v9711_v36 = vld [vmem:[#allocation2 + $0x708] sm:$0xf] }
 0x13b   :  { %16861 = vst [vmem:[#allocation213_spill] sm:$0xff] %v13872_v2  ;;  %2537 = vmatpush.bf16.msra.mxu0 %v13872_v2  ;;  %2560 = vmatpush.bf16.msra.mxu1 %v13874_v31  ;;  %v9699_v2 = vld [vmem:[#allocation2 + $0x6f0] sm:$0xf] }
 0x13c   :  { %16862 = vst [vmem:[#allocation214_spill] sm:$0xff] %v13874_v31  ;;  %v1088_v61 = vpop.f32.mrf.mxu0  ;;  %v12050_v31 = vld [vmem:[#allocation2 + $0x638] sm:$0xf0] }
 0x13d   :  { %v1131_v13 = vpop.f32.mrf.mxu2  ;;  %v1154_v5 = vpop.f32.mrf.mxu3  ;;  %v1089_v4 = vadd.f32 %v1088_v61, %v13575_v47  ;;  %v9605_v47 = vld [vmem:[#allocation2 + $0x63c] sm:$0xf0]  ;;  %v13888_v61 = vor.u32 %v12053_v60, %v9615_v18 }
 0x13e   :  { %v1132_v41 = vadd.f32 %v1131_v13, %v13684_v48  ;;  %v1111_v6 = vpop.f32.mrf.mxu1  ;;  %v12049_v48 = vld [vmem:[#allocation2 + $0x634] sm:$0xf] }
 0x13f   :  { %v13883_v26 = vadd.f32 %v1111_v6, %v1089_v4  ;;  %2081 = vmatmul.bf16.vlgmr.msrb.gmra.mxu0 %v13716_v32  ;;  %v12073_v13 = vld [vmem:[#allocation2 + $0x6f4] sm:$0xf]  ;;  %16863 = vst [vmem:[#allocation215_spill] sm:$0xff] %v13888_v61 }
 0x140   :  { %v13880_v35 = vadd.f32 %v1154_v5, %v1132_v41  ;;  %v13891_v41 = vor.u32 %v12049_v48, %v9605_v47  ;;  %v9701_v5 = vld [vmem:[#allocation2 + $0x6fc] sm:$0xf0]  ;;  %v12077_v4 = vld [vmem:[#allocation2 + $0x710] sm:$0xf0]  ;;  %2538 = vmatpush.bf16.msra.mxu0 %v13888_v61  ;;  %v12074_v47 = vld [vmem:[#allocation2 + $0x6f8] sm:$0xf0] }
 0x141   :  { %2104 = vmatmul.bf16.vlgmr.msrb.gmra.mxu1 %v13718_v23  ;;  %v13893_v6 = vor.u32 %v12073_v13, %v9701_v5  ;;  %v13896_v1 = vor.u32 %v12077_v4, %v9711_v36  ;;  %v13905_v5 = vor.u32 %v12074_v47, %v9699_v2  ;;  %v12070_v61 = vld [vmem:[#allocation2 + $0x6dc] sm:$0xf] }
 0x142   :  { %2127 = vmatmul.bf16.vlgmr.msrb.gmra.mxu2 %v13716_v32  ;;  %2150 = vmatmul.bf16.vlgmr.msrb.gmra.mxu3 %v13718_v23  ;;  %16864 = vst [vmem:[#allocation216_spill] sm:$0xff] %v13891_v41  ;;  %v9603_v32 = vld [vmem:[#allocation2 + $0x630] sm:$0xf] }
 0x143   :  { %16865 = vst [vmem:[#allocation217_spill] sm:$0xff] %v13893_v6  ;;  %2585 = vmatpush.bf16.msra.mxu2 %v13891_v41  ;;  %2608 = vmatpush.bf16.msra.mxu3 %v13893_v6  ;;  %v13902_v48 = vor.u32 %v12050_v31, %v9603_v32  ;;  %v9591_v31 = vld [vmem:[#allocation2 + $0x618] sm:$0xf]  ;;  %v12047_v32 = vld [vmem:[#allocation2 + $0x620] sm:$0xf0] }
 0x144   :  { %16866 = vst [vmem:[#allocation218_spill] sm:$0xff] %v13896_v1  ;;  %v1090_v23 = vpop.f32.mrf.mxu0  ;;  %2561 = vmatpush.bf16.msra.mxu1 %v13896_v1  ;;  %v9689_v1 = vld [vmem:[#allocation2 + $0x6e4] sm:$0xf0]  ;;  %v13917_v2 = vor.u32 %v12047_v32, %v9591_v31  ;;  %v12044_v31 = vld [vmem:[#allocation2 + $0x608] sm:$0xf0] }
 0x145   :  { %v1134_v10 = vpop.f32.mrf.mxu2  ;;  %v1157_v60 = vpop.f32.mrf.mxu3  ;;  %16867 = vst [vmem:[#allocation219_spill] sm:$0xff] %v13902_v48  ;;  %v1091_v36 = vadd.f32 %v1090_v23, %v13617_v30  ;;  %2539 = vmatpush.bf16.msra.mxu0 %v13902_v48  ;;  %v13915_v30 = vor.u32 %v12070_v61, %v9689_v1  ;;  %v12043_v23 = vld [vmem:[#allocation2 + $0x604] sm:$0xf]  ;;  %v9579_v61 = vld [vmem:[#allocation2 + $0x600] sm:$0xf] }
 0x146   :  { %v1135_v18 = vadd.f32 %v1134_v10, %v13723_v43  ;;  %v1113_v13 = vpop.f32.mrf.mxu1  ;;  %16868 = vst [vmem:[#allocation220_spill] sm:$0xff] %v13905_v5  ;;  %v12046_v43 = vld [vmem:[#allocation2 + $0x61c] sm:$0xf]  ;;  %v9593_v10 = vld [vmem:[#allocation2 + $0x624] sm:$0xf0] }
 0x147   :  { %v13910_v41 = vadd.f32 %v1113_v13, %v1091_v36  ;;  %v13912_v6 = vor.u32 %v12046_v43, %v9593_v10  ;;  %16870 = vst [vmem:[#allocation222_spill] sm:$0xff] %v13915_v30  ;;  %v9581_v36 = vld [vmem:[#allocation2 + $0x60c] sm:$0xf0]  ;;  %v12067_v13 = vld [vmem:[#allocation2 + $0x6c4] sm:$0xf]  ;;  %2609 = vmatpush.bf16.msra.mxu3 %v13915_v30  ;;  %v13931_v30 = vor.u32 %v12044_v31, %v9579_v61 }
 0x148   :  { %v13907_v4 = vadd.f32 %v1157_v60, %v1135_v18  ;;  %2562 = vmatpush.bf16.msra.mxu1 %v13905_v5  ;;  %16871 = vst [vmem:[#allocation223_spill] sm:$0xff] %v13917_v2  ;;  %v9687_v18 = vld [vmem:[#allocation2 + $0x6d8] sm:$0xf]  ;;  %v12071_v60 = vld [vmem:[#allocation2 + $0x6e0] sm:$0xf0]  ;;  %v13924_v5 = vor.u32 %v12043_v23, %v9581_v36 }
 0x149   :  { %16869 = vst [vmem:[#allocation221_spill] sm:$0xff] %v13912_v6  ;;  %2586 = vmatpush.bf16.msra.mxu2 %v13912_v6  ;;  %v13920_v47 = vor.u32 %v12071_v60, %v9687_v18  ;;  %v9677_v43 = vld [vmem:[#allocation2 + $0x6cc] sm:$0xf0]  ;;  %2540 = vmatpush.bf16.msra.mxu0 %v13917_v2  ;;  %v9675_v32 = vld [vmem:[#allocation2 + $0x6c0] sm:$0xf] }
 0x14a   :  { %16873 = vst [vmem:[#allocation225_spill] sm:$0xff] %v13924_v5  ;;  %v13926_v1 = vor.u32 %v12067_v13, %v9677_v43  ;;  %v12068_v60 = vld [vmem:[#allocation2 + $0x6c8] sm:$0xf0]  ;;  %v9864_v31 = vld [vmem:[#allocation2 + $0x810] sm:$0xf] }
 0x14b   :  { %16872 = vst [vmem:[#allocation224_spill] sm:$0xff] %v13920_v47  ;;  %v13936_v23 = vor.u32 %v12068_v60, %v9675_v32  ;;  %v12114_v32 = vld [vmem:[#allocation2 + $0x818] sm:$0xf0] }
 0x14c   :  { %16874 = vst [vmem:[#allocation226_spill] sm:$0xff] %v13926_v1  ;;  %v1093_v18 = vpop.f32.mrf.mxu0  ;;  %2563 = vmatpush.bf16.msra.mxu1 %v13920_v47  ;;  %2610 = vmatpush.bf16.msra.mxu3 %v13926_v1  ;;  %v13956_v60 = vor.u32 %v12114_v32, %v9864_v31  ;;  %v9731_v1 = vld [vmem:[#allocation2 + $0x728] sm:$0xf] }
 0x14d   :  { %v1136_v10 = vpop.f32.mrf.mxu2  ;;  %v1159_v6 = vpop.f32.mrf.mxu3  ;;  %v1094_v53 = vadd.f32 %v1093_v18, %v13639_v15  ;;  %16875 = vst [vmem:[#allocation227_spill] sm:$0xff] %v13931_v30  ;;  %2587 = vmatpush.bf16.msra.mxu2 %v13924_v5  ;;  %2541 = vmatpush.bf16.msra.mxu0 %v13931_v30  ;;  %v9876_v15 = vld [vmem:[#allocation2 + $0x828] sm:$0xf]  ;;  %v9960_v18 = vld [vmem:[#allocation2 + $0x8d0] sm:$0xf] }
 0x14e   :  { %v1137_v48 = vadd.f32 %v1136_v10, %v13749_v27  ;;  %v1116_v63 = vpop.f32.mrf.mxu1  ;;  %16876 = vst [vmem:[#allocation228_spill] sm:$0xff] %v13936_v23  ;;  %v12117_v27 = vld [vmem:[#allocation2 + $0x830] sm:$0xf0] }
 0x14f   :  { %v13938_v36 = vadd.f32 %v1116_v63, %v1094_v53  ;;  %2086 = vmatmul.bf16.gmra.mxu0 %v13781_v28  ;;  %v12141_v53 = vld [vmem:[#allocation2 + $0x8f0] sm:$0xf0]  ;;  %16879 = vst [vmem:[#allocation231_spill] sm:$0xff] %v13956_v60 }
 0x150   :  { %v13933_v2 = vadd.f32 %v1159_v6, %v1137_v48  ;;  %v9972_v6 = vld [vmem:[#allocation2 + $0x8e8] sm:$0xf]  ;;  %2564 = vmatpush.bf16.msra.mxu1 %v13936_v23  ;;  %v13947_v48 = vor.u32 %v12117_v27, %v9876_v15  ;;  %v12138_v15 = vld [vmem:[#allocation2 + $0x8d8] sm:$0xf0]  ;;  %v9671_v27 = vld [vmem:[#allocation2 + $0x6b0] sm:$0xf] }
 0x151   :  { %2109 = vmatmul.bf16.gmra.mxu1 %v13784_v39  ;;  %v13949_v13 = vor.u32 %v12141_v53, %v9972_v6  ;;  %v12066_v6 = vld [vmem:[#allocation2 + $0x6b8] sm:$0xf0]  ;;  %v13958_v53 = vor.u32 %v12138_v15, %v9960_v18  ;;  %v9852_v18 = vld [vmem:[#allocation2 + $0x7f8] sm:$0xf]  ;;  %v12111_v15 = vld [vmem:[#allocation2 + $0x800] sm:$0xf0] }
 0x152   :  { %2132 = vmatmul.bf16.gmra.mxu2 %v13781_v28  ;;  %2155 = vmatmul.bf16.gmra.mxu3 %v13784_v39  ;;  %16877 = vst [vmem:[#allocation229_spill] sm:$0xff] %v13947_v48  ;;  %v9635_v23 = vld [vmem:[#allocation2 + $0x668] sm:$0xf]  ;;  %v12057_v30 = vld [vmem:[#allocation2 + $0x670] sm:$0xf0] }
 0x153   :  { %16878 = vst [vmem:[#allocation230_spill] sm:$0xff] %v13949_v13  ;;  %3041 = vmatpush.bf16.msrb.mxu2 %v13947_v48  ;;  %3064 = vmatpush.bf16.msrb.mxu3 %v13949_v13  ;;  %v12129_v13 = vld [vmem:[#allocation2 + $0x890] sm:$0xf0] }
 0x154   :  { %v1095_v61 = vpop.f32.mrf.mxu0  ;;  %16880 = vst [vmem:[#allocation232_spill] sm:$0xff] %v13958_v53 }
 0x155   :  { %v1139_v63 = vpop.f32.mrf.mxu2  ;;  %v1162_v10 = vpop.f32.mrf.mxu3  ;;  %v12090_v61 = vld [vmem:[#allocation2 + $0x778] sm:$0xf0] }
 0x156   :  { %v1140_v43 = vadd.f32 %v1139_v63, %v13791_v42  ;;  %v1118_v28 = vpop.f32.mrf.mxu1  ;;  %v13960_v42 = vor.u32 %v12066_v6, %v9671_v27  ;;  %v9767_v63 = vld [vmem:[#allocation2 + $0x770] sm:$0xf]  ;;  %v9948_v27 = vld [vmem:[#allocation2 + $0x8b8] sm:$0xf]  ;;  %v13974_v6 = vor.u32 %v12111_v15, %v9852_v18 }
 0x157   :  { %3042 = vmatpush.bf16.msrb.mxu2 %v13956_v60  ;;  %v13963_v28 = vor.u32 %v12090_v61, %v9767_v63  ;;  %3065 = vmatpush.bf16.msrb.mxu3 %v13958_v53  ;;  %v12135_v63 = vld [vmem:[#allocation2 + $0x8c0] sm:$0xf0]  ;;  %v9659_v61 = vld [vmem:[#allocation2 + $0x698] sm:$0xf] }
 0x158   :  { %v13954_v39 = vadd.f32 %v1162_v10, %v1140_v43  ;;  %16881 = vst [vmem:[#allocation233_spill] sm:$0xff] %v13960_v42  ;;  %2626 = vmatpush.bf16.msrb.mxu0 %v13960_v42  ;;  %v9755_v53 = vld [vmem:[#allocation2 + $0x758] sm:$0xf]  ;;  %v12087_v60 = vld [vmem:[#allocation2 + $0x760] sm:$0xf0] }
 0x159   :  { %16882 = vst [vmem:[#allocation234_spill] sm:$0xff] %v13963_v28  ;;  %2649 = vmatpush.bf16.msrb.mxu1 %v13963_v28  ;;  %v12108_v28 = vld [vmem:[#allocation2 + $0x7e8] sm:$0xf0]  ;;  %v9924_v42 = vld [vmem:[#allocation2 + $0x888] sm:$0xf] }
 0x15a   :  { %16883 = vst [vmem:[#allocation235_spill] sm:$0xff] %v13974_v6 }
 0x15b   :  { %3043 = vmatpush.bf16.msrb.mxu2 %v13974_v6  ;;  %v9563_v6 = vld [vmem:[%s16263_s0 + $0xc0] sm:$0xf] }
 0x15c   :  { %v1529_v10 = vpop.f32.mrf.mxu0 }
 0x15d   :  { %v1141_v48 = vpop.f32.mrf.mxu2  ;;  %v1164_v43 = vpop.f32.mrf.mxu3 }
 0x15e   :  { %v1552_v31 = vpop.f32.mrf.mxu1  ;;  %v12063_v43 = vld [vmem:[#allocation2 + $0x6a0] sm:$0xf0] }
 0x15f   :  { %v1553_v32 = vadd.f32 %v1552_v31, %v1529_v10  ;;  %2091 = vmatmul.bf16.gmra.mxu0 %v13825_v20  ;;  %v13977_v10 = vor.u32 %v12135_v63, %v9948_v27  ;;  %v13979_v31 = vor.u32 %v12063_v43, %v9659_v61 }
 0x161   :  { %v13970_v48 = vadd.f32 %v1553_v32, %v13682_v0  ;;  %2114 = vmatmul.bf16.gmra.mxu1 %v13829_v37  ;;  %16884 = vst [vmem:[#allocation236_spill] sm:$0xff] %v13977_v10  ;;  %v13982_v0 = vor.u32 %v12087_v60, %v9755_v53  ;;  %v9840_v32 = vld [vmem:[#allocation2 + $0x7e0] sm:$0xf]  ;;  %3066 = vmatpush.bf16.msrb.mxu3 %v13977_v10  ;;  %v12040_v10 = vld [vmem:[%s16263_s0 + $0xc4] sm:$0xf0] }
 0x162   :  { %2137 = vmatmul.bf16.gmra.mxu2 %v13825_v20  ;;  %2160 = vmatmul.bf16.gmra.mxu3 %v13829_v37  ;;  %16885 = vst [vmem:[#allocation237_spill] sm:$0xff] %v13979_v31  ;;  %v9936_v20 = vld [vmem:[#allocation2 + $0x8a0] sm:$0xf]  ;;  %v13986_v15 = vor.u32 %v12108_v28, %v9840_v32  ;;  %v12132_v37 = vld [vmem:[#allocation2 + $0x8a8] sm:$0xf0] }
 0x163   :  { %16886 = vst [vmem:[#allocation238_spill] sm:$0xff] %v13982_v0  ;;  %2627 = vmatpush.bf16.msrb.mxu0 %v13979_v31  ;;  %2650 = vmatpush.bf16.msrb.mxu1 %v13982_v0  ;;  %v13989_v61 = vor.u32 %v12132_v37, %v9936_v20  ;;  %v12039_v32 = vld [vmem:[%s16263_s0 + $0xc4] sm:$0xf]  ;;  %v9565_v20 = vld [vmem:[%s16263_s0 + $0xc8] sm:$0xf0] }
 0x164   :  { %16887 = vst [vmem:[#allocation239_spill] sm:$0xff] %v13986_v15  ;;  %v1531_v63 = vpop.f32.mrf.mxu0  ;;  %3044 = vmatpush.bf16.msrb.mxu2 %v13986_v15  ;;  %v12060_v37 = vld [vmem:[#allocation2 + $0x688] sm:$0xf0]  ;;  %v12105_v15 = vld [vmem:[#allocation2 + $0x7d0] sm:$0xf0] }
 0x165   :  { %v1575_v18 = vpop.f32.mrf.mxu2  ;;  %v1598_v27 = vpop.f32.mrf.mxu3  ;;  %16888 = vst [vmem:[#allocation240_spill] sm:$0xff] %v13989_v61  ;;  %3067 = vmatpush.bf16.msrb.mxu3 %v13989_v61  ;;  %v14018_v61 = vor.u32 %v12129_v13, %v9924_v42 }
 0x166   :  { %v1599_v43 = vadd.f32 %v1598_v27, %v1575_v18  ;;  %v1554_v60 = vpop.f32.mrf.mxu1  ;;  %v9647_v18 = vld [vmem:[#allocation2 + $0x680] sm:$0xf] }
 0x167   :  { %v1555_v53 = vadd.f32 %v1554_v60, %v1531_v63  ;;  %v9743_v27 = vld [vmem:[#allocation2 + $0x740] sm:$0xf]  ;;  %v14011_v60 = vor.u32 %v12060_v37, %v9647_v18  ;;  %16892 = vst [vmem:[#allocation244_spill] sm:$0xff] %v14018_v61  ;;  %v14020_v18 = vor.u32 %v12040_v10, %v9563_v6  ;;  %v14024_v37 = vor.u32 %v12057_v30, %v9635_v23  ;;  %v9623_v30 = vld [vmem:[#allocation2 + $0x650] sm:$0xf] }
 0x168   :  { %v13999_v28 = vadd.f32 %v1599_v43, %v13831_v40  ;;  %v12084_v40 = vld [vmem:[#allocation2 + $0x748] sm:$0xf0]  ;;  %v9828_v43 = vld [vmem:[#allocation2 + $0x7c8] sm:$0xf]  ;;  %v9719_v23 = vld [vmem:[#allocation2 + $0x710] sm:$0xf] }
 0x169   :  { %v14009_v63 = vadd.f32 %v1555_v53, %v13721_v59  ;;  %16889 = vst [vmem:[#allocation241_spill] sm:$0xff] %v14011_v60  ;;  %v14013_v0 = vor.u32 %v12084_v40, %v9743_v27  ;;  %v14015_v31 = vor.u32 %v12105_v15, %v9828_v43  ;;  %2628 = vmatpush.bf16.msrb.mxu0 %v14011_v60  ;;  %v12081_v59 = vld [vmem:[#allocation2 + $0x730] sm:$0xf0] }
 0x16a   :  { %16893 = vst [vmem:[#allocation245_spill] sm:$0xff] %v14020_v18  ;;  %v14026_v15 = vor.u32 %v12081_v59, %v9731_v1  ;;  %v14028_v43 = vor.u32 %v12039_v32, %v9565_v20  ;;  %3068 = vmatpush.bf16.msrb.mxu3 %v14018_v61  ;;  %v12054_v1 = vld [vmem:[#allocation2 + $0x658] sm:$0xf0]  ;;  %v9816_v32 = vld [vmem:[#allocation2 + $0x7b0] sm:$0xf] }
 0x16b   :  { %16890 = vst [vmem:[#allocation242_spill] sm:$0xff] %v14013_v0  ;;  %2651 = vmatpush.bf16.msrb.mxu1 %v14013_v0  ;;  %3045 = vmatpush.bf16.msrb.mxu2 %v14015_v31  ;;  %v12102_v20 = vld [vmem:[#allocation2 + $0x7b8] sm:$0xf0]  ;;  %v9912_v59 = vld [vmem:[#allocation2 + $0x870] sm:$0xf] }
 0x16c   :  { %16891 = vst [vmem:[#allocation243_spill] sm:$0xff] %v14015_v31  ;;  %v1534_v40 = vpop.f32.mrf.mxu0  ;;  %v12051_v61 = vld [vmem:[#allocation2 + $0x640] sm:$0xf0]  ;;  %v9707_v31 = vld [vmem:[#allocation2 + $0x6f8] sm:$0xf] }
 0x16d   :  { %v1577_v53 = vpop.f32.mrf.mxu2  ;;  %16894 = vst [vmem:[#allocation246_spill] sm:$0xff] %v14024_v37  ;;  %v1600_v27 = vpop.f32.mrf.mxu3  ;;  %2629 = vmatpush.bf16.msrb.mxu0 %v14024_v37  ;;  %v12072_v37 = vld [vmem:[#allocation2 + $0x6e8] sm:$0xf0]  ;;  %v9792_v0 = vld [vmem:[#allocation2 + $0x780] sm:$0xf] }
 0x16e   :  { %16895 = vst [vmem:[#allocation247_spill] sm:$0xff] %v14026_v15  ;;  %v1601_v13 = vadd.f32 %v1600_v27, %v1577_v53  ;;  %v1557_v42 = vpop.f32.mrf.mxu1  ;;  %v14042_v53 = vor.u32 %v12054_v1, %v9623_v30  ;;  %v12126_v27 = vld [vmem:[#allocation2 + $0x878] sm:$0xf0] }
 0x16f   :  { %16896 = vst [vmem:[#allocation248_spill] sm:$0xff] %v14028_v43  ;;  %v1558_v60 = vadd.f32 %v1557_v42, %v1534_v40  ;;  %2542 = vmatmul.bf16.vlgmr.msra.gmra.mxu0 %v14020_v18  ;;  %2652 = vmatpush.bf16.msrb.mxu1 %v14026_v15  ;;  %v12078_v40 = vld [vmem:[#allocation2 + $0x718] sm:$0xf0]  ;;  %v9611_v42 = vld [vmem:[#allocation2 + $0x638] sm:$0xf] }
 0x170   :  { %v14033_v6 = vadd.f32 %v1601_v13, %v13859_v22  ;;  %16897 = vst [vmem:[#allocation249_spill] sm:$0xff] %v14042_v53  ;;  %v14045_v22 = vor.u32 %v12102_v20, %v9816_v32  ;;  %v14047_v13 = vor.u32 %v12126_v27, %v9912_v59  ;;  %v14055_v32 = vor.u32 %v12051_v61, %v9611_v42  ;;  %v12075_v20 = vld [vmem:[#allocation2 + $0x700] sm:$0xf0]  ;;  %v12041_v61 = vld [vmem:[%s16263_s0 + $0xd4] sm:$0xf] }
 0x171   :  { %v14038_v10 = vadd.f32 %v1558_v60, %v13747_v11  ;;  %2565 = vmatmul.bf16.vlgmr.msra.gmra.mxu1 %v14028_v43  ;;  %2630 = vmatpush.bf16.msrb.mxu0 %v14042_v53  ;;  %v14050_v11 = vor.u32 %v12078_v40, %v9719_v23  ;;  %v14057_v53 = vor.u32 %v12075_v20, %v9707_v31  ;;  %v9571_v40 = vld [vmem:[%s16263_s0 + $0xd0] sm:$0xf]  ;;  %v9573_v31 = vld [vmem:[%s16263_s0 + $0xd8] sm:$0xf0]  ;;  %v12099_v42 = vld [vmem:[#allocation2 + $0x7a0] sm:$0xf0] }
 0x172   :  { %2588 = vmatmul.bf16.vlgmr.msra.gmra.mxu2 %v14020_v18  ;;  %2611 = vmatmul.bf16.vlgmr.msra.gmra.mxu3 %v14028_v43  ;;  %16898 = vst [vmem:[#allocation250_spill] sm:$0xff] %v14045_v22  ;;  %v9695_v15 = vld [vmem:[#allocation2 + $0x6e0] sm:$0xf] }
 0x173   :  { %16899 = vst [vmem:[#allocation251_spill] sm:$0xff] %v14047_v13  ;;  %3046 = vmatpush.bf16.msrb.mxu2 %v14045_v22  ;;  %3069 = vmatpush.bf16.msrb.mxu3 %v14047_v13  ;;  %v12042_v22 = vld [vmem:[%s16263_s0 + $0xd4] sm:$0xf0]  ;;  %v14086_v5 = vor.u32 %v12072_v37, %v9695_v15  ;;  %v14096_v15 = vor.u32 %v12041_v61, %v9573_v31  ;;  %v9980_v31 = vld [vmem:[#allocation2 + $0x8f0] sm:$0xf] }
 0x174   :  { %16900 = vst [vmem:[#allocation252_spill] sm:$0xff] %v14050_v11  ;;  %v1536_v1 = vpop.f32.mrf.mxu0  ;;  %2653 = vmatpush.bf16.msrb.mxu1 %v14050_v11  ;;  %v14088_v47 = vor.u32 %v12042_v22, %v9571_v40 }
 0x175   :  { %v1580_v60 = vpop.f32.mrf.mxu2  ;;  %v1603_v30 = vpop.f32.mrf.mxu3  ;;  %16901 = vst [vmem:[#allocation253_spill] sm:$0xff] %v14055_v32  ;;  %2631 = vmatpush.bf16.msrb.mxu0 %v14055_v32 }
 0x176   :  { %v1604_v59 = vadd.f32 %v1603_v30, %v1580_v60  ;;  %v1559_v27 = vpop.f32.mrf.mxu1  ;;  %16902 = vst [vmem:[#allocation254_spill] sm:$0xff] %v14057_v53  ;;  %v9804_v60 = vld [vmem:[#allocation2 + $0x798] sm:$0xf] }
 0x177   :  { %v1560_v23 = vadd.f32 %v1559_v27, %v1536_v1  ;;  %v9900_v30 = vld [vmem:[#allocation2 + $0x858] sm:$0xf]  ;;  %v14078_v20 = vor.u32 %v12099_v42, %v9804_v60  ;;  %v12123_v27 = vld [vmem:[#allocation2 + $0x860] sm:$0xf0]  ;;  %16906 = vst [vmem:[#allocation258_spill] sm:$0xff] %v14086_v5 }
 0x178   :  { %v14067_v13 = vadd.f32 %v1604_v59, %v13883_v26  ;;  %2654 = vmatpush.bf16.msrb.mxu1 %v14057_v53  ;;  %v9599_v26 = vld [vmem:[#allocation2 + $0x620] sm:$0xf]  ;;  %v12048_v59 = vld [vmem:[#allocation2 + $0x628] sm:$0xf0]  ;;  %v14081_v32 = vor.u32 %v12123_v27, %v9900_v30  ;;  %16907 = vst [vmem:[#allocation259_spill] sm:$0xff] %v14088_v47 }
 0x179   :  { %v14076_v1 = vadd.f32 %v1560_v23, %v13789_v51  ;;  %16903 = vst [vmem:[#allocation255_spill] sm:$0xff] %v14078_v20  ;;  %v14083_v11 = vor.u32 %v12048_v59, %v9599_v26  ;;  %3047 = vmatpush.bf16.msrb.mxu2 %v14078_v20  ;;  %v12096_v51 = vld [vmem:[#allocation2 + $0x788] sm:$0xf0]  ;;  %v9888_v23 = vld [vmem:[#allocation2 + $0x840] sm:$0xf] }
 0x17a   :  { %16904 = vst [vmem:[#allocation256_spill] sm:$0xff] %v14081_v32  ;;  %v12120_v60 = vld [vmem:[#allocation2 + $0x848] sm:$0xf0]  ;;  %3070 = vmatpush.bf16.msrb.mxu3 %v14081_v32  ;;  %v14092_v30 = vor.u32 %v12096_v51, %v9792_v0  ;;  %v9587_v26 = vld [vmem:[#allocation2 + $0x608] sm:$0xf] }
 0x17b   :  { %16905 = vst [vmem:[#allocation257_spill] sm:$0xff] %v14083_v11  ;;  %2632 = vmatpush.bf16.msrb.mxu0 %v14083_v11  ;;  %v14094_v27 = vor.u32 %v12120_v60, %v9888_v23  ;;  %v12045_v59 = vld [vmem:[#allocation2 + $0x610] sm:$0xf0]  ;;  %v9683_v53 = vld [vmem:[#allocation2 + $0x6c8] sm:$0xf] }
 0x17c   :  { %16908 = vst [vmem:[#allocation260_spill] sm:$0xff] %v14092_v30  ;;  %v1539_v37 = vpop.f32.mrf.mxu0  ;;  %2655 = vmatpush.bf16.msrb.mxu1 %v14086_v5  ;;  %v14099_v54 = vor.u32 %v12045_v59, %v9587_v26  ;;  %v14102_v0 = vor.u32 %v12069_v52, %v9683_v53  ;;  %v9884_v52 = vld [vmem:[#allocation2 + $0x830] sm:$0xf]  ;;  %v12118_v53 = vld [vmem:[#allocation2 + $0x838] sm:$0xf0] }
 0x17d   :  { %v1582_v42 = vpop.f32.mrf.mxu2  ;;  %16909 = vst [vmem:[#allocation261_spill] sm:$0xff] %v14094_v27  ;;  %v1605_v20 = vpop.f32.mrf.mxu3  ;;  %3048 = vmatpush.bf16.msrb.mxu2 %v14092_v30  ;;  %v9842_v5 = vld [vmem:[#allocation2 + $0x7ec] sm:$0xf0]  ;;  %v12131_v11 = vld [vmem:[#allocation2 + $0x8a4] sm:$0xf] }
 0x17e   :  { %16910 = vst [vmem:[#allocation262_spill] sm:$0xff] %v14096_v15  ;;  %v1606_v22 = vadd.f32 %v1605_v20, %v1582_v42  ;;  %v1562_v40 = vpop.f32.mrf.mxu1  ;;  %3071 = vmatpush.bf16.msrb.mxu3 %v14094_v27  ;;  %v12142_v20 = vld [vmem:[#allocation2 + $0x8f8] sm:$0xf0]  ;;  %v9560_v42 = vld [vmem:[%s16263_s0 + $0xe0] sm:$0xff] }
 0x17f   :  { %16911 = vst [vmem:[#allocation263_spill] sm:$0xff] %v14099_v54  ;;  %v1563_v32 = vadd.f32 %v1562_v40, %v1539_v37  ;;  %2547 = vmatmul.bf16.gmra.mxu0 %v14088_v47  ;;  %v14119_v60 = vor.u32 %v12142_v20, %v9980_v31  ;;  %v2265_v40 = vunpack.c.h.b16 %v9560_v42  ;;  %v9968_v31 = vld [vmem:[#allocation2 + $0x8d8] sm:$0xf] }
 0x180   :  { %16912 = vst [vmem:[#allocation264_spill] sm:$0xff] %v14102_v0  ;;  %v14105_v51 = vadd.f32 %v1606_v22, %v13910_v41  ;;  %2633 = vmatpush.bf16.msrb.mxu0 %v14099_v54  ;;  %2656 = vmatpush.bf16.msrb.mxu1 %v14102_v0  ;;  %v14117_v41 = vor.u32 %v12118_v53, %v9884_v52  ;;  %v2264_v22 = vunpack.c.l.b16 %v9560_v42  ;;  %v9872_v52 = vld [vmem:[#allocation2 + $0x818] sm:$0xf]  ;;  %v12115_v53 = vld [vmem:[#allocation2 + $0x820] sm:$0xf0] }
 0x181   :  { %v14110_v61 = vadd.f32 %v1563_v32, %v13812_v55  ;;  %2570 = vmatmul.bf16.gmra.mxu1 %v14096_v15  ;;  %16914 = vst [vmem:[#allocation266_spill] sm:$0xff] %v14119_v60  ;;  %v14129_v20 = vor.u32 %v12115_v53, %v9872_v52  ;;  %v12116_v0 = vld [vmem:[#allocation2 + $0x82c] sm:$0xf]  ;;  %v9878_v54 = vld [vmem:[#allocation2 + $0x834] sm:$0xf0]  ;;  %v14140_v52 = vpack.c.b16 %v2265_v40, %v2265_v40 }
 0x182   :  { %2593 = vmatmul.bf16.gmra.mxu2 %v14088_v47  ;;  %2616 = vmatmul.bf16.gmra.mxu3 %v14096_v15  ;;  %16913 = vst [vmem:[#allocation265_spill] sm:$0xff] %v14117_v41 }
 0x183   :  { %3133 = vmatpush.bf16.msra.mxu2 %v14117_v41  ;;  %3156 = vmatpush.bf16.msra.mxu3 %v14119_v60  ;;  %16915 = vst [vmem:[#allocation267_spill] sm:$0xff] %v14129_v20  ;;  %v14133_v41 = vor.u32 %v12116_v0, %v9878_v54  ;;  %v14135_v60 = vpack.c.b16 %v2264_v22, %v2264_v22  ;;  %v9860_v0 = vld [vmem:[#allocation2 + $0x800] sm:$0xf]  ;;  %v12112_v22 = vld [vmem:[#allocation2 + $0x808] sm:$0xf0] }
 0x184   :  { %v1541_v32 = vpop.f32.mrf.mxu0  ;;  %16920 = vst [vmem:[#allocation272_spill] sm:$0xff] %v14140_v52  ;;  %v14151_v40 = vor.u32 %v12112_v22, %v9860_v0 }
 0x185   :  { %v1585_v23 = vpop.f32.mrf.mxu2  ;;  %v1608_v55 = vpop.f32.mrf.mxu3  ;;  %v12139_v32 = vld [vmem:[#allocation2 + $0x8e0] sm:$0xf0]  ;;  %16917 = vst [vmem:[#allocation269_spill] sm:$0xff] %v14133_v41  ;;  %3087 = vmatpush.bf16.msra.mxu0 %v14133_v41 }
 0x186   :  { %v1609_v26 = vadd.f32 %v1608_v55, %v1585_v23  ;;  %v1564_v59 = vpop.f32.mrf.mxu1  ;;  %v14131_v27 = vor.u32 %v12139_v32, %v9968_v31  ;;  %v12140_v23 = vld [vmem:[#allocation2 + $0x8ec] sm:$0xf]  ;;  %v9974_v55 = vld [vmem:[#allocation2 + $0x8f4] sm:$0xf0]  ;;  %16918 = vst [vmem:[#allocation270_spill] sm:$0xff] %v14135_v60 }
 0x187   :  { %3134 = vmatpush.bf16.msra.mxu2 %v14129_v20  ;;  %v9956_v31 = vld [vmem:[#allocation2 + $0x8c0] sm:$0xf]  ;;  %16921 = vst [vmem:[#allocation273_spill] sm:$0xff] %v14151_v40  ;;  %v12109_v20 = vld [vmem:[#allocation2 + $0x7f0] sm:$0xf0] }
 0x188   :  { %v14127_v37 = vadd.f32 %v1609_v26, %v13938_v36  ;;  %16916 = vst [vmem:[#allocation268_spill] sm:$0xff] %v14131_v27  ;;  %v14138_v36 = vor.u32 %v12140_v23, %v9974_v55  ;;  %3157 = vmatpush.bf16.msra.mxu3 %v14131_v27  ;;  %v12136_v23 = vld [vmem:[#allocation2 + $0x8c8] sm:$0xf0]  ;;  %v12113_v55 = vld [vmem:[#allocation2 + $0x814] sm:$0xf] }
 0x189   :  { %v9962_v27 = vld [vmem:[#allocation2 + $0x8dc] sm:$0xf0] }
 0x18a   :  { %16919 = vst [vmem:[#allocation271_spill] sm:$0xff] %v14138_v36  ;;  %3110 = vmatpush.bf16.msra.mxu1 %v14138_v36  ;;  %v9944_v36 = vld [vmem:[#allocation2 + $0x8a8] sm:$0xf] }
 0x18b   :  { %3135 = vmatpush.bf16.msra.mxu2 %v14151_v40 }
 0x18c   :  { %v1621_v26 = vpop.f32.mrf.mxu0 }
 0x18d   :  { %v1587_v59 = vpop.f32.mrf.mxu2  ;;  %v1610_v42 = vpop.f32.mrf.mxu3 }
 0x18e   :  { %v1644_v53 = vpop.f32.mrf.mxu1  ;;  %v9866_v59 = vld [vmem:[#allocation2 + $0x81c] sm:$0xf0]  ;;  %v14154_v42 = vor.u32 %v12136_v23, %v9956_v31  ;;  %v12133_v31 = vld [vmem:[#allocation2 + $0x8b0] sm:$0xf0] }
 0x18f   :  { %v1645_v54 = vadd.f32 %v1644_v53, %v1621_v26  ;;  %2552 = vmatmul.bf16.gmra.mxu0 %v14135_v60  ;;  %v14156_v26 = vor.u32 %v12113_v55, %v9866_v59  ;;  %v12137_v53 = vld [vmem:[#allocation2 + $0x8d4] sm:$0xf]  ;;  %v14166_v59 = vor.u32 %v12133_v31, %v9944_v36  ;;  %v12110_v36 = vld [vmem:[#allocation2 + $0x7fc] sm:$0xf]  ;;  %v9854_v31 = vld [vmem:[#allocation2 + $0x804] sm:$0xf0] }
 0x190   :  { %16922 = vst [vmem:[#allocation274_spill] sm:$0xff] %v14154_v42  ;;  %3158 = vmatpush.bf16.msra.mxu3 %v14154_v42  ;;  %v12106_v42 = vld [vmem:[#allocation2 + $0x7d8] sm:$0xf0] }
 0x191   :  { %v14147_v32 = vadd.f32 %v1645_v54, %v13856_v24  ;;  %2575 = vmatmul.bf16.gmra.mxu1 %v14140_v52  ;;  %16923 = vst [vmem:[#allocation275_spill] sm:$0xff] %v14156_v26  ;;  %v14159_v24 = vor.u32 %v12137_v53, %v9962_v27  ;;  %v9848_v54 = vld [vmem:[#allocation2 + $0x7e8] sm:$0xf]  ;;  %3088 = vmatpush.bf16.msra.mxu0 %v14156_v26  ;;  %v9932_v26 = vld [vmem:[#allocation2 + $0x890] sm:$0xf] }
 0x192   :  { %2598 = vmatmul.bf16.gmra.mxu2 %v14135_v60  ;;  %2621 = vmatmul.bf16.gmra.mxu3 %v14140_v52  ;;  %v14163_v22 = vor.u32 %v12109_v20, %v9848_v54  ;;  %16926 = vst [vmem:[#allocation278_spill] sm:$0xff] %v14166_v59  ;;  %v9776_v20 = vld [vmem:[%s16263_s0 + $0xf0] sm:$0xf]  ;;  %v12092_v54 = vld [vmem:[%s16263_s0 + $0xf4] sm:$0xf0] }
 0x193   :  { %16924 = vst [vmem:[#allocation276_spill] sm:$0xff] %v14159_v24  ;;  %3111 = vmatpush.bf16.msra.mxu1 %v14159_v24 }
 0x194   :  { %16925 = vst [vmem:[#allocation277_spill] sm:$0xff] %v14163_v22  ;;  %v1623_v55 = vpop.f32.mrf.mxu0  ;;  %3136 = vmatpush.bf16.msra.mxu2 %v14163_v22  ;;  %3159 = vmatpush.bf16.msra.mxu3 %v14166_v59  ;;  %v9836_v22 = vld [vmem:[#allocation2 + $0x7d0] sm:$0xf] }
 0x195   :  { %v2036_v0 = vpop.f32.mrf.mxu2  ;;  %v2059_v23 = vpop.f32.mrf.mxu3  ;;  %v14192_v24 = vor.u32 %v12106_v42, %v9836_v22 }
 0x196   :  { %v2060_v40 = vadd.f32 %v2059_v23, %v2036_v0  ;;  %v1646_v27 = vpop.f32.mrf.mxu1  ;;  %v12134_v0 = vld [vmem:[#allocation2 + $0x8bc] sm:$0xf] }
 0x197   :  { %v1647_v53 = vadd.f32 %v1646_v27, %v1623_v55  ;;  %v14188_v55 = vor.u32 %v12110_v36, %v9854_v31  ;;  %v9950_v27 = vld [vmem:[#allocation2 + $0x8c4] sm:$0xf0]  ;;  %16929 = vst [vmem:[#allocation281_spill] sm:$0xff] %v14192_v24  ;;  %v14201_v31 = vor.u32 %v12131_v11, %v9938_v49  ;;  %v12104_v49 = vld [vmem:[#allocation2 + $0x7cc] sm:$0xf] }
 0x198   :  { %v14170_v41 = vadd.f32 %v2060_v40, %v13970_v48  ;;  %v12091_v48 = vld [vmem:[%s16263_s0 + $0xf4] sm:$0xf]  ;;  %v9778_v40 = vld [vmem:[%s16263_s0 + $0xf8] sm:$0xf0]  ;;  %v14190_v59 = vor.u32 %v12134_v0, %v9950_v27  ;;  %3137 = vmatpush.bf16.msra.mxu2 %v14192_v24  ;;  %v14203_v0 = vor.u32 %v12092_v54, %v9776_v20  ;;  %v12128_v11 = vld [vmem:[#allocation2 + $0x88c] sm:$0xf] }
 0x199   :  { %v14180_v23 = vadd.f32 %v1647_v53, %v13880_v35  ;;  %16927 = vst [vmem:[#allocation279_spill] sm:$0xff] %v14188_v55  ;;  %v12130_v35 = vld [vmem:[#allocation2 + $0x898] sm:$0xf0]  ;;  %v12107_v53 = vld [vmem:[#allocation2 + $0x7e4] sm:$0xf]  ;;  %3089 = vmatpush.bf16.msra.mxu0 %v14188_v55 }
 0x19a   :  { %16928 = vst [vmem:[#allocation280_spill] sm:$0xff] %v14190_v59  ;;  %v14195_v30 = vor.u32 %v12130_v35, %v9932_v26  ;;  %3112 = vmatpush.bf16.msra.mxu1 %v14190_v59  ;;  %v14199_v36 = vor.u32 %v12107_v53, %v9842_v5  ;;  %v14206_v35 = vor.u32 %v12091_v48, %v9778_v40  ;;  %v9830_v5 = vld [vmem:[#allocation2 + $0x7d4] sm:$0xf0]  ;;  %v12103_v54 = vld [vmem:[#allocation2 + $0x7c0] sm:$0xf0] }
 0x19b   :  { %16932 = vst [vmem:[#allocation284_spill] sm:$0xff] %v14201_v31  ;;  %v9920_v48 = vld [vmem:[#allocation2 + $0x878] sm:$0xf]  ;;  %v14219_v40 = vor.u32 %v12104_v49, %v9830_v5  ;;  %v12127_v53 = vld [vmem:[#allocation2 + $0x880] sm:$0xf0] }
 0x19c   :  { %16930 = vst [vmem:[#allocation282_spill] sm:$0xff] %v14195_v30  ;;  %v1626_v22 = vpop.f32.mrf.mxu0  ;;  %3160 = vmatpush.bf16.msra.mxu3 %v14195_v30  ;;  %v12125_v30 = vld [vmem:[#allocation2 + $0x874] sm:$0xf]  ;;  %v9800_v24 = vld [vmem:[#allocation2 + $0x788] sm:$0xf] }
 0x19d   :  { %v2038_v19 = vpop.f32.mrf.mxu2  ;;  %16931 = vst [vmem:[#allocation283_spill] sm:$0xff] %v14199_v36  ;;  %v2061_v42 = vpop.f32.mrf.mxu3  ;;  %3090 = vmatpush.bf16.msra.mxu0 %v14199_v36  ;;  %v12097_v36 = vld [vmem:[#allocation2 + $0x790] sm:$0xf0] }
 0x19e   :  { %v2062_v26 = vadd.f32 %v2061_v42, %v2038_v19  ;;  %v1649_v27 = vpop.f32.mrf.mxu1  ;;  %16933 = vst [vmem:[#allocation285_spill] sm:$0xff] %v14206_v35  ;;  %3113 = vmatpush.bf16.msra.mxu1 %v14201_v31  ;;  %v9824_v19 = vld [vmem:[#allocation2 + $0x7b8] sm:$0xf] }
 0x19f   :  { %v1650_v55 = vadd.f32 %v1649_v27, %v1626_v22  ;;  %2634 = vmatmul.bf16.vlgmr.msrb.gmra.mxu0 %v14020_v18  ;;  %16934 = vst [vmem:[#allocation286_spill] sm:$0xff] %v14219_v40  ;;  %v9926_v42 = vld [vmem:[#allocation2 + $0x894] sm:$0xf0]  ;;  %v14224_v22 = vor.u32 %v12127_v53, %v9920_v48  ;;  %v9818_v27 = vld [vmem:[#allocation2 + $0x7bc] sm:$0xf0] }
 0x1a0   :  { %v14210_v59 = vadd.f32 %v2062_v26, %v14009_v63  ;;  %v14222_v63 = vor.u32 %v12103_v54, %v9824_v19  ;;  %v12101_v26 = vld [vmem:[#allocation2 + $0x7b4] sm:$0xf]  ;;  %v9914_v54 = vld [vmem:[#allocation2 + $0x87c] sm:$0xf0] }
 0x1a1   :  { %v14215_v20 = vadd.f32 %v1650_v55, %v13907_v4  ;;  %2657 = vmatmul.bf16.vlgmr.msrb.gmra.mxu1 %v14028_v43  ;;  %16936 = vst [vmem:[#allocation288_spill] sm:$0xff] %v14224_v22  ;;  %3091 = vmatpush.bf16.msra.mxu0 %v14219_v40  ;;  %v14227_v4 = vor.u32 %v12128_v11, %v9926_v42  ;;  %v9896_v43 = vld [vmem:[#allocation2 + $0x848] sm:$0xf] }
 0x1a2   :  { %3049 = vmatmul.bf16.vlgmr.msrb.gmra.mxu2 %v14203_v0  ;;  %3072 = vmatmul.bf16.vlgmr.msrb.gmra.mxu3 %v14206_v35  ;;  %16935 = vst [vmem:[#allocation287_spill] sm:$0xff] %v14222_v63  ;;  %v14232_v19 = vor.u32 %v12101_v26, %v9818_v27  ;;  %v14234_v40 = vor.u32 %v12125_v30, %v9914_v54  ;;  %v12094_v26 = vld [vmem:[%s16263_s0 + $0x104] sm:$0xf0]  ;;  %v9812_v27 = vld [vmem:[#allocation2 + $0x7a0] sm:$0xf] }
 0x1a3   :  { %16937 = vst [vmem:[#allocation289_spill] sm:$0xff] %v14227_v4  ;;  %3138 = vmatpush.bf16.msra.mxu2 %v14222_v63  ;;  %3161 = vmatpush.bf16.msra.mxu3 %v14224_v22  ;;  %v9784_v63 = vld [vmem:[%s16263_s0 + $0x100] sm:$0xf]  ;;  %v12100_v22 = vld [vmem:[#allocation2 + $0x7a8] sm:$0xf0] }
 0x1a4   :  { %v1628_v5 = vpop.f32.mrf.mxu0  ;;  %3114 = vmatpush.bf16.msra.mxu1 %v14227_v4  ;;  %16938 = vst [vmem:[#allocation290_spill] sm:$0xff] %v14232_v19  ;;  %v12124_v54 = vld [vmem:[#allocation2 + $0x868] sm:$0xf0] }
 0x1a5   :  { %v2041_v55 = vpop.f32.mrf.mxu2  ;;  %v2064_v49 = vpop.f32.mrf.mxu3  ;;  %16939 = vst [vmem:[#allocation291_spill] sm:$0xff] %v14234_v40  ;;  %3092 = vmatpush.bf16.msra.mxu0 %v14232_v19 }
 0x1a6   :  { %v2065_v48 = vadd.f32 %v2064_v49, %v2041_v55  ;;  %v1651_v53 = vpop.f32.mrf.mxu1  ;;  %v9908_v55 = vld [vmem:[#allocation2 + $0x860] sm:$0xf]  ;;  %v12093_v49 = vld [vmem:[%s16263_s0 + $0x104] sm:$0xf] }
 0x1a7   :  { %v1652_v11 = vadd.f32 %v1651_v53, %v1628_v5  ;;  %v14255_v5 = vor.u32 %v12100_v22, %v9812_v27  ;;  %v9806_v53 = vld [vmem:[#allocation2 + $0x7a4] sm:$0xf0]  ;;  %v14258_v19 = vor.u32 %v12124_v54, %v9908_v55  ;;  %v12121_v22 = vld [vmem:[#allocation2 + $0x850] sm:$0xf0]  ;;  %v12095_v54 = vld [vmem:[#allocation2 + $0x784] sm:$0xf] }
 0x1a8   :  { %v14238_v42 = vadd.f32 %v2065_v48, %v14038_v10  ;;  %v9786_v10 = vld [vmem:[%s16263_s0 + $0x108] sm:$0xf0]  ;;  %3115 = vmatpush.bf16.msra.mxu1 %v14234_v40  ;;  %v12098_v48 = vld [vmem:[#allocation2 + $0x79c] sm:$0xf]  ;;  %v14267_v40 = vor.u32 %v12097_v36, %v9800_v24  ;;  %v14269_v55 = vor.u32 %v12121_v22, %v9896_v43 }
 0x1a9   :  { %v14247_v30 = vadd.f32 %v1652_v11, %v13933_v2  ;;  %16940 = vst [vmem:[#allocation292_spill] sm:$0xff] %v14255_v5  ;;  %v14260_v4 = vor.u32 %v12098_v48, %v9806_v53  ;;  %v12122_v2 = vld [vmem:[#allocation2 + $0x85c] sm:$0xf]  ;;  %v9902_v11 = vld [vmem:[#allocation2 + $0x864] sm:$0xf0]  ;;  %3139 = vmatpush.bf16.msra.mxu2 %v14255_v5  ;;  %3162 = vmatpush.bf16.msra.mxu3 %v14258_v19 }
 0x1aa   :  { %16941 = vst [vmem:[#allocation293_spill] sm:$0xff] %v14258_v19  ;;  %v14263_v31 = vor.u32 %v12122_v2, %v9902_v11  ;;  %v9794_v48 = vld [vmem:[#allocation2 + $0x78c] sm:$0xf0]  ;;  %v12119_v53 = vld [vmem:[#allocation2 + $0x844] sm:$0xf]  ;;  %v14271_v5 = vor.u32 %v12094_v26, %v9784_v63  ;;  %v14274_v9 = vor.u32 %v12093_v49, %v9786_v10 }
 0x1ab   :  { %16942 = vst [vmem:[#allocation294_spill] sm:$0xff] %v14260_v4  ;;  %3093 = vmatpush.bf16.msra.mxu0 %v14260_v4  ;;  %v9890_v2 = vld [vmem:[#allocation2 + $0x84c] sm:$0xf0]  ;;  %v14276_v19 = vor.u32 %v12095_v54, %v9794_v48  ;;  %v10187_v26 = vld [vmem:[#allocation2 + $0xa74] sm:$0xf0] }
 0x1ac   :  { %16943 = vst [vmem:[#allocation295_spill] sm:$0xff] %v14263_v31  ;;  %v1631_v14 = vpop.f32.mrf.mxu0  ;;  %3116 = vmatpush.bf16.msra.mxu1 %v14263_v31  ;;  %v14279_v43 = vor.u32 %v12119_v53, %v9890_v2  ;;  %v9773_v48 = vld [vmem:[%s16263_s0 + $0x110] sm:$0xff] }
 0x1ad   :  { %v2043_v27 = vpop.f32.mrf.mxu2  ;;  %16944 = vst [vmem:[#allocation296_spill] sm:$0xff] %v14267_v40  ;;  %v2066_v18 = vpop.f32.mrf.mxu3  ;;  %3140 = vmatpush.bf16.msra.mxu2 %v14267_v40  ;;  %3163 = vmatpush.bf16.msra.mxu3 %v14269_v55  ;;  %v2771_v2 = vunpack.c.l.b16 %v9773_v48  ;;  %v12174_v40 = vld [vmem:[#allocation2 + $0x9dc] sm:$0xf] }
 0x1ae   :  { %16945 = vst [vmem:[#allocation297_spill] sm:$0xff] %v14269_v55  ;;  %v2067_v11 = vadd.f32 %v2066_v18, %v2043_v27  ;;  %v1654_v57 = vpop.f32.mrf.mxu1  ;;  %v12192_v18 = vld [vmem:[#allocation2 + $0xa6c] sm:$0xf] }
 0x1af   :  { %16946 = vst [vmem:[#allocation298_spill] sm:$0xff] %v14271_v5  ;;  %v1655_v24 = vadd.f32 %v1654_v57, %v1631_v14  ;;  %2639 = vmatmul.bf16.gmra.mxu0 %v14088_v47  ;;  %v12168_v57 = vld [vmem:[#allocation2 + $0x9ac] sm:$0xf]  ;;  %v10091_v14 = vld [vmem:[#allocation2 + $0x9b4] sm:$0xf0]  ;;  %v14296_v10 = vor.u32 %v12192_v18, %v10187_v26  ;;  %v14315_v55 = vpack.c.b16 %v2771_v2, %v2771_v2 }
 0x1b0   :  { %16947 = vst [vmem:[#allocation299_spill] sm:$0xff] %v14274_v9  ;;  %v14282_v36 = vadd.f32 %v2067_v11, %v14076_v1  ;;  %3094 = vmatpush.bf16.msra.mxu0 %v14276_v19  ;;  %3117 = vmatpush.bf16.msra.mxu1 %v14279_v43  ;;  %v14294_v1 = vor.u32 %v12168_v57, %v10091_v14  ;;  %v12165_v11 = vld [vmem:[#allocation2 + $0x994] sm:$0xf]  ;;  %v2772_v14 = vunpack.c.h.b16 %v9773_v48  ;;  %v10175_v26 = vld [vmem:[#allocation2 + $0xa5c] sm:$0xf0] }
 0x1b1   :  { %16948 = vst [vmem:[#allocation300_spill] sm:$0xff] %v14276_v19  ;;  %v14287_v63 = vadd.f32 %v1655_v24, %v13954_v39  ;;  %2662 = vmatmul.bf16.gmra.mxu1 %v14096_v15  ;;  %3617 = vmatpush.bf16.msrb.mxu3 %v14296_v10  ;;  %v10079_v24 = vld [vmem:[#allocation2 + $0x99c] sm:$0xf0]  ;;  %v12189_v57 = vld [vmem:[#allocation2 + $0xa54] sm:$0xf] }
 0x1b2   :  { %16949 = vst [vmem:[#allocation301_spill] sm:$0xff] %v14279_v43  ;;  %3054 = vmatmul.bf16.gmra.mxu2 %v14271_v5  ;;  %3077 = vmatmul.bf16.gmra.mxu3 %v14274_v9  ;;  %v14306_v18 = vor.u32 %v12165_v11, %v10079_v24  ;;  %v12193_v43 = vld [vmem:[#allocation2 + $0xa70] sm:$0xf0]  ;;  %v14319_v11 = vpack.c.b16 %v2772_v14, %v2772_v14  ;;  %v10077_v14 = vld [vmem:[#allocation2 + $0x990] sm:$0xf] }
 0x1b3   :  { %16950 = vst [vmem:[#allocation302_spill] sm:$0xff] %v14294_v1  ;;  %3594 = vmatpush.bf16.msrb.mxu2 %v14294_v1  ;;  %v10185_v1 = vld [vmem:[#allocation2 + $0xa68] sm:$0xf]  ;;  %v12173_v47 = vld [vmem:[#allocation2 + $0x9d0] sm:$0xf0] }
 0x1b4   :  { %16951 = vst [vmem:[#allocation303_spill] sm:$0xff] %v14296_v10  ;;  %v1633_v22 = vpop.f32.mrf.mxu0 }
 0x1b5   :  { %v2046_v49 = vpop.f32.mrf.mxu2  ;;  %v2069_v39 = vpop.f32.mrf.mxu3  ;;  %16952 = vst [vmem:[#allocation304_spill] sm:$0xff] %v14306_v18  ;;  %v10089_v22 = vld [vmem:[#allocation2 + $0x9a8] sm:$0xf] }
 0x1b6   :  { %v2070_v27 = vadd.f32 %v2069_v39, %v2046_v49  ;;  %v1656_v54 = vpop.f32.mrf.mxu1  ;;  %v12169_v49 = vld [vmem:[#allocation2 + $0x9b0] sm:$0xf0]  ;;  %v14308_v39 = vor.u32 %v12189_v57, %v10175_v26  ;;  %16956 = vst [vmem:[#allocation308_spill] sm:$0xff] %v14315_v55  ;;  %v10067_v57 = vld [vmem:[#allocation2 + $0x984] sm:$0xf0] }
 0x1b7   :  { %v14310_v54 = vor.u32 %v12169_v49, %v10089_v22  ;;  %3595 = vmatpush.bf16.msrb.mxu2 %v14306_v18  ;;  %16957 = vst [vmem:[#allocation309_spill] sm:$0xff] %v14319_v11  ;;  %v10163_v26 = vld [vmem:[#allocation2 + $0xa44] sm:$0xf0]  ;;  %v12166_v22 = vld [vmem:[#allocation2 + $0x998] sm:$0xf0] }
 0x1b8   :  { %v14304_v53 = vadd.f32 %v2070_v27, %v14110_v61  ;;  %16953 = vst [vmem:[#allocation305_spill] sm:$0xff] %v14308_v39  ;;  %v14313_v61 = vor.u32 %v12193_v43, %v10185_v1  ;;  %3618 = vmatpush.bf16.msrb.mxu3 %v14308_v39  ;;  %v12186_v43 = vld [vmem:[#allocation2 + $0xa3c] sm:$0xf]  ;;  %v14333_v49 = vor.u32 %v12166_v22, %v10077_v14  ;;  %v12159_v39 = vld [vmem:[#allocation2 + $0x964] sm:$0xf] }
 0x1b9   :  { %16954 = vst [vmem:[#allocation306_spill] sm:$0xff] %v14310_v54  ;;  %3548 = vmatpush.bf16.msrb.mxu0 %v14310_v54  ;;  %v12183_v18 = vld [vmem:[#allocation2 + $0xa24] sm:$0xf]  ;;  %v10149_v54 = vld [vmem:[#allocation2 + $0xa20] sm:$0xf] }
 0x1ba   :  { %16955 = vst [vmem:[#allocation307_spill] sm:$0xff] %v14313_v61  ;;  %3571 = vmatpush.bf16.msrb.mxu1 %v14313_v61 }
 0x1bb   :  { %16960 = vst [vmem:[#allocation312_spill] sm:$0xff] %v14333_v49 }
 0x1bc   :  { %v2082_v19 = vpop.f32.mrf.mxu0 }
 0x1bd   :  { %v2048_v10 = vpop.f32.mrf.mxu2  ;;  %v2071_v27 = vpop.f32.mrf.mxu3  ;;  %3549 = vmatpush.bf16.msrb.mxu0 %v14333_v49  ;;  %v12163_v49 = vld [vmem:[#allocation2 + $0x980] sm:$0xf0] }
 0x1be   :  { %v2105_v48 = vpop.f32.mrf.mxu1  ;;  %v12162_v10 = vld [vmem:[#allocation2 + $0x97c] sm:$0xf]  ;;  %v10173_v27 = vld [vmem:[#allocation2 + $0xa50] sm:$0xf] }
 0x1bf   :  { %v2106_v24 = vadd.f32 %v2105_v48, %v2082_v19  ;;  %2644 = vmatmul.bf16.gmra.mxu0 %v14135_v60  ;;  %v14328_v2 = vor.u32 %v12162_v10, %v10067_v57  ;;  %v14331_v19 = vor.u32 %v12186_v43, %v10163_v26  ;;  %v12190_v48 = vld [vmem:[#allocation2 + $0xa58] sm:$0xf0]  ;;  %v10151_v10 = vld [vmem:[#allocation2 + $0xa2c] sm:$0xf0] }
 0x1c0   :  { %v14342_v43 = vor.u32 %v12183_v18, %v10151_v10  ;;  %v12187_v10 = vld [vmem:[#allocation2 + $0xa40] sm:$0xf0] }
 0x1c1   :  { %v14324_v1 = vadd.f32 %v2106_v24, %v13999_v28  ;;  %2667 = vmatmul.bf16.gmra.mxu1 %v14140_v52  ;;  %16958 = vst [vmem:[#allocation310_spill] sm:$0xff] %v14328_v2  ;;  %3596 = vmatpush.bf16.msrb.mxu2 %v14328_v2  ;;  %v14336_v28 = vor.u32 %v12190_v48, %v10173_v27  ;;  %v10055_v24 = vld [vmem:[#allocation2 + $0x96c] sm:$0xf0]  ;;  %v10157_v52 = vld [vmem:[#allocation2 + $0xa28] sm:$0xf] }
 0x1c2   :  { %3059 = vmatmul.bf16.gmra.mxu2 %v14315_v55  ;;  %3082 = vmatmul.bf16.gmra.mxu3 %v14319_v11  ;;  %16959 = vst [vmem:[#allocation311_spill] sm:$0xff] %v14331_v19  ;;  %v14340_v61 = vor.u32 %v12159_v39, %v10055_v24  ;;  %v10161_v39 = vld [vmem:[#allocation2 + $0xa38] sm:$0xf] }
 0x1c3   :  { %16961 = vst [vmem:[#allocation313_spill] sm:$0xff] %v14336_v28  ;;  %3619 = vmatpush.bf16.msrb.mxu3 %v14331_v19  ;;  %3572 = vmatpush.bf16.msrb.mxu1 %v14336_v28  ;;  %v10065_v19 = vld [vmem:[#allocation2 + $0x978] sm:$0xf]  ;;  %v12156_v28 = vld [vmem:[#allocation2 + $0x94c] sm:$0xf] }
 0x1c4   :  { %16962 = vst [vmem:[#allocation314_spill] sm:$0xff] %v14340_v61  ;;  %v2084_v14 = vpop.f32.mrf.mxu0  ;;  %v14353_v24 = vor.u32 %v12163_v49, %v10065_v19 }
 0x1c5   :  { %v2128_v57 = vpop.f32.mrf.mxu2  ;;  %16963 = vst [vmem:[#allocation315_spill] sm:$0xff] %v14342_v43  ;;  %v2151_v26 = vpop.f32.mrf.mxu3  ;;  %3597 = vmatpush.bf16.msrb.mxu2 %v14340_v61  ;;  %v12160_v61 = vld [vmem:[#allocation2 + $0x968] sm:$0xf0] }
 0x1c6   :  { %v2152_v22 = vadd.f32 %v2151_v26, %v2128_v57  ;;  %v2107_v2 = vpop.f32.mrf.mxu1  ;;  %16964 = vst [vmem:[#allocation316_spill] sm:$0xff] %v14353_v24  ;;  %v10043_v57 = vld [vmem:[#allocation2 + $0x954] sm:$0xf0]  ;;  %v14355_v26 = vor.u32 %v12187_v10, %v10161_v39  ;;  %3550 = vmatpush.bf16.msrb.mxu0 %v14353_v24  ;;  %v10019_v24 = vld [vmem:[#allocation2 + $0x924] sm:$0xf0] }
 0x1c7   :  { %v2108_v27 = vadd.f32 %v2107_v2, %v2084_v14  ;;  %3620 = vmatpush.bf16.msrb.mxu3 %v14342_v43  ;;  %v14357_v2 = vor.u32 %v12156_v28, %v10043_v57  ;;  %v12180_v14 = vld [vmem:[#allocation2 + $0xa0c] sm:$0xf] }
 0x1c8   :  { %v14347_v48 = vadd.f32 %v2152_v22, %v14147_v32  ;;  %16965 = vst [vmem:[#allocation317_spill] sm:$0xff] %v14355_v26  ;;  %v10139_v32 = vld [vmem:[#allocation2 + $0xa14] sm:$0xf0]  ;;  %v10053_v22 = vld [vmem:[#allocation2 + $0x960] sm:$0xf]  ;;  %3573 = vmatpush.bf16.msrb.mxu1 %v14355_v26 }
 0x1c9   :  { %v14351_v18 = vadd.f32 %v2108_v27, %v14033_v6  ;;  %16966 = vst [vmem:[#allocation318_spill] sm:$0xff] %v14357_v2  ;;  %v14360_v43 = vor.u32 %v12180_v14, %v10139_v32  ;;  %v12184_v6 = vld [vmem:[#allocation2 + $0xa28] sm:$0xf0]  ;;  %3598 = vmatpush.bf16.msrb.mxu2 %v14357_v2  ;;  %v14364_v19 = vor.u32 %v12160_v61, %v10053_v22  ;;  %v10041_v61 = vld [vmem:[#allocation2 + $0x948] sm:$0xf] }
 0x1ca   :  { %v14366_v49 = vor.u32 %v12184_v6, %v10149_v54  ;;  %v12157_v22 = vld [vmem:[#allocation2 + $0x950] sm:$0xf0]  ;;  %v10137_v54 = vld [vmem:[#allocation2 + $0xa08] sm:$0xf]  ;;  %v10125_v26 = vld [vmem:[#allocation2 + $0x9f0] sm:$0xf] }
 0x1cb   :  { %16967 = vst [vmem:[#allocation319_spill] sm:$0xff] %v14360_v43  ;;  %3621 = vmatpush.bf16.msrb.mxu3 %v14360_v43  ;;  %3551 = vmatpush.bf16.msrb.mxu0 %v14364_v19  ;;  %v12181_v43 = vld [vmem:[#allocation2 + $0xa10] sm:$0xf0] }
 0x1cc   :  { %16968 = vst [vmem:[#allocation320_spill] sm:$0xff] %v14364_v19  ;;  %v2087_v39 = vpop.f32.mrf.mxu0  ;;  %3574 = vmatpush.bf16.msrb.mxu1 %v14366_v49  ;;  %v12154_v19 = vld [vmem:[#allocation2 + $0x938] sm:$0xf0] }
 0x1cd   :  { %v2130_v27 = vpop.f32.mrf.mxu2  ;;  %16969 = vst [vmem:[#allocation321_spill] sm:$0xff] %v14366_v49  ;;  %v2153_v28 = vpop.f32.mrf.mxu3  ;;  %v10029_v49 = vld [vmem:[#allocation2 + $0x930] sm:$0xf] }
 0x1ce   :  { %v2154_v10 = vadd.f32 %v2153_v28, %v2130_v27  ;;  %v2110_v57 = vpop.f32.mrf.mxu1  ;;  %v12153_v27 = vld [vmem:[#allocation2 + $0x934] sm:$0xf]  ;;  %v10031_v28 = vld [vmem:[#allocation2 + $0x93c] sm:$0xf0] }
 0x1cf   :  { %v2111_v14 = vadd.f32 %v2110_v57, %v2087_v39  ;;  %3095 = vmatmul.bf16.vlgmr.msra.gmra.mxu0 %v14203_v0  ;;  %v12177_v39 = vld [vmem:[#allocation2 + $0x9f4] sm:$0xf]  ;;  %v14380_v57 = vor.u32 %v12157_v22, %v10041_v61 }
 0x1d0   :  { %v14371_v32 = vadd.f32 %v2154_v10, %v14180_v23  ;;  %v14383_v23 = vor.u32 %v12153_v27, %v10031_v28  ;;  %v10127_v10 = vld [vmem:[#allocation2 + $0x9fc] sm:$0xf0]  ;;  %v14393_v27 = vor.u32 %v12154_v19, %v10029_v49  ;;  %v12178_v28 = vld [vmem:[#allocation2 + $0x9f8] sm:$0xf0]  ;;  %v10115_v19 = vld [vmem:[#allocation2 + $0x9e4] sm:$0xf0] }
 0x1d1   :  { %v14376_v6 = vadd.f32 %v2111_v14, %v14067_v13  ;;  %3118 = vmatmul.bf16.vlgmr.msra.gmra.mxu1 %v14206_v35  ;;  %16970 = vst [vmem:[#allocation322_spill] sm:$0xff] %v14380_v57  ;;  %v14385_v2 = vor.u32 %v12177_v39, %v10127_v10  ;;  %3552 = vmatpush.bf16.msrb.mxu0 %v14380_v57  ;;  %v10017_v49 = vld [vmem:[#allocation2 + $0x918] sm:$0xf] }
 0x1d2   :  { %3141 = vmatmul.bf16.vlgmr.msra.gmra.mxu2 %v14203_v0  ;;  %3164 = vmatmul.bf16.vlgmr.msra.gmra.mxu3 %v14206_v35  ;;  %16971 = vst [vmem:[#allocation323_spill] sm:$0xff] %v14383_v23  ;;  %v14388_v13 = vor.u32 %v12181_v43, %v10137_v54  ;;  %v14395_v57 = vor.u32 %v12178_v28, %v10125_v26  ;;  %v12151_v26 = vld [vmem:[#allocation2 + $0x920] sm:$0xf0] }
 0x1d3   :  { %16972 = vst [vmem:[#allocation324_spill] sm:$0xff] %v14385_v2  ;;  %3599 = vmatpush.bf16.msrb.mxu2 %v14383_v23  ;;  %3622 = vmatpush.bf16.msrb.mxu3 %v14385_v2  ;;  %v12150_v23 = vld [vmem:[#allocation2 + $0x91c] sm:$0xf]  ;;  %v12147_v28 = vld [vmem:[#allocation2 + $0x904] sm:$0xf] }
 0x1d4   :  { %16973 = vst [vmem:[#allocation325_spill] sm:$0xff] %v14388_v13  ;;  %v2089_v22 = vpop.f32.mrf.mxu0  ;;  %3575 = vmatpush.bf16.msrb.mxu1 %v14388_v13  ;;  %v14404_v13 = vor.u32 %v12150_v23, %v10019_v24  ;;  %v10103_v24 = vld [vmem:[#allocation2 + $0x9cc] sm:$0xf0] }
 0x1d5   :  { %v2133_v14 = vpop.f32.mrf.mxu2  ;;  %v2156_v61 = vpop.f32.mrf.mxu3  ;;  %16974 = vst [vmem:[#allocation326_spill] sm:$0xff] %v14393_v27  ;;  %3553 = vmatpush.bf16.msrb.mxu0 %v14393_v27 }
 0x1d6   :  { %v2157_v39 = vadd.f32 %v2156_v61, %v2133_v14  ;;  %v2112_v10 = vpop.f32.mrf.mxu1  ;;  %16975 = vst [vmem:[#allocation327_spill] sm:$0xff] %v14395_v57  ;;  %v14407_v14 = vor.u32 %v12174_v40, %v10115_v19  ;;  %v14409_v61 = vor.u32 %v12151_v26, %v10017_v49  ;;  %v10005_v19 = vld [vmem:[#allocation2 + $0x900] sm:$0xf]  ;;  %v12148_v49 = vld [vmem:[#allocation2 + $0x908] sm:$0xf0] }
 0x1d7   :  { %v2113_v43 = vadd.f32 %v2112_v10, %v2089_v22  ;;  %16976 = vst [vmem:[#allocation328_spill] sm:$0xff] %v14404_v13  ;;  %v10113_v22 = vld [vmem:[#allocation2 + $0x9d8] sm:$0xf]  ;;  %3600 = vmatpush.bf16.msrb.mxu2 %v14404_v13  ;;  %v12171_v10 = vld [vmem:[#allocation2 + $0x9c4] sm:$0xf]  ;;  %v14421_v31 = vor.u32 %v12148_v49, %v10005_v19 }
 0x1d8   :  { %v14399_v54 = vadd.f32 %v2157_v39, %v14215_v20  ;;  %3576 = vmatpush.bf16.msrb.mxu1 %v14395_v57  ;;  %16977 = vst [vmem:[#allocation329_spill] sm:$0xff] %v14407_v14  ;;  %v12175_v20 = vld [vmem:[#allocation2 + $0x9e0] sm:$0xf0]  ;;  %3623 = vmatpush.bf16.msrb.mxu3 %v14407_v14  ;;  %v14418_v40 = vor.u32 %v12171_v10, %v10103_v24  ;;  %v10101_v26 = vld [vmem:[#allocation2 + $0x9c0] sm:$0xf] }
 0x1d9   :  { %v14402_v2 = vadd.f32 %v2113_v43, %v14105_v51  ;;  %16978 = vst [vmem:[#allocation330_spill] sm:$0xff] %v14409_v61  ;;  %v14412_v39 = vor.u32 %v12175_v20, %v10113_v22  ;;  %v10007_v51 = vld [vmem:[#allocation2 + $0x90c] sm:$0xf0]  ;;  %3554 = vmatpush.bf16.msrb.mxu0 %v14409_v61  ;;  %v12172_v22 = vld [vmem:[#allocation2 + $0x9c8] sm:$0xf0] }
 0x1da   :  { %v14416_v43 = vor.u32 %v12147_v28, %v10007_v51  ;;  %16981 = vst [vmem:[#allocation333_spill] sm:$0xff] %v14418_v40  ;;  %v14424_v61 = vor.u32 %v12172_v22, %v10101_v26  ;;  %v12245_v10 = vld [vmem:[#allocation2 + $0xbf0] sm:$0xf0]  ;;  %v10290_v22 = vld [vmem:[#allocation2 + $0xb10] sm:$0xf] }
 0x1db   :  { %16979 = vst [vmem:[#allocation331_spill] sm:$0xff] %v14412_v39  ;;  %v12161_v14 = vld [vmem:[#allocation2 + $0x970] sm:$0xf0] }
 0x1dc   :  { %16980 = vst [vmem:[#allocation332_spill] sm:$0xff] %v14416_v43  ;;  %v2092_v27 = vpop.f32.mrf.mxu0  ;;  %3577 = vmatpush.bf16.msrb.mxu1 %v14412_v39  ;;  %3601 = vmatpush.bf16.msrb.mxu2 %v14416_v43  ;;  %v12233_v43 = vld [vmem:[#allocation2 + $0xb90] sm:$0xf0]  ;;  %v10061_v39 = vld [vmem:[#allocation2 + $0x968] sm:$0xf] }
 0x1dd   :  { %v2135_v23 = vpop.f32.mrf.mxu2  ;;  %v2158_v57 = vpop.f32.mrf.mxu3  ;;  %16982 = vst [vmem:[#allocation334_spill] sm:$0xff] %v14421_v31  ;;  %3624 = vmatpush.bf16.msrb.mxu3 %v14418_v40  ;;  %3555 = vmatpush.bf16.msrb.mxu0 %v14421_v31  ;;  %v10097_v31 = vld [vmem:[#allocation2 + $0x9b0] sm:$0xf]  ;;  %v10350_v40 = vld [vmem:[#allocation2 + $0xb88] sm:$0xf] }
 0x1de   :  { %v2159_v20 = vadd.f32 %v2158_v57, %v2135_v23  ;;  %v2115_v13 = vpop.f32.mrf.mxu1  ;;  %16983 = vst [vmem:[#allocation335_spill] sm:$0xff] %v14424_v61  ;;  %v10302_v57 = vld [vmem:[#allocation2 + $0xb28] sm:$0xf] }
 0x1df   :  { %v2116_v4 = vadd.f32 %v2115_v13, %v2092_v27  ;;  %3100 = vmatmul.bf16.gmra.mxu0 %v14271_v5  ;;  %v12221_v13 = vld [vmem:[#allocation2 + $0xb30] sm:$0xf0]  ;;  %v10398_v27 = vld [vmem:[#allocation2 + $0xbe8] sm:$0xf] }
 0x1e0   :  { %v14427_v28 = vadd.f32 %v2159_v20, %v14247_v30  ;;  %3578 = vmatpush.bf16.msrb.mxu1 %v14424_v61  ;;  %v14439_v30 = vor.u32 %v12221_v13, %v10302_v57  ;;  %v14441_v23 = vor.u32 %v12245_v10, %v10398_v27  ;;  %v12218_v20 = vld [vmem:[#allocation2 + $0xb18] sm:$0xf0]  ;;  %v10386_v61 = vld [vmem:[#allocation2 + $0xbd0] sm:$0xf] }
 0x1e1   :  { %v14432_v51 = vadd.f32 %v2116_v4, %v14127_v37  ;;  %3123 = vmatmul.bf16.gmra.mxu1 %v14274_v9  ;;  %v14448_v57 = vor.u32 %v12218_v20, %v10290_v22  ;;  %v12242_v13 = vld [vmem:[#allocation2 + $0xbd8] sm:$0xf0]  ;;  %v12215_v20 = vld [vmem:[#allocation2 + $0xb00] sm:$0xf0] }
 0x1e2   :  { %3146 = vmatmul.bf16.gmra.mxu2 %v14271_v5  ;;  %3169 = vmatmul.bf16.gmra.mxu3 %v14274_v9  ;;  %16984 = vst [vmem:[#allocation336_spill] sm:$0xff] %v14439_v30  ;;  %v12170_v27 = vld [vmem:[#allocation2 + $0x9b8] sm:$0xf0]  ;;  %v14450_v10 = vor.u32 %v12242_v13, %v10386_v61  ;;  %v10374_v13 = vld [vmem:[#allocation2 + $0xbb8] sm:$0xf] }
 0x1e3   :  { %16985 = vst [vmem:[#allocation337_spill] sm:$0xff] %v14441_v23  ;;  %4055 = vmatpush.bf16.msra.mxu2 %v14439_v30  ;;  %4078 = vmatpush.bf16.msra.mxu3 %v14441_v23  ;;  %v10193_v30 = vld [vmem:[#allocation2 + $0xa70] sm:$0xf]  ;;  %v9989_v23 = vld [vmem:[%s16263_s0 + $0x120] sm:$0xf] }
 0x1e4   :  { %v2094_v4 = vpop.f32.mrf.mxu0  ;;  %16986 = vst [vmem:[#allocation338_spill] sm:$0xff] %v14448_v57 }
 0x1e5   :  { %v2138_v24 = vpop.f32.mrf.mxu2  ;;  %v2161_v37 = vpop.f32.mrf.mxu3  ;;  %16987 = vst [vmem:[#allocation339_spill] sm:$0xff] %v14450_v10  ;;  %v14452_v4 = vor.u32 %v12170_v27, %v10097_v31  ;;  %v10278_v31 = vld [vmem:[#allocation2 + $0xaf8] sm:$0xf] }
 0x1e6   :  { %v2162_v19 = vadd.f32 %v2161_v37, %v2138_v24  ;;  %v2117_v49 = vpop.f32.mrf.mxu1  ;;  %v12194_v24 = vld [vmem:[#allocation2 + $0xa78] sm:$0xf0] }
 0x1e7   :  { %16988 = vst [vmem:[#allocation340_spill] sm:$0xff] %v14452_v4  ;;  %4056 = vmatpush.bf16.msra.mxu2 %v14448_v57  ;;  %v14455_v49 = vor.u32 %v12194_v24, %v10193_v30  ;;  %4079 = vmatpush.bf16.msra.mxu3 %v14450_v10  ;;  %v14466_v30 = vor.u32 %v12215_v20, %v10278_v31  ;;  %v12239_v24 = vld [vmem:[#allocation2 + $0xbc0] sm:$0xf0]  ;;  %v10181_v10 = vld [vmem:[#allocation2 + $0xa58] sm:$0xf] }
 0x1e8   :  { %v14446_v26 = vadd.f32 %v2162_v19, %v14287_v63  ;;  %3640 = vmatpush.bf16.msra.mxu0 %v14452_v4  ;;  %v12191_v57 = vld [vmem:[#allocation2 + $0xa60] sm:$0xf0]  ;;  %v10362_v4 = vld [vmem:[#allocation2 + $0xba0] sm:$0xf] }
 0x1e9   :  { %16989 = vst [vmem:[#allocation341_spill] sm:$0xff] %v14455_v49  ;;  %3663 = vmatpush.bf16.msra.mxu1 %v14455_v49  ;;  %v12212_v49 = vld [vmem:[#allocation2 + $0xae8] sm:$0xf0] }
 0x1ea   :  { %16990 = vst [vmem:[#allocation342_spill] sm:$0xff] %v14466_v30 }
 0x1eb   :  { %4057 = vmatpush.bf16.msra.mxu2 %v14466_v30 }
 0x1ec   :  { %v2543_v19 = vpop.f32.mrf.mxu0 }
 0x1ed   :  { %v2140_v37 = vpop.f32.mrf.mxu2  ;;  %v2163_v63 = vpop.f32.mrf.mxu3 }
 0x1ee   :  { %v2566_v22 = vpop.f32.mrf.mxu1  ;;  %v10085_v37 = vld [vmem:[#allocation2 + $0x998] sm:$0xf]  ;;  %v12167_v63 = vld [vmem:[#allocation2 + $0x9a0] sm:$0xf0] }
 0x1ef   :  { %v2567_v61 = vadd.f32 %v2566_v22, %v2543_v19  ;;  %3105 = vmatmul.bf16.gmra.mxu0 %v14315_v55  ;;  %v14469_v19 = vor.u32 %v12239_v24, %v10374_v13  ;;  %v14471_v22 = vor.u32 %v12167_v63, %v10085_v37  ;;  %v12236_v13 = vld [vmem:[#allocation2 + $0xba8] sm:$0xf0] }
 0x1f0   :  { %v14481_v63 = vor.u32 %v12236_v13, %v10362_v4  ;;  %v12143_v4 = vld [vmem:[%s16263_s0 + $0x124] sm:$0xf]  ;;  %v12164_v13 = vld [vmem:[#allocation2 + $0x988] sm:$0xf0] }
 0x1f1   :  { %v14462_v27 = vadd.f32 %v2567_v61, %v14170_v41  ;;  %3128 = vmatmul.bf16.gmra.mxu1 %v14319_v11  ;;  %16991 = vst [vmem:[#allocation343_spill] sm:$0xff] %v14469_v19  ;;  %v14474_v41 = vor.u32 %v12191_v57, %v10181_v10  ;;  %v10266_v61 = vld [vmem:[#allocation2 + $0xae0] sm:$0xf]  ;;  %4080 = vmatpush.bf16.msra.mxu3 %v14469_v19  ;;  %v12144_v19 = vld [vmem:[%s16263_s0 + $0x124] sm:$0xf0] }
 0x1f2   :  { %3151 = vmatmul.bf16.gmra.mxu2 %v14315_v55  ;;  %3174 = vmatmul.bf16.gmra.mxu3 %v14319_v11  ;;  %16992 = vst [vmem:[#allocation344_spill] sm:$0xff] %v14471_v22  ;;  %v14478_v20 = vor.u32 %v12212_v49, %v10266_v61  ;;  %v9991_v61 = vld [vmem:[%s16263_s0 + $0x128] sm:$0xf0]  ;;  %v10364_v55 = vld [vmem:[#allocation2 + $0xbac] sm:$0xf0] }
 0x1f3   :  { %16993 = vst [vmem:[#allocation345_spill] sm:$0xff] %v14474_v41  ;;  %3641 = vmatpush.bf16.msra.mxu0 %v14471_v22  ;;  %3664 = vmatpush.bf16.msra.mxu1 %v14474_v41 }
 0x1f4   :  { %16994 = vst [vmem:[#allocation346_spill] sm:$0xff] %v14478_v20  ;;  %v2545_v37 = vpop.f32.mrf.mxu0  ;;  %4058 = vmatpush.bf16.msra.mxu2 %v14478_v20  ;;  %v12209_v20 = vld [vmem:[#allocation2 + $0xad0] sm:$0xf0] }
 0x1f5   :  { %v2589_v31 = vpop.f32.mrf.mxu2  ;;  %v2612_v24 = vpop.f32.mrf.mxu3  ;;  %16995 = vst [vmem:[#allocation347_spill] sm:$0xff] %v14481_v63  ;;  %4081 = vmatpush.bf16.msra.mxu3 %v14481_v63  ;;  %v14510_v63 = vor.u32 %v12233_v43, %v10350_v40 }
 0x1f6   :  { %v2613_v30 = vadd.f32 %v2612_v24, %v2589_v31  ;;  %v2568_v57 = vpop.f32.mrf.mxu1  ;;  %v10073_v31 = vld [vmem:[#allocation2 + $0x980] sm:$0xf] }
 0x1f7   :  { %v2569_v10 = vadd.f32 %v2568_v57, %v2545_v37  ;;  %v10169_v24 = vld [vmem:[#allocation2 + $0xa40] sm:$0xf]  ;;  %v14503_v57 = vor.u32 %v12164_v13, %v10073_v31  ;;  %16999 = vst [vmem:[#allocation351_spill] sm:$0xff] %v14510_v63  ;;  %v14512_v31 = vor.u32 %v12144_v19, %v9989_v23  ;;  %v14516_v13 = vor.u32 %v12161_v14, %v10061_v39  ;;  %v12158_v14 = vld [vmem:[#allocation2 + $0x958] sm:$0xf0] }
 0x1f8   :  { %v14491_v49 = vadd.f32 %v2613_v30, %v14324_v1  ;;  %v12188_v1 = vld [vmem:[#allocation2 + $0xa48] sm:$0xf0]  ;;  %v10254_v30 = vld [vmem:[#allocation2 + $0xac8] sm:$0xf]  ;;  %v10145_v39 = vld [vmem:[#allocation2 + $0xa10] sm:$0xf] }
 0x1f9   :  { %v14501_v37 = vadd.f32 %v2569_v10, %v14210_v59  ;;  %16996 = vst [vmem:[#allocation348_spill] sm:$0xff] %v14503_v57  ;;  %v14505_v41 = vor.u32 %v12188_v1, %v10169_v24  ;;  %v14507_v22 = vor.u32 %v12209_v20, %v10254_v30  ;;  %3642 = vmatpush.bf16.msra.mxu0 %v14503_v57  ;;  %v12185_v59 = vld [vmem:[#allocation2 + $0xa30] sm:$0xf0] }
 0x1fa   :  { %17000 = vst [vmem:[#allocation352_spill] sm:$0xff] %v14512_v31  ;;  %v14518_v20 = vor.u32 %v12185_v59, %v10157_v52  ;;  %v14520_v30 = vor.u32 %v12143_v4, %v9991_v61  ;;  %4082 = vmatpush.bf16.msra.mxu3 %v14510_v63  ;;  %v10049_v52 = vld [vmem:[#allocation2 + $0x950] sm:$0xf]  ;;  %v12206_v61 = vld [vmem:[#allocation2 + $0xab8] sm:$0xf0] }
 0x1fb   :  { %16997 = vst [vmem:[#allocation349_spill] sm:$0xff] %v14505_v41  ;;  %3665 = vmatpush.bf16.msra.mxu1 %v14505_v41  ;;  %4059 = vmatpush.bf16.msra.mxu2 %v14507_v22  ;;  %v10242_v4 = vld [vmem:[#allocation2 + $0xab0] sm:$0xf]  ;;  %v12155_v63 = vld [vmem:[#allocation2 + $0x940] sm:$0xf0] }
 0x1fc   :  { %16998 = vst [vmem:[#allocation350_spill] sm:$0xff] %v14507_v22  ;;  %v2548_v1 = vpop.f32.mrf.mxu0  ;;  %v10338_v59 = vld [vmem:[#allocation2 + $0xb70] sm:$0xf]  ;;  %v10133_v22 = vld [vmem:[#allocation2 + $0x9f8] sm:$0xf] }
 0x1fd   :  { %v2591_v10 = vpop.f32.mrf.mxu2  ;;  %17001 = vst [vmem:[#allocation353_spill] sm:$0xff] %v14516_v13  ;;  %v2614_v24 = vpop.f32.mrf.mxu3  ;;  %3643 = vmatpush.bf16.msra.mxu0 %v14516_v13  ;;  %v12176_v13 = vld [vmem:[#allocation2 + $0x9e8] sm:$0xf0]  ;;  %v10218_v41 = vld [vmem:[#allocation2 + $0xa80] sm:$0xf] }
 0x1fe   :  { %17002 = vst [vmem:[#allocation354_spill] sm:$0xff] %v14518_v20  ;;  %v2615_v43 = vadd.f32 %v2614_v24, %v2591_v10  ;;  %v2571_v40 = vpop.f32.mrf.mxu1  ;;  %v14534_v10 = vor.u32 %v12158_v14, %v10049_v52  ;;  %v12230_v24 = vld [vmem:[#allocation2 + $0xb78] sm:$0xf0] }
 0x1ff   :  { %17003 = vst [vmem:[#allocation355_spill] sm:$0xff] %v14520_v30  ;;  %v2572_v57 = vadd.f32 %v2571_v40, %v2548_v1  ;;  %3556 = vmatmul.bf16.vlgmr.msrb.gmra.mxu0 %v14512_v31  ;;  %3666 = vmatpush.bf16.msra.mxu1 %v14518_v20  ;;  %v12182_v1 = vld [vmem:[#allocation2 + $0xa18] sm:$0xf0]  ;;  %v10037_v40 = vld [vmem:[#allocation2 + $0x938] sm:$0xf] }
 0x200   :  { %v14525_v23 = vadd.f32 %v2615_v43, %v14351_v18  ;;  %17004 = vst [vmem:[#allocation356_spill] sm:$0xff] %v14534_v10  ;;  %v14537_v18 = vor.u32 %v12206_v61, %v10242_v4  ;;  %v14539_v43 = vor.u32 %v12230_v24, %v10338_v59  ;;  %v14547_v4 = vor.u32 %v12155_v63, %v10037_v40  ;;  %v12179_v61 = vld [vmem:[#allocation2 + $0xa00] sm:$0xf0]  ;;  %v12145_v63 = vld [vmem:[%s16263_s0 + $0x134] sm:$0xf] }
 0x201   :  { %v14530_v19 = vadd.f32 %v2572_v57, %v14238_v42  ;;  %3579 = vmatmul.bf16.vlgmr.msrb.gmra.mxu1 %v14520_v30  ;;  %3644 = vmatpush.bf16.msra.mxu0 %v14534_v10  ;;  %v14542_v42 = vor.u32 %v12182_v1, %v10145_v39  ;;  %v14549_v10 = vor.u32 %v12179_v61, %v10133_v22  ;;  %v9997_v1 = vld [vmem:[%s16263_s0 + $0x130] sm:$0xf]  ;;  %v9999_v22 = vld [vmem:[%s16263_s0 + $0x138] sm:$0xf0]  ;;  %v12203_v40 = vld [vmem:[#allocation2 + $0xaa0] sm:$0xf0] }
 0x202   :  { %3602 = vmatmul.bf16.vlgmr.msrb.gmra.mxu2 %v14512_v31  ;;  %3625 = vmatmul.bf16.vlgmr.msrb.gmra.mxu3 %v14520_v30  ;;  %17005 = vst [vmem:[#allocation357_spill] sm:$0xff] %v14537_v18  ;;  %v10121_v20 = vld [vmem:[#allocation2 + $0x9e0] sm:$0xf] }
 0x203   :  { %17006 = vst [vmem:[#allocation358_spill] sm:$0xff] %v14539_v43  ;;  %4060 = vmatpush.bf16.msra.mxu2 %v14537_v18  ;;  %4083 = vmatpush.bf16.msra.mxu3 %v14539_v43  ;;  %v12146_v18 = vld [vmem:[%s16263_s0 + $0x134] sm:$0xf0]  ;;  %v14578_v60 = vor.u32 %v12176_v13, %v10121_v20  ;;  %v14588_v20 = vor.u32 %v12145_v63, %v9999_v22  ;;  %v10406_v22 = vld [vmem:[#allocation2 + $0xbf0] sm:$0xf] }
 0x204   :  { %17007 = vst [vmem:[#allocation359_spill] sm:$0xff] %v14542_v42  ;;  %v2550_v14 = vpop.f32.mrf.mxu0  ;;  %3667 = vmatpush.bf16.msra.mxu1 %v14542_v42  ;;  %v14580_v15 = vor.u32 %v12146_v18, %v9997_v1 }
 0x205   :  { %v2594_v57 = vpop.f32.mrf.mxu2  ;;  %v2617_v52 = vpop.f32.mrf.mxu3  ;;  %17008 = vst [vmem:[#allocation360_spill] sm:$0xff] %v14547_v4  ;;  %3645 = vmatpush.bf16.msra.mxu0 %v14547_v4 }
 0x206   :  { %v2618_v59 = vadd.f32 %v2617_v52, %v2594_v57  ;;  %v2573_v24 = vpop.f32.mrf.mxu1  ;;  %17009 = vst [vmem:[#allocation361_spill] sm:$0xff] %v14549_v10  ;;  %v10230_v57 = vld [vmem:[#allocation2 + $0xa98] sm:$0xf] }
 0x207   :  { %v2574_v39 = vadd.f32 %v2573_v24, %v2550_v14  ;;  %v10326_v52 = vld [vmem:[#allocation2 + $0xb58] sm:$0xf]  ;;  %v14570_v61 = vor.u32 %v12203_v40, %v10230_v57  ;;  %v12227_v24 = vld [vmem:[#allocation2 + $0xb60] sm:$0xf0]  ;;  %17013 = vst [vmem:[#allocation365_spill] sm:$0xff] %v14578_v60 }
 0x208   :  { %v14559_v43 = vadd.f32 %v2618_v59, %v14376_v6  ;;  %3668 = vmatpush.bf16.msra.mxu1 %v14549_v10  ;;  %v10025_v6 = vld [vmem:[#allocation2 + $0x920] sm:$0xf]  ;;  %v12152_v59 = vld [vmem:[#allocation2 + $0x928] sm:$0xf0]  ;;  %v14573_v4 = vor.u32 %v12227_v24, %v10326_v52  ;;  %v10109_v10 = vld [vmem:[#allocation2 + $0x9c8] sm:$0xf] }
 0x209   :  { %v14568_v14 = vadd.f32 %v2574_v39, %v14282_v36  ;;  %17010 = vst [vmem:[#allocation362_spill] sm:$0xff] %v14570_v61  ;;  %v14575_v42 = vor.u32 %v12152_v59, %v10025_v6  ;;  %4061 = vmatpush.bf16.msra.mxu2 %v14570_v61  ;;  %v12200_v36 = vld [vmem:[#allocation2 + $0xa88] sm:$0xf0]  ;;  %v10314_v39 = vld [vmem:[#allocation2 + $0xb40] sm:$0xf] }
 0x20a   :  { %17011 = vst [vmem:[#allocation363_spill] sm:$0xff] %v14573_v4  ;;  %v12224_v57 = vld [vmem:[#allocation2 + $0xb48] sm:$0xf0]  ;;  %4084 = vmatpush.bf16.msra.mxu3 %v14573_v4  ;;  %v14584_v52 = vor.u32 %v12200_v36, %v10218_v41  ;;  %v10013_v6 = vld [vmem:[#allocation2 + $0x908] sm:$0xf]  ;;  %v14594_v41 = vor.u32 %v12173_v47, %v10109_v10 }
 0x20b   :  { %17012 = vst [vmem:[#allocation364_spill] sm:$0xff] %v14575_v42  ;;  %3646 = vmatpush.bf16.msra.mxu0 %v14575_v42  ;;  %v14586_v24 = vor.u32 %v12224_v57, %v10314_v39  ;;  %v12149_v59 = vld [vmem:[#allocation2 + $0x910] sm:$0xf0]  ;;  %v10310_v47 = vld [vmem:[#allocation2 + $0xb30] sm:$0xf] }
 0x20c   :  { %17014 = vst [vmem:[#allocation366_spill] sm:$0xff] %v14584_v52  ;;  %v2553_v13 = vpop.f32.mrf.mxu0  ;;  %3669 = vmatpush.bf16.msra.mxu1 %v14578_v60  ;;  %v14591_v11 = vor.u32 %v12149_v59, %v10013_v6  ;;  %v12222_v10 = vld [vmem:[#allocation2 + $0xb38] sm:$0xf0]  ;;  %v10268_v60 = vld [vmem:[#allocation2 + $0xaec] sm:$0xf0] }
 0x20d   :  { %v2596_v40 = vpop.f32.mrf.mxu2  ;;  %17015 = vst [vmem:[#allocation367_spill] sm:$0xff] %v14586_v24  ;;  %v2619_v61 = vpop.f32.mrf.mxu3  ;;  %4062 = vmatpush.bf16.msra.mxu2 %v14584_v52  ;;  %v12235_v42 = vld [vmem:[#allocation2 + $0xba4] sm:$0xf] }
 0x20e   :  { %v2620_v18 = vadd.f32 %v2619_v61, %v2596_v40  ;;  %v2576_v1 = vpop.f32.mrf.mxu1  ;;  %17016 = vst [vmem:[#allocation368_spill] sm:$0xff] %v14591_v11  ;;  %4085 = vmatpush.bf16.msra.mxu3 %v14586_v24  ;;  %v12246_v61 = vld [vmem:[#allocation2 + $0xbf8] sm:$0xf0]  ;;  %v9986_v40 = vld [vmem:[%s16263_s0 + $0x140] sm:$0xff] }
 0x20f   :  { %v2577_v4 = vadd.f32 %v2576_v1, %v2553_v13  ;;  %17017 = vst [vmem:[#allocation369_spill] sm:$0xff] %v14594_v41  ;;  %3561 = vmatmul.bf16.gmra.mxu0 %v14580_v15  ;;  %v14611_v57 = vor.u32 %v12246_v61, %v10406_v22  ;;  %v3279_v1 = vunpack.c.h.b16 %v9986_v40  ;;  %v10394_v22 = vld [vmem:[#allocation2 + $0xbd8] sm:$0xf] }
 0x210   :  { %v14597_v36 = vadd.f32 %v2620_v18, %v14402_v2  ;;  %3647 = vmatpush.bf16.msra.mxu0 %v14591_v11  ;;  %3670 = vmatpush.bf16.msra.mxu1 %v14594_v41  ;;  %v14609_v2 = vor.u32 %v12222_v10, %v10310_v47  ;;  %v3278_v18 = vunpack.c.l.b16 %v9986_v40  ;;  %v10298_v47 = vld [vmem:[#allocation2 + $0xb18] sm:$0xf]  ;;  %v12219_v10 = vld [vmem:[#allocation2 + $0xb20] sm:$0xf0]  ;;  %v12220_v41 = vld [vmem:[#allocation2 + $0xb2c] sm:$0xf] }
 0x211   :  { %v14602_v63 = vadd.f32 %v2577_v4, %v14304_v53  ;;  %3584 = vmatmul.bf16.gmra.mxu1 %v14588_v20  ;;  %17019 = vst [vmem:[#allocation371_spill] sm:$0xff] %v14611_v57  ;;  %v14621_v61 = vor.u32 %v12219_v10, %v10298_v47  ;;  %v10304_v11 = vld [vmem:[#allocation2 + $0xb34] sm:$0xf0]  ;;  %v14632_v47 = vpack.c.b16 %v3279_v1, %v3279_v1 }
 0x212   :  { %3607 = vmatmul.bf16.gmra.mxu2 %v14580_v15  ;;  %3630 = vmatmul.bf16.gmra.mxu3 %v14588_v20  ;;  %17018 = vst [vmem:[#allocation370_spill] sm:$0xff] %v14609_v2 }
 0x213   :  { %4147 = vmatpush.bf16.msrb.mxu2 %v14609_v2  ;;  %4170 = vmatpush.bf16.msrb.mxu3 %v14611_v57  ;;  %17020 = vst [vmem:[#allocation372_spill] sm:$0xff] %v14621_v61  ;;  %v14625_v2 = vor.u32 %v12220_v41, %v10304_v11  ;;  %v14627_v57 = vpack.c.b16 %v3278_v18, %v3278_v18  ;;  %v10286_v41 = vld [vmem:[#allocation2 + $0xb00] sm:$0xf]  ;;  %v12216_v18 = vld [vmem:[#allocation2 + $0xb08] sm:$0xf0] }
 0x214   :  { %v2555_v4 = vpop.f32.mrf.mxu0  ;;  %v14643_v1 = vor.u32 %v12216_v18, %v10286_v41 }
 0x215   :  { %v2599_v39 = vpop.f32.mrf.mxu2  ;;  %v2622_v53 = vpop.f32.mrf.mxu3  ;;  %v12243_v4 = vld [vmem:[#allocation2 + $0xbe0] sm:$0xf0]  ;;  %17022 = vst [vmem:[#allocation374_spill] sm:$0xff] %v14625_v2  ;;  %4101 = vmatpush.bf16.msrb.mxu0 %v14625_v2 }
 0x216   :  { %v2623_v6 = vadd.f32 %v2622_v53, %v2599_v39  ;;  %v2578_v59 = vpop.f32.mrf.mxu1  ;;  %v14623_v24 = vor.u32 %v12243_v4, %v10394_v22  ;;  %v12244_v39 = vld [vmem:[#allocation2 + $0xbec] sm:$0xf]  ;;  %v10400_v53 = vld [vmem:[#allocation2 + $0xbf4] sm:$0xf0]  ;;  %v10382_v22 = vld [vmem:[#allocation2 + $0xbc0] sm:$0xf] }
 0x217   :  { %4148 = vmatpush.bf16.msrb.mxu2 %v14621_v61  ;;  %17024 = vst [vmem:[#allocation376_spill] sm:$0xff] %v14643_v1  ;;  %v12213_v61 = vld [vmem:[#allocation2 + $0xaf0] sm:$0xf0] }
 0x218   :  { %v14619_v13 = vadd.f32 %v2623_v6, %v14432_v51  ;;  %17021 = vst [vmem:[#allocation373_spill] sm:$0xff] %v14623_v24  ;;  %v14630_v51 = vor.u32 %v12244_v39, %v10400_v53  ;;  %4171 = vmatpush.bf16.msrb.mxu3 %v14623_v24  ;;  %v12240_v39 = vld [vmem:[#allocation2 + $0xbc8] sm:$0xf0]  ;;  %v12217_v53 = vld [vmem:[#allocation2 + $0xb14] sm:$0xf] }
 0x219   :  { %v10388_v24 = vld [vmem:[#allocation2 + $0xbdc] sm:$0xf0] }
 0x21a   :  { %17023 = vst [vmem:[#allocation375_spill] sm:$0xff] %v14630_v51  ;;  %4124 = vmatpush.bf16.msrb.mxu1 %v14630_v51  ;;  %v10370_v51 = vld [vmem:[#allocation2 + $0xba8] sm:$0xf] }
 0x21b   :  { %4149 = vmatpush.bf16.msrb.mxu2 %v14643_v1 }
 0x21c   :  { %v2635_v6 = vpop.f32.mrf.mxu0 }
 0x21d   :  { %v2601_v59 = vpop.f32.mrf.mxu2  ;;  %v2624_v40 = vpop.f32.mrf.mxu3 }
 0x21e   :  { %v2658_v10 = vpop.f32.mrf.mxu1  ;;  %v10292_v59 = vld [vmem:[#allocation2 + $0xb1c] sm:$0xf0]  ;;  %v14646_v40 = vor.u32 %v12240_v39, %v10382_v22  ;;  %v12237_v22 = vld [vmem:[#allocation2 + $0xbb0] sm:$0xf0] }
 0x21f   :  { %v2659_v11 = vadd.f32 %v2658_v10, %v2635_v6  ;;  %3566 = vmatmul.bf16.gmra.mxu0 %v14627_v57  ;;  %v14648_v6 = vor.u32 %v12217_v53, %v10292_v59  ;;  %v12241_v10 = vld [vmem:[#allocation2 + $0xbd4] sm:$0xf]  ;;  %v14658_v59 = vor.u32 %v12237_v22, %v10370_v51  ;;  %v12214_v51 = vld [vmem:[#allocation2 + $0xafc] sm:$0xf]  ;;  %v10280_v22 = vld [vmem:[#allocation2 + $0xb04] sm:$0xf0] }
 0x220   :  { %17025 = vst [vmem:[#allocation377_spill] sm:$0xff] %v14646_v40  ;;  %4172 = vmatpush.bf16.msrb.mxu3 %v14646_v40  ;;  %v12210_v40 = vld [vmem:[#allocation2 + $0xad8] sm:$0xf0] }
 0x221   :  { %v14639_v4 = vadd.f32 %v2659_v11, %v14347_v48  ;;  %3589 = vmatmul.bf16.gmra.mxu1 %v14632_v47  ;;  %17026 = vst [vmem:[#allocation378_spill] sm:$0xff] %v14648_v6  ;;  %v14651_v48 = vor.u32 %v12241_v10, %v10388_v24  ;;  %v10274_v11 = vld [vmem:[#allocation2 + $0xae8] sm:$0xf]  ;;  %4102 = vmatpush.bf16.msrb.mxu0 %v14648_v6  ;;  %v10358_v6 = vld [vmem:[#allocation2 + $0xb90] sm:$0xf] }
 0x222   :  { %3612 = vmatmul.bf16.gmra.mxu2 %v14627_v57  ;;  %3635 = vmatmul.bf16.gmra.mxu3 %v14632_v47  ;;  %v14655_v18 = vor.u32 %v12213_v61, %v10274_v11  ;;  %17029 = vst [vmem:[#allocation381_spill] sm:$0xff] %v14658_v59  ;;  %v10202_v61 = vld [vmem:[%s16263_s0 + $0x150] sm:$0xf]  ;;  %v12196_v11 = vld [vmem:[%s16263_s0 + $0x154] sm:$0xf0] }
 0x223   :  { %17027 = vst [vmem:[#allocation379_spill] sm:$0xff] %v14651_v48  ;;  %4125 = vmatpush.bf16.msrb.mxu1 %v14651_v48 }
 0x224   :  { %17028 = vst [vmem:[#allocation380_spill] sm:$0xff] %v14655_v18  ;;  %v2637_v53 = vpop.f32.mrf.mxu0  ;;  %4150 = vmatpush.bf16.msrb.mxu2 %v14655_v18  ;;  %4173 = vmatpush.bf16.msrb.mxu3 %v14658_v59  ;;  %v10262_v18 = vld [vmem:[#allocation2 + $0xad0] sm:$0xf] }
 0x225   :  { %v3050_v41 = vpop.f32.mrf.mxu2  ;;  %v3073_v39 = vpop.f32.mrf.mxu3  ;;  %v14684_v48 = vor.u32 %v12210_v40, %v10262_v18 }
 0x226   :  { %v3074_v1 = vadd.f32 %v3073_v39, %v3050_v41  ;;  %v2660_v24 = vpop.f32.mrf.mxu1  ;;  %v12238_v41 = vld [vmem:[#allocation2 + $0xbbc] sm:$0xf] }
 0x227   :  { %v2661_v10 = vadd.f32 %v2660_v24, %v2637_v53  ;;  %v14680_v53 = vor.u32 %v12214_v51, %v10280_v22  ;;  %v10376_v24 = vld [vmem:[#allocation2 + $0xbc4] sm:$0xf0]  ;;  %17032 = vst [vmem:[#allocation384_spill] sm:$0xff] %v14684_v48  ;;  %v14693_v22 = vor.u32 %v12235_v42, %v10364_v55  ;;  %v10256_v55 = vld [vmem:[#allocation2 + $0xad4] sm:$0xf0] }
 0x228   :  { %v14662_v2 = vadd.f32 %v3074_v1, %v14462_v27  ;;  %v12195_v27 = vld [vmem:[%s16263_s0 + $0x154] sm:$0xf]  ;;  %v10204_v1 = vld [vmem:[%s16263_s0 + $0x158] sm:$0xf0]  ;;  %v14682_v59 = vor.u32 %v12238_v41, %v10376_v24  ;;  %4151 = vmatpush.bf16.msrb.mxu2 %v14684_v48  ;;  %v14695_v41 = vor.u32 %v12196_v11, %v10202_v61  ;;  %v12232_v42 = vld [vmem:[#allocation2 + $0xb8c] sm:$0xf] }
 0x229   :  { %v14672_v39 = vadd.f32 %v2661_v10, %v14371_v32  ;;  %17030 = vst [vmem:[#allocation382_spill] sm:$0xff] %v14680_v53  ;;  %v12234_v32 = vld [vmem:[#allocation2 + $0xb98] sm:$0xf0]  ;;  %v12211_v10 = vld [vmem:[#allocation2 + $0xae4] sm:$0xf]  ;;  %4103 = vmatpush.bf16.msrb.mxu0 %v14680_v53 }
 0x22a   :  { %17031 = vst [vmem:[#allocation383_spill] sm:$0xff] %v14682_v59  ;;  %v14687_v52 = vor.u32 %v12234_v32, %v10358_v6  ;;  %4126 = vmatpush.bf16.msrb.mxu1 %v14682_v59  ;;  %v14691_v51 = vor.u32 %v12211_v10, %v10268_v60  ;;  %v14698_v32 = vor.u32 %v12195_v27, %v10204_v1  ;;  %v12208_v60 = vld [vmem:[#allocation2 + $0xacc] sm:$0xf]  ;;  %v12207_v11 = vld [vmem:[#allocation2 + $0xac0] sm:$0xf0] }
 0x22b   :  { %17035 = vst [vmem:[#allocation387_spill] sm:$0xff] %v14693_v22  ;;  %v10346_v27 = vld [vmem:[#allocation2 + $0xb78] sm:$0xf]  ;;  %v14711_v1 = vor.u32 %v12208_v60, %v10256_v55  ;;  %v12231_v10 = vld [vmem:[#allocation2 + $0xb80] sm:$0xf0] }
 0x22c   :  { %17033 = vst [vmem:[#allocation385_spill] sm:$0xff] %v14687_v52  ;;  %v2640_v18 = vpop.f32.mrf.mxu0  ;;  %4174 = vmatpush.bf16.msrb.mxu3 %v14687_v52  ;;  %v12229_v52 = vld [vmem:[#allocation2 + $0xb74] sm:$0xf]  ;;  %v10226_v48 = vld [vmem:[#allocation2 + $0xa88] sm:$0xf] }
 0x22d   :  { %v3052_v9 = vpop.f32.mrf.mxu2  ;;  %17034 = vst [vmem:[#allocation386_spill] sm:$0xff] %v14691_v51  ;;  %v3075_v40 = vpop.f32.mrf.mxu3  ;;  %4104 = vmatpush.bf16.msrb.mxu0 %v14691_v51  ;;  %v12201_v51 = vld [vmem:[#allocation2 + $0xa90] sm:$0xf0] }
 0x22e   :  { %v3076_v6 = vadd.f32 %v3075_v40, %v3052_v9  ;;  %v2663_v24 = vpop.f32.mrf.mxu1  ;;  %4127 = vmatpush.bf16.msrb.mxu1 %v14693_v22  ;;  %v10250_v9 = vld [vmem:[#allocation2 + $0xab8] sm:$0xf]  ;;  %17036 = vst [vmem:[#allocation388_spill] sm:$0xff] %v14711_v1 }
 0x22f   :  { %v2664_v53 = vadd.f32 %v2663_v24, %v2640_v18  ;;  %3648 = vmatmul.bf16.vlgmr.msra.gmra.mxu0 %v14512_v31  ;;  %v10352_v40 = vld [vmem:[#allocation2 + $0xb94] sm:$0xf0]  ;;  %v14716_v18 = vor.u32 %v12231_v10, %v10346_v27  ;;  %v10244_v24 = vld [vmem:[#allocation2 + $0xabc] sm:$0xf0] }
 0x230   :  { %v14702_v59 = vadd.f32 %v3076_v6, %v14501_v37  ;;  %v14714_v37 = vor.u32 %v12207_v11, %v10250_v9  ;;  %v12205_v6 = vld [vmem:[#allocation2 + $0xab4] sm:$0xf]  ;;  %v10340_v11 = vld [vmem:[#allocation2 + $0xb7c] sm:$0xf0] }
 0x231   :  { %v14707_v61 = vadd.f32 %v2664_v53, %v14399_v54  ;;  %3671 = vmatmul.bf16.vlgmr.msra.gmra.mxu1 %v14520_v30  ;;  %17038 = vst [vmem:[#allocation390_spill] sm:$0xff] %v14716_v18  ;;  %4105 = vmatpush.bf16.msrb.mxu0 %v14711_v1  ;;  %v14719_v54 = vor.u32 %v12232_v42, %v10352_v40  ;;  %v10322_v30 = vld [vmem:[#allocation2 + $0xb48] sm:$0xf] }
 0x232   :  { %4063 = vmatmul.bf16.vlgmr.msra.gmra.mxu2 %v14695_v41  ;;  %4086 = vmatmul.bf16.vlgmr.msra.gmra.mxu3 %v14698_v32  ;;  %17037 = vst [vmem:[#allocation389_spill] sm:$0xff] %v14714_v37  ;;  %v14724_v9 = vor.u32 %v12205_v6, %v10244_v24  ;;  %v14726_v1 = vor.u32 %v12229_v52, %v10340_v11  ;;  %v12198_v6 = vld [vmem:[%s16263_s0 + $0x164] sm:$0xf0]  ;;  %v10238_v24 = vld [vmem:[#allocation2 + $0xaa0] sm:$0xf] }
 0x233   :  { %17039 = vst [vmem:[#allocation391_spill] sm:$0xff] %v14719_v54  ;;  %4152 = vmatpush.bf16.msrb.mxu2 %v14714_v37  ;;  %4175 = vmatpush.bf16.msrb.mxu3 %v14716_v18  ;;  %v10210_v37 = vld [vmem:[%s16263_s0 + $0x160] sm:$0xf]  ;;  %v12204_v18 = vld [vmem:[#allocation2 + $0xaa8] sm:$0xf0] }
 0x234   :  { %v2642_v55 = vpop.f32.mrf.mxu0  ;;  %4128 = vmatpush.bf16.msrb.mxu1 %v14719_v54  ;;  %17040 = vst [vmem:[#allocation392_spill] sm:$0xff] %v14724_v9  ;;  %v12228_v11 = vld [vmem:[#allocation2 + $0xb68] sm:$0xf0] }
 0x235   :  { %v3055_v53 = vpop.f32.mrf.mxu2  ;;  %v3078_v60 = vpop.f32.mrf.mxu3  ;;  %17041 = vst [vmem:[#allocation393_spill] sm:$0xff] %v14726_v1  ;;  %4106 = vmatpush.bf16.msrb.mxu0 %v14724_v9 }
 0x236   :  { %v3079_v27 = vadd.f32 %v3078_v60, %v3055_v53  ;;  %v2665_v10 = vpop.f32.mrf.mxu1  ;;  %v10334_v53 = vld [vmem:[#allocation2 + $0xb60] sm:$0xf]  ;;  %v12197_v60 = vld [vmem:[%s16263_s0 + $0x164] sm:$0xf] }
 0x237   :  { %v2666_v42 = vadd.f32 %v2665_v10, %v2642_v55  ;;  %v14747_v55 = vor.u32 %v12204_v18, %v10238_v24  ;;  %v10232_v10 = vld [vmem:[#allocation2 + $0xaa4] sm:$0xf0]  ;;  %v14750_v9 = vor.u32 %v12228_v11, %v10334_v53  ;;  %v12225_v18 = vld [vmem:[#allocation2 + $0xb50] sm:$0xf0]  ;;  %v12199_v11 = vld [vmem:[#allocation2 + $0xa84] sm:$0xf] }
 0x238   :  { %v14730_v40 = vadd.f32 %v3079_v27, %v14530_v19  ;;  %v10212_v19 = vld [vmem:[%s16263_s0 + $0x168] sm:$0xf0]  ;;  %4129 = vmatpush.bf16.msrb.mxu1 %v14726_v1  ;;  %v12202_v27 = vld [vmem:[#allocation2 + $0xa9c] sm:$0xf]  ;;  %v14759_v1 = vor.u32 %v12201_v51, %v10226_v48  ;;  %v14761_v53 = vor.u32 %v12225_v18, %v10322_v30 }
 0x239   :  { %v14739_v52 = vadd.f32 %v2666_v42, %v14427_v28  ;;  %17043 = vst [vmem:[#allocation395_spill] sm:$0xff] %v14747_v55  ;;  %v14752_v54 = vor.u32 %v12202_v27, %v10232_v10  ;;  %v12226_v28 = vld [vmem:[#allocation2 + $0xb5c] sm:$0xf]  ;;  %v10328_v42 = vld [vmem:[#allocation2 + $0xb64] sm:$0xf0]  ;;  %4153 = vmatpush.bf16.msrb.mxu2 %v14747_v55  ;;  %4176 = vmatpush.bf16.msrb.mxu3 %v14750_v9  ;;  %v17046_v18 = vld [vmem:[#allocation24_spill] sm:$0xff] }
 0x23a   :  { %17042 = vst [vmem:[#allocation394_spill] sm:$0xff] %v14730_v40  ;;  %v14755_v22 = vor.u32 %v12226_v28, %v10328_v42  ;;  %v10220_v27 = vld [vmem:[#allocation2 + $0xa8c] sm:$0xf0]  ;;  %v12223_v10 = vld [vmem:[#allocation2 + $0xb44] sm:$0xf]  ;;  %v14763_v55 = vor.u32 %v12198_v6, %v10210_v37  ;;  %v14766_v40 = vor.u32 %v12197_v60, %v10212_v19 }
 0x23b   :  { %17044 = vst [vmem:[#allocation396_spill] sm:$0xff] %v14750_v9  ;;  %4107 = vmatpush.bf16.msrb.mxu0 %v14752_v54  ;;  %v10316_v28 = vld [vmem:[#allocation2 + $0xb4c] sm:$0xf0]  ;;  %v14768_v9 = vor.u32 %v12199_v11, %v10220_v27  ;;  %v17050_v11 = vld [vmem:[#allocation26_spill] sm:$0xff] }
 0x23c   :  { %v2645_v5 = vpop.f32.mrf.mxu0  ;;  %4130 = vmatpush.bf16.msrb.mxu1 %v14755_v22  ;;  %v14771_v30 = vor.u32 %v12223_v10, %v10316_v28  ;;  %v10199_v6 = vld [vmem:[%s16263_s0 + $0x170] sm:$0xff] }
 0x23d   :  { %v3057_v24 = vpop.f32.mrf.mxu2  ;;  %v3080_v31 = vpop.f32.mrf.mxu3  ;;  %4154 = vmatpush.bf16.msrb.mxu2 %v14759_v1  ;;  %4177 = vmatpush.bf16.msrb.mxu3 %v14761_v53  ;;  %v17051_v27 = vld [vmem:[#allocation32_spill] sm:$0xff] }
 0x23e   :  { %v3081_v42 = vadd.f32 %v3080_v31, %v3057_v24  ;;  %v2668_v35 = vpop.f32.mrf.mxu1  ;;  %v17049_v24 = vld [vmem:[#allocation31_spill] sm:$0xff] }
 0x23f   :  { %v2669_v48 = vadd.f32 %v2668_v35, %v2645_v5  ;;  %3653 = vmatmul.bf16.gmra.mxu0 %v14580_v15 }
 0x240   :  { %v14774_v51 = vadd.f32 %v3081_v42, %v14568_v14  ;;  %4108 = vmatpush.bf16.msrb.mxu0 %v14768_v9  ;;  %4131 = vmatpush.bf16.msrb.mxu1 %v14771_v30 }
 0x241   :  { %v14779_v37 = vadd.f32 %v2669_v48, %v14446_v26  ;;  %3676 = vmatmul.bf16.gmra.mxu1 %v14588_v20  ;;  %4302 = vmatpush.bf16.msra.mxu2 %v12983_v8  ;;  %v3786_v8 = vunpack.c.h.b16 %v10199_v6 }
 0x242   :  { %4068 = vmatmul.bf16.gmra.mxu2 %v14763_v55  ;;  %4091 = vmatmul.bf16.gmra.mxu3 %v14766_v40 }
 0x243   :  { %4325 = vmatpush.bf16.msra.mxu3 %v12986_v12 }
 0x244   :  { %4256 = vmatpush.bf16.msra.mxu0 %v12979_v3  ;;  %v2647_v26 = vpop.f32.mrf.mxu0  ;;  %4279 = vmatpush.bf16.msra.mxu1 %v12981_v7  ;;  %v3785_v3 = vunpack.c.l.b16 %v10199_v6  ;;  %v17056_v6 = vld [vmem:[#allocation33_spill] sm:$0xff] }
 0x245   :  { %v3060_v35 = vpop.f32.mrf.mxu2  ;;  %v3083_v5 = vpop.f32.mrf.mxu3  ;;  %4303 = vmatpush.bf16.msra.mxu2 %v12995_v21 }
 0x246   :  { %v3084_v31 = vadd.f32 %v3083_v5, %v3060_v35  ;;  %v2670_v14 = vpop.f32.mrf.mxu1  ;;  %v14803_v19 = vpack.c.b16 %v3785_v3, %v3785_v3  ;;  %v17053_v5 = vld [vmem:[#allocation30_spill] sm:$0xff] }
 0x247   :  { %4326 = vmatpush.bf16.msra.mxu3 %v12997_v25  ;;  %v17057_v3 = vld [vmem:[#allocation34_spill] sm:$0xff] }
 0x248   :  { %v14795_v60 = vadd.f32 %v3084_v31, %v14602_v63  ;;  %4257 = vmatpush.bf16.msra.mxu0 %v12990_v16  ;;  %4280 = vmatpush.bf16.msra.mxu1 %v12992_v17  ;;  %v14806_v63 = vpack.c.b16 %v3786_v8, %v3786_v8  ;;  %v17055_v31 = vld [vmem:[#allocation36_spill] sm:$0xff]  ;;  %v17058_v8 = vld [vmem:[#allocation37_spill] sm:$0xff] }
 0x249   :  { %4304 = vmatpush.bf16.msra.mxu2 %v13006_v34 }
 0x24b   :  { %4327 = vmatpush.bf16.msra.mxu3 %v13009_v38 }
 0x24c   :  { %4258 = vmatpush.bf16.msra.mxu0 %v13000_v29  ;;  %v3096_v21 = vpop.f32.mrf.mxu0  ;;  %4281 = vmatpush.bf16.msra.mxu1 %v13004_v33 }
 0x24d   :  { %v3062_v7 = vpop.f32.mrf.mxu2  ;;  %v3085_v12 = vpop.f32.mrf.mxu3  ;;  %4305 = vmatpush.bf16.msra.mxu2 %v13018_v46 }
 0x24e   :  { %v3119_v25 = vpop.f32.mrf.mxu1  ;;  %v17059_v7 = vld [vmem:[#allocation38_spill] sm:$0xff]  ;;  %v17060_v12 = vld [vmem:[#allocation39_spill] sm:$0xff] }
 0x24f   :  { %v3120_v16 = vadd.f32 %v3119_v25, %v3096_v21  ;;  %3658 = vmatmul.bf16.gmra.mxu0 %v14627_v57  ;;  %4328 = vmatpush.bf16.msra.mxu3 %v13021_v50  ;;  %v17061_v25 = vld [vmem:[#allocation41_spill] sm:$0xff] }
 0x250   :  { %4259 = vmatpush.bf16.msra.mxu0 %v13012_v44  ;;  %4282 = vmatpush.bf16.msra.mxu1 %v13016_v45 }
 0x251   :  { %v14812_v17 = vadd.f32 %v3120_v16, %v14491_v49  ;;  %3681 = vmatmul.bf16.gmra.mxu1 %v14632_v47  ;;  %4306 = vmatpush.bf16.msra.mxu2 %v13030_v58  ;;  %v17045_v49 = vld [vmem:[#allocation27_spill] sm:$0xff]  ;;  %v17047_v58 = vld [vmem:[#allocation28_spill] sm:$0xff] }
 0x252   :  { %4073 = vmatmul.bf16.gmra.mxu2 %v14803_v19  ;;  %4096 = vmatmul.bf16.gmra.mxu3 %v14806_v63 }
 0x253   :  { %4329 = vmatpush.bf16.msra.mxu3 %v13033_v62  ;;  %v17048_v62 = vld [vmem:[#allocation25_spill] sm:$0xff] }
 0x254   :  { %v3098_v34 = vpop.f32.mrf.mxu0  ;;  %4260 = vmatpush.bf16.msra.mxu0 %v13024_v56  ;;  %4283 = vmatpush.bf16.msra.mxu1 %v17046_v18  ;;  %v17065_v18 = vld [vmem:[#allocation45_spill] sm:$0xff] }
 0x255   :  { %v3142_v29 = vpop.f32.mrf.mxu2  ;;  %v3165_v33 = vpop.f32.mrf.mxu3  ;;  %4307 = vmatpush.bf16.msra.mxu2 %v17045_v49 }
 0x256   :  { %v3166_v38 = vadd.f32 %v3165_v33, %v3142_v29  ;;  %v3121_v46 = vpop.f32.mrf.mxu1 }
 0x257   :  { %v3122_v50 = vadd.f32 %v3121_v46, %v3098_v34  ;;  %4330 = vmatpush.bf16.msra.mxu3 %v17047_v58  ;;  %v17062_v34 = vld [vmem:[#allocation40_spill] sm:$0xff]  ;;  %v17063_v46 = vld [vmem:[#allocation42_spill] sm:$0xff] }
 0x258   :  { %v14825_v44 = vadd.f32 %v3166_v38, %v14639_v4  ;;  %4261 = vmatpush.bf16.msra.mxu0 %v17048_v62  ;;  %4284 = vmatpush.bf16.msra.mxu1 %v17050_v11  ;;  %v17052_v4 = vld [vmem:[#allocation29_spill] sm:$0xff]  ;;  %v17066_v58 = vld [vmem:[#allocation44_spill] sm:$0xff]  ;;  %v17068_v11 = vld [vmem:[#allocation47_spill] sm:$0xff] }
 0x259   :  { %v14829_v45 = vadd.f32 %v3122_v50, %v14525_v23  ;;  %4308 = vmatpush.bf16.msra.mxu2 %v17049_v24  ;;  %v17054_v23 = vld [vmem:[#allocation35_spill] sm:$0xff]  ;;  %v17067_v24 = vld [vmem:[#allocation46_spill] sm:$0xff] }
 0x25a   :  { %v17064_v50 = vld [vmem:[#allocation43_spill] sm:$0xff] }
 0x25b   :  { %4331 = vmatpush.bf16.msra.mxu3 %v17051_v27 }
 0x25c   :  { %v3101_v28 = vpop.f32.mrf.mxu0  ;;  %4262 = vmatpush.bf16.msra.mxu0 %v17052_v4  ;;  %4285 = vmatpush.bf16.msra.mxu1 %v17053_v5  ;;  %v17071_v4 = vld [vmem:[#allocation50_spill] sm:$0xff]  ;;  %v17072_v5 = vld [vmem:[#allocation51_spill] sm:$0xff] }
 0x25d   :  { %v3144_v56 = vpop.f32.mrf.mxu2  ;;  %v3167_v10 = vpop.f32.mrf.mxu3  ;;  %4309 = vmatpush.bf16.msra.mxu2 %v17054_v23  ;;  %v17073_v23 = vld [vmem:[#allocation52_spill] sm:$0xff] }
 0x25e   :  { %v3168_v42 = vadd.f32 %v3167_v10, %v3144_v56  ;;  %v3124_v48 = vpop.f32.mrf.mxu1 }
 0x25f   :  { %v3125_v35 = vadd.f32 %v3124_v48, %v3101_v28  ;;  %4109 = vmatmul.bf16.vlgmr.msrb.gmra.mxu0 %v14695_v41  ;;  %4332 = vmatpush.bf16.msra.mxu3 %v17055_v31  ;;  %v17070_v48 = vld [vmem:[#allocation48_spill] sm:$0xff]  ;;  %v17074_v31 = vld [vmem:[#allocation53_spill] sm:$0xff] }
 0x260   :  { %v14839_v26 = vadd.f32 %v3168_v42, %v14672_v39  ;;  %4263 = vmatpush.bf16.msra.mxu0 %v17056_v6  ;;  %4286 = vmatpush.bf16.msra.mxu1 %v17057_v3  ;;  %v17075_v6 = vld [vmem:[#allocation54_spill] sm:$0xff] }
 0x261   :  { %v14844_v14 = vadd.f32 %v3125_v35, %v14559_v43  ;;  %4132 = vmatmul.bf16.vlgmr.msrb.gmra.mxu1 %v14698_v32 }
 0x262   :  { %4155 = vmatmul.bf16.vlgmr.msrb.gmra.mxu2 %v14695_v41  ;;  %4178 = vmatmul.bf16.vlgmr.msrb.gmra.mxu3 %v14698_v32 }
 0x263   :  { %4394 = vmatpush.bf16.msrb.mxu2 %v17058_v8  ;;  %4417 = vmatpush.bf16.msrb.mxu3 %v17059_v7  ;;  %v17076_v7 = vld [vmem:[#allocation55_spill] sm:$0xff] }
 0x264   :  { %4348 = vmatpush.bf16.msrb.mxu0 %v17060_v12  ;;  %v3103_v43 = vpop.f32.mrf.mxu0  ;;  %4371 = vmatpush.bf16.msrb.mxu1 %v17061_v25  ;;  %v17077_v12 = vld [vmem:[#allocation56_spill] sm:$0xff]  ;;  %v17079_v25 = vld [vmem:[#allocation58_spill] sm:$0xff] }
 0x265   :  { %v3147_v39 = vpop.f32.mrf.mxu2  ;;  %v3170_v21 = vpop.f32.mrf.mxu3 }
 0x266   :  { %v3171_v16 = vadd.f32 %v3170_v21, %v3147_v39  ;;  %v3126_v29 = vpop.f32.mrf.mxu1  ;;  %v17078_v21 = vld [vmem:[#allocation57_spill] sm:$0xff] }
 0x267   :  { %v3127_v33 = vadd.f32 %v3126_v29, %v3103_v43  ;;  %4395 = vmatpush.bf16.msrb.mxu2 %v17062_v34  ;;  %4418 = vmatpush.bf16.msrb.mxu3 %v17063_v46  ;;  %v17081_v29 = vld [vmem:[#allocation60_spill] sm:$0xff]  ;;  %v17083_v46 = vld [vmem:[#allocation62_spill] sm:$0xff] }
 0x268   :  { %v14857_v38 = vadd.f32 %v3171_v16, %v14707_v61  ;;  %4349 = vmatpush.bf16.msrb.mxu0 %v17064_v50  ;;  %4372 = vmatpush.bf16.msrb.mxu1 %v17065_v18  ;;  %v17069_v61 = vld [vmem:[#allocation49_spill] sm:$0xff]  ;;  %v17080_v16 = vld [vmem:[#allocation59_spill] sm:$0xff] }
 0x269   :  { %v14862_v49 = vadd.f32 %v3127_v33, %v14597_v36  ;;  %v17082_v33 = vld [vmem:[#allocation61_spill] sm:$0xff] }
 0x26b   :  { %4396 = vmatpush.bf16.msrb.mxu2 %v17066_v58  ;;  %4419 = vmatpush.bf16.msrb.mxu3 %v17067_v24 }
 0x26c   :  { %4350 = vmatpush.bf16.msrb.mxu0 %v17068_v11  ;;  %v3106_v27 = vpop.f32.mrf.mxu0  ;;  %4373 = vmatpush.bf16.msrb.mxu1 %v17069_v61  ;;  %v17085_v11 = vld [vmem:[#allocation64_spill] sm:$0xff]  ;;  %v17088_v61 = vld [vmem:[#allocation69_spill] sm:$0xff] }
 0x26d   :  { %v3149_v62 = vpop.f32.mrf.mxu2  ;;  %v3172_v56 = vpop.f32.mrf.mxu3 }
 0x26e   :  { %v3173_v10 = vadd.f32 %v3172_v56, %v3149_v62  ;;  %v3129_v28 = vpop.f32.mrf.mxu1  ;;  %v17084_v62 = vld [vmem:[#allocation63_spill] sm:$0xff]  ;;  %v17087_v56 = vld [vmem:[#allocation66_spill] sm:$0xff] }
 0x26f   :  { %v3130_v42 = vadd.f32 %v3129_v28, %v3106_v27  ;;  %4397 = vmatpush.bf16.msrb.mxu2 %v17070_v48  ;;  %4114 = vmatmul.bf16.gmra.mxu0 %v14763_v55 }
 0x270   :  { %v14871_v36 = vadd.f32 %v3173_v10, %v14739_v52  ;;  %4420 = vmatpush.bf16.msrb.mxu3 %v17071_v4  ;;  %4351 = vmatpush.bf16.msrb.mxu0 %v17072_v5  ;;  %v17089_v10 = vld [vmem:[#allocation70_spill] sm:$0xff] }
 0x271   :  { %v14876_v35 = vadd.f32 %v3130_v42, %v14619_v13  ;;  %4137 = vmatmul.bf16.gmra.mxu1 %v14766_v40 }
 0x272   :  { %4160 = vmatmul.bf16.gmra.mxu2 %v14763_v55  ;;  %4183 = vmatmul.bf16.gmra.mxu3 %v14766_v40 }
 0x273   :  { %4398 = vmatpush.bf16.msrb.mxu2 %v17073_v23  ;;  %4374 = vmatpush.bf16.msrb.mxu1 %v17074_v31 }
 0x274   :  { %4421 = vmatpush.bf16.msrb.mxu3 %v17075_v6  ;;  %v3108_v8 = vpop.f32.mrf.mxu0  ;;  %4352 = vmatpush.bf16.msrb.mxu0 %v17076_v7 }
 0x275   :  { %v3152_v52 = vpop.f32.mrf.mxu2  ;;  %v3175_v3 = vpop.f32.mrf.mxu3 }
 0x276   :  { %v3176_v39 = vadd.f32 %v3175_v3, %v3152_v52  ;;  %v3131_v13 = vpop.f32.mrf.mxu1 }
 0x277   :  { %4399 = vmatpush.bf16.msrb.mxu2 %v17077_v12  ;;  %4375 = vmatpush.bf16.msrb.mxu1 %v17078_v21  ;;  %v17090_v12 = vld [vmem:[#allocation394_spill] sm:$0xff] }
 0x278   :  { %v14889_v43 = vadd.f32 %v3176_v39, %v14779_v37  ;;  %4422 = vmatpush.bf16.msrb.mxu3 %v17079_v25  ;;  %4353 = vmatpush.bf16.msrb.mxu0 %v17080_v16  ;;  %v17086_v37 = vld [vmem:[#allocation65_spill] sm:$0xff]  ;;  %v17094_v16 = vld [vmem:[#allocation71_spill] sm:$0xff] }
 0x279   :  { %v17091_v25 = vld [vmem:[#allocation285_spill] sm:$0xff] }
 0x27b   :  { %4400 = vmatpush.bf16.msrb.mxu2 %v17081_v29  ;;  %4376 = vmatpush.bf16.msrb.mxu1 %v17082_v33 }
 0x27c   :  { %4423 = vmatpush.bf16.msrb.mxu3 %v17083_v46  ;;  %v3557_v18 = vpop.f32.mrf.mxu0  ;;  %4354 = vmatpush.bf16.msrb.mxu0 %v17084_v62  ;;  %v17097_v62 = vld [vmem:[#allocation74_spill] sm:$0xff] }
 0x27d   :  { %v3154_v34 = vpop.f32.mrf.mxu2  ;;  %v3177_v50 = vpop.f32.mrf.mxu3 }
 0x27e   :  { %v3580_v58 = vpop.f32.mrf.mxu1 }
 0x27f   :  { %v3581_v24 = vadd.f32 %v3580_v58, %v3557_v18  ;;  %4377 = vmatpush.bf16.msrb.mxu1 %v17085_v11  ;;  %4401 = vmatpush.bf16.msrb.mxu2 %v17086_v37  ;;  %v17096_v18 = vld [vmem:[#allocation72_spill] sm:$0xff]  ;;  %v17099_v37 = vld [vmem:[#allocation77_spill] sm:$0xff] }
 0x280   :  { %4119 = vmatmul.bf16.gmra.mxu0 %v14803_v19  ;;  %4424 = vmatpush.bf16.msrb.mxu3 %v17087_v56 }
 0x281   :  { %v14902_v27 = vadd.f32 %v3581_v24, %v14662_v2  ;;  %4142 = vmatmul.bf16.gmra.mxu1 %v14806_v63  ;;  %4355 = vmatpush.bf16.msrb.mxu0 %v17088_v61  ;;  %v17098_v24 = vld [vmem:[#allocation75_spill] sm:$0xff]  ;;  %v17100_v61 = vld [vmem:[#allocation76_spill] sm:$0xff] }
 0x282   :  { %4165 = vmatmul.bf16.gmra.mxu2 %v14803_v19  ;;  %4188 = vmatmul.bf16.gmra.mxu3 %v14806_v63 }
 0x283   :  { %4378 = vmatpush.bf16.msrb.mxu1 %v17089_v10  ;;  %v17101_v10 = vld [vmem:[#allocation78_spill] sm:$0xff] }
 0x284   :  { %v3559_v48 = vpop.f32.mrf.mxu0 }
 0x285   :  { %v3603_v28 = vpop.f32.mrf.mxu2  ;;  %v3626_v42 = vpop.f32.mrf.mxu3 }
 0x286   :  { %v3627_v4 = vadd.f32 %v3626_v42, %v3603_v28  ;;  %v3582_v5 = vpop.f32.mrf.mxu1  ;;  %v17102_v28 = vld [vmem:[#allocation80_spill] sm:$0xff] }
 0x287   :  { %v3583_v23 = vadd.f32 %v3582_v5, %v3559_v48  ;;  %v17103_v48 = vld [vmem:[#allocation81_spill] sm:$0xff] }
 0x288   :  { %v14910_v31 = vadd.f32 %v3627_v4, %v14812_v17  ;;  %v17093_v17 = vld [vmem:[#allocation68_spill] sm:$0xff] }
 0x289   :  { %v14913_v2 = vadd.f32 %v3583_v23, %v14702_v59  ;;  %v17092_v59 = vld [vmem:[#allocation67_spill] sm:$0xff] }
 0x28c   :  { %v3562_v3 = vpop.f32.mrf.mxu0 }
 0x28d   :  { %v3605_v52 = vpop.f32.mrf.mxu2  ;;  %v3628_v6 = vpop.f32.mrf.mxu3 }
 0x28e   :  { %v3629_v8 = vadd.f32 %v3628_v6, %v3605_v52  ;;  %v3585_v39 = vpop.f32.mrf.mxu1 }
 0x28f   :  { %v3586_v13 = vadd.f32 %v3585_v39, %v3562_v3  ;;  %v17105_v3 = vld [vmem:[#allocation82_spill] sm:$0xff] }
 0x290   :  { %v14916_v7 = vadd.f32 %v3629_v8, %v14829_v45  ;;  %4264 = vmatmul.bf16.vlgmr.msra.gmra.mxu0 %v14203_v0  ;;  %v17095_v45 = vld [vmem:[#allocation73_spill] sm:$0xff]  ;;  %v17107_v39 = vld [vmem:[#allocation298_spill] sm:$0xff] }
 0x291   :  { %v14920_v21 = vadd.f32 %v3586_v13, %v17090_v12  ;;  %4287 = vmatmul.bf16.vlgmr.msra.gmra.mxu1 %v17091_v25  ;;  %4440 = vmatpush.bf16.msra.mxu0 %v17094_v16  ;;  %v17108_v13 = vld [vmem:[#allocation85_spill] sm:$0xff]  ;;  %v17111_v16 = vld [vmem:[#allocation86_spill] sm:$0xff] }
 0x292   :  { %4310 = vmatmul.bf16.vlgmr.msra.gmra.mxu2 %v14203_v0  ;;  %4333 = vmatmul.bf16.vlgmr.msra.gmra.mxu3 %v17091_v25 }
 0x293   :  { %4486 = vmatpush.bf16.msra.mxu2 %v17092_v59  ;;  %4509 = vmatpush.bf16.msra.mxu3 %v17093_v17  ;;  %v17109_v59 = vld [vmem:[#allocation299_spill] sm:$0xff]  ;;  %v17110_v17 = vld [vmem:[#allocation84_spill] sm:$0xff] }
 0x294   :  { %4463 = vmatpush.bf16.msra.mxu1 %v17095_v45  ;;  %v3564_v34 = vpop.f32.mrf.mxu0  ;;  %v17113_v45 = vld [vmem:[#allocation90_spill] sm:$0xff] }
 0x295   :  { %v3608_v29 = vpop.f32.mrf.mxu2  ;;  %v3631_v33 = vpop.f32.mrf.mxu3  ;;  %4441 = vmatpush.bf16.msra.mxu0 %v17098_v24  ;;  %v17117_v24 = vld [vmem:[#allocation94_spill] sm:$0xff] }
 0x296   :  { %v3632_v46 = vadd.f32 %v3631_v33, %v3608_v29  ;;  %v3587_v50 = vpop.f32.mrf.mxu1  ;;  %v17112_v29 = vld [vmem:[#allocation89_spill] sm:$0xff] }
 0x297   :  { %4487 = vmatpush.bf16.msra.mxu2 %v17096_v18  ;;  %v3588_v58 = vadd.f32 %v3587_v50, %v3564_v34  ;;  %4510 = vmatpush.bf16.msra.mxu3 %v17097_v62  ;;  %v17114_v50 = vld [vmem:[#allocation87_spill] sm:$0xff]  ;;  %v17115_v18 = vld [vmem:[#allocation88_spill] sm:$0xff] }
 0x298   :  { %v14933_v11 = vadd.f32 %v3632_v46, %v14844_v14  ;;  %4464 = vmatpush.bf16.msra.mxu1 %v17099_v37  ;;  %v17104_v14 = vld [vmem:[#allocation79_spill] sm:$0xff] }
 0x299   :  { %v14937_v56 = vadd.f32 %v3588_v58, %v14774_v51  ;;  %4442 = vmatpush.bf16.msra.mxu0 %v17102_v28  ;;  %v17106_v51 = vld [vmem:[#allocation83_spill] sm:$0xff]  ;;  %v17116_v58 = vld [vmem:[#allocation93_spill] sm:$0xff] }
 0x29a   :  { %v17118_v37 = vld [vmem:[#allocation91_spill] sm:$0xff] }
 0x29b   :  { %4488 = vmatpush.bf16.msra.mxu2 %v17100_v61  ;;  %4511 = vmatpush.bf16.msra.mxu3 %v17101_v10  ;;  %v17119_v61 = vld [vmem:[#allocation92_spill] sm:$0xff]  ;;  %v17120_v10 = vld [vmem:[#allocation95_spill] sm:$0xff] }
 0x29c   :  { %4465 = vmatpush.bf16.msra.mxu1 %v17103_v48  ;;  %v3567_v5 = vpop.f32.mrf.mxu0 }
 0x29d   :  { %v3610_v42 = vpop.f32.mrf.mxu2  ;;  %v3633_v4 = vpop.f32.mrf.mxu3  ;;  %4443 = vmatpush.bf16.msra.mxu0 %v17106_v51 }
 0x29e   :  { %v3634_v23 = vadd.f32 %v3633_v4, %v3610_v42  ;;  %v3590_v52 = vpop.f32.mrf.mxu1  ;;  %v17121_v42 = vld [vmem:[#allocation97_spill] sm:$0xff] }
 0x29f   :  { %4489 = vmatpush.bf16.msra.mxu2 %v17104_v14  ;;  %v3591_v6 = vadd.f32 %v3590_v52, %v3567_v5  ;;  %4512 = vmatpush.bf16.msra.mxu3 %v17105_v3  ;;  %v17123_v14 = vld [vmem:[#allocation98_spill] sm:$0xff]  ;;  %v17126_v3 = vld [vmem:[#allocation100_spill] sm:$0xff] }
 0x2a0   :  { %v14947_v8 = vadd.f32 %v3634_v23, %v14862_v49  ;;  %4269 = vmatmul.bf16.gmra.mxu0 %v17107_v39  ;;  %4466 = vmatpush.bf16.msra.mxu1 %v17108_v13  ;;  %v17122_v23 = vld [vmem:[#allocation96_spill] sm:$0xff]  ;;  %v17127_v13 = vld [vmem:[#allocation309_spill] sm:$0xff] }
 0x2a1   :  { %v14952_v12 = vadd.f32 %v3591_v6, %v14795_v60  ;;  %4292 = vmatmul.bf16.gmra.mxu1 %v17109_v59  ;;  %4444 = vmatpush.bf16.msra.mxu0 %v17112_v29  ;;  %v17125_v6 = vld [vmem:[#allocation308_spill] sm:$0xff] }
 0x2a2   :  { %4315 = vmatmul.bf16.gmra.mxu2 %v17107_v39  ;;  %4338 = vmatmul.bf16.gmra.mxu3 %v17109_v59 }
 0x2a3   :  { %4490 = vmatpush.bf16.msra.mxu2 %v17110_v17  ;;  %4513 = vmatpush.bf16.msra.mxu3 %v17111_v16 }
 0x2a4   :  { %4467 = vmatpush.bf16.msra.mxu1 %v17113_v45  ;;  %v3569_v34 = vpop.f32.mrf.mxu0 }
 0x2a5   :  { %v3613_v49 = vpop.f32.mrf.mxu2  ;;  %v3636_v33 = vpop.f32.mrf.mxu3  ;;  %4445 = vmatpush.bf16.msra.mxu0 %v17116_v58 }
 0x2a6   :  { %v3637_v46 = vadd.f32 %v3636_v33, %v3613_v49  ;;  %v3592_v60 = vpop.f32.mrf.mxu1 }
 0x2a7   :  { %4491 = vmatpush.bf16.msra.mxu2 %v17114_v50  ;;  %4514 = vmatpush.bf16.msra.mxu3 %v17115_v18 }
 0x2a8   :  { %v14965_v62 = vadd.f32 %v3637_v46, %v14876_v35  ;;  %4468 = vmatpush.bf16.msra.mxu1 %v17117_v24  ;;  %v17124_v35 = vld [vmem:[#allocation99_spill] sm:$0xff] }
 0x2a9   :  { %4446 = vmatpush.bf16.msra.mxu0 %v17120_v10  ;;  %v17130_v10 = vld [vmem:[#allocation101_spill] sm:$0xff] }
 0x2ab   :  { %4492 = vmatpush.bf16.msra.mxu2 %v17118_v37  ;;  %4515 = vmatpush.bf16.msra.mxu3 %v17119_v61 }
 0x2ac   :  { %4469 = vmatpush.bf16.msra.mxu1 %v17121_v42  ;;  %v3649_v4 = vpop.f32.mrf.mxu0  ;;  %v17132_v42 = vld [vmem:[#allocation105_spill] sm:$0xff] }
 0x2ad   :  { %v3615_v28 = vpop.f32.mrf.mxu2  ;;  %v3638_v48 = vpop.f32.mrf.mxu3  ;;  %4447 = vmatpush.bf16.msra.mxu0 %v17124_v35 }
 0x2ae   :  { %v3672_v5 = vpop.f32.mrf.mxu1  ;;  %v17131_v28 = vld [vmem:[#allocation102_spill] sm:$0xff] }
 0x2af   :  { %4493 = vmatpush.bf16.msra.mxu2 %v17122_v23  ;;  %v3673_v52 = vadd.f32 %v3672_v5, %v3649_v4  ;;  %4516 = vmatpush.bf16.msra.mxu3 %v17123_v14  ;;  %v17134_v23 = vld [vmem:[#allocation103_spill] sm:$0xff] }
 0x2b0   :  { %4274 = vmatmul.bf16.gmra.mxu0 %v17125_v6  ;;  %4470 = vmatpush.bf16.msra.mxu1 %v17126_v3  ;;  %v17136_v14 = vld [vmem:[#allocation107_spill] sm:$0xff]  ;;  %v17137_v3 = vld [vmem:[#allocation109_spill] sm:$0xff] }
 0x2b1   :  { %v14978_v51 = vadd.f32 %v3673_v52, %v14825_v44  ;;  %4297 = vmatmul.bf16.gmra.mxu1 %v17127_v13  ;;  %v17135_v52 = vld [vmem:[#allocation104_spill] sm:$0xff] }
 0x2b2   :  { %4320 = vmatmul.bf16.gmra.mxu2 %v17125_v6  ;;  %4343 = vmatmul.bf16.gmra.mxu3 %v17127_v13 }
 0x2b4   :  { %v3651_v29 = vpop.f32.mrf.mxu0 }
 0x2b5   :  { %v4064_v17 = vpop.f32.mrf.mxu2  ;;  %v4087_v16 = vpop.f32.mrf.mxu3 }
 0x2b6   :  { %v4088_v49 = vadd.f32 %v4087_v16, %v4064_v17  ;;  %v3674_v45 = vpop.f32.mrf.mxu1  ;;  %v17138_v16 = vld [vmem:[#allocation108_spill] sm:$0xff] }
 0x2b7   :  { %v3675_v33 = vadd.f32 %v3674_v45, %v3651_v29  ;;  %v17139_v29 = vld [vmem:[#allocation110_spill] sm:$0xff] }
 0x2b8   :  { %v14984_v34 = vadd.f32 %v4088_v49, %v14902_v27  ;;  %v17128_v27 = vld [vmem:[#allocation245_spill] sm:$0xff] }
 0x2b9   :  { %v14987_v46 = vadd.f32 %v3675_v33, %v14839_v26  ;;  %v17129_v26 = vld [vmem:[#allocation248_spill] sm:$0xff]  ;;  %v17140_v49 = vld [vmem:[#allocation113_spill] sm:$0xff]  ;;  %v17141_v33 = vld [vmem:[#allocation114_spill] sm:$0xff] }
 0x2bc   :  { %v3654_v50 = vpop.f32.mrf.mxu0 }
 0x2bd   :  { %v4066_v44 = vpop.f32.mrf.mxu2  ;;  %v4089_v60 = vpop.f32.mrf.mxu3 }
 0x2be   :  { %v4090_v18 = vadd.f32 %v4089_v60, %v4066_v44  ;;  %v3677_v58 = vpop.f32.mrf.mxu1 }
 0x2bf   :  { %v3678_v24 = vadd.f32 %v3677_v58, %v3654_v50 }
 0x2c0   :  { %v14990_v37 = vadd.f32 %v4090_v18, %v14913_v2  ;;  %4356 = vmatmul.bf16.vlgmr.msrb.gmra.mxu0 %v14203_v0  ;;  %v17133_v2 = vld [vmem:[#allocation106_spill] sm:$0xff] }
 0x2c1   :  { %v14994_v61 = vadd.f32 %v3678_v24, %v14857_v38  ;;  %4379 = vmatmul.bf16.vlgmr.msrb.gmra.mxu1 %v17091_v25  ;;  %4532 = vmatpush.bf16.msrb.mxu0 %v17132_v42  ;;  %v17143_v24 = vld [vmem:[#allocation112_spill] sm:$0xff] }
 0x2c2   :  { %4402 = vmatmul.bf16.vlgmr.msrb.gmra.mxu2 %v17128_v27  ;;  %4425 = vmatmul.bf16.vlgmr.msrb.gmra.mxu3 %v17129_v26 }
 0x2c3   :  { %4578 = vmatpush.bf16.msrb.mxu2 %v17130_v10  ;;  %4601 = vmatpush.bf16.msrb.mxu3 %v17131_v28  ;;  %v17145_v28 = vld [vmem:[#allocation118_spill] sm:$0xff] }
 0x2c4   :  { %4555 = vmatpush.bf16.msrb.mxu1 %v17133_v2  ;;  %v3656_v0 = vpop.f32.mrf.mxu0  ;;  %v17147_v2 = vld [vmem:[#allocation262_spill] sm:$0xff] }
 0x2c5   :  { %v4069_v48 = vpop.f32.mrf.mxu2  ;;  %v4092_v4 = vpop.f32.mrf.mxu3  ;;  %4533 = vmatpush.bf16.msrb.mxu0 %v17136_v14  ;;  %v17154_v14 = vld [vmem:[#allocation123_spill] sm:$0xff] }
 0x2c6   :  { %v4093_v5 = vadd.f32 %v4092_v4, %v4069_v48  ;;  %v3679_v38 = vpop.f32.mrf.mxu1  ;;  %v17146_v48 = vld [vmem:[#allocation259_spill] sm:$0xff] }
 0x2c7   :  { %4579 = vmatpush.bf16.msrb.mxu2 %v17134_v23  ;;  %v3680_v25 = vadd.f32 %v3679_v38, %v3656_v0  ;;  %4602 = vmatpush.bf16.msrb.mxu3 %v17135_v52  ;;  %v17148_v4 = vld [vmem:[#allocation115_spill] sm:$0xff]  ;;  %v17149_v0 = vld [vmem:[#allocation116_spill] sm:$0xff]  ;;  %v17151_v38 = vld [vmem:[#allocation122_spill] sm:$0xff] }
 0x2c8   :  { %v15007_v35 = vadd.f32 %v4093_v5, %v14920_v21  ;;  %4556 = vmatpush.bf16.msrb.mxu1 %v17137_v3  ;;  %v17142_v21 = vld [vmem:[#allocation111_spill] sm:$0xff]  ;;  %v17150_v5 = vld [vmem:[#allocation121_spill] sm:$0xff] }
 0x2c9   :  { %v15011_v17 = vadd.f32 %v3680_v25, %v14871_v36  ;;  %4534 = vmatpush.bf16.msrb.mxu0 %v17140_v49  ;;  %v17144_v36 = vld [vmem:[#allocation117_spill] sm:$0xff]  ;;  %v17152_v52 = vld [vmem:[#allocation119_spill] sm:$0xff] }
 0x2ca   :  { %v17156_v49 = vld [vmem:[#allocation125_spill] sm:$0xff] }
 0x2cb   :  { %4580 = vmatpush.bf16.msrb.mxu2 %v17138_v16  ;;  %4603 = vmatpush.bf16.msrb.mxu3 %v17139_v29  ;;  %v17155_v16 = vld [vmem:[#allocation124_spill] sm:$0xff]  ;;  %v4208_v29 = vld [vmem:[#allocation4] sm:$0x7] }
 0x2cc   :  { %4557 = vmatpush.bf16.msrb.mxu1 %v17141_v33  ;;  %v3659_v60 = vpop.f32.mrf.mxu0  ;;  %v17158_v33 = vld [vmem:[#allocation127_spill] sm:$0xff] }
 0x2cd   :  { %v4071_v45 = vpop.f32.mrf.mxu2  ;;  %v4094_v44 = vpop.f32.mrf.mxu3  ;;  %4535 = vmatpush.bf16.msrb.mxu0 %v17144_v36  ;;  %v15049_v36 = vperm.slane %v4208_v29, 1 }
 0x2ce   :  { %v4095_v50 = vadd.f32 %v4094_v44, %v4071_v45  ;;  %v3682_v18 = vpop.f32.mrf.mxu1  ;;  %v17157_v45 = vld [vmem:[#allocation126_spill] sm:$0xff] }
 0x2cf   :  { %4581 = vmatpush.bf16.msrb.mxu2 %v17142_v21  ;;  %v3683_v58 = vadd.f32 %v3682_v18, %v3659_v60  ;;  %4604 = vmatpush.bf16.msrb.mxu3 %v17143_v24  ;;  %v17159_v60 = vld [vmem:[#allocation128_spill] sm:$0xff]  ;;  %v17160_v24 = vld [vmem:[#allocation129_spill] sm:$0xff] }
 0x2d0   :  { %v15021_v10 = vadd.f32 %v4095_v50, %v14937_v56  ;;  %4361 = vmatmul.bf16.gmra.mxu0 %v17107_v39  ;;  %4558 = vmatpush.bf16.msrb.mxu1 %v17145_v28  ;;  %v15046_v50 = vperm.slane %v4208_v29, 0  ;;  %v17161_v28 = vld [vmem:[#allocation130_spill] sm:$0xff] }
 0x2d1   :  { %v15026_v42 = vadd.f32 %v3683_v58, %v14889_v43  ;;  %4384 = vmatmul.bf16.gmra.mxu1 %v17109_v59  ;;  %4536 = vmatpush.bf16.msrb.mxu0 %v17150_v5  ;;  %v17153_v59 = vld [vmem:[#allocation120_spill] sm:$0xff] }
 0x2d2   :  { %4407 = vmatmul.bf16.gmra.mxu2 %v17146_v48  ;;  %4430 = vmatmul.bf16.gmra.mxu3 %v17147_v2  ;;  %v4216_v5 = vadd.f32 %v15046_v50, %v14984_v34 }
 0x2d3   :  { %4582 = vmatpush.bf16.msrb.mxu2 %v17148_v4  ;;  %4605 = vmatpush.bf16.msrb.mxu3 %v17149_v0  ;;  %v17162_v4 = vld [vmem:[#allocation131_spill] sm:$0xff]  ;;  %v17163_v0 = vld [vmem:[#allocation132_spill] sm:$0xff] }
 0x2d4   :  { %4559 = vmatpush.bf16.msrb.mxu1 %v17151_v38  ;;  %v3661_v23 = vpop.f32.mrf.mxu0  ;;  %v17164_v38 = vld [vmem:[#allocation270_spill] sm:$0xff] }
 0x2d5   :  { %v4074_v56 = vpop.f32.mrf.mxu2  ;;  %v4097_v39 = vpop.f32.mrf.mxu3  ;;  %4537 = vmatpush.bf16.msrb.mxu0 %v17154_v14 }
 0x2d6   :  { %v4098_v25 = vadd.f32 %v4097_v39, %v4074_v56  ;;  %v3684_v43 = vpop.f32.mrf.mxu1  ;;  %v17165_v39 = vld [vmem:[#allocation272_spill] sm:$0xff] }
 0x2d7   :  { %4583 = vmatpush.bf16.msrb.mxu2 %v17152_v52  ;;  %4606 = vmatpush.bf16.msrb.mxu3 %v17153_v59  ;;  %v4231_v43 = vmax.f32 %v4216_v5, 0.0 }
 0x2d8   :  { %v15039_v3 = vadd.f32 %v4098_v25, %v14952_v12  ;;  %4560 = vmatpush.bf16.msrb.mxu1 %v17155_v16 }
 0x2d9   :  { %4538 = vmatpush.bf16.msrb.mxu0 %v17158_v33 }
 0x2db   :  { %4584 = vmatpush.bf16.msrb.mxu2 %v17156_v49  ;;  %4607 = vmatpush.bf16.msrb.mxu3 %v17157_v45 }
 0x2dc   :  { %4561 = vmatpush.bf16.msrb.mxu1 %v17159_v60  ;;  %v4110_v21 = vpop.f32.mrf.mxu0 }
 0x2dd   :  { %v4076_v44 = vpop.f32.mrf.mxu2  ;;  %v4099_v18 = vpop.f32.mrf.mxu3  ;;  %4539 = vmatpush.bf16.msrb.mxu0 %v17162_v4 }
 0x2de   :  { %v4133_v58 = vpop.f32.mrf.mxu1 }
 0x2df   :  { %4585 = vmatpush.bf16.msrb.mxu2 %v17160_v24  ;;  %v4134_v12 = vadd.f32 %v4133_v58, %v4110_v21  ;;  %4608 = vmatpush.bf16.msrb.mxu3 %v17161_v28 }
 0x2e0   :  { %4366 = vmatmul.bf16.gmra.mxu0 %v17125_v6  ;;  %4562 = vmatpush.bf16.msrb.mxu1 %v17163_v0 }
 0x2e1   :  { %v4194_v56 = vadd.f32 %v4134_v12, %v14910_v31  ;;  %4389 = vmatmul.bf16.gmra.mxu1 %v17127_v13  ;;  %v15063_v31 = vperm.slane %v4208_v29, 2  ;;  %v4219_v13 = vadd.f32 %v15046_v50, %v14990_v37  ;;  %v4222_v29 = vadd.f32 %v15046_v50, %v15007_v35  ;;  %v17166_v35 = vld [vmem:[#allocation133_spill] sm:$0xff] }
 0x2e2   :  { %4412 = vmatmul.bf16.gmra.mxu2 %v17164_v38  ;;  %4435 = vmatmul.bf16.gmra.mxu3 %v17165_v39 }
 0x2e3   :  { %v4217_v23 = vadd.f32 %v15049_v36, %v4194_v56  ;;  %v4234_v21 = vmax.f32 %v4219_v13, 0.0 }
 0x2e4   :  { %v4112_v6 = vpop.f32.mrf.mxu0 }
 0x2e5   :  { %v4156_v25 = vpop.f32.mrf.mxu2  ;;  %v4232_v52 = vmax.f32 %v4217_v23, 0.0  ;;  %v4179_v59 = vpop.f32.mrf.mxu3 }
 0x2e6   :  { %v4180_v14 = vadd.f32 %v4179_v59, %v4156_v25  ;;  %v4135_v16 = vpop.f32.mrf.mxu1 }
 0x2e7   :  { %v4246_v49 = vpack.c.bf16 %v4232_v52, %v4231_v43  ;;  %v4136_v45 = vadd.f32 %v4135_v16, %v4112_v6  ;;  %v17168_v6 = vld [vmem:[#allocation137_spill] sm:$0xff] }
 0x2e8   :  { %v4195_v34 = vadd.f32 %v4180_v14, %v14978_v51 }
 0x2e9   :  { %v4197_v33 = vadd.f32 %v4136_v45, %v14916_v7  ;;  %v6109_v5 = vunpack.c.l.b16 %v4246_v49  ;;  %v6110_v56 = vunpack.c.h.b16 %v4246_v49 }
 0x2ea   :  { %v4218_v60 = vadd.f32 %v15063_v31, %v4195_v34  ;;  %v4237_v34 = vmax.f32 %v4222_v29, 0.0  ;;  %v4225_v29 = vadd.f32 %v15046_v50, %v15021_v10 }
 0x2eb   :  { %v4220_v44 = vadd.f32 %v15049_v36, %v4197_v33 }
 0x2ec   :  { %v4115_v12 = vpop.f32.mrf.mxu0  ;;  %v4233_v37 = vmax.f32 %v4218_v60, 0.0 }
 0x2ed   :  { %v4158_v18 = vpop.f32.mrf.mxu2  ;;  %v4235_v58 = vmax.f32 %v4220_v44, 0.0  ;;  %v4181_v24 = vpop.f32.mrf.mxu3 }
 0x2ee   :  { %v4182_v28 = vadd.f32 %v4181_v24, %v4158_v18  ;;  %v4138_v4 = vpop.f32.mrf.mxu1 }
 0x2ef   :  { %v4248_v0 = vpack.c.bf16 %v4235_v58, %v4234_v21  ;;  %v4139_v51 = vadd.f32 %v4138_v4, %v4115_v12  ;;  %v17172_v21 = vld [vmem:[#allocation135_spill] sm:$0xff]  ;;  %v17173_v12 = vld [vmem:[#allocation136_spill] sm:$0xff] }
 0x2f0   :  { %v4198_v7 = vadd.f32 %v4182_v28, %v14987_v46  ;;  %4448 = vmatmul.bf16.vlgmr.msra.gmra.mxu0 %v17128_v27  ;;  %v17167_v46 = vld [vmem:[#allocation134_spill] sm:$0xff]  ;;  %v17174_v28 = vld [vmem:[#allocation141_spill] sm:$0xff] }
 0x2f1   :  { %v6112_v23 = vunpack.c.l.b16 %v4248_v0  ;;  %v6113_v25 = vunpack.c.h.b16 %v4248_v0  ;;  %v4200_v43 = vadd.f32 %v4139_v51, %v14933_v11  ;;  %4471 = vmatmul.bf16.vlgmr.msra.gmra.mxu1 %v17129_v26  ;;  %4624 = vmatpush.bf16.msra.mxu0 %v17168_v6  ;;  %v4247_v11 = vpack.c.bf16 %v4233_v37, %v4233_v37 }
 0x2f2   :  { %4494 = vmatmul.bf16.vlgmr.msra.gmra.mxu2 %v17128_v27  ;;  %v4221_v52 = vadd.f32 %v15063_v31, %v4198_v7  ;;  %4517 = vmatmul.bf16.vlgmr.msra.gmra.mxu3 %v17129_v26  ;;  %v17171_v27 = vld [vmem:[#allocation138_spill] sm:$0xff] }
 0x2f3   :  { %4685 = vmatpush.bf16.msra.mxu2 %v17166_v35  ;;  %v4223_v59 = vadd.f32 %v15049_v36, %v4200_v43  ;;  %4708 = vmatpush.bf16.msra.mxu3 %v17167_v46  ;;  %v15083_v14 = vpack.c.b16 %v6113_v25, %v6110_v56  ;;  %v15085_v16 = vpack.c.b16 %v6112_v23, %v6109_v5  ;;  %v6111_v4 = vunpack.c.l.b16 %v4247_v11  ;;  %v17175_v5 = vld [vmem:[#allocation142_spill] sm:$0xff]  ;;  %v17177_v35 = vld [vmem:[#allocation139_spill] sm:$0xff]  ;;  %v17178_v46 = vld [vmem:[#allocation140_spill] sm:$0xff] }
 0x2f4   :  { %v4236_v49 = vmax.f32 %v4221_v52, 0.0  ;;  %4647 = vmatpush.bf16.msra.mxu1 %v17171_v27  ;;  %v4117_v33 = vpop.f32.mrf.mxu0 }
 0x2f5   :  { %17169 = vst [vmem:[#allocation27_spill] sm:$0xff] %v15083_v14  ;;  %v4161_v45 = vpop.f32.mrf.mxu2  ;;  %v4238_v13 = vmax.f32 %v4223_v59, 0.0  ;;  %v4184_v26 = vpop.f32.mrf.mxu3  ;;  %4625 = vmatpush.bf16.msra.mxu0 %v17174_v28  ;;  %v4228_v28 = vadd.f32 %v15046_v50, %v15039_v3  ;;  %v17190_v3 = vld [vmem:[#allocation153_spill] sm:$0xff]  ;;  %v12336_v14 = vld [vmem:[#allocation6 + $0x244] sm:$0xf0] }
 0x2f6   :  { %17170 = vst [vmem:[#allocation24_spill] sm:$0xff] %v15085_v16  ;;  %v4249_v44 = vpack.c.bf16 %v4236_v49, %v4236_v49  ;;  %v4185_v60 = vadd.f32 %v4184_v26, %v4161_v45  ;;  %v4140_v18 = vpop.f32.mrf.mxu1  ;;  %v17182_v49 = vld [vmem:[#allocation146_spill] sm:$0xff]  ;;  %v4240_v45 = vmax.f32 %v4225_v29, 0.0 }
 0x2f7   :  { %4686 = vmatpush.bf16.msra.mxu2 %v17172_v21  ;;  %v4250_v58 = vpack.c.bf16 %v4238_v13, %v4237_v34  ;;  %v4141_v24 = vadd.f32 %v4140_v18, %v4117_v33  ;;  %4709 = vmatpush.bf16.msra.mxu3 %v17173_v12  ;;  %v17184_v21 = vld [vmem:[#allocation144_spill] sm:$0xff]  ;;  %v10585_v16 = vld [vmem:[#allocation6 + $0x240] sm:$0xf] }
 0x2f8   :  { %v6114_v0 = vunpack.c.l.b16 %v4249_v44  ;;  %v4201_v51 = vadd.f32 %v4185_v60, %v14994_v61  ;;  %4648 = vmatpush.bf16.msra.mxu1 %v17175_v5  ;;  %v17179_v61 = vld [vmem:[#allocation145_spill] sm:$0xff]  ;;  %v17183_v60 = vld [vmem:[#allocation143_spill] sm:$0xff] }
 0x2f9   :  { %v4203_v37 = vadd.f32 %v4141_v24, %v14947_v8  ;;  %v6116_v7 = vunpack.c.h.b16 %v4250_v58  ;;  %v6115_v56 = vunpack.c.l.b16 %v4250_v58  ;;  %4626 = vmatpush.bf16.msra.mxu0 %v17179_v61  ;;  %v17186_v24 = vld [vmem:[#allocation150_spill] sm:$0xff] }
 0x2fa   :  { %v15096_v43 = vpack.c.b16 %v6114_v0, %v6111_v4  ;;  %v4224_v52 = vadd.f32 %v15063_v31, %v4201_v51  ;;  %v17193_v61 = vld [vmem:[#allocation154_spill] sm:$0xff] }
 0x2fb   :  { %4687 = vmatpush.bf16.msra.mxu2 %v17177_v35  ;;  %v4226_v59 = vadd.f32 %v15049_v36, %v4203_v37  ;;  %4710 = vmatpush.bf16.msra.mxu3 %v17178_v46  ;;  %v15103_v6 = vpack.c.b16 %v6116_v7, %v6113_v25  ;;  %v15105_v11 = vpack.c.b16 %v6115_v56, %v6112_v23  ;;  %v17185_v25 = vld [vmem:[#allocation149_spill] sm:$0xff]  ;;  %v17189_v35 = vld [vmem:[#allocation148_spill] sm:$0xff] }
 0x2fc   :  { %17176 = vst [vmem:[#allocation28_spill] sm:$0xff] %v15096_v43  ;;  %v4239_v10 = vmax.f32 %v4224_v52, 0.0  ;;  %4649 = vmatpush.bf16.msra.mxu1 %v17182_v49 }
 0x2fd   :  { %17180 = vst [vmem:[#allocation25_spill] sm:$0xff] %v15103_v6  ;;  %v4163_v8 = vpop.f32.mrf.mxu2  ;;  %v4241_v27 = vmax.f32 %v4226_v59, 0.0  ;;  %v4186_v34 = vpop.f32.mrf.mxu3  ;;  %4627 = vmatpush.bf16.msra.mxu0 %v17185_v25  ;;  %v17198_v25 = vld [vmem:[#allocation157_spill] sm:$0xff]  ;;  %v12340_v6 = vld [vmem:[#allocation6 + $0x264] sm:$0xf0] }
 0x2fe   :  { %17181 = vst [vmem:[#allocation31_spill] sm:$0xff] %v15105_v11  ;;  %v4120_v13 = vpop.f32.mrf.mxu0  ;;  %v4251_v26 = vpack.c.bf16 %v4239_v10, %v4239_v10  ;;  %v4187_v33 = vadd.f32 %v4186_v34, %v4163_v8  ;;  %v4143_v44 = vpop.f32.mrf.mxu1  ;;  %v4243_v10 = vmax.f32 %v4228_v28, 0.0  ;;  %v10537_v11 = vld [vmem:[#allocation6 + $0x1e0] sm:$0xf] }
 0x2ff   :  { %4688 = vmatpush.bf16.msra.mxu2 %v17183_v60  ;;  %v4144_v18 = vadd.f32 %v4143_v44, %v4120_v13  ;;  %4711 = vmatpush.bf16.msra.mxu3 %v17184_v21  ;;  %v4252_v23 = vpack.c.bf16 %v4241_v27, %v4240_v45  ;;  %v17194_v27 = vld [vmem:[#allocation151_spill] sm:$0xff] }
 0x300   :  { %v4204_v58 = vadd.f32 %v4187_v33, %v15011_v17  ;;  %4453 = vmatmul.bf16.gmra.mxu0 %v17146_v48  ;;  %4650 = vmatpush.bf16.msra.mxu1 %v17186_v24  ;;  %v6117_v12 = vunpack.c.l.b16 %v4251_v26  ;;  %v17187_v17 = vld [vmem:[#allocation147_spill] sm:$0xff]  ;;  %v17195_v26 = vld [vmem:[#allocation152_spill] sm:$0xff] }
 0x301   :  { %v4206_v4 = vadd.f32 %v4144_v18, %v14965_v62  ;;  %4476 = vmatmul.bf16.gmra.mxu1 %v17147_v2  ;;  %v6119_v51 = vunpack.c.h.b16 %v4252_v23  ;;  %v6118_v5 = vunpack.c.l.b16 %v4252_v23  ;;  %4628 = vmatpush.bf16.msra.mxu0 %v17190_v3  ;;  %v17197_v33 = vld [vmem:[#allocation156_spill] sm:$0xff]  ;;  %v17201_v24 = vld [vmem:[#allocation159_spill] sm:$0xff] }
 0x302   :  { %4499 = vmatmul.bf16.gmra.mxu2 %v17146_v48  ;;  %v4227_v29 = vadd.f32 %v15063_v31, %v4204_v58  ;;  %4522 = vmatmul.bf16.gmra.mxu3 %v17147_v2  ;;  %v15122_v37 = vpack.c.b16 %v6117_v12, %v6114_v0  ;;  %v17200_v58 = vld [vmem:[#allocation158_spill] sm:$0xff] }
 0x303   :  { %4689 = vmatpush.bf16.msra.mxu2 %v17187_v17  ;;  %v4229_v52 = vadd.f32 %v15049_v36, %v4206_v4  ;;  %4712 = vmatpush.bf16.msra.mxu3 %v17189_v35  ;;  %v15127_v62 = vpack.c.b16 %v6119_v51, %v6116_v7  ;;  %v15129_v59 = vpack.c.b16 %v6118_v5, %v6115_v56  ;;  %v17196_v7 = vld [vmem:[#allocation155_spill] sm:$0xff]  ;;  %v17204_v17 = vld [vmem:[#allocation160_spill] sm:$0xff] }
 0x304   :  { %17188 = vst [vmem:[#allocation26_spill] sm:$0xff] %v15122_v37  ;;  %v4242_v48 = vmax.f32 %v4227_v29, 0.0  ;;  %4651 = vmatpush.bf16.msra.mxu1 %v17193_v61  ;;  %v17206_v61 = vld [vmem:[#allocation162_spill] sm:$0xff] }
 0x305   :  { %17191 = vst [vmem:[#allocation32_spill] sm:$0xff] %v15127_v62  ;;  %v4166_v46 = vpop.f32.mrf.mxu2  ;;  %v4244_v2 = vmax.f32 %v4229_v52, 0.0  ;;  %v4189_v8 = vpop.f32.mrf.mxu3  ;;  %4629 = vmatpush.bf16.msra.mxu0 %v17196_v7  ;;  %v10601_v37 = vld [vmem:[#allocation6 + $0x260] sm:$0xf]  ;;  %v10523_v62 = vld [vmem:[#allocation6 + $0x1c8] sm:$0xf0] }
 0x306   :  { %17192 = vst [vmem:[#allocation29_spill] sm:$0xff] %v15129_v59  ;;  %v4122_v49 = vpop.f32.mrf.mxu0  ;;  %v4190_v0 = vadd.f32 %v4189_v8, %v4166_v46  ;;  %v4145_v45 = vpop.f32.mrf.mxu1  ;;  %v4253_v34 = vpack.c.bf16 %v4242_v48, %v4242_v48  ;;  %v17205_v46 = vld [vmem:[#allocation161_spill] sm:$0xff]  ;;  %v12319_v59 = vld [vmem:[#allocation6 + $0x1c4] sm:$0xf] }
 0x307   :  { %4690 = vmatpush.bf16.msra.mxu2 %v17194_v27  ;;  %v4254_v13 = vpack.c.bf16 %v4244_v2, %v4243_v10  ;;  %4713 = vmatpush.bf16.msra.mxu3 %v17195_v26  ;;  %v17207_v10 = vld [vmem:[#allocation163_spill] sm:$0xff] }
 0x308   :  { %v4207_v56 = vadd.f32 %v4190_v0, %v15026_v42  ;;  %4652 = vmatpush.bf16.msra.mxu1 %v17197_v33  ;;  %v6120_v44 = vunpack.c.l.b16 %v4253_v34 }
 0x309   :  { %v6538_v60 = vunpack.c.l.b16 %v4254_v13  ;;  %v6539_v18 = vunpack.c.h.b16 %v4254_v13  ;;  %4630 = vmatpush.bf16.msra.mxu0 %v17201_v24 }
 0x30a   :  { %v4230_v21 = vadd.f32 %v15063_v31, %v4207_v56  ;;  %v15139_v23 = vpack.c.b16 %v6120_v44, %v6117_v12 }
 0x30b   :  { %4691 = vmatpush.bf16.msra.mxu2 %v17198_v25  ;;  %4714 = vmatpush.bf16.msra.mxu3 %v17200_v58  ;;  %v15143_v28 = vpack.c.b16 %v6538_v60, %v6118_v5  ;;  %v15145_v4 = vpack.c.b16 %v6539_v18, %v6119_v51  ;;  %v17208_v51 = vld [vmem:[#allocation164_spill] sm:$0xff]  ;;  %v17213_v18 = vld [vmem:[#allocation166_spill] sm:$0xff] }
 0x30c   :  { %17199 = vst [vmem:[#allocation30_spill] sm:$0xff] %v15139_v23  ;;  %v4245_v42 = vmax.f32 %v4230_v21, 0.0  ;;  %4653 = vmatpush.bf16.msra.mxu1 %v17204_v17  ;;  %v17214_v21 = vld [vmem:[#allocation169_spill] sm:$0xff]  ;;  %v17215_v58 = vld [vmem:[#allocation170_spill] sm:$0xff] }
 0x30d   :  { %17202 = vst [vmem:[#allocation35_spill] sm:$0xff] %v15143_v28  ;;  %v4168_v29 = vpop.f32.mrf.mxu2  ;;  %v4191_v52 = vpop.f32.mrf.mxu3  ;;  %4631 = vmatpush.bf16.msra.mxu0 %v17207_v10  ;;  %v17221_v10 = vld [vmem:[#allocation172_spill] sm:$0xff] }
 0x30e   :  { %17203 = vst [vmem:[#allocation36_spill] sm:$0xff] %v15145_v4  ;;  %v4265_v35 = vpop.f32.mrf.mxu0  ;;  %v4255_v3 = vpack.c.bf16 %v4245_v42, %v4245_v42  ;;  %v4288_v48 = vpop.f32.mrf.mxu1  ;;  %v17216_v52 = vld [vmem:[#allocation167_spill] sm:$0xff]  ;;  %v10539_v4 = vld [vmem:[#allocation6 + $0x1e8] sm:$0xf0] }
 0x30f   :  { %4692 = vmatpush.bf16.msra.mxu2 %v17205_v46  ;;  %v15149_v12 = vadd.f32 %v4288_v48, %v4265_v35  ;;  %4715 = vmatpush.bf16.msra.mxu3 %v17206_v61  ;;  %v17218_v48 = vld [vmem:[#allocation173_spill] sm:$0xff]  ;;  %v17219_v46 = vld [vmem:[#allocation174_spill] sm:$0xff]  ;;  %v17220_v61 = vld [vmem:[#allocation171_spill] sm:$0xff] }
 0x310   :  { %4458 = vmatmul.bf16.gmra.mxu0 %v17164_v38  ;;  %4654 = vmatpush.bf16.msra.mxu1 %v17208_v51  ;;  %v6540_v5 = vunpack.c.l.b16 %v4255_v3  ;;  %v17217_v3 = vld [vmem:[#allocation168_spill] sm:$0xff]  ;;  %v17222_v51 = vld [vmem:[#allocation177_spill] sm:$0xff] }
 0x311   :  { %4481 = vmatmul.bf16.gmra.mxu1 %v17165_v39 }
 0x312   :  { %4504 = vmatmul.bf16.gmra.mxu2 %v17164_v38  ;;  %4527 = vmatmul.bf16.gmra.mxu3 %v17165_v39  ;;  %v15158_v2 = vpack.c.b16 %v6540_v5, %v6120_v44  ;;  %v17210_v38 = vld [vmem:[#allocation352_spill] sm:$0xff]  ;;  %v17211_v39 = vld [vmem:[#allocation355_spill] sm:$0xff]  ;;  %v17212_v44 = vld [vmem:[#allocation165_spill] sm:$0xff] }
 0x314   :  { %17209 = vst [vmem:[#allocation33_spill] sm:$0xff] %v15158_v2 }
 0x315   :  { %v4311_v8 = vpop.f32.mrf.mxu2  ;;  %v4334_v49 = vpop.f32.mrf.mxu3 }
 0x316   :  { %v4267_v0 = vpop.f32.mrf.mxu0  ;;  %v15160_v45 = vadd.f32 %v4334_v49, %v4311_v8  ;;  %v4290_v27 = vpop.f32.mrf.mxu1  ;;  %v17223_v8 = vld [vmem:[#allocation178_spill] sm:$0xff] }
 0x317   :  { %v15162_v34 = vadd.f32 %v4290_v27, %v4267_v0 }
 0x31d   :  { %v4313_v13 = vpop.f32.mrf.mxu2  ;;  %v4336_v26 = vpop.f32.mrf.mxu3 }
 0x31e   :  { %v4270_v7 = vpop.f32.mrf.mxu0  ;;  %v15164_v56 = vadd.f32 %v4336_v26, %v4313_v13  ;;  %v4293_v33 = vpop.f32.mrf.mxu1  ;;  %v17224_v26 = vld [vmem:[#allocation175_spill] sm:$0xff] }
 0x31f   :  { %v15166_v60 = vadd.f32 %v4293_v33, %v4270_v7  ;;  %v17225_v33 = vld [vmem:[#allocation176_spill] sm:$0xff] }
 0x320   :  { %4540 = vmatmul.bf16.vlgmr.msrb.gmra.mxu0 %v17210_v38 }
 0x321   :  { %4563 = vmatmul.bf16.vlgmr.msrb.gmra.mxu1 %v17211_v39  ;;  %4731 = vmatpush.bf16.msrb.mxu0 %v17214_v21  ;;  %v17228_v21 = vld [vmem:[#allocation179_spill] sm:$0xff] }
 0x322   :  { %4586 = vmatmul.bf16.vlgmr.msrb.gmra.mxu2 %v17210_v38  ;;  %4609 = vmatmul.bf16.vlgmr.msrb.gmra.mxu3 %v17211_v39 }
 0x323   :  { %4777 = vmatpush.bf16.msrb.mxu2 %v17212_v44  ;;  %4800 = vmatpush.bf16.msrb.mxu3 %v17213_v18  ;;  %v17226_v44 = vld [vmem:[#allocation181_spill] sm:$0xff]  ;;  %v17227_v18 = vld [vmem:[#allocation182_spill] sm:$0xff] }
 0x324   :  { %4754 = vmatpush.bf16.msrb.mxu1 %v17215_v58  ;;  %v17230_v58 = vld [vmem:[#allocation185_spill] sm:$0xff] }
 0x325   :  { %v4316_v25 = vpop.f32.mrf.mxu2  ;;  %v4339_v24 = vpop.f32.mrf.mxu3  ;;  %4732 = vmatpush.bf16.msrb.mxu0 %v17218_v48 }
 0x326   :  { %v4272_v42 = vpop.f32.mrf.mxu0  ;;  %v15176_v29 = vadd.f32 %v4339_v24, %v4316_v25  ;;  %v4295_v17 = vpop.f32.mrf.mxu1  ;;  %v17229_v25 = vld [vmem:[#allocation180_spill] sm:$0xff] }
 0x327   :  { %4778 = vmatpush.bf16.msrb.mxu2 %v17216_v52  ;;  %v15179_v35 = vadd.f32 %v4295_v17, %v4272_v42  ;;  %4801 = vmatpush.bf16.msrb.mxu3 %v17217_v3  ;;  %v17231_v42 = vld [vmem:[#allocation186_spill] sm:$0xff] }
 0x328   :  { %4755 = vmatpush.bf16.msrb.mxu1 %v17219_v46  ;;  %v17232_v46 = vld [vmem:[#allocation183_spill] sm:$0xff] }
 0x329   :  { %4733 = vmatpush.bf16.msrb.mxu0 %v17222_v51  ;;  %v17235_v51 = vld [vmem:[#allocation188_spill] sm:$0xff] }
 0x32b   :  { %4779 = vmatpush.bf16.msrb.mxu2 %v17220_v61  ;;  %4802 = vmatpush.bf16.msrb.mxu3 %v17221_v10  ;;  %v17233_v61 = vld [vmem:[#allocation184_spill] sm:$0xff]  ;;  %v17234_v10 = vld [vmem:[#allocation187_spill] sm:$0xff] }
 0x32c   :  { %4756 = vmatpush.bf16.msrb.mxu1 %v17223_v8  ;;  %v17237_v8 = vld [vmem:[#allocation190_spill] sm:$0xff] }
 0x32d   :  { %v4318_v5 = vpop.f32.mrf.mxu2  ;;  %v4341_v49 = vpop.f32.mrf.mxu3  ;;  %4734 = vmatpush.bf16.msrb.mxu0 %v17226_v44 }
 0x32e   :  { %v4275_v0 = vpop.f32.mrf.mxu0  ;;  %v15188_v27 = vadd.f32 %v4341_v49, %v4318_v5  ;;  %v4298_v13 = vpop.f32.mrf.mxu1  ;;  %v17236_v5 = vld [vmem:[#allocation189_spill] sm:$0xff]  ;;  %v17238_v49 = vld [vmem:[#allocation191_spill] sm:$0xff] }
 0x32f   :  { %4780 = vmatpush.bf16.msrb.mxu2 %v17224_v26  ;;  %v15191_v7 = vadd.f32 %v4298_v13, %v4275_v0  ;;  %4803 = vmatpush.bf16.msrb.mxu3 %v17225_v33  ;;  %v17239_v13 = vld [vmem:[#allocation192_spill] sm:$0xff] }
 0x330   :  { %4545 = vmatmul.bf16.gmra.mxu0 %v14580_v15  ;;  %4757 = vmatpush.bf16.msrb.mxu1 %v17227_v18  ;;  %v17240_v18 = vld [vmem:[#allocation193_spill] sm:$0xff] }
 0x331   :  { %4568 = vmatmul.bf16.gmra.mxu1 %v14588_v20  ;;  %4735 = vmatpush.bf16.msrb.mxu0 %v17230_v58  ;;  %v17242_v58 = vld [vmem:[#allocation195_spill] sm:$0xff] }
 0x332   :  { %4591 = vmatmul.bf16.gmra.mxu2 %v14580_v15  ;;  %4614 = vmatmul.bf16.gmra.mxu3 %v14588_v20 }
 0x333   :  { %4781 = vmatpush.bf16.msrb.mxu2 %v17228_v21  ;;  %4804 = vmatpush.bf16.msrb.mxu3 %v17229_v25  ;;  %v17241_v25 = vld [vmem:[#allocation194_spill] sm:$0xff] }
 0x334   :  { %4758 = vmatpush.bf16.msrb.mxu1 %v17231_v42 }
 0x335   :  { %v4321_v24 = vpop.f32.mrf.mxu2  ;;  %v4344_v17 = vpop.f32.mrf.mxu3  ;;  %4736 = vmatpush.bf16.msrb.mxu0 %v17234_v10 }
 0x336   :  { %v4277_v52 = vpop.f32.mrf.mxu0  ;;  %v15204_v3 = vadd.f32 %v4344_v17, %v4321_v24  ;;  %v4300_v48 = vpop.f32.mrf.mxu1  ;;  %v17243_v24 = vld [vmem:[#allocation196_spill] sm:$0xff] }
 0x337   :  { %4782 = vmatpush.bf16.msrb.mxu2 %v17232_v46  ;;  %4805 = vmatpush.bf16.msrb.mxu3 %v17233_v61 }
 0x338   :  { %4759 = vmatpush.bf16.msrb.mxu1 %v17235_v51 }
 0x339   :  { %4737 = vmatpush.bf16.msrb.mxu0 %v17238_v49 }
 0x33b   :  { %4783 = vmatpush.bf16.msrb.mxu2 %v17236_v5  ;;  %4806 = vmatpush.bf16.msrb.mxu3 %v17237_v8 }
 0x33c   :  { %4760 = vmatpush.bf16.msrb.mxu1 %v17239_v13 }
 0x33d   :  { %v4323_v0 = vpop.f32.mrf.mxu2  ;;  %v4346_v26 = vpop.f32.mrf.mxu3  ;;  %4738 = vmatpush.bf16.msrb.mxu0 %v17242_v58 }
 0x33e   :  { %v4357_v33 = vpop.f32.mrf.mxu0  ;;  %v4380_v44 = vpop.f32.mrf.mxu1 }
 0x33f   :  { %4784 = vmatpush.bf16.msrb.mxu2 %v17240_v18  ;;  %v15215_v21 = vadd.f32 %v4380_v44, %v4357_v33  ;;  %4807 = vmatpush.bf16.msrb.mxu3 %v17241_v25  ;;  %v17245_v33 = vld [vmem:[#allocation198_spill] sm:$0xff] }
 0x340   :  { %4550 = vmatmul.bf16.gmra.mxu0 %v14627_v57  ;;  %4761 = vmatpush.bf16.msrb.mxu1 %v17243_v24  ;;  %v17247_v18 = vld [vmem:[#allocation202_spill] sm:$0xff] }
 0x341   :  { %4573 = vmatmul.bf16.gmra.mxu1 %v14632_v47 }
 0x342   :  { %4596 = vmatmul.bf16.gmra.mxu2 %v14627_v57  ;;  %4619 = vmatmul.bf16.gmra.mxu3 %v14632_v47 }
 0x345   :  { %v4403_v42 = vpop.f32.mrf.mxu2  ;;  %v4426_v52 = vpop.f32.mrf.mxu3 }
 0x346   :  { %v4404_v17 = vadd.f32 %v4403_v42, %v15149_v12  ;;  %v4359_v48 = vpop.f32.mrf.mxu0  ;;  %v4382_v46 = vpop.f32.mrf.mxu1  ;;  %v17244_v12 = vld [vmem:[#allocation197_spill] sm:$0xff]  ;;  %v17248_v42 = vld [vmem:[#allocation199_spill] sm:$0xff] }
 0x347   :  { %v15227_v10 = vadd.f32 %v4382_v46, %v4359_v48  ;;  %v17250_v48 = vld [vmem:[#allocation205_spill] sm:$0xff]  ;;  %v17251_v46 = vld [vmem:[#allocation206_spill] sm:$0xff] }
 0x348   :  { %v15225_v61 = vadd.f32 %v4426_v52, %v4404_v17  ;;  %v17249_v52 = vld [vmem:[#allocation200_spill] sm:$0xff] }
 0x34d   :  { %v4405_v51 = vpop.f32.mrf.mxu2  ;;  %v4428_v8 = vpop.f32.mrf.mxu3 }
 0x34e   :  { %v4406_v5 = vadd.f32 %v4405_v51, %v15162_v34  ;;  %v4362_v49 = vpop.f32.mrf.mxu0  ;;  %v4385_v0 = vpop.f32.mrf.mxu1  ;;  %v17246_v34 = vld [vmem:[#allocation201_spill] sm:$0xff]  ;;  %v17252_v51 = vld [vmem:[#allocation203_spill] sm:$0xff] }
 0x34f   :  { %v15232_v26 = vadd.f32 %v4385_v0, %v4362_v49  ;;  %v17255_v49 = vld [vmem:[#allocation210_spill] sm:$0xff] }
 0x350   :  { %v15230_v13 = vadd.f32 %v4428_v8, %v4406_v5  ;;  %4632 = vmatmul.bf16.vlgmr.msra.gmra.mxu0 %v17210_v38  ;;  %v17253_v5 = vld [vmem:[#allocation204_spill] sm:$0xff] }
 0x351   :  { %4655 = vmatmul.bf16.vlgmr.msra.gmra.mxu1 %v17211_v39  ;;  %4870 = vmatpush.bf16.msra.mxu0 %v17246_v34 }
 0x352   :  { %4693 = vmatmul.bf16.vlgmr.msra.gmra.mxu2 %v14695_v41  ;;  %4716 = vmatmul.bf16.vlgmr.msra.gmra.mxu3 %v14698_v32 }
 0x353   :  { %4916 = vmatpush.bf16.msra.mxu2 %v17244_v12  ;;  %4939 = vmatpush.bf16.msra.mxu3 %v17245_v33 }
 0x354   :  { %4893 = vmatpush.bf16.msra.mxu1 %v17247_v18 }
 0x355   :  { %v4408_v44 = vpop.f32.mrf.mxu2  ;;  %v4431_v58 = vpop.f32.mrf.mxu3  ;;  %4871 = vmatpush.bf16.msra.mxu0 %v17250_v48 }
 0x356   :  { %v4409_v25 = vadd.f32 %v4408_v44, %v15166_v60  ;;  %v4364_v24 = vpop.f32.mrf.mxu0  ;;  %v4387_v38 = vpop.f32.mrf.mxu1  ;;  %v17254_v60 = vld [vmem:[#allocation209_spill] sm:$0xff]  ;;  %v17256_v44 = vld [vmem:[#allocation207_spill] sm:$0xff] }
 0x357   :  { %4917 = vmatpush.bf16.msra.mxu2 %v17248_v42  ;;  %v15246_v17 = vadd.f32 %v4387_v38, %v4364_v24  ;;  %4940 = vmatpush.bf16.msra.mxu3 %v17249_v52  ;;  %v17258_v24 = vld [vmem:[#allocation213_spill] sm:$0xff]  ;;  %v17259_v38 = vld [vmem:[#allocation214_spill] sm:$0xff]  ;;  %v17261_v42 = vld [vmem:[#allocation212_spill] sm:$0xff] }
 0x358   :  { %v15244_v39 = vadd.f32 %v4431_v58, %v4409_v25  ;;  %4894 = vmatpush.bf16.msra.mxu1 %v17251_v46  ;;  %v17257_v58 = vld [vmem:[#allocation208_spill] sm:$0xff]  ;;  %v17262_v52 = vld [vmem:[#allocation215_spill] sm:$0xff]  ;;  %v17263_v46 = vld [vmem:[#allocation218_spill] sm:$0xff] }
 0x359   :  { %4872 = vmatpush.bf16.msra.mxu0 %v17254_v60 }
 0x35b   :  { %4918 = vmatpush.bf16.msra.mxu2 %v17252_v51  ;;  %4941 = vmatpush.bf16.msra.mxu3 %v17253_v5 }
 0x35c   :  { %4895 = vmatpush.bf16.msra.mxu1 %v17255_v49  ;;  %v17265_v49 = vld [vmem:[#allocation217_spill] sm:$0xff] }
 0x35d   :  { %v4410_v8 = vpop.f32.mrf.mxu2  ;;  %v4433_v12 = vpop.f32.mrf.mxu3  ;;  %4873 = vmatpush.bf16.msra.mxu0 %v17258_v24 }
 0x35e   :  { %v4411_v0 = vadd.f32 %v4410_v8, %v15179_v35  ;;  %v4367_v33 = vpop.f32.mrf.mxu0  ;;  %v4390_v34 = vpop.f32.mrf.mxu1  ;;  %v17260_v35 = vld [vmem:[#allocation211_spill] sm:$0xff]  ;;  %v17264_v8 = vld [vmem:[#allocation216_spill] sm:$0xff] }
 0x35f   :  { %4919 = vmatpush.bf16.msra.mxu2 %v17256_v44  ;;  %v15259_v25 = vadd.f32 %v4390_v34, %v4367_v33  ;;  %4942 = vmatpush.bf16.msra.mxu3 %v17257_v58  ;;  %v17268_v33 = vld [vmem:[#allocation221_spill] sm:$0xff]  ;;  %v17269_v34 = vld [vmem:[#allocation222_spill] sm:$0xff]  ;;  %v17270_v44 = vld [vmem:[#allocation223_spill] sm:$0xff] }
 0x360   :  { %v15257_v18 = vadd.f32 %v4433_v12, %v4411_v0  ;;  %4637 = vmatmul.bf16.gmra.mxu0 %v14580_v15  ;;  %4896 = vmatpush.bf16.msra.mxu1 %v17259_v38  ;;  %v17266_v0 = vld [vmem:[#allocation219_spill] sm:$0xff]  ;;  %v17267_v12 = vld [vmem:[#allocation220_spill] sm:$0xff] }
 0x361   :  { %4660 = vmatmul.bf16.gmra.mxu1 %v14588_v20  ;;  %4874 = vmatpush.bf16.msra.mxu0 %v17262_v52  ;;  %v17271_v58 = vld [vmem:[#allocation224_spill] sm:$0xff]  ;;  %v17272_v52 = vld [vmem:[#allocation225_spill] sm:$0xff] }
 0x362   :  { %4698 = vmatmul.bf16.gmra.mxu2 %v14763_v55  ;;  %4721 = vmatmul.bf16.gmra.mxu3 %v14766_v40 }
 0x363   :  { %4920 = vmatpush.bf16.msra.mxu2 %v17260_v35  ;;  %4943 = vmatpush.bf16.msra.mxu3 %v17261_v42 }
 0x364   :  { %4897 = vmatpush.bf16.msra.mxu1 %v17263_v46  ;;  %v17274_v46 = vld [vmem:[#allocation227_spill] sm:$0xff] }
 0x365   :  { %v4413_v48 = vpop.f32.mrf.mxu2  ;;  %v4436_v15 = vpop.f32.mrf.mxu3  ;;  %4875 = vmatpush.bf16.msra.mxu0 %v17266_v0 }
 0x366   :  { %v4414_v51 = vadd.f32 %v4413_v48, %v15191_v7  ;;  %v4369_v5 = vpop.f32.mrf.mxu0  ;;  %v4392_v60 = vpop.f32.mrf.mxu1  ;;  %v17273_v48 = vld [vmem:[#allocation226_spill] sm:$0xff] }
 0x367   :  { %4921 = vmatpush.bf16.msra.mxu2 %v17264_v8  ;;  %4944 = vmatpush.bf16.msra.mxu3 %v17265_v49 }
 0x368   :  { %v15274_v20 = vadd.f32 %v4436_v15, %v4414_v51  ;;  %4898 = vmatpush.bf16.msra.mxu1 %v17267_v12  ;;  %v17275_v15 = vld [vmem:[#allocation228_spill] sm:$0xff] }
 0x369   :  { %4876 = vmatpush.bf16.msra.mxu0 %v17270_v44 }
 0x36b   :  { %4922 = vmatpush.bf16.msra.mxu2 %v17268_v33  ;;  %4945 = vmatpush.bf16.msra.mxu3 %v17269_v34 }
 0x36c   :  { %4899 = vmatpush.bf16.msra.mxu1 %v17271_v58 }
 0x36d   :  { %v4415_v7 = vpop.f32.mrf.mxu2  ;;  %v4438_v24 = vpop.f32.mrf.mxu3  ;;  %4877 = vmatpush.bf16.msra.mxu0 %v17274_v46 }
 0x36e   :  { %v4449_v38 = vpop.f32.mrf.mxu0  ;;  %v4472_v42 = vpop.f32.mrf.mxu1 }
 0x36f   :  { %v4450_v35 = vadd.f32 %v4449_v38, %v15160_v45  ;;  %4923 = vmatpush.bf16.msra.mxu2 %v17272_v52  ;;  %4946 = vmatpush.bf16.msra.mxu3 %v17273_v48  ;;  %v17278_v38 = vld [vmem:[#allocation233_spill] sm:$0xff] }
 0x370   :  { %4642 = vmatmul.bf16.gmra.mxu0 %v14627_v57  ;;  %4900 = vmatpush.bf16.msra.mxu1 %v17275_v15 }
 0x371   :  { %v15287_v51 = vadd.f32 %v4472_v42, %v4450_v35  ;;  %4665 = vmatmul.bf16.gmra.mxu1 %v14632_v47  ;;  %v17279_v35 = vld [vmem:[#allocation234_spill] sm:$0xff] }
 0x372   :  { %4703 = vmatmul.bf16.gmra.mxu2 %v14803_v19  ;;  %4726 = vmatmul.bf16.gmra.mxu3 %v14806_v63 }
 0x375   :  { %v4495_v45 = vpop.f32.mrf.mxu2  ;;  %v4518_v60 = vpop.f32.mrf.mxu3 }
 0x376   :  { %v4496_v5 = vadd.f32 %v4495_v45, %v15215_v21  ;;  %v4451_v8 = vpop.f32.mrf.mxu0  ;;  %v4474_v0 = vpop.f32.mrf.mxu1  ;;  %v17280_v45 = vld [vmem:[#allocation231_spill] sm:$0xff] }
 0x377   :  { %v4452_v49 = vadd.f32 %v4451_v8, %v15164_v56  ;;  %v17276_v56 = vld [vmem:[#allocation229_spill] sm:$0xff]  ;;  %v17283_v8 = vld [vmem:[#allocation238_spill] sm:$0xff] }
 0x378   :  { %v15296_v12 = vadd.f32 %v4518_v60, %v4496_v5  ;;  %v17282_v5 = vld [vmem:[#allocation237_spill] sm:$0xff] }
 0x379   :  { %v15298_v33 = vadd.f32 %v4474_v0, %v4452_v49  ;;  %v17284_v49 = vld [vmem:[#allocation235_spill] sm:$0xff]  ;;  %v17286_v0 = vld [vmem:[#allocation241_spill] sm:$0xff] }
 0x37d   :  { %v4497_v57 = vpop.f32.mrf.mxu2  ;;  %v4520_v47 = vpop.f32.mrf.mxu3 }
 0x37e   :  { %v4498_v34 = vadd.f32 %v4497_v57, %v15227_v10  ;;  %v4454_v44 = vpop.f32.mrf.mxu0  ;;  %v4477_v58 = vpop.f32.mrf.mxu1  ;;  %v17277_v10 = vld [vmem:[#allocation230_spill] sm:$0xff] }
 0x37f   :  { %v4455_v7 = vadd.f32 %v4454_v44, %v15176_v29  ;;  %v17287_v57 = vld [vmem:[#allocation242_spill] sm:$0xff] }
 0x380   :  { %v15302_v24 = vadd.f32 %v4520_v47, %v4498_v34  ;;  %4739 = vmatmul.bf16.vlgmr.msrb.gmra.mxu0 %v14695_v41 }
 0x381   :  { %v15304_v21 = vadd.f32 %v4477_v58, %v4455_v7  ;;  %4762 = vmatmul.bf16.vlgmr.msrb.gmra.mxu1 %v14698_v32  ;;  %4962 = vmatpush.bf16.msrb.mxu0 %v17278_v38  ;;  %v17289_v38 = vld [vmem:[#allocation240_spill] sm:$0xff] }
 0x382   :  { %4785 = vmatmul.bf16.vlgmr.msrb.gmra.mxu2 %v14695_v41  ;;  %4808 = vmatmul.bf16.vlgmr.msrb.gmra.mxu3 %v14698_v32  ;;  %v17281_v32 = vld [vmem:[#allocation232_spill] sm:$0xff] }
 0x383   :  { %5055 = vmatpush.bf16.msrb.mxu2 %v17276_v56  ;;  %5078 = vmatpush.bf16.msrb.mxu3 %v17277_v10  ;;  %v17288_v56 = vld [vmem:[#allocation239_spill] sm:$0xff] }
 0x384   :  { %4985 = vmatpush.bf16.msrb.mxu1 %v17279_v35 }
 0x385   :  { %v4500_v29 = vpop.f32.mrf.mxu2  ;;  %v4523_v52 = vpop.f32.mrf.mxu3  ;;  %4963 = vmatpush.bf16.msrb.mxu0 %v17282_v5 }
 0x386   :  { %v4501_v42 = vadd.f32 %v4500_v29, %v15232_v26  ;;  %v4456_v48 = vpop.f32.mrf.mxu0  ;;  %v4479_v15 = vpop.f32.mrf.mxu1  ;;  %v17285_v26 = vld [vmem:[#allocation236_spill] sm:$0xff]  ;;  %v17290_v29 = vld [vmem:[#allocation246_spill] sm:$0xff] }
 0x387   :  { %v4457_v46 = vadd.f32 %v4456_v48, %v15188_v27  ;;  %5056 = vmatpush.bf16.msrb.mxu2 %v17280_v45  ;;  %5079 = vmatpush.bf16.msrb.mxu3 %v17281_v32 }
 0x388   :  { %v15317_v41 = vadd.f32 %v4523_v52, %v4501_v42  ;;  %4986 = vmatpush.bf16.msrb.mxu1 %v17283_v8  ;;  %v17291_v42 = vld [vmem:[#allocation247_spill] sm:$0xff]  ;;  %v17294_v52 = vld [vmem:[#allocation249_spill] sm:$0xff]  ;;  %v17296_v8 = vld [vmem:[#allocation250_spill] sm:$0xff] }
 0x389   :  { %v15321_v60 = vadd.f32 %v4479_v15, %v4457_v46  ;;  %4964 = vmatpush.bf16.msrb.mxu0 %v17286_v0  ;;  %v17295_v46 = vld [vmem:[#allocation252_spill] sm:$0xff]  ;;  %v17300_v0 = vld [vmem:[#allocation255_spill] sm:$0xff] }
 0x38b   :  { %5057 = vmatpush.bf16.msrb.mxu2 %v17284_v49  ;;  %5080 = vmatpush.bf16.msrb.mxu3 %v17285_v26  ;;  %v17299_v26 = vld [vmem:[#allocation254_spill] sm:$0xff] }
 0x38c   :  { %4987 = vmatpush.bf16.msrb.mxu1 %v17287_v57  ;;  %v17302_v57 = vld [vmem:[#allocation257_spill] sm:$0xff] }
 0x38d   :  { %v4502_v27 = vpop.f32.mrf.mxu2  ;;  %v4525_v47 = vpop.f32.mrf.mxu3  ;;  %4965 = vmatpush.bf16.msrb.mxu0 %v17290_v29  ;;  %v17306_v29 = vld [vmem:[#allocation263_spill] sm:$0xff] }
 0x38e   :  { %v4503_v34 = vadd.f32 %v4502_v27, %v15246_v17  ;;  %v4459_v44 = vpop.f32.mrf.mxu0  ;;  %v4482_v58 = vpop.f32.mrf.mxu1  ;;  %v17293_v17 = vld [vmem:[#allocation244_spill] sm:$0xff] }
 0x38f   :  { %v4460_v7 = vadd.f32 %v4459_v44, %v15204_v3  ;;  %5058 = vmatpush.bf16.msrb.mxu2 %v17288_v56  ;;  %5081 = vmatpush.bf16.msrb.mxu3 %v17289_v38  ;;  %v17292_v3 = vld [vmem:[#allocation243_spill] sm:$0xff]  ;;  %v17301_v27 = vld [vmem:[#allocation256_spill] sm:$0xff]  ;;  %v17305_v38 = vld [vmem:[#allocation261_spill] sm:$0xff] }
 0x390   :  { %v15331_v10 = vadd.f32 %v4525_v47, %v4503_v34  ;;  %4744 = vmatmul.bf16.gmra.mxu0 %v14763_v55  ;;  %4988 = vmatpush.bf16.msrb.mxu1 %v17291_v42  ;;  %v17303_v34 = vld [vmem:[#allocation258_spill] sm:$0xff]  ;;  %v17307_v42 = vld [vmem:[#allocation264_spill] sm:$0xff] }
 0x391   :  { %v15335_v35 = vadd.f32 %v4482_v58, %v4460_v7  ;;  %4767 = vmatmul.bf16.gmra.mxu1 %v14766_v40  ;;  %4966 = vmatpush.bf16.msrb.mxu0 %v17294_v52  ;;  %v17304_v58 = vld [vmem:[#allocation260_spill] sm:$0xff] }
 0x392   :  { %4790 = vmatmul.bf16.gmra.mxu2 %v14763_v55  ;;  %4813 = vmatmul.bf16.gmra.mxu3 %v14766_v40  ;;  %v17297_v55 = vld [vmem:[#allocation251_spill] sm:$0xff]  ;;  %v17298_v40 = vld [vmem:[#allocation253_spill] sm:$0xff] }
 0x393   :  { %5059 = vmatpush.bf16.msrb.mxu2 %v17292_v3  ;;  %5082 = vmatpush.bf16.msrb.mxu3 %v17293_v17 }
 0x394   :  { %4989 = vmatpush.bf16.msrb.mxu1 %v17295_v46 }
 0x395   :  { %v4505_v48 = vpop.f32.mrf.mxu2  ;;  %v4528_v45 = vpop.f32.mrf.mxu3  ;;  %4967 = vmatpush.bf16.msrb.mxu0 %v17298_v40 }
 0x396   :  { %v4506_v15 = vadd.f32 %v4505_v48, %v15259_v25  ;;  %v4461_v32 = vpop.f32.mrf.mxu0  ;;  %v4484_v5 = vpop.f32.mrf.mxu1 }
 0x397   :  { %5060 = vmatpush.bf16.msrb.mxu2 %v17296_v8  ;;  %5083 = vmatpush.bf16.msrb.mxu3 %v17297_v55 }
 0x398   :  { %v15348_v49 = vadd.f32 %v4528_v45, %v4506_v15  ;;  %4990 = vmatpush.bf16.msrb.mxu1 %v17299_v26 }
 0x399   :  { %4968 = vmatpush.bf16.msrb.mxu0 %v17302_v57 }
 0x39b   :  { %5061 = vmatpush.bf16.msrb.mxu2 %v17300_v0  ;;  %5084 = vmatpush.bf16.msrb.mxu3 %v17301_v27 }
 0x39c   :  { %4991 = vmatpush.bf16.msrb.mxu1 %v17303_v34 }
 0x39d   :  { %v4507_v25 = vpop.f32.mrf.mxu2  ;;  %v4530_v47 = vpop.f32.mrf.mxu3  ;;  %4969 = vmatpush.bf16.msrb.mxu0 %v17306_v29 }
 0x39e   :  { %v4541_v44 = vpop.f32.mrf.mxu0  ;;  %v4564_v7 = vpop.f32.mrf.mxu1  ;;  %v17308_v47 = vld [vmem:[#allocation265_spill] sm:$0xff] }
 0x39f   :  { %5062 = vmatpush.bf16.msrb.mxu2 %v17304_v58  ;;  %v4565_v56 = vadd.f32 %v4564_v7, %v4541_v44  ;;  %5085 = vmatpush.bf16.msrb.mxu3 %v17305_v38  ;;  %v17309_v44 = vld [vmem:[#allocation266_spill] sm:$0xff]  ;;  %v17310_v7 = vld [vmem:[#allocation269_spill] sm:$0xff] }
 0x3a0   :  { %4749 = vmatmul.bf16.gmra.mxu0 %v14803_v19  ;;  %4992 = vmatpush.bf16.msrb.mxu1 %v17307_v42  ;;  %v17312_v42 = vld [vmem:[#allocation267_spill] sm:$0xff] }
 0x3a1   :  { %v15363_v3 = vadd.f32 %v4565_v56, %v15225_v61  ;;  %4772 = vmatmul.bf16.gmra.mxu1 %v14806_v63  ;;  %v10410_v61 = vld [vmem:[%s16263_s0 + $0x8] sm:$0xf] }
 0x3a2   :  { %4795 = vmatmul.bf16.gmra.mxu2 %v14803_v19  ;;  %4818 = vmatmul.bf16.gmra.mxu3 %v14806_v63  ;;  %v12248_v19 = vld [vmem:[%s16263_s0 + $0xc] sm:$0xf0]  ;;  %v12247_v63 = vld [vmem:[%s16263_s0 + $0xc] sm:$0xf] }
 0x3a3   :  { %v15386_v55 = vor.u32 %v12248_v19, %v10410_v61  ;;  %v10418_v61 = vld [vmem:[%s16263_s0 + $0x18] sm:$0xf]  ;;  %v12250_v19 = vld [vmem:[%s16263_s0 + $0x1c] sm:$0xf0] }
 0x3a5   :  { %v4587_v17 = vpop.f32.mrf.mxu2  ;;  %v4610_v52 = vpop.f32.mrf.mxu3 }
 0x3a6   :  { %v4543_v48 = vpop.f32.mrf.mxu0  ;;  %v4611_v46 = vadd.f32 %v4610_v52, %v4587_v17  ;;  %v4566_v15 = vpop.f32.mrf.mxu1  ;;  %v17313_v52 = vld [vmem:[#allocation268_spill] sm:$0xff] }
 0x3a7   :  { %v4567_v45 = vadd.f32 %v4566_v15, %v4543_v48  ;;  %v17314_v48 = vld [vmem:[#allocation275_spill] sm:$0xff]  ;;  %v17315_v15 = vld [vmem:[#allocation276_spill] sm:$0xff] }
 0x3a8   :  { %v15369_v32 = vadd.f32 %v4611_v46, %v15287_v51  ;;  %v10412_v51 = vld [vmem:[%s16263_s0 + $0x10] sm:$0xf0] }
 0x3a9   :  { %v15372_v5 = vadd.f32 %v4567_v45, %v15230_v13  ;;  %v15388_v26 = vor.u32 %v12247_v63, %v10412_v51  ;;  %v12249_v63 = vld [vmem:[%s16263_s0 + $0x1c] sm:$0xf] }
 0x3aa   :  { %v17316_v51 = vld [vmem:[#allocation273_spill] sm:$0xff] }
 0x3ad   :  { %v4589_v8 = vpop.f32.mrf.mxu2  ;;  %v4612_v13 = vpop.f32.mrf.mxu3 }
 0x3ae   :  { %v4546_v40 = vpop.f32.mrf.mxu0  ;;  %v4613_v0 = vadd.f32 %v4612_v13, %v4589_v8  ;;  %v4569_v27 = vpop.f32.mrf.mxu1  ;;  %v17318_v8 = vld [vmem:[#allocation279_spill] sm:$0xff] }
 0x3af   :  { %v4570_v57 = vadd.f32 %v4569_v27, %v4546_v40  ;;  %v15429_v40 = vor.u32 %v12250_v19, %v10418_v61 }
 0x3b0   :  { %v15391_v25 = vadd.f32 %v4613_v0, %v15298_v33  ;;  %4878 = vmatmul.bf16.vlgmr.msra.gmra.mxu0 %v15386_v55  ;;  %v17311_v33 = vld [vmem:[#allocation271_spill] sm:$0xff]  ;;  %v17319_v0 = vld [vmem:[#allocation280_spill] sm:$0xff] }
 0x3b1   :  { %v15395_v34 = vadd.f32 %v4570_v57, %v15244_v39  ;;  %4901 = vmatmul.bf16.vlgmr.msra.gmra.mxu1 %v15388_v26  ;;  %5101 = vmatpush.bf16.msra.mxu0 %v17310_v7 }
 0x3b2   :  { %4924 = vmatmul.bf16.vlgmr.msra.gmra.mxu2 %v15386_v55  ;;  %4947 = vmatmul.bf16.vlgmr.msra.gmra.mxu3 %v15388_v26 }
 0x3b3   :  { %5147 = vmatpush.bf16.msra.mxu2 %v17308_v47  ;;  %5170 = vmatpush.bf16.msra.mxu3 %v17309_v44 }
 0x3b4   :  { %5124 = vmatpush.bf16.msra.mxu1 %v17311_v33 }
 0x3b5   :  { %v4592_v58 = vpop.f32.mrf.mxu2  ;;  %v4615_v56 = vpop.f32.mrf.mxu3  ;;  %5102 = vmatpush.bf16.msra.mxu0 %v17314_v48  ;;  %v17326_v48 = vld [vmem:[#allocation286_spill] sm:$0xff] }
 0x3b6   :  { %v4548_v38 = vpop.f32.mrf.mxu0  ;;  %v4616_v29 = vadd.f32 %v4615_v56, %v4592_v58  ;;  %v4571_v39 = vpop.f32.mrf.mxu1  ;;  %v17320_v58 = vld [vmem:[#allocation277_spill] sm:$0xff]  ;;  %v17321_v56 = vld [vmem:[#allocation278_spill] sm:$0xff] }
 0x3b7   :  { %5148 = vmatpush.bf16.msra.mxu2 %v17312_v42  ;;  %v4572_v17 = vadd.f32 %v4571_v39, %v4548_v38  ;;  %5171 = vmatpush.bf16.msra.mxu3 %v17313_v52  ;;  %v17322_v38 = vld [vmem:[#allocation283_spill] sm:$0xff]  ;;  %v17323_v39 = vld [vmem:[#allocation284_spill] sm:$0xff]  ;;  %v17325_v52 = vld [vmem:[#allocation282_spill] sm:$0xff] }
 0x3b8   :  { %v15408_v46 = vadd.f32 %v4616_v29, %v15304_v21  ;;  %5125 = vmatpush.bf16.msra.mxu1 %v17315_v15  ;;  %v10420_v21 = vld [vmem:[%s16263_s0 + $0x20] sm:$0xf0]  ;;  %v17327_v15 = vld [vmem:[#allocation289_spill] sm:$0xff] }
 0x3b9   :  { %v15412_v45 = vadd.f32 %v4572_v17, %v15257_v18  ;;  %v17317_v18 = vld [vmem:[#allocation274_spill] sm:$0xff]  ;;  %5103 = vmatpush.bf16.msra.mxu0 %v17318_v8  ;;  %v15432_v47 = vor.u32 %v12249_v63, %v10420_v21  ;;  %v17324_v17 = vld [vmem:[#allocation281_spill] sm:$0xff] }
 0x3ba   :  { %v17330_v8 = vld [vmem:[#allocation290_spill] sm:$0xff] }
 0x3bb   :  { %5149 = vmatpush.bf16.msra.mxu2 %v17316_v51  ;;  %5172 = vmatpush.bf16.msra.mxu3 %v17317_v18  ;;  %v17328_v51 = vld [vmem:[#allocation287_spill] sm:$0xff]  ;;  %v17329_v18 = vld [vmem:[#allocation288_spill] sm:$0xff] }
 0x3bc   :  { %5126 = vmatpush.bf16.msra.mxu1 %v17319_v0 }
 0x3bd   :  { %v4594_v13 = vpop.f32.mrf.mxu2  ;;  %v4617_v27 = vpop.f32.mrf.mxu3  ;;  %5104 = vmatpush.bf16.msra.mxu0 %v17322_v38  ;;  %v17335_v38 = vld [vmem:[#allocation295_spill] sm:$0xff] }
 0x3be   :  { %v4551_v57 = vpop.f32.mrf.mxu0  ;;  %v4618_v44 = vadd.f32 %v4617_v27, %v4594_v13  ;;  %v4574_v7 = vpop.f32.mrf.mxu1  ;;  %v17331_v27 = vld [vmem:[#allocation291_spill] sm:$0xff] }
 0x3bf   :  { %5150 = vmatpush.bf16.msra.mxu2 %v17320_v58  ;;  %v4575_v33 = vadd.f32 %v4574_v7, %v4551_v57  ;;  %5173 = vmatpush.bf16.msra.mxu3 %v17321_v56  ;;  %v17333_v7 = vld [vmem:[#allocation293_spill] sm:$0xff]  ;;  %v17334_v58 = vld [vmem:[#allocation294_spill] sm:$0xff] }
 0x3c0   :  { %v15438_v29 = vadd.f32 %v4618_v44, %v15321_v60  ;;  %4883 = vmatmul.bf16.gmra.mxu0 %v15429_v40  ;;  %5127 = vmatpush.bf16.msra.mxu1 %v17323_v39  ;;  %v17332_v44 = vld [vmem:[#allocation292_spill] sm:$0xff] }
 0x3c1   :  { %v15443_v42 = vadd.f32 %v4575_v33, %v15274_v20  ;;  %4906 = vmatmul.bf16.gmra.mxu1 %v15432_v47  ;;  %5105 = vmatpush.bf16.msra.mxu0 %v17326_v48  ;;  %v4842_v20 = vld [vmem:[%s16263_s0 + $0x28] sm:$0xff] }
 0x3c2   :  { %4929 = vmatmul.bf16.gmra.mxu2 %v15429_v40  ;;  %4952 = vmatmul.bf16.gmra.mxu3 %v15432_v47  ;;  %v4856_v0 = vunpack.c.l.b16 %v4842_v20  ;;  %v4857_v57 = vunpack.c.h.b16 %v4842_v20  ;;  %v17336_v48 = vld [vmem:[#allocation296_spill] sm:$0xff] }
 0x3c3   :  { %5151 = vmatpush.bf16.msra.mxu2 %v17324_v17  ;;  %5174 = vmatpush.bf16.msra.mxu3 %v17325_v52 }
 0x3c4   :  { %5128 = vmatpush.bf16.msra.mxu1 %v17327_v15  ;;  %v15465_v56 = vpack.c.b16 %v4856_v0, %v4856_v0  ;;  %v15468_v52 = vpack.c.b16 %v4857_v57, %v4857_v57  ;;  %v17337_v15 = vld [vmem:[#allocation297_spill] sm:$0xff] }
 0x3c5   :  { %v4597_v60 = vpop.f32.mrf.mxu2  ;;  %v4620_v61 = vpop.f32.mrf.mxu3  ;;  %5106 = vmatpush.bf16.msra.mxu0 %v17330_v8 }
 0x3c6   :  { %v4553_v19 = vpop.f32.mrf.mxu0  ;;  %v4621_v63 = vadd.f32 %v4620_v61, %v4597_v60  ;;  %v4576_v21 = vpop.f32.mrf.mxu1  ;;  %v17338_v61 = vld [vmem:[#allocation300_spill] sm:$0xff] }
 0x3c7   :  { %5152 = vmatpush.bf16.msra.mxu2 %v17328_v51  ;;  %5175 = vmatpush.bf16.msra.mxu3 %v17329_v18  ;;  %v17339_v19 = vld [vmem:[#allocation301_spill] sm:$0xff] }
 0x3c8   :  { %v15459_v13 = vadd.f32 %v4621_v63, %v15335_v35  ;;  %5129 = vmatpush.bf16.msra.mxu1 %v17331_v27 }
 0x3c9   :  { %5107 = vmatpush.bf16.msra.mxu0 %v17334_v58 }
 0x3cb   :  { %5153 = vmatpush.bf16.msra.mxu2 %v17332_v44  ;;  %5176 = vmatpush.bf16.msra.mxu3 %v17333_v7  ;;  %v12252_v44 = vld [vmem:[%s16263_s0 + $0x3c] sm:$0xf0]  ;;  %v12251_v7 = vld [vmem:[%s16263_s0 + $0x3c] sm:$0xf] }
 0x3cc   :  { %5130 = vmatpush.bf16.msra.mxu1 %v17335_v38 }
 0x3cd   :  { %v4599_v33 = vpop.f32.mrf.mxu2  ;;  %v4622_v39 = vpop.f32.mrf.mxu3  ;;  %5108 = vmatpush.bf16.msra.mxu0 %v17338_v61  ;;  %v17340_v61 = vld [vmem:[#allocation302_spill] sm:$0xff] }
 0x3ce   :  { %v4633_v17 = vpop.f32.mrf.mxu0  ;;  %v4656_v35 = vpop.f32.mrf.mxu1 }
 0x3cf   :  { %5154 = vmatpush.bf16.msra.mxu2 %v17336_v48  ;;  %v4657_v60 = vadd.f32 %v4656_v35, %v4633_v17  ;;  %5177 = vmatpush.bf16.msra.mxu3 %v17337_v15 }
 0x3d0   :  { %4888 = vmatmul.bf16.gmra.mxu0 %v15465_v56  ;;  %5131 = vmatpush.bf16.msra.mxu1 %v17339_v19  ;;  %v17341_v19 = vld [vmem:[#allocation303_spill] sm:$0xff] }
 0x3d1   :  { %v15476_v20 = vadd.f32 %v4657_v60, %v15296_v12  ;;  %4911 = vmatmul.bf16.gmra.mxu1 %v15468_v52  ;;  %v10431_v12 = vld [vmem:[%s16263_s0 + $0x38] sm:$0xf] }
 0x3d2   :  { %4934 = vmatmul.bf16.gmra.mxu2 %v15465_v56  ;;  %4957 = vmatmul.bf16.gmra.mxu3 %v15468_v52  ;;  %v15499_v38 = vor.u32 %v12252_v44, %v10431_v12  ;;  %v17346_v12 = vld [vmem:[#allocation312_spill] sm:$0xff] }
 0x3d5   :  { %v4694_v63 = vpop.f32.mrf.mxu2  ;;  %v4717_v21 = vpop.f32.mrf.mxu3 }
 0x3d6   :  { %v4635_v51 = vpop.f32.mrf.mxu0  ;;  %v4718_v18 = vadd.f32 %v4717_v21, %v4694_v63  ;;  %v4658_v8 = vpop.f32.mrf.mxu1  ;;  %v17342_v63 = vld [vmem:[#allocation306_spill] sm:$0xff] }
 0x3d7   :  { %v4659_v0 = vadd.f32 %v4658_v8, %v4635_v51  ;;  %v17344_v8 = vld [vmem:[#allocation304_spill] sm:$0xff] }
 0x3d8   :  { %v15482_v27 = vadd.f32 %v4718_v18, %v15363_v3  ;;  %v10433_v3 = vld [vmem:[%s16263_s0 + $0x40] sm:$0xf0] }
 0x3d9   :  { %v15485_v57 = vadd.f32 %v4659_v0, %v15302_v24  ;;  %v15501_v35 = vor.u32 %v12251_v7, %v10433_v3  ;;  %v17345_v0 = vld [vmem:[#allocation305_spill] sm:$0xff] }
 0x3da   :  { %v17347_v7 = vld [vmem:[#allocation313_spill] sm:$0xff] }
 0x3dd   :  { %v4696_v58 = vpop.f32.mrf.mxu2  ;;  %v4719_v33 = vpop.f32.mrf.mxu3 }
 0x3de   :  { %v4638_v24 = vpop.f32.mrf.mxu0  ;;  %v4720_v39 = vadd.f32 %v4719_v33, %v4696_v58  ;;  %v4661_v17 = vpop.f32.mrf.mxu1  ;;  %v10439_v58 = vld [vmem:[%s16263_s0 + $0x48] sm:$0xf]  ;;  %v12254_v33 = vld [vmem:[%s16263_s0 + $0x4c] sm:$0xf0] }
 0x3df   :  { %v4662_v48 = vadd.f32 %v4661_v17, %v4638_v24  ;;  %v17348_v24 = vld [vmem:[#allocation310_spill] sm:$0xff]  ;;  %v17350_v17 = vld [vmem:[#allocation316_spill] sm:$0xff] }
 0x3e0   :  { %v15504_v60 = vadd.f32 %v4720_v39, %v15372_v5  ;;  %4970 = vmatmul.bf16.vlgmr.msrb.gmra.mxu0 %v15386_v55  ;;  %v17343_v5 = vld [vmem:[#allocation307_spill] sm:$0xff]  ;;  %v10441_v39 = vld [vmem:[%s16263_s0 + $0x50] sm:$0xf0] }
 0x3e1   :  { %v15508_v15 = vadd.f32 %v4662_v48, %v15317_v41  ;;  %4993 = vmatmul.bf16.vlgmr.msrb.gmra.mxu1 %v15388_v26  ;;  %5240 = vmatpush.bf16.msrb.mxu0 %v17342_v63 }
 0x3e2   :  { %5063 = vmatmul.bf16.vlgmr.msrb.gmra.mxu2 %v15499_v38  ;;  %5086 = vmatmul.bf16.vlgmr.msrb.gmra.mxu3 %v15501_v35 }
 0x3e3   :  { %5286 = vmatpush.bf16.msrb.mxu2 %v17340_v61  ;;  %5309 = vmatpush.bf16.msrb.mxu3 %v17341_v19  ;;  %v17351_v61 = vld [vmem:[#allocation317_spill] sm:$0xff] }
 0x3e4   :  { %5263 = vmatpush.bf16.msrb.mxu1 %v17343_v5 }
 0x3e5   :  { %v4699_v21 = vpop.f32.mrf.mxu2  ;;  %v4722_v51 = vpop.f32.mrf.mxu3  ;;  %5241 = vmatpush.bf16.msrb.mxu0 %v17346_v12  ;;  %v17355_v12 = vld [vmem:[#allocation321_spill] sm:$0xff] }
 0x3e6   :  { %v4640_v55 = vpop.f32.mrf.mxu0  ;;  %v4723_v18 = vadd.f32 %v4722_v51, %v4699_v21  ;;  %v4663_v41 = vpop.f32.mrf.mxu1  ;;  %v15543_v21 = vor.u32 %v12254_v33, %v10439_v58  ;;  %v17356_v58 = vld [vmem:[#allocation318_spill] sm:$0xff]  ;;  %v17357_v33 = vld [vmem:[#allocation319_spill] sm:$0xff] }
 0x3e7   :  { %5287 = vmatpush.bf16.msrb.mxu2 %v17344_v8  ;;  %v4664_v26 = vadd.f32 %v4663_v41, %v4640_v55  ;;  %5310 = vmatpush.bf16.msrb.mxu3 %v17345_v0  ;;  %v17353_v8 = vld [vmem:[#allocation315_spill] sm:$0xff] }
 0x3e8   :  { %v15521_v44 = vadd.f32 %v4723_v18, %v15395_v34  ;;  %5264 = vmatpush.bf16.msrb.mxu1 %v17347_v7  ;;  %v12253_v34 = vld [vmem:[%s16263_s0 + $0x4c] sm:$0xf]  ;;  %v17352_v18 = vld [vmem:[#allocation314_spill] sm:$0xff] }
 0x3e9   :  { %v15525_v3 = vadd.f32 %v4664_v26, %v15331_v10  ;;  %v17349_v10 = vld [vmem:[#allocation311_spill] sm:$0xff]  ;;  %5242 = vmatpush.bf16.msrb.mxu0 %v17350_v17  ;;  %v15545_v55 = vor.u32 %v12253_v34, %v10441_v39  ;;  %v17354_v26 = vld [vmem:[#allocation320_spill] sm:$0xff]  ;;  %v17359_v34 = vld [vmem:[#allocation325_spill] sm:$0xff] }
 0x3ea   :  { %v17360_v17 = vld [vmem:[#allocation323_spill] sm:$0xff] }
 0x3eb   :  { %5288 = vmatpush.bf16.msrb.mxu2 %v17348_v24  ;;  %5311 = vmatpush.bf16.msrb.mxu3 %v17349_v10  ;;  %v17358_v24 = vld [vmem:[#allocation322_spill] sm:$0xff] }
 0x3ec   :  { %5265 = vmatpush.bf16.msrb.mxu1 %v17351_v61  ;;  %v17362_v61 = vld [vmem:[#allocation326_spill] sm:$0xff] }
 0x3ed   :  { %v4701_v48 = vpop.f32.mrf.mxu2  ;;  %v4724_v19 = vpop.f32.mrf.mxu3  ;;  %5243 = vmatpush.bf16.msrb.mxu0 %v17354_v26 }
 0x3ee   :  { %v4643_v63 = vpop.f32.mrf.mxu0  ;;  %v4725_v5 = vadd.f32 %v4724_v19, %v4701_v48  ;;  %v4666_v51 = vpop.f32.mrf.mxu1  ;;  %v17361_v48 = vld [vmem:[#allocation324_spill] sm:$0xff] }
 0x3ef   :  { %5289 = vmatpush.bf16.msrb.mxu2 %v17352_v18  ;;  %v4667_v41 = vadd.f32 %v4666_v51, %v4643_v63  ;;  %5312 = vmatpush.bf16.msrb.mxu3 %v17353_v8  ;;  %v17363_v63 = vld [vmem:[#allocation327_spill] sm:$0xff]  ;;  %v17364_v18 = vld [vmem:[#allocation328_spill] sm:$0xff]  ;;  %v17366_v8 = vld [vmem:[#allocation330_spill] sm:$0xff] }
 0x3f0   :  { %v15551_v0 = vadd.f32 %v4725_v5, %v15412_v45  ;;  %4975 = vmatmul.bf16.gmra.mxu0 %v15429_v40  ;;  %5266 = vmatpush.bf16.msrb.mxu1 %v17355_v12  ;;  %v17367_v12 = vld [vmem:[#allocation331_spill] sm:$0xff] }
 0x3f1   :  { %v15556_v7 = vadd.f32 %v4667_v41, %v15348_v49  ;;  %4998 = vmatmul.bf16.gmra.mxu1 %v15432_v47  ;;  %5244 = vmatpush.bf16.msrb.mxu0 %v17358_v24  ;;  %v10428_v47 = vld [vmem:[%s16263_s0 + $0x58] sm:$0xff] }
 0x3f2   :  { %5068 = vmatmul.bf16.gmra.mxu2 %v15543_v21  ;;  %5091 = vmatmul.bf16.gmra.mxu3 %v15545_v55  ;;  %v5041_v5 = vunpack.c.l.b16 %v10428_v47  ;;  %v5042_v51 = vunpack.c.h.b16 %v10428_v47  ;;  %v17365_v41 = vld [vmem:[#allocation329_spill] sm:$0xff] }
 0x3f3   :  { %5290 = vmatpush.bf16.msrb.mxu2 %v17356_v58  ;;  %5313 = vmatpush.bf16.msrb.mxu3 %v17357_v33 }
 0x3f4   :  { %5267 = vmatpush.bf16.msrb.mxu1 %v17359_v34  ;;  %v15579_v24 = vpack.c.b16 %v5041_v5, %v5041_v5  ;;  %v17368_v34 = vld [vmem:[#allocation332_spill] sm:$0xff] }
 0x3f5   :  { %v4704_v45 = vpop.f32.mrf.mxu2  ;;  %v4727_v40 = vpop.f32.mrf.mxu3  ;;  %5245 = vmatpush.bf16.msrb.mxu0 %v17362_v61 }
 0x3f6   :  { %v4645_v39 = vpop.f32.mrf.mxu0  ;;  %v4728_v10 = vadd.f32 %v4727_v40, %v4704_v45  ;;  %v4668_v49 = vpop.f32.mrf.mxu1 }
 0x3f7   :  { %5291 = vmatpush.bf16.msrb.mxu2 %v17360_v17  ;;  %5314 = vmatpush.bf16.msrb.mxu3 %v17361_v48  ;;  %v17369_v39 = vld [vmem:[#allocation333_spill] sm:$0xff]  ;;  %v17371_v49 = vld [vmem:[#allocation335_spill] sm:$0xff] }
 0x3f8   :  { %v15572_v19 = vadd.f32 %v4728_v10, %v15443_v42  ;;  %5268 = vmatpush.bf16.msrb.mxu1 %v17363_v63  ;;  %v15581_v42 = vpack.c.b16 %v5042_v51, %v5042_v51  ;;  %v17370_v10 = vld [vmem:[#allocation334_spill] sm:$0xff] }
 0x3f9   :  { %5246 = vmatpush.bf16.msrb.mxu0 %v17366_v8 }
 0x3fb   :  { %5292 = vmatpush.bf16.msrb.mxu2 %v17364_v18  ;;  %5315 = vmatpush.bf16.msrb.mxu3 %v17365_v41 }
 0x3fc   :  { %5269 = vmatpush.bf16.msrb.mxu1 %v17367_v12 }
 0x3fd   :  { %v4706_v26 = vpop.f32.mrf.mxu2  ;;  %v4729_v58 = vpop.f32.mrf.mxu3  ;;  %5247 = vmatpush.bf16.msrb.mxu0 %v17370_v10 }
 0x3fe   :  { %v4740_v33 = vpop.f32.mrf.mxu0  ;;  %v4763_v45 = vpop.f32.mrf.mxu1 }
 0x3ff   :  { %5293 = vmatpush.bf16.msrb.mxu2 %v17368_v34  ;;  %v4764_v40 = vadd.f32 %v4763_v45, %v4740_v33  ;;  %5316 = vmatpush.bf16.msrb.mxu3 %v17369_v39  ;;  %v17374_v45 = vld [vmem:[#allocation340_spill] sm:$0xff] }
 0x400   :  { %4980 = vmatmul.bf16.gmra.mxu0 %v15465_v56  ;;  %5270 = vmatpush.bf16.msrb.mxu1 %v17371_v49  ;;  %v17376_v49 = vld [vmem:[#allocation338_spill] sm:$0xff] }
 0x401   :  { %v15589_v47 = vadd.f32 %v4764_v40, %v15369_v32  ;;  %5003 = vmatmul.bf16.gmra.mxu1 %v15468_v52 }
 0x402   :  { %5073 = vmatmul.bf16.gmra.mxu2 %v15579_v24  ;;  %5096 = vmatmul.bf16.gmra.mxu3 %v15581_v42 }
 0x405   :  { %v4786_v17 = vpop.f32.mrf.mxu2  ;;  %v4809_v48 = vpop.f32.mrf.mxu3 }
 0x406   :  { %v4742_v61 = vpop.f32.mrf.mxu0  ;;  %v4810_v63 = vadd.f32 %v4809_v48, %v4786_v17  ;;  %v4765_v5 = vpop.f32.mrf.mxu1  ;;  %v17377_v48 = vld [vmem:[#allocation339_spill] sm:$0xff] }
 0x407   :  { %v4766_v51 = vadd.f32 %v4765_v5, %v4742_v61  ;;  %v17379_v61 = vld [vmem:[#allocation345_spill] sm:$0xff]  ;;  %v17380_v5 = vld [vmem:[#allocation342_spill] sm:$0xff] }
 0x408   :  { %v15595_v18 = vadd.f32 %v4810_v63, %v15476_v20  ;;  %v17373_v20 = vld [vmem:[#allocation337_spill] sm:$0xff] }
 0x409   :  { %v15598_v56 = vadd.f32 %v4766_v51, %v15391_v25  ;;  %v17372_v25 = vld [vmem:[#allocation336_spill] sm:$0xff]  ;;  %v17381_v51 = vld [vmem:[#allocation343_spill] sm:$0xff] }
 0x40d   :  { %v4788_v32 = vpop.f32.mrf.mxu2  ;;  %v4811_v41 = vpop.f32.mrf.mxu3 }
 0x40e   :  { %v4745_v8 = vpop.f32.mrf.mxu0  ;;  %v4812_v52 = vadd.f32 %v4811_v41, %v4788_v32  ;;  %v4768_v26 = vpop.f32.mrf.mxu1  ;;  %v17382_v32 = vld [vmem:[#allocation348_spill] sm:$0xff] }
 0x40f   :  { %v4769_v12 = vadd.f32 %v4768_v26, %v4745_v8  ;;  %v17383_v8 = vld [vmem:[#allocation349_spill] sm:$0xff] }
 0x410   :  { %v15601_v58 = vadd.f32 %v4812_v52, %v15485_v57  ;;  %5109 = vmatmul.bf16.vlgmr.msra.gmra.mxu0 %v15499_v38  ;;  %v17375_v57 = vld [vmem:[#allocation341_spill] sm:$0xff] }
 0x411   :  { %v15605_v33 = vadd.f32 %v4769_v12, %v15408_v46  ;;  %5132 = vmatmul.bf16.vlgmr.msra.gmra.mxu1 %v15501_v35  ;;  %5332 = vmatpush.bf16.msra.mxu0 %v17374_v45  ;;  %v17385_v45 = vld [vmem:[#allocation347_spill] sm:$0xff] }
 0x412   :  { %5155 = vmatmul.bf16.vlgmr.msra.gmra.mxu2 %v15499_v38  ;;  %5178 = vmatmul.bf16.vlgmr.msra.gmra.mxu3 %v15501_v35  ;;  %v17378_v38 = vld [vmem:[#allocation344_spill] sm:$0xff] }
 0x413   :  { %5425 = vmatpush.bf16.msra.mxu2 %v17372_v25  ;;  %5448 = vmatpush.bf16.msra.mxu3 %v17373_v20 }
 0x414   :  { %5355 = vmatpush.bf16.msra.mxu1 %v17375_v57  ;;  %v17387_v57 = vld [vmem:[#allocation354_spill] sm:$0xff] }
 0x415   :  { %v4791_v34 = vpop.f32.mrf.mxu2  ;;  %v4814_v40 = vpop.f32.mrf.mxu3  ;;  %5333 = vmatpush.bf16.msra.mxu0 %v17378_v38 }
 0x416   :  { %v4747_v39 = vpop.f32.mrf.mxu0  ;;  %v4815_v10 = vadd.f32 %v4814_v40, %v4791_v34  ;;  %v4770_v46 = vpop.f32.mrf.mxu1 }
 0x417   :  { %5426 = vmatpush.bf16.msra.mxu2 %v17376_v49  ;;  %v4771_v17 = vadd.f32 %v4770_v46, %v4747_v39  ;;  %5449 = vmatpush.bf16.msra.mxu3 %v17377_v48  ;;  %v17388_v39 = vld [vmem:[#allocation350_spill] sm:$0xff]  ;;  %v17390_v46 = vld [vmem:[#allocation356_spill] sm:$0xff]  ;;  %v17391_v49 = vld [vmem:[#allocation359_spill] sm:$0xff] }
 0x418   :  { %v15618_v35 = vadd.f32 %v4815_v10, %v15508_v15  ;;  %5356 = vmatpush.bf16.msra.mxu1 %v17379_v61  ;;  %v17384_v15 = vld [vmem:[#allocation346_spill] sm:$0xff]  ;;  %v17389_v10 = vld [vmem:[#allocation351_spill] sm:$0xff]  ;;  %v17392_v61 = vld [vmem:[#allocation357_spill] sm:$0xff] }
 0x419   :  { %v15622_v63 = vadd.f32 %v4771_v17, %v15438_v29  ;;  %5334 = vmatpush.bf16.msra.mxu0 %v17382_v32  ;;  %v17386_v29 = vld [vmem:[#allocation353_spill] sm:$0xff]  ;;  %v17396_v32 = vld [vmem:[#allocation362_spill] sm:$0xff] }
 0x41b   :  { %5427 = vmatpush.bf16.msra.mxu2 %v17380_v5  ;;  %5450 = vmatpush.bf16.msra.mxu3 %v17381_v51  ;;  %v17393_v5 = vld [vmem:[#allocation358_spill] sm:$0xff]  ;;  %v17395_v51 = vld [vmem:[#allocation361_spill] sm:$0xff] }
 0x41c   :  { %5357 = vmatpush.bf16.msra.mxu1 %v17383_v8  ;;  %v17398_v8 = vld [vmem:[#allocation364_spill] sm:$0xff] }
 0x41d   :  { %v4793_v41 = vpop.f32.mrf.mxu2  ;;  %v4816_v52 = vpop.f32.mrf.mxu3  ;;  %5335 = vmatpush.bf16.msra.mxu0 %v17386_v29  ;;  %v17401_v29 = vld [vmem:[#allocation367_spill] sm:$0xff] }
 0x41e   :  { %v4750_v26 = vpop.f32.mrf.mxu0  ;;  %v4817_v12 = vadd.f32 %v4816_v52, %v4793_v41  ;;  %v4773_v25 = vpop.f32.mrf.mxu1  ;;  %v17397_v41 = vld [vmem:[#allocation363_spill] sm:$0xff] }
 0x41f   :  { %5428 = vmatpush.bf16.msra.mxu2 %v17384_v15  ;;  %v4774_v20 = vadd.f32 %v4773_v25, %v4750_v26  ;;  %5451 = vmatpush.bf16.msra.mxu3 %v17385_v45  ;;  %v17399_v26 = vld [vmem:[#allocation365_spill] sm:$0xff] }
 0x420   :  { %v15632_v34 = vadd.f32 %v4817_v12, %v15525_v3  ;;  %5114 = vmatmul.bf16.gmra.mxu0 %v15543_v21  ;;  %5358 = vmatpush.bf16.msra.mxu1 %v17387_v57  ;;  %v17403_v57 = vld [vmem:[#allocation369_spill] sm:$0xff] }
 0x421   :  { %v15637_v40 = vadd.f32 %v4774_v20, %v15459_v13  ;;  %5137 = vmatmul.bf16.gmra.mxu1 %v15545_v55  ;;  %5336 = vmatpush.bf16.msra.mxu0 %v17390_v46  ;;  %v17400_v20 = vld [vmem:[#allocation366_spill] sm:$0xff] }
 0x422   :  { %5160 = vmatmul.bf16.gmra.mxu2 %v15543_v21  ;;  %5183 = vmatmul.bf16.gmra.mxu3 %v15545_v55  ;;  %v17394_v21 = vld [vmem:[#allocation360_spill] sm:$0xff] }
 0x423   :  { %5429 = vmatpush.bf16.msra.mxu2 %v17388_v39  ;;  %5452 = vmatpush.bf16.msra.mxu3 %v17389_v10 }
 0x424   :  { %5359 = vmatpush.bf16.msra.mxu1 %v17391_v49 }
 0x425   :  { %v4796_v3 = vpop.f32.mrf.mxu2  ;;  %v4819_v17 = vpop.f32.mrf.mxu3  ;;  %5337 = vmatpush.bf16.msra.mxu0 %v17394_v21 }
 0x426   :  { %v4752_v48 = vpop.f32.mrf.mxu0  ;;  %v4820_v38 = vadd.f32 %v4819_v17, %v4796_v3  ;;  %v4775_v13 = vpop.f32.mrf.mxu1 }
 0x427   :  { %5430 = vmatpush.bf16.msra.mxu2 %v17392_v61  ;;  %5453 = vmatpush.bf16.msra.mxu3 %v17393_v5 }
 0x428   :  { %v15650_v55 = vadd.f32 %v4820_v38, %v15556_v7  ;;  %5360 = vmatpush.bf16.msra.mxu1 %v17395_v51  ;;  %v17402_v7 = vld [vmem:[#allocation368_spill] sm:$0xff] }
 0x429   :  { %5338 = vmatpush.bf16.msra.mxu0 %v17398_v8 }
 0x42b   :  { %5431 = vmatpush.bf16.msra.mxu2 %v17396_v32  ;;  %5454 = vmatpush.bf16.msra.mxu3 %v17397_v41 }
 0x42c   :  { %5361 = vmatpush.bf16.msra.mxu1 %v17399_v26 }
 0x42d   :  { %v4798_v52 = vpop.f32.mrf.mxu2  ;;  %v4821_v12 = vpop.f32.mrf.mxu3  ;;  %5339 = vmatpush.bf16.msra.mxu0 %v17402_v7 }
 0x42e   :  { %v4879_v25 = vpop.f32.mrf.mxu0  ;;  %v4902_v15 = vpop.f32.mrf.mxu1  ;;  %v17404_v12 = vld [vmem:[#allocation370_spill] sm:$0xff] }
 0x42f   :  { %5432 = vmatpush.bf16.msra.mxu2 %v17400_v20  ;;  %v4903_v45 = vadd.f32 %v4902_v15, %v4879_v25  ;;  %5455 = vmatpush.bf16.msra.mxu3 %v17401_v29  ;;  %v17405_v25 = vld [vmem:[#allocation371_spill] sm:$0xff]  ;;  %v17406_v15 = vld [vmem:[#allocation374_spill] sm:$0xff] }
 0x430   :  { %5119 = vmatmul.bf16.gmra.mxu0 %v15579_v24  ;;  %5362 = vmatpush.bf16.msra.mxu1 %v17403_v57  ;;  %v17408_v57 = vld [vmem:[#allocation372_spill] sm:$0xff] }
 0x431   :  { %v15663_v39 = vadd.f32 %v4903_v45, %v15482_v27  ;;  %5142 = vmatmul.bf16.gmra.mxu1 %v15581_v42  ;;  %v10452_v27 = vld [vmem:[%s16263_s0 + $0x68] sm:$0xf] }
 0x432   :  { %5165 = vmatmul.bf16.gmra.mxu2 %v15579_v24  ;;  %5188 = vmatmul.bf16.gmra.mxu3 %v15581_v42  ;;  %v12256_v24 = vld [vmem:[%s16263_s0 + $0x6c] sm:$0xf0]  ;;  %v12255_v42 = vld [vmem:[%s16263_s0 + $0x6c] sm:$0xf] }
 0x433   :  { %v15686_v5 = vor.u32 %v12256_v24, %v10452_v27  ;;  %v10460_v27 = vld [vmem:[%s16263_s0 + $0x78] sm:$0xf]  ;;  %v12258_v24 = vld [vmem:[%s16263_s0 + $0x7c] sm:$0xf0] }
 0x435   :  { %v4925_v10 = vpop.f32.mrf.mxu2  ;;  %v4948_v46 = vpop.f32.mrf.mxu3 }
 0x436   :  { %v4881_v3 = vpop.f32.mrf.mxu0  ;;  %v4949_v49 = vadd.f32 %v4948_v46, %v4925_v10  ;;  %v4904_v17 = vpop.f32.mrf.mxu1  ;;  %v17409_v46 = vld [vmem:[#allocation373_spill] sm:$0xff] }
 0x437   :  { %v4905_v48 = vadd.f32 %v4904_v17, %v4881_v3  ;;  %v17410_v3 = vld [vmem:[#allocation378_spill] sm:$0xff]  ;;  %v17411_v17 = vld [vmem:[#allocation379_spill] sm:$0xff] }
 0x438   :  { %v15669_v38 = vadd.f32 %v4949_v49, %v15589_v47  ;;  %v10454_v47 = vld [vmem:[%s16263_s0 + $0x70] sm:$0xf0] }
 0x439   :  { %v15672_v13 = vadd.f32 %v4905_v48, %v15504_v60  ;;  %v15688_v51 = vor.u32 %v12255_v42, %v10454_v47  ;;  %v12257_v42 = vld [vmem:[%s16263_s0 + $0x7c] sm:$0xf]  ;;  %v17412_v47 = vld [vmem:[#allocation376_spill] sm:$0xff] }
 0x43d   :  { %v4927_v61 = vpop.f32.mrf.mxu2  ;;  %v4950_v60 = vpop.f32.mrf.mxu3 }
 0x43e   :  { %v4884_v21 = vpop.f32.mrf.mxu0  ;;  %v4951_v32 = vadd.f32 %v4950_v60, %v4927_v61  ;;  %v4907_v41 = vpop.f32.mrf.mxu1  ;;  %v17414_v61 = vld [vmem:[#allocation382_spill] sm:$0xff] }
 0x43f   :  { %v4908_v8 = vadd.f32 %v4907_v41, %v4884_v21  ;;  %v15729_v21 = vor.u32 %v12258_v24, %v10460_v27 }
 0x440   :  { %v15691_v52 = vadd.f32 %v4951_v32, %v15598_v56  ;;  %5248 = vmatmul.bf16.vlgmr.msrb.gmra.mxu0 %v15686_v5  ;;  %v17407_v56 = vld [vmem:[#allocation375_spill] sm:$0xff] }
 0x441   :  { %v15695_v26 = vadd.f32 %v4908_v8, %v15521_v44  ;;  %5271 = vmatmul.bf16.vlgmr.msrb.gmra.mxu1 %v15688_v51  ;;  %5471 = vmatpush.bf16.msrb.mxu0 %v17406_v15  ;;  %v17415_v32 = vld [vmem:[#allocation383_spill] sm:$0xff] }
 0x442   :  { %5294 = vmatmul.bf16.vlgmr.msrb.gmra.mxu2 %v15686_v5  ;;  %5317 = vmatmul.bf16.vlgmr.msrb.gmra.mxu3 %v15688_v51 }
 0x443   :  { %5517 = vmatpush.bf16.msrb.mxu2 %v17404_v12  ;;  %5540 = vmatpush.bf16.msrb.mxu3 %v17405_v25 }
 0x444   :  { %5494 = vmatpush.bf16.msrb.mxu1 %v17407_v56 }
 0x445   :  { %v4930_v20 = vpop.f32.mrf.mxu2  ;;  %v4953_v45 = vpop.f32.mrf.mxu3  ;;  %5472 = vmatpush.bf16.msrb.mxu0 %v17410_v3  ;;  %v17423_v3 = vld [vmem:[#allocation388_spill] sm:$0xff] }
 0x446   :  { %v4886_v29 = vpop.f32.mrf.mxu0  ;;  %v4954_v7 = vadd.f32 %v4953_v45, %v4930_v20  ;;  %v4909_v44 = vpop.f32.mrf.mxu1  ;;  %v17416_v20 = vld [vmem:[#allocation380_spill] sm:$0xff]  ;;  %v17417_v45 = vld [vmem:[#allocation381_spill] sm:$0xff] }
 0x447   :  { %5518 = vmatpush.bf16.msrb.mxu2 %v17408_v57  ;;  %v4910_v10 = vadd.f32 %v4909_v44, %v4886_v29  ;;  %5541 = vmatpush.bf16.msrb.mxu3 %v17409_v46  ;;  %v17418_v29 = vld [vmem:[#allocation386_spill] sm:$0xff]  ;;  %v17420_v44 = vld [vmem:[#allocation387_spill] sm:$0xff]  ;;  %v17422_v46 = vld [vmem:[#allocation385_spill] sm:$0xff] }
 0x448   :  { %v15708_v49 = vadd.f32 %v4954_v7, %v15605_v33  ;;  %5495 = vmatpush.bf16.msrb.mxu1 %v17411_v17  ;;  %v10462_v33 = vld [vmem:[%s16263_s0 + $0x80] sm:$0xf0] }
 0x449   :  { %v15712_v48 = vadd.f32 %v4910_v10, %v15551_v0  ;;  %v17413_v0 = vld [vmem:[#allocation377_spill] sm:$0xff]  ;;  %5473 = vmatpush.bf16.msrb.mxu0 %v17414_v61  ;;  %v15732_v12 = vor.u32 %v12257_v42, %v10462_v33  ;;  %v17421_v10 = vld [vmem:[#allocation384_spill] sm:$0xff]  ;;  %v17424_v17 = vld [vmem:[#allocation391_spill] sm:$0xff] }
 0x44a   :  { %v17427_v61 = vld [vmem:[#allocation392_spill] sm:$0xff] }
 0x44b   :  { %5519 = vmatpush.bf16.msrb.mxu2 %v17412_v47  ;;  %5542 = vmatpush.bf16.msrb.mxu3 %v17413_v0  ;;  %v17425_v47 = vld [vmem:[#allocation389_spill] sm:$0xff]  ;;  %v17426_v0 = vld [vmem:[#allocation390_spill] sm:$0xff] }
 0x44c   :  { %5496 = vmatpush.bf16.msrb.mxu1 %v17415_v32 }
 0x44d   :  { %v4932_v60 = vpop.f32.mrf.mxu2  ;;  %v4955_v41 = vpop.f32.mrf.mxu3  ;;  %5474 = vmatpush.bf16.msrb.mxu0 %v17418_v29 }
 0x44e   :  { %v4889_v8 = vpop.f32.mrf.mxu0  ;;  %v4956_v25 = vadd.f32 %v4955_v41, %v4932_v60  ;;  %v4912_v15 = vpop.f32.mrf.mxu1  ;;  %v17428_v41 = vld [vmem:[#allocation393_spill] sm:$0xff] }
 0x44f   :  { %5520 = vmatpush.bf16.msrb.mxu2 %v17416_v20  ;;  %v4913_v56 = vadd.f32 %v4912_v15, %v4889_v8  ;;  %5543 = vmatpush.bf16.msrb.mxu3 %v17417_v45  ;;  %v17430_v15 = vld [vmem:[#allocation396_spill] sm:$0xff] }
 0x450   :  { %v15738_v7 = vadd.f32 %v4956_v25, %v15622_v63  ;;  %5253 = vmatmul.bf16.gmra.mxu0 %v15729_v21  ;;  %5497 = vmatpush.bf16.msrb.mxu1 %v17420_v44  ;;  %v17429_v25 = vld [vmem:[#allocation395_spill] sm:$0xff] }
 0x451   :  { %v15743_v57 = vadd.f32 %v4913_v56, %v15572_v19  ;;  %5276 = vmatmul.bf16.gmra.mxu1 %v15732_v12  ;;  %5475 = vmatpush.bf16.msrb.mxu0 %v17423_v3  ;;  %v10449_v19 = vld [vmem:[%s16263_s0 + $0x88] sm:$0xff] }
 0x452   :  { %17419 = vst [vmem:[#allocation34_spill] sm:$0xff] %v15738_v7  ;;  %5299 = vmatmul.bf16.gmra.mxu2 %v15729_v21  ;;  %5322 = vmatmul.bf16.gmra.mxu3 %v15732_v12  ;;  %v5226_v32 = vunpack.c.l.b16 %v10449_v19  ;;  %v5227_v8 = vunpack.c.h.b16 %v10449_v19 }
 0x453   :  { %5521 = vmatpush.bf16.msrb.mxu2 %v17421_v10  ;;  %5544 = vmatpush.bf16.msrb.mxu3 %v17422_v46 }
 0x454   :  { %5498 = vmatpush.bf16.msrb.mxu1 %v17424_v17  ;;  %v15765_v56 = vpack.c.b16 %v5226_v32, %v5226_v32  ;;  %v15768_v44 = vpack.c.b16 %v5227_v8, %v5227_v8  ;;  %v12260_v17 = vld [vmem:[%s16263_s0 + $0x9c] sm:$0xf0] }
 0x455   :  { %v4935_v63 = vpop.f32.mrf.mxu2  ;;  %v4958_v27 = vpop.f32.mrf.mxu3  ;;  %5476 = vmatpush.bf16.msrb.mxu0 %v17427_v61 }
 0x456   :  { %v4891_v24 = vpop.f32.mrf.mxu0  ;;  %v4959_v42 = vadd.f32 %v4958_v27, %v4935_v63  ;;  %v4914_v33 = vpop.f32.mrf.mxu1  ;;  %v12259_v27 = vld [vmem:[%s16263_s0 + $0x9c] sm:$0xf] }
 0x457   :  { %5522 = vmatpush.bf16.msrb.mxu2 %v17425_v47  ;;  %5545 = vmatpush.bf16.msrb.mxu3 %v17426_v0 }
 0x458   :  { %v15759_v60 = vadd.f32 %v4959_v42, %v15637_v40  ;;  %5499 = vmatpush.bf16.msrb.mxu1 %v17428_v41 }
 0x459   :  { %5477 = vmatpush.bf16.msrb.mxu0 %v14752_v54 }
 0x45b   :  { %5523 = vmatpush.bf16.msrb.mxu2 %v17429_v25  ;;  %5546 = vmatpush.bf16.msrb.mxu3 %v17430_v15 }
 0x45c   :  { %5500 = vmatpush.bf16.msrb.mxu1 %v14755_v22 }
 0x45d   :  { %v4937_v20 = vpop.f32.mrf.mxu2  ;;  %v4960_v45 = vpop.f32.mrf.mxu3  ;;  %5478 = vmatpush.bf16.msrb.mxu0 %v14768_v9 }
 0x45e   :  { %v4971_v29 = vpop.f32.mrf.mxu0  ;;  %v4994_v40 = vpop.f32.mrf.mxu1 }
 0x45f   :  { %5524 = vmatpush.bf16.msrb.mxu2 %v14759_v1  ;;  %v4995_v10 = vadd.f32 %v4994_v40, %v4971_v29  ;;  %5547 = vmatpush.bf16.msrb.mxu3 %v14761_v53  ;;  %v12261_v40 = vld [vmem:[%s16263_s0 + $0xac] sm:$0xf] }
 0x460   :  { %5258 = vmatmul.bf16.gmra.mxu0 %v15765_v56  ;;  %5501 = vmatpush.bf16.msrb.mxu1 %v14771_v30 }
 0x461   :  { %v15776_v54 = vadd.f32 %v4995_v10, %v15595_v18  ;;  %5281 = vmatmul.bf16.gmra.mxu1 %v15768_v44  ;;  %v10473_v18 = vld [vmem:[%s16263_s0 + $0x98] sm:$0xf] }
 0x462   :  { %5304 = vmatmul.bf16.gmra.mxu2 %v15765_v56  ;;  %5327 = vmatmul.bf16.gmra.mxu3 %v15768_v44  ;;  %v15799_v42 = vor.u32 %v12260_v17, %v10473_v18 }
 0x465   :  { %v5064_v22 = vpop.f32.mrf.mxu2  ;;  %v5087_v1 = vpop.f32.mrf.mxu3 }
 0x466   :  { %v4973_v46 = vpop.f32.mrf.mxu0  ;;  %v5088_v3 = vadd.f32 %v5087_v1, %v5064_v22  ;;  %v4996_v53 = vpop.f32.mrf.mxu1 }
 0x467   :  { %v4997_v63 = vadd.f32 %v4996_v53, %v4973_v46 }
 0x468   :  { %v15782_v9 = vadd.f32 %v5088_v3, %v15663_v39  ;;  %v10475_v39 = vld [vmem:[%s16263_s0 + $0xa0] sm:$0xf0] }
 0x469   :  { %v15785_v30 = vadd.f32 %v4997_v63, %v15601_v58  ;;  %v15801_v0 = vor.u32 %v12259_v27, %v10475_v39 }
 0x46d   :  { %v5066_v24 = vpop.f32.mrf.mxu2  ;;  %v5089_v19 = vpop.f32.mrf.mxu3 }
 0x46e   :  { %v4976_v58 = vpop.f32.mrf.mxu0  ;;  %v5090_v33 = vadd.f32 %v5089_v19, %v5066_v24  ;;  %v4999_v47 = vpop.f32.mrf.mxu1 }
 0x46f   :  { %v5000_v61 = vadd.f32 %v4999_v47, %v4976_v58 }
 0x470   :  { %v15804_v32 = vadd.f32 %v5090_v33, %v15672_v13  ;;  %5340 = vmatmul.bf16.vlgmr.msra.gmra.mxu0 %v15686_v5  ;;  %v10470_v33 = vld [vmem:[%s16263_s0 + $0xb8] sm:$0xff] }
 0x471   :  { %v15808_v41 = vadd.f32 %v5000_v61, %v15618_v35  ;;  %5363 = vmatmul.bf16.vlgmr.msra.gmra.mxu1 %v15688_v51  ;;  %v10481_v35 = vld [vmem:[%s16263_s0 + $0xa8] sm:$0xf]  ;;  %v12262_v51 = vld [vmem:[%s16263_s0 + $0xac] sm:$0xf0]  ;;  %v5411_v47 = vunpack.c.l.b16 %v10470_v33 }
 0x472   :  { %5433 = vmatmul.bf16.vlgmr.msra.gmra.mxu2 %v15799_v42  ;;  %5456 = vmatmul.bf16.vlgmr.msra.gmra.mxu3 %v15801_v0  ;;  %v10482_v1 = vor.u32 %v12262_v51, %v10481_v35 }
 0x475   :  { %v5069_v8 = vpop.f32.mrf.mxu2  ;;  %v5092_v25 = vpop.f32.mrf.mxu3 }
 0x476   :  { %v4978_v15 = vpop.f32.mrf.mxu0  ;;  %v5093_v20 = vadd.f32 %v5092_v25, %v5069_v8  ;;  %v5001_v45 = vpop.f32.mrf.mxu1 }
 0x477   :  { %v5002_v29 = vadd.f32 %v5001_v45, %v4978_v15 }
 0x478   :  { %v15814_v13 = vadd.f32 %v5093_v20, %v15695_v26  ;;  %v10483_v26 = vld [vmem:[%s16263_s0 + $0xb0] sm:$0xf0] }
 0x479   :  { %v15817_v5 = vadd.f32 %v5002_v29, %v15632_v34  ;;  %v10486_v53 = vor.u32 %v12261_v40, %v10483_v26 }
 0x47b   :  { %17431 = vst [vmem:[#allocation37_spill] sm:$0xff] %v15817_v5 }
 0x47d   :  { %v5071_v10 = vpop.f32.mrf.mxu2  ;;  %v5094_v22 = vpop.f32.mrf.mxu3 }
 0x47e   :  { %v4981_v34 = vpop.f32.mrf.mxu0  ;;  %v5095_v46 = vadd.f32 %v5094_v22, %v5071_v10  ;;  %v5004_v3 = vpop.f32.mrf.mxu1 }
 0x47f   :  { %v5005_v63 = vadd.f32 %v5004_v3, %v4981_v34 }
 0x480   :  { %v15832_v18 = vadd.f32 %v5095_v46, %v15712_v48  ;;  %5345 = vmatmul.bf16.gmra.mxu0 %v15729_v21  ;;  %v5412_v21 = vunpack.c.h.b16 %v10470_v33 }
 0x481   :  { %v5022_v17 = vadd.f32 %v5005_v63, %v15650_v55  ;;  %5368 = vmatmul.bf16.gmra.mxu1 %v15732_v12  ;;  %v5417_v12 = vpack.c.b16 %v5411_v47, %v5411_v47 }
 0x482   :  { %5438 = vmatmul.bf16.gmra.mxu2 %v10482_v1  ;;  %5461 = vmatmul.bf16.gmra.mxu3 %v10486_v53  ;;  %v5418_v15 = vpack.c.b16 %v5412_v21, %v5412_v21 }
 0x485   :  { %v5074_v27 = vpop.f32.mrf.mxu2  ;;  %v5097_v39 = vpop.f32.mrf.mxu3 }
 0x486   :  { %v4983_v24 = vpop.f32.mrf.mxu0  ;;  %v5098_v19 = vadd.f32 %v5097_v39, %v5074_v27  ;;  %v5006_v58 = vpop.f32.mrf.mxu1 }
 0x488   :  { %v15841_v48 = vadd.f32 %v5098_v19, %v15743_v57 }
 0x48d   :  { %v5076_v61 = vpop.f32.mrf.mxu2  ;;  %v5099_v55 = vpop.f32.mrf.mxu3 }
 0x48e   :  { %v5110_v8 = vpop.f32.mrf.mxu0  ;;  %v5133_v25 = vpop.f32.mrf.mxu1 }
 0x48f   :  { %v5134_v20 = vadd.f32 %v5133_v25, %v5110_v8 }
 0x490   :  { %5350 = vmatmul.bf16.gmra.mxu0 %v15765_v56 }
 0x491   :  { %v5194_v45 = vadd.f32 %v5134_v20, %v15669_v38  ;;  %5373 = vmatmul.bf16.gmra.mxu1 %v15768_v44 }
 0x492   :  { %5443 = vmatmul.bf16.gmra.mxu2 %v5417_v12  ;;  %5466 = vmatmul.bf16.gmra.mxu3 %v5418_v15 }
 0x495   :  { %v5156_v29 = vpop.f32.mrf.mxu2  ;;  %v5179_v57 = vpop.f32.mrf.mxu3 }
 0x496   :  { %v15846_v35 = vpop.f32.mrf.mxu0  ;;  %v5180_v51 = vadd.f32 %v5179_v57, %v5156_v29  ;;  %v15848_v40 = vpop.f32.mrf.mxu1 }
 0x498   :  { %v15851_v26 = vadd.f32 %v5180_v51, %v15776_v54 }
 0x49d   :  { %v15853_v10 = vpop.f32.mrf.mxu2  ;;  %v15855_v22 = vpop.f32.mrf.mxu3 }
 0x49e   :  { %v5115_v56 = vpop.f32.mrf.mxu0  ;;  %v5138_v38 = vpop.f32.mrf.mxu1 }
 0x49f   :  { %v5139_v34 = vadd.f32 %v5138_v38, %v5115_v56 }
 0x4a0   :  { %5479 = vmatmul.bf16.vlgmr.msrb.gmra.mxu0 %v15799_v42 }
 0x4a1   :  { %v5200_v44 = vadd.f32 %v5139_v34, %v15708_v49  ;;  %5502 = vmatmul.bf16.vlgmr.msrb.gmra.mxu1 %v15801_v0 }
 0x4a2   :  { %5525 = vmatmul.bf16.vlgmr.msrb.gmra.mxu2 %v15799_v42  ;;  %5548 = vmatmul.bf16.vlgmr.msrb.gmra.mxu3 %v15801_v0 }
 0x4a5   :  { %v5161_v46 = vpop.f32.mrf.mxu2  ;;  %v5184_v54 = vpop.f32.mrf.mxu3 }
 0x4a6   :  { %v15862_v3 = vpop.f32.mrf.mxu0  ;;  %v5185_v63 = vadd.f32 %v5184_v54, %v5161_v46  ;;  %v15864_v27 = vpop.f32.mrf.mxu1 }
 0x4a8   :  { %v15867_v39 = vadd.f32 %v5185_v63, %v15808_v41 }
 0x4aa   :  { %17432 = vst [vmem:[#allocation38_spill] sm:$0xff] %v15867_v39 }
 0x4ad   :  { %v15869_v24 = vpop.f32.mrf.mxu2  ;;  %v15871_v19 = vpop.f32.mrf.mxu3 }
 0x4ae   :  { %17433 = vst [vmem:[#allocation39_spill] sm:$0xff] %v15869_v24  ;;  %v5120_v49 = vpop.f32.mrf.mxu0  ;;  %v5143_v58 = vpop.f32.mrf.mxu1  ;;  %v10553_v24 = vld [vmem:[#allocation6 + $0x200] sm:$0xf] }
 0x4af   :  { %17434 = vst [vmem:[#allocation41_spill] sm:$0xff] %v15871_v19  ;;  %v5144_v33 = vadd.f32 %v5143_v58, %v5120_v49  ;;  %v12312_v19 = vld [vmem:[#allocation6 + $0x184] sm:$0xf0] }
 0x4b0   :  { %5484 = vmatmul.bf16.gmra.mxu0 %v10482_v1 }
 0x4b1   :  { %v5206_v42 = vadd.f32 %v5144_v33, %v15759_v60  ;;  %5507 = vmatmul.bf16.gmra.mxu1 %v10486_v53 }
 0x4b2   :  { %5530 = vmatmul.bf16.gmra.mxu2 %v10482_v1  ;;  %5553 = vmatmul.bf16.gmra.mxu3 %v10486_v53 }
 0x4b5   :  { %v5166_v0 = vpop.f32.mrf.mxu2  ;;  %v5189_v47 = vpop.f32.mrf.mxu3 }
 0x4b6   :  { %v5122_v21 = vpop.f32.mrf.mxu0  ;;  %v5190_v61 = vadd.f32 %v5189_v47, %v5166_v0  ;;  %v5145_v55 = vpop.f32.mrf.mxu1 }
 0x4b8   :  { %v15874_v41 = vadd.f32 %v5190_v61, %v5022_v17 }
 0x4bd   :  { %v5168_v8 = vpop.f32.mrf.mxu2  ;;  %v5191_v25 = vpop.f32.mrf.mxu3 }
 0x4be   :  { %v5249_v20 = vpop.f32.mrf.mxu0  ;;  %v5272_v29 = vpop.f32.mrf.mxu1 }
 0x4bf   :  { %v5273_v57 = vadd.f32 %v5272_v29, %v5249_v20 }
 0x4c0   :  { %5489 = vmatmul.bf16.gmra.mxu0 %v5417_v12 }
 0x4c1   :  { %v15877_v51 = vadd.f32 %v5273_v57, %v15782_v9  ;;  %5512 = vmatmul.bf16.gmra.mxu1 %v5418_v15 }
 0x4c2   :  { %5535 = vmatmul.bf16.gmra.mxu2 %v5417_v12  ;;  %5558 = vmatmul.bf16.gmra.mxu3 %v5418_v15 }
 0x4c5   :  { %v5295_v60 = vpop.f32.mrf.mxu2  ;;  %v5318_v1 = vpop.f32.mrf.mxu3 }
 0x4c6   :  { %v15879_v53 = vpop.f32.mrf.mxu0  ;;  %v5319_v56 = vadd.f32 %v5318_v1, %v5295_v60  ;;  %v15881_v38 = vpop.f32.mrf.mxu1 }
 0x4c8   :  { %v15883_v17 = vadd.f32 %v5319_v56, %v5194_v45 }
 0x4cd   :  { %v15885_v34 = vpop.f32.mrf.mxu2  ;;  %v15887_v46 = vpop.f32.mrf.mxu3 }
 0x4ce   :  { %v5254_v54 = vpop.f32.mrf.mxu0  ;;  %v5277_v63 = vpop.f32.mrf.mxu1 }
 0x4cf   :  { %v5278_v9 = vadd.f32 %v5277_v63, %v5254_v54  ;;  %v12358_v54 = vld [vmem:[#allocation6 + $0x2f4] sm:$0xf0] }
 0x4d1   :  { %v15890_v49 = vadd.f32 %v5278_v9, %v15814_v13 }
 0x4d5   :  { %v5300_v12 = vpop.f32.mrf.mxu2  ;;  %v5323_v15 = vpop.f32.mrf.mxu3 }
 0x4d6   :  { %v15892_v58 = vpop.f32.mrf.mxu0  ;;  %v5324_v33 = vadd.f32 %v5323_v15, %v5300_v12  ;;  %v15894_v0 = vpop.f32.mrf.mxu1 }
 0x4d8   :  { %v15896_v47 = vadd.f32 %v5324_v33, %v5200_v44  ;;  %v10673_v44 = vld [vmem:[#allocation6 + $0x2f0] sm:$0xf] }
 0x4d9   :  { %v10674_v12 = vor.u32 %v12358_v54, %v10673_v44  ;;  %v10545_v54 = vld [vmem:[#allocation6 + $0x1f0] sm:$0xf] }
 0x4da   :  { %17435 = vst [vmem:[#allocation40_spill] sm:$0xff] %v15896_v47  ;;  %v10491_v47 = vld [vmem:[#allocation6 + $0x188] sm:$0xf0] }
 0x4db   :  { %6025 = vmatpush.bf16.msra.mxu2 %v10674_v12  ;;  %v12323_v12 = vld [vmem:[#allocation6 + $0x1e4] sm:$0xf] }
 0x4dc   :  { %v10542_v28 = vor.u32 %v12323_v12, %v10539_v4  ;;  %v12321_v4 = vld [vmem:[#allocation6 + $0x1d4] sm:$0xf]  ;;  %v10529_v12 = vld [vmem:[#allocation6 + $0x1d0] sm:$0xf] }
 0x4dd   :  { %v15898_v45 = vpop.f32.mrf.mxu2  ;;  %v15900_v21 = vpop.f32.mrf.mxu3 }
 0x4de   :  { %v5259_v61 = vpop.f32.mrf.mxu0  ;;  %v5282_v55 = vpop.f32.mrf.mxu1 }
 0x4df   :  { %v5283_v8 = vadd.f32 %v5282_v55, %v5259_v61  ;;  %v10547_v61 = vld [vmem:[#allocation6 + $0x1f8] sm:$0xf0]  ;;  %v10609_v55 = vld [vmem:[#allocation6 + $0x270] sm:$0xf] }
 0x4e1   :  { %v15903_v25 = vadd.f32 %v5283_v8, %v15841_v48  ;;  %v12325_v48 = vld [vmem:[#allocation6 + $0x1f4] sm:$0xf] }
 0x4e5   :  { %v5305_v13 = vpop.f32.mrf.mxu2  ;;  %v5328_v20 = vpop.f32.mrf.mxu3 }
 0x4e6   :  { %v5261_v29 = vpop.f32.mrf.mxu0  ;;  %v5329_v57 = vadd.f32 %v5328_v20, %v5305_v13  ;;  %v5284_v60 = vpop.f32.mrf.mxu1  ;;  %v12342_v20 = vld [vmem:[#allocation6 + $0x274] sm:$0xf0] }
 0x4e7   :  { %v10665_v29 = vld [vmem:[#allocation6 + $0x2e0] sm:$0xf] }
 0x4e8   :  { %v15905_v1 = vadd.f32 %v5329_v57, %v5206_v42  ;;  %v10550_v42 = vor.u32 %v12325_v48, %v10547_v61  ;;  %v12356_v57 = vld [vmem:[#allocation6 + $0x2e4] sm:$0xf0]  ;;  %v10602_v48 = vor.u32 %v12340_v6, %v10601_v37  ;;  %v12338_v37 = vld [vmem:[#allocation6 + $0x254] sm:$0xf0] }
 0x4e9   :  { %v10666_v44 = vor.u32 %v12356_v57, %v10665_v29  ;;  %v12324_v61 = vld [vmem:[#allocation6 + $0x1e4] sm:$0xf0] }
 0x4ea   :  { %17436 = vst [vmem:[#allocation42_spill] sm:$0xff] %v15905_v1  ;;  %6044 = vmatpush.bf16.msra.mxu3 %v10550_v42  ;;  %v10538_v23 = vor.u32 %v12324_v61, %v10537_v11  ;;  %v10649_v11 = vld [vmem:[#allocation6 + $0x2c0] sm:$0xf] }
 0x4eb   :  { %6026 = vmatpush.bf16.msra.mxu2 %v10666_v44  ;;  %v10593_v44 = vld [vmem:[#allocation6 + $0x250] sm:$0xf] }
 0x4ed   :  { %v5307_v56 = vpop.f32.mrf.mxu2  ;;  %v5330_v63 = vpop.f32.mrf.mxu3 }
 0x4ee   :  { %v15907_v9 = vpop.f32.mrf.mxu0  ;;  %v15909_v15 = vpop.f32.mrf.mxu1  ;;  %v10610_v56 = vor.u32 %v12342_v20, %v10609_v55  ;;  %v12326_v63 = vld [vmem:[#allocation6 + $0x1f4] sm:$0xf0]  ;;  %6045 = vmatpush.bf16.msra.mxu3 %v10542_v28  ;;  %v10657_v55 = vld [vmem:[#allocation6 + $0x2d0] sm:$0xf]  ;;  %v12352_v28 = vld [vmem:[#allocation6 + $0x2c4] sm:$0xf0] }
 0x4ef   :  { %v10546_v2 = vor.u32 %v12326_v63, %v10545_v54  ;;  %v12354_v20 = vld [vmem:[#allocation6 + $0x2d4] sm:$0xf0]  ;;  %v10650_v63 = vor.u32 %v12352_v28, %v10649_v11  ;;  %v10513_v28 = vld [vmem:[#allocation6 + $0x1b0] sm:$0xf] }
 0x4f0   :  { %6006 = vmatpush.bf16.msra.mxu1 %v10610_v56  ;;  %v10658_v57 = vor.u32 %v12354_v20, %v10657_v55  ;;  %v10531_v56 = vld [vmem:[#allocation6 + $0x1d8] sm:$0xf0]  ;;  %v10521_v55 = vld [vmem:[#allocation6 + $0x1c0] sm:$0xf]  ;;  %v12320_v20 = vld [vmem:[#allocation6 + $0x1c4] sm:$0xf0] }
 0x4f1   :  { %5987 = vmatpush.bf16.msra.mxu0 %v10546_v2  ;;  %v10534_v6 = vor.u32 %v12321_v4, %v10531_v56  ;;  %v10594_v2 = vor.u32 %v12338_v37, %v10593_v44  ;;  %v10522_v4 = vor.u32 %v12320_v20, %v10521_v55  ;;  %v10586_v56 = vor.u32 %v12336_v14, %v10585_v16  ;;  %v10515_v44 = vld [vmem:[#allocation6 + $0x1b8] sm:$0xf0]  ;;  %v12334_v14 = vld [vmem:[#allocation6 + $0x234] sm:$0xf0]  ;;  %v10641_v55 = vld [vmem:[#allocation6 + $0x2b0] sm:$0xf] }
 0x4f2   :  { %6027 = vmatpush.bf16.msra.mxu2 %v10658_v57  ;;  %v12317_v57 = vld [vmem:[#allocation6 + $0x1b4] sm:$0xf]  ;;  %v12332_v20 = vld [vmem:[#allocation6 + $0x224] sm:$0xf0] }
 0x4f3   :  { %6046 = vmatpush.bf16.msra.mxu3 %v10534_v6  ;;  %v10518_v11 = vor.u32 %v12317_v57, %v10515_v44  ;;  %v12315_v44 = vld [vmem:[#allocation6 + $0x1a4] sm:$0xf] }
 0x4f4   :  { %6007 = vmatpush.bf16.msra.mxu1 %v10602_v48  ;;  %v12322_v48 = vld [vmem:[#allocation6 + $0x1d4] sm:$0xf0] }
 0x4f5   :  { %v15911_v33 = vpop.f32.mrf.mxu2  ;;  %v15913_v8 = vpop.f32.mrf.mxu3  ;;  %5988 = vmatpush.bf16.msra.mxu0 %v10538_v23  ;;  %v10530_v61 = vor.u32 %v12322_v48, %v10529_v12  ;;  %v10526_v23 = vor.u32 %v12319_v59, %v10523_v62  ;;  %v12318_v62 = vld [vmem:[#allocation6 + $0x1b4] sm:$0xf0]  ;;  %v10577_v59 = vld [vmem:[#allocation6 + $0x230] sm:$0xf]  ;;  %v12316_v48 = vld [vmem:[#allocation6 + $0x1a4] sm:$0xf0] }
 0x4f6   :  { %v15915_v13 = vpop.f32.mrf.mxu0  ;;  %v15917_v60 = vpop.f32.mrf.mxu1  ;;  %6028 = vmatpush.bf16.msra.mxu2 %v10650_v63  ;;  %v10514_v12 = vor.u32 %v12318_v62, %v10513_v28  ;;  %v10578_v16 = vor.u32 %v12334_v14, %v10577_v59  ;;  %v10505_v63 = vld [vmem:[#allocation6 + $0x1a0] sm:$0xf]  ;;  %v12314_v28 = vld [vmem:[#allocation6 + $0x194] sm:$0xf0]  ;;  %v10561_v59 = vld [vmem:[#allocation6 + $0x210] sm:$0xf] }
 0x4f7   :  { %6047 = vmatpush.bf16.msra.mxu3 %v10526_v23  ;;  %v12350_v23 = vld [vmem:[#allocation6 + $0x2b4] sm:$0xf0] }
 0x4f8   :  { %6008 = vmatpush.bf16.msra.mxu1 %v10594_v2  ;;  %v10642_v5 = vor.u32 %v12350_v23, %v10641_v55  ;;  %v12330_v14 = vld [vmem:[#allocation6 + $0x214] sm:$0xf0] }
 0x4f9   :  { %5989 = vmatpush.bf16.msra.mxu0 %v10530_v61  ;;  %v10569_v61 = vld [vmem:[#allocation6 + $0x220] sm:$0xf] }
 0x4fa   :  { %v10570_v57 = vor.u32 %v12332_v20, %v10569_v61  ;;  %6029 = vmatpush.bf16.msra.mxu2 %v10642_v5  ;;  %v10562_v61 = vor.u32 %v12330_v14, %v10561_v59 }
 0x4fb   :  { %6048 = vmatpush.bf16.msra.mxu3 %v10518_v11 }
 0x4fc   :  { %6009 = vmatpush.bf16.msra.mxu1 %v10586_v56  ;;  %v10506_v56 = vor.u32 %v12316_v48, %v10505_v63  ;;  %v12348_v63 = vld [vmem:[#allocation6 + $0x2a4] sm:$0xf0] }
 0x4fd   :  { %v15919_v43 = vpop.f32.mrf.mxu2  ;;  %v15921_v29 = vpop.f32.mrf.mxu3  ;;  %5990 = vmatpush.bf16.msra.mxu0 %v10522_v4  ;;  %v10497_v4 = vld [vmem:[#allocation6 + $0x190] sm:$0xf] }
 0x4fe   :  { %v15923_v42 = vpop.f32.mrf.mxu0  ;;  %v15925_v54 = vpop.f32.mrf.mxu1  ;;  %v10498_v48 = vor.u32 %v12314_v28, %v10497_v4  ;;  %v12346_v4 = vld [vmem:[#allocation6 + $0x294] sm:$0xf0] }
 0x500   :  { %6010 = vmatpush.bf16.msra.mxu1 %v10578_v16  ;;  %v12313_v16 = vld [vmem:[#allocation6 + $0x194] sm:$0xf] }
 0x501   :  { %5991 = vmatpush.bf16.msra.mxu0 %v10514_v12  ;;  %v10633_v12 = vld [vmem:[#allocation6 + $0x2a0] sm:$0xf] }
 0x502   :  { %v10634_v20 = vor.u32 %v12348_v63, %v10633_v12  ;;  %v10611_v12 = vld [vmem:[#allocation6 + $0x278] sm:$0xf0] }
 0x504   :  { %6011 = vmatpush.bf16.msra.mxu1 %v10570_v57  ;;  %6030 = vmatpush.bf16.msra.mxu2 %v10634_v20  ;;  %v12311_v57 = vld [vmem:[#allocation6 + $0x184] sm:$0xf]  ;;  %v10801_v20 = vld [vmem:[#allocation6 + $0xf0] sm:$0xf] }
 0x505   :  { %v15927_v1 = vpop.f32.mrf.mxu2  ;;  %v15929_v37 = vpop.f32.mrf.mxu3  ;;  %5992 = vmatpush.bf16.msra.mxu0 %v10506_v56  ;;  %v10625_v56 = vld [vmem:[#allocation6 + $0x290] sm:$0xf] }
 0x506   :  { %v15931_v6 = vpop.f32.mrf.mxu0  ;;  %v15933_v2 = vpop.f32.mrf.mxu1  ;;  %v10626_v14 = vor.u32 %v12346_v4, %v10625_v56  ;;  %v12339_v56 = vld [vmem:[#allocation6 + $0x264] sm:$0xf]  ;;  %v10603_v4 = vld [vmem:[#allocation6 + $0x268] sm:$0xf0] }
 0x507   :  { %17437 = vst [vmem:[#allocation43_spill] sm:$0xff] %v15931_v6  ;;  %v10507_v6 = vld [vmem:[#allocation6 + $0x1a8] sm:$0xf0] }
 0x508   :  { %17438 = vst [vmem:[#allocation45_spill] sm:$0xff] %v15933_v2  ;;  %v10510_v39 = vor.u32 %v12315_v44, %v10507_v6  ;;  %v10499_v6 = vld [vmem:[#allocation6 + $0x198] sm:$0xf0]  ;;  %v10489_v44 = vld [vmem:[#allocation6 + $0x180] sm:$0xf]  ;;  %6012 = vmatpush.bf16.msra.mxu1 %v10562_v61  ;;  %6031 = vmatpush.bf16.msra.mxu2 %v10626_v14  ;;  %v5458_v14 = vadd.f32 %v15913_v8, %v15911_v33 }
 0x509   :  { %v10502_v5 = vor.u32 %v12313_v16, %v10499_v6  ;;  %5993 = vmatpush.bf16.msra.mxu0 %v10498_v48  ;;  %v10490_v28 = vor.u32 %v12312_v19, %v10489_v44  ;;  %v12357_v61 = vld [vmem:[#allocation6 + $0x2f4] sm:$0xf]  ;;  %v12344_v19 = vld [vmem:[#allocation6 + $0x284] sm:$0xf0] }
 0x50a   :  { %6049 = vmatpush.bf16.msra.mxu3 %v10510_v39  ;;  %v12328_v39 = vld [vmem:[#allocation6 + $0x204] sm:$0xf0]  ;;  %v5563_v33 = vadd.f32 %v5458_v14, %v15877_v51  ;;  %v5136_v51 = vadd.f32 %v15848_v40, %v15846_v35  ;;  %v5182_v14 = vadd.f32 %v15855_v22, %v15853_v10  ;;  %v10651_v35 = vld [vmem:[#allocation6 + $0x2c8] sm:$0xf0]  ;;  %v10777_v40 = vld [vmem:[#allocation6 + $0xc0] sm:$0xf] }
 0x50b   :  { %v10554_v59 = vor.u32 %v12328_v39, %v10553_v24 }
 0x50d   :  { %v15935_v2 = vpop.f32.mrf.mxu2  ;;  %v15937_v11 = vpop.f32.mrf.mxu3  ;;  %6013 = vmatpush.bf16.msra.mxu1 %v10554_v59  ;;  %5994 = vmatpush.bf16.msra.mxu0 %v10490_v28  ;;  %v12355_v59 = vld [vmem:[#allocation6 + $0x2e4] sm:$0xf]  ;;  %v10606_v28 = vor.u32 %v12339_v56, %v10603_v4  ;;  %v12290_v56 = vld [vmem:[#allocation6 + $0xd4] sm:$0xf0]  ;;  %v10729_v4 = vld [vmem:[#allocation6 + $0x60] sm:$0xf] }
 0x50e   :  { %v5351_v62 = vpop.f32.mrf.mxu0  ;;  %v5374_v55 = vpop.f32.mrf.mxu1  ;;  %6050 = vmatpush.bf16.msra.mxu3 %v10502_v5  ;;  %v10617_v5 = vld [vmem:[#allocation6 + $0x280] sm:$0xf] }
 0x50f   :  { %v5375_v23 = vadd.f32 %v5374_v55, %v5351_v62  ;;  %v10494_v62 = vor.u32 %v12311_v57, %v10491_v47  ;;  %v12341_v55 = vld [vmem:[#allocation6 + $0x274] sm:$0xf]  ;;  %v12294_v47 = vld [vmem:[#allocation6 + $0xf4] sm:$0xf0]  ;;  %v10618_v44 = vor.u32 %v12344_v19, %v10617_v5 }
 0x510   :  { %v10802_v39 = vor.u32 %v12294_v47, %v10801_v20  ;;  %v10595_v20 = vld [vmem:[#allocation6 + $0x258] sm:$0xf0]  ;;  %v12353_v19 = vld [vmem:[#allocation6 + $0x2d4] sm:$0xf]  ;;  %v10785_v47 = vld [vmem:[#allocation6 + $0xd0] sm:$0xf] }
 0x511   :  { %v15940_v7 = vadd.f32 %v5375_v23, %v15874_v41  ;;  %v10614_v41 = vor.u32 %v12341_v55, %v10611_v12  ;;  %v10675_v23 = vld [vmem:[#allocation6 + $0x2f8] sm:$0xf0]  ;;  %6032 = vmatpush.bf16.msra.mxu2 %v10618_v44  ;;  %v12292_v55 = vld [vmem:[#allocation6 + $0xe4] sm:$0xf0] }
 0x512   :  { %6051 = vmatpush.bf16.msra.mxu3 %v10494_v62  ;;  %v10678_v24 = vor.u32 %v12357_v61, %v10675_v23  ;;  %v10667_v62 = vld [vmem:[#allocation6 + $0x2e8] sm:$0xf0]  ;;  %v12337_v23 = vld [vmem:[#allocation6 + $0x254] sm:$0xf] }
 0x513   :  { %17439 = vst [vmem:[#allocation44_spill] sm:$0xff] %v15940_v7  ;;  %6063 = vmatpush.bf16.msrb.mxu0 %v10614_v41  ;;  %v10670_v12 = vor.u32 %v12355_v59, %v10667_v62  ;;  %v12278_v41 = vld [vmem:[#allocation6 + $0x74] sm:$0xf0]  ;;  %v10598_v5 = vor.u32 %v12337_v23, %v10595_v20  ;;  %v12276_v59 = vld [vmem:[#allocation6 + $0x64] sm:$0xf0]  ;;  %v5197_v20 = vadd.f32 %v5136_v51, %v15691_v52 }
 0x514   :  { %6082 = vmatpush.bf16.msrb.mxu1 %v10678_v24  ;;  %v10659_v24 = vld [vmem:[#allocation6 + $0x2d8] sm:$0xf0]  ;;  %v10769_v52 = vld [vmem:[#allocation6 + $0xb0] sm:$0xf]  ;;  %v12272_v51 = vld [vmem:[#allocation6 + $0x44] sm:$0xf0] }
 0x515   :  { %v5444_v16 = vpop.f32.mrf.mxu2  ;;  %v5467_v63 = vpop.f32.mrf.mxu3 }
 0x516   :  { %v5353_v6 = vpop.f32.mrf.mxu0  ;;  %v5468_v7 = vadd.f32 %v5467_v63, %v5444_v16  ;;  %v5376_v48 = vpop.f32.mrf.mxu1  ;;  %6392 = vmatpush.bf16.msrb.mxu3 %v10802_v39  ;;  %v10793_v16 = vld [vmem:[#allocation6 + $0xe0] sm:$0xf]  ;;  %v10662_v39 = vor.u32 %v12353_v19, %v10659_v24 }
 0x517   :  { %v10794_v63 = vor.u32 %v12292_v55, %v10793_v16  ;;  %v10737_v6 = vld [vmem:[#allocation6 + $0x70] sm:$0xf]  ;;  %6064 = vmatpush.bf16.msrb.mxu0 %v10606_v28  ;;  %v10730_v28 = vor.u32 %v12276_v59, %v10729_v4  ;;  %v5460_v16 = vadd.f32 %v15921_v29, %v15919_v43  ;;  %v12335_v55 = vld [vmem:[#allocation6 + $0x244] sm:$0xf]  ;;  %v5365_v43 = vadd.f32 %v15909_v15, %v15907_v9 }
 0x518   :  { %v15943_v57 = vadd.f32 %v5468_v7, %v15903_v25  ;;  %v10738_v7 = vor.u32 %v12278_v41, %v10737_v6  ;;  %v5275_v25 = vadd.f32 %v15881_v38, %v15879_v53  ;;  %6083 = vmatpush.bf16.msrb.mxu1 %v10670_v12  ;;  %v10786_v38 = vor.u32 %v12290_v56, %v10785_v47  ;;  %v10587_v12 = vld [vmem:[#allocation6 + $0x248] sm:$0xf0]  ;;  %v10721_v29 = vld [vmem:[#allocation6 + $0x50] sm:$0xf] }
 0x519   :  { %v5578_v6 = vadd.f32 %v5563_v33, %v15046_v50  ;;  %v5198_v33 = vadd.f32 %v5182_v14, %v15785_v30  ;;  %v5463_v9 = vadd.f32 %v15929_v37, %v15927_v1  ;;  %v5380_v30 = vadd.f32 %v5365_v43, %v15851_v26  ;;  %v12284_v43 = vld [vmem:[#allocation6 + $0xa4] sm:$0xf0] }
 0x51a   :  { %6393 = vmatpush.bf16.msrb.mxu3 %v10794_v63  ;;  %6373 = vmatpush.bf16.msrb.mxu2 %v10738_v7  ;;  %v5381_v62 = vadd.f32 %v5275_v25, %v15804_v32  ;;  %v12351_v63 = vld [vmem:[#allocation6 + $0x2c4] sm:$0xf]  ;;  %v10590_v7 = vor.u32 %v12335_v55, %v10587_v12  ;;  %v5321_v32 = vadd.f32 %v15887_v46, %v15885_v34  ;;  %v12274_v25 = vld [vmem:[#allocation6 + $0x54] sm:$0xf0]  ;;  %v10579_v34 = vld [vmem:[#allocation6 + $0x238] sm:$0xf0] }
 0x51b   :  { %6065 = vmatpush.bf16.msrb.mxu0 %v10598_v5  ;;  %v10654_v10 = vor.u32 %v12351_v63, %v10651_v35  ;;  %v12333_v5 = vld [vmem:[#allocation6 + $0x234] sm:$0xf]  ;;  %v5593_v19 = vmax.f32 %v5578_v6, 0.0  ;;  %v5367_v55 = vadd.f32 %v15917_v60, %v15915_v13  ;;  %v12331_v63 = vld [vmem:[#allocation6 + $0x224] sm:$0xf] }
 0x51c   :  { %6084 = vmatpush.bf16.msrb.mxu1 %v10662_v39  ;;  %v12349_v46 = vld [vmem:[#allocation6 + $0x2b4] sm:$0xf]  ;;  %v10643_v39 = vld [vmem:[#allocation6 + $0x2b8] sm:$0xf0]  ;;  %v5382_v56 = vadd.f32 %v5321_v32, %v5197_v20  ;;  %v10571_v6 = vld [vmem:[#allocation6 + $0x228] sm:$0xf0] }
 0x51d   :  { %v5446_v61 = vpop.f32.mrf.mxu2  ;;  %v5469_v8 = vpop.f32.mrf.mxu3  ;;  %v10761_v32 = vld [vmem:[#allocation6 + $0xa0] sm:$0xf]  ;;  %v5383_v20 = vadd.f32 %v5367_v55, %v5198_v33 }
 0x51e   :  { %v5480_v48 = vpop.f32.mrf.mxu0  ;;  %v5503_v44 = vpop.f32.mrf.mxu1  ;;  %6394 = vmatpush.bf16.msrb.mxu3 %v10786_v38  ;;  %6374 = vmatpush.bf16.msrb.mxu2 %v10730_v28  ;;  %v12288_v61 = vld [vmem:[#allocation6 + $0xc4] sm:$0xf0]  ;;  %v5566_v8 = vadd.f32 %v5460_v16, %v5381_v62  ;;  %v12286_v38 = vld [vmem:[#allocation6 + $0xb4] sm:$0xf0]  ;;  %v10713_v28 = vld [vmem:[#allocation6 + $0x40] sm:$0xf]  ;;  %v5280_v16 = vadd.f32 %v15894_v0, %v15892_v58  ;;  %v5465_v58 = vadd.f32 %v15937_v11, %v15935_v2 }
 0x51f   :  { %v5504_v53 = vadd.f32 %v5503_v44, %v5480_v48  ;;  %v10778_v22 = vor.u32 %v12288_v61, %v10777_v40  ;;  %6066 = vmatpush.bf16.msrb.mxu0 %v10590_v7  ;;  %v10582_v44 = vor.u32 %v12333_v5, %v10579_v34  ;;  %v10770_v37 = vor.u32 %v12286_v38, %v10769_v52  ;;  %v10635_v61 = vld [vmem:[#allocation6 + $0x2a8] sm:$0xf0] }
 0x520   :  { %6085 = vmatpush.bf16.msrb.mxu1 %v10654_v10  ;;  %v10714_v62 = vor.u32 %v12272_v51, %v10713_v28  ;;  %v5581_v26 = vadd.f32 %v5566_v8, %v15046_v50  ;;  %v5569_v7 = vadd.f32 %v5463_v9, %v15890_v49  ;;  %v10574_v40 = vor.u32 %v12331_v63, %v10571_v6  ;;  %v10705_v10 = vld [vmem:[#allocation6 + $0x30] sm:$0xf]  ;;  %v12329_v8 = vld [vmem:[#allocation6 + $0x214] sm:$0xf]  ;;  %v10627_v9 = vld [vmem:[#allocation6 + $0x298] sm:$0xf0] }
 0x521   :  { %v5564_v41 = vadd.f32 %v5504_v53, %v15883_v17  ;;  %v10722_v17 = vor.u32 %v12274_v25, %v10721_v29  ;;  %v10646_v53 = vor.u32 %v12349_v46, %v10643_v39  ;;  %v10762_v60 = vor.u32 %v12284_v43, %v10761_v32  ;;  %v10697_v39 = vld [vmem:[#allocation6 + $0x20] sm:$0xf]  ;;  %v12280_v6 = vld [vmem:[#allocation6 + $0x84] sm:$0xf0] }
 0x522   :  { %6395 = vmatpush.bf16.msrb.mxu3 %v10778_v22  ;;  %v12270_v22 = vld [vmem:[#allocation6 + $0x34] sm:$0xf0]  ;;  %v5141_v29 = vadd.f32 %v15864_v27, %v15862_v3  ;;  %v5596_v2 = vmax.f32 %v5581_v26, 0.0  ;;  %v5370_v5 = vadd.f32 %v15925_v54, %v15923_v42  ;;  %v17440_v26 = vld [vmem:[#allocation40_spill] sm:$0xff] }
 0x523   :  { %v5579_v23 = vadd.f32 %v5564_v41, %v15049_v36  ;;  %6375 = vmatpush.bf16.msrb.mxu2 %v10722_v17  ;;  %6067 = vmatpush.bf16.msrb.mxu0 %v10582_v44  ;;  %v12347_v41 = vld [vmem:[#allocation6 + $0x2a4] sm:$0xf]  ;;  %v10706_v25 = vor.u32 %v12270_v22, %v10705_v10  ;;  %v5326_v17 = vadd.f32 %v15900_v21, %v15898_v45  ;;  %v12282_v44 = vld [vmem:[#allocation6 + $0x94] sm:$0xf0] }
 0x524   :  { %6086 = vmatpush.bf16.msrb.mxu1 %v10646_v53  ;;  %v10638_v13 = vor.u32 %v12347_v41, %v10635_v61  ;;  %v15989_v45 = vadd.f32 %v5569_v7, %v15046_v50  ;;  %v10689_v41 = vld [vmem:[#allocation6 + $0x10] sm:$0xf]  ;;  %v12266_v7 = vld [vmem:[#allocation6 + $0x14] sm:$0xf0] }
 0x525   :  { %v5526_v48 = vpop.f32.mrf.mxu2  ;;  %v5594_v15 = vmax.f32 %v5579_v23, 0.0  ;;  %v5549_v24 = vpop.f32.mrf.mxu3  ;;  %v5387_v23 = vadd.f32 %v5280_v16, %v15832_v18  ;;  %v12345_v18 = vld [vmem:[#allocation6 + $0x294] sm:$0xf]  ;;  %v10690_v32 = vor.u32 %v12266_v7, %v10689_v41 }
 0x526   :  { %v5482_v47 = vpop.f32.mrf.mxu0  ;;  %v5550_v4 = vadd.f32 %v5549_v24, %v5526_v48  ;;  %v5505_v59 = vpop.f32.mrf.mxu1  ;;  %6396 = vmatpush.bf16.msrb.mxu3 %v10770_v37  ;;  %v10563_v48 = vld [vmem:[#allocation6 + $0x218] sm:$0xf0]  ;;  %v10630_v24 = vor.u32 %v12345_v18, %v10627_v9  ;;  %v10619_v37 = vld [vmem:[#allocation6 + $0x288] sm:$0xf0]  ;;  %v17443_v10 = vld [vmem:[#allocation41_spill] sm:$0xff] }
 0x527   :  { %v15969_v14 = vpack.c.bf16 %v5594_v15, %v5593_v19  ;;  %v5506_v1 = vadd.f32 %v5505_v59, %v5482_v47  ;;  %6376 = vmatpush.bf16.msrb.mxu2 %v10714_v62  ;;  %6068 = vmatpush.bf16.msrb.mxu0 %v10574_v40  ;;  %v10566_v19 = vor.u32 %v12329_v8, %v10563_v48  ;;  %v10753_v47 = vld [vmem:[#allocation6 + $0x90] sm:$0xf]  ;;  %v10555_v59 = vld [vmem:[#allocation6 + $0x208] sm:$0xf0]  ;;  %v10745_v62 = vld [vmem:[#allocation6 + $0x80] sm:$0xf] }
 0x528   :  { %v5565_v12 = vadd.f32 %v5550_v4, %v5380_v30  ;;  %6087 = vmatpush.bf16.msrb.mxu1 %v10638_v13  ;;  %v5572_v21 = vadd.f32 %v5465_v58, %v5387_v23  ;;  %v12268_v30 = vld [vmem:[#allocation6 + $0x24] sm:$0xf0]  ;;  %v12327_v4 = vld [vmem:[#allocation6 + $0x204] sm:$0xf]  ;;  %v10746_v13 = vor.u32 %v12280_v6, %v10745_v62  ;;  %v5599_v8 = vmax.f32 %v15989_v45, 0.0  ;;  %v17446_v6 = vld [vmem:[#allocation45_spill] sm:$0xff] }
 0x529   :  { %v5567_v35 = vadd.f32 %v5506_v1, %v5382_v56  ;;  %v5723_v42 = vunpack.c.l.b16 %v15969_v14  ;;  %v10754_v56 = vor.u32 %v12282_v44, %v10753_v47  ;;  %v5724_v53 = vunpack.c.h.b16 %v15969_v14  ;;  %v12343_v1 = vld [vmem:[#allocation6 + $0x284] sm:$0xf]  ;;  %v12309_v45 = vld [vmem:[#allocation6 + $0x174] sm:$0xf] }
 0x52a   :  { %v5580_v0 = vadd.f32 %v5565_v12, %v15063_v31  ;;  %6397 = vmatpush.bf16.msrb.mxu3 %v10762_v60  ;;  %v10698_v28 = vor.u32 %v12268_v30, %v10697_v39  ;;  %v10558_v51 = vor.u32 %v12327_v4, %v10555_v59  ;;  %v10622_v63 = vor.u32 %v12343_v1, %v10619_v37  ;;  %v17442_v60 = vld [vmem:[#allocation39_spill] sm:$0xff] }
 0x52b   :  { %v5582_v49 = vadd.f32 %v5567_v35, %v15049_v36  ;;  %6377 = vmatpush.bf16.msrb.mxu2 %v10706_v25  ;;  %6069 = vmatpush.bf16.msrb.mxu0 %v10566_v19  ;;  %v17441_v35 = vld [vmem:[#allocation34_spill] sm:$0xff]  ;;  %v5187_v22 = vadd.f32 %v17443_v10, %v17442_v60  ;;  %v16012_v48 = vadd.f32 %v5572_v21, %v15046_v50  ;;  %v17447_v60 = vld [vmem:[#allocation37_spill] sm:$0xff] }
 0x52c   :  { %v5595_v34 = vmax.f32 %v5580_v0, 0.0  ;;  %6088 = vmatpush.bf16.msrb.mxu1 %v10630_v24  ;;  %v5203_v14 = vadd.f32 %v5141_v29, %v17441_v35  ;;  %v10739_v19 = vld [vmem:[#allocation6 + $0x78] sm:$0xf0]  ;;  %v10681_v21 = vld [vmem:[#allocation6] sm:$0xf] }
 0x52d   :  { %v5528_v11 = vpop.f32.mrf.mxu2  ;;  %v5597_v3 = vmax.f32 %v5582_v49, 0.0  ;;  %v5551_v27 = vpop.f32.mrf.mxu3  ;;  %v17444_v49 = vld [vmem:[#allocation38_spill] sm:$0xff]  ;;  %v5204_v10 = vadd.f32 %v5187_v22, %v17447_v60 }
 0x52e   :  { %v5485_v46 = vpop.f32.mrf.mxu0  ;;  %v5552_v33 = vadd.f32 %v5551_v27, %v5528_v11  ;;  %v5508_v15 = vpop.f32.mrf.mxu1  ;;  %6398 = vmatpush.bf16.msrb.mxu3 %v10754_v56  ;;  %v5609_v40 = vpack.c.bf16 %v5595_v34, %v5595_v34  ;;  %v5388_v29 = vadd.f32 %v5326_v17, %v5203_v14  ;;  %v5386_v25 = vadd.f32 %v5370_v5, %v17444_v49  ;;  %v12310_v11 = vld [vmem:[#allocation6 + $0x174] sm:$0xf0]  ;;  %v12277_v17 = vld [vmem:[#allocation6 + $0x74] sm:$0xf]  ;;  %v12308_v56 = vld [vmem:[#allocation6 + $0x164] sm:$0xf0] }
 0x52f   :  { %v15992_v54 = vpack.c.bf16 %v5597_v3, %v5596_v2  ;;  %v5509_v52 = vadd.f32 %v5508_v15, %v5485_v46  ;;  %6378 = vmatpush.bf16.msrb.mxu2 %v10698_v28  ;;  %6070 = vmatpush.bf16.msrb.mxu0 %v10558_v51  ;;  %v10865_v2 = vld [vmem:[#allocation6 + $0x170] sm:$0xf]  ;;  %v10867_v15 = vld [vmem:[#allocation6 + $0x178] sm:$0xf0]  ;;  %v10731_v28 = vld [vmem:[#allocation6 + $0x68] sm:$0xf0] }
 0x530   :  { %v5568_v38 = vadd.f32 %v5552_v33, %v5383_v20  ;;  %6089 = vmatpush.bf16.msrb.mxu1 %v10622_v63  ;;  %v10866_v46 = vor.u32 %v12310_v11, %v10865_v2  ;;  %v10742_v33 = vor.u32 %v12277_v17, %v10739_v19  ;;  %v5725_v24 = vunpack.c.l.b16 %v5609_v40  ;;  %v12307_v51 = vld [vmem:[#allocation6 + $0x164] sm:$0xf]  ;;  %v12293_v40 = vld [vmem:[#allocation6 + $0xf4] sm:$0xf]  ;;  %v10851_v19 = vld [vmem:[#allocation6 + $0x158] sm:$0xf0] }
 0x531   :  { %v5726_v16 = vunpack.c.l.b16 %v15992_v54  ;;  %v5727_v55 = vunpack.c.h.b16 %v15992_v54  ;;  %v5570_v12 = vadd.f32 %v5509_v52, %v17440_v26  ;;  %v10870_v39 = vor.u32 %v12309_v45, %v10867_v15  ;;  %v10857_v52 = vld [vmem:[#allocation6 + $0x160] sm:$0xf]  ;;  %v12273_v11 = vld [vmem:[#allocation6 + $0x54] sm:$0xf]  ;;  %v10795_v15 = vld [vmem:[#allocation6 + $0xe8] sm:$0xf0] }
 0x532   :  { %v5583_v61 = vadd.f32 %v5568_v38, %v15063_v31  ;;  %6399 = vmatpush.bf16.msrb.mxu3 %v10746_v13  ;;  %v12275_v38 = vld [vmem:[#allocation6 + $0x64] sm:$0xf]  ;;  %v12305_v17 = vld [vmem:[#allocation6 + $0x154] sm:$0xf] }
 0x533   :  { %v5585_v43 = vadd.f32 %v5570_v12, %v15049_v36  ;;  %v5735_v58 = vpack.c.b16 %v5726_v16, %v5723_v42  ;;  %v16005_v0 = vpack.c.b16 %v5727_v55, %v5724_v53  ;;  %6379 = vmatpush.bf16.msrb.mxu2 %v10690_v32  ;;  %v12264_v42 = vld [vmem:[#allocation6 + $0x4] sm:$0xf0]  ;;  %v10858_v53 = vor.u32 %v12308_v56, %v10857_v52  ;;  %v10859_v12 = vld [vmem:[#allocation6 + $0x168] sm:$0xf0]  ;;  %v12271_v56 = vld [vmem:[#allocation6 + $0x44] sm:$0xf] }
 0x534   :  { %v5598_v23 = vmax.f32 %v5583_v61, 0.0  ;;  %v10682_v59 = vor.u32 %v12264_v42, %v10681_v21  ;;  %v10734_v26 = vor.u32 %v12275_v38, %v10731_v28  ;;  %v17445_v63 = vld [vmem:[#allocation43_spill] sm:$0xff]  ;;  %v10862_v14 = vor.u32 %v12307_v51, %v10859_v12  ;;  %v10803_v61 = vld [vmem:[#allocation6 + $0xf8] sm:$0xf0]  ;;  %v10843_v51 = vld [vmem:[#allocation6 + $0x148] sm:$0xf0] }
 0x535   :  { %v5531_v20 = vpop.f32.mrf.mxu2  ;;  %v5600_v34 = vmax.f32 %v5585_v43, 0.0  ;;  %v5554_v3 = vpop.f32.mrf.mxu3  ;;  %5995 = vmatmul.bf16.vlgmr.msra.gmra.mxu0 %v5735_v58  ;;  %6014 = vmatmul.bf16.vlgmr.msra.gmra.mxu1 %v16005_v0  ;;  %v5372_v41 = vadd.f32 %v17446_v6, %v17445_v63  ;;  %v10806_v13 = vor.u32 %v12293_v40, %v10803_v61  ;;  %v10854_v45 = vor.u32 %v12305_v17, %v10851_v19  ;;  %v10841_v21 = vld [vmem:[#allocation6 + $0x140] sm:$0xf]  ;;  %v10833_v61 = vld [vmem:[#allocation6 + $0x130] sm:$0xf] }
 0x536   :  { %v5487_v27 = vpop.f32.mrf.mxu0  ;;  %v16015_v5 = vpack.c.bf16 %v5598_v23, %v5598_v23  ;;  %v5555_v18 = vadd.f32 %v5554_v3, %v5531_v20  ;;  %6052 = vmatmul.bf16.vlgmr.msra.gmra.mxu3 %v5735_v58  ;;  %v5510_v9 = vpop.f32.mrf.mxu1  ;;  %6411 = vmatpush.bf16.msra.mxu0 %v10866_v46  ;;  %v12306_v23 = vld [vmem:[#allocation6 + $0x154] sm:$0xf0] }
 0x537   :  { %v16017_v47 = vpack.c.bf16 %v5600_v34, %v5599_v8  ;;  %v5511_v44 = vadd.f32 %v5510_v9, %v5487_v27  ;;  %6430 = vmatpush.bf16.msra.mxu1 %v10742_v33  ;;  %6468 = vmatpush.bf16.msra.mxu3 %v10870_v39  ;;  %v10723_v8 = vld [vmem:[#allocation6 + $0x58] sm:$0xf0]  ;;  %v5389_v34 = vadd.f32 %v5372_v41, %v5204_v10  ;;  %v12269_v10 = vld [vmem:[#allocation6 + $0x34] sm:$0xf] }
 0x538   :  { %v5728_v30 = vunpack.c.l.b16 %v16015_v5  ;;  %v5571_v4 = vadd.f32 %v5555_v18, %v5386_v25  ;;  %6380 = vmatpush.bf16.msrb.mxu2 %v10682_v59  ;;  %v10849_v25 = vld [vmem:[#allocation6 + $0x150] sm:$0xf]  ;;  %v10726_v46 = vor.u32 %v12273_v11, %v10723_v8  ;;  %v12291_v18 = vld [vmem:[#allocation6 + $0xe4] sm:$0xf]  ;;  %v10779_v11 = vld [vmem:[#allocation6 + $0xc8] sm:$0xf0] }
 0x539   :  { %v5573_v1 = vadd.f32 %v5511_v44, %v5388_v29  ;;  %v5729_v37 = vunpack.c.l.b16 %v16017_v47  ;;  %v5730_v62 = vunpack.c.h.b16 %v16017_v47  ;;  %v10798_v42 = vor.u32 %v12291_v18, %v10795_v15  ;;  %v12303_v59 = vld [vmem:[#allocation6 + $0x144] sm:$0xf]  ;;  %v10707_v47 = vld [vmem:[#allocation6 + $0x38] sm:$0xf0]  ;;  %v10825_v8 = vld [vmem:[#allocation6 + $0x120] sm:$0xf] }
 0x53a   :  { %v16026_v7 = vpack.c.b16 %v5728_v30, %v5725_v24  ;;  %v5586_v35 = vadd.f32 %v5571_v4, %v15063_v31  ;;  %6412 = vmatpush.bf16.msra.mxu0 %v10858_v53  ;;  %v12304_v24 = vld [vmem:[#allocation6 + $0x144] sm:$0xf0]  ;;  %v10715_v4 = vld [vmem:[#allocation6 + $0x48] sm:$0xf0]  ;;  %v17448_v53 = vld [vmem:[#allocation42_spill] sm:$0xff]  ;;  %v10846_v5 = vor.u32 %v12303_v59, %v10843_v51 }
 0x53b   :  { %v5588_v32 = vadd.f32 %v5573_v1, %v15049_v36  ;;  %v16034_v43 = vpack.c.b16 %v5729_v37, %v5726_v16  ;;  %v16040_v58 = vpack.c.b16 %v5730_v62, %v5727_v55  ;;  %6431 = vmatpush.bf16.msra.mxu1 %v10734_v26  ;;  %v5602_v16 = vmax.f32 %v16012_v48, 0.0  ;;  %6469 = vmatpush.bf16.msra.mxu3 %v10862_v14  ;;  %v12289_v1 = vld [vmem:[#allocation6 + $0xd4] sm:$0xf]  ;;  %v10787_v26 = vld [vmem:[#allocation6 + $0xd8] sm:$0xf0] }
 0x53c   :  { %v5601_v29 = vmax.f32 %v5586_v35, 0.0  ;;  %6033 = vmatmul.bf16.vlgmr.msra.gmra.mxu2 %v16026_v7  ;;  %v10850_v55 = vor.u32 %v12306_v23, %v10849_v25  ;;  %v5590_v48 = vadd.f32 %v15943_v57, %v15046_v50  ;;  %v10842_v52 = vor.u32 %v12304_v24, %v10841_v21  ;;  %v12301_v23 = vld [vmem:[#allocation6 + $0x134] sm:$0xf]  ;;  %v12267_v18 = vld [vmem:[#allocation6 + $0x24] sm:$0xf] }
 0x53d   :  { %v5533_v49 = vpop.f32.mrf.mxu2  ;;  %v5603_v20 = vmax.f32 %v5588_v32, 0.0  ;;  %v5556_v2 = vpop.f32.mrf.mxu3  ;;  %6449 = vmatpush.bf16.msra.mxu2 %v10806_v13  ;;  %v10718_v28 = vor.u32 %v12271_v56, %v10715_v4  ;;  %v10790_v6 = vor.u32 %v12289_v1, %v10787_v26  ;;  %v12302_v32 = vld [vmem:[#allocation6 + $0x134] sm:$0xf0]  ;;  %v10710_v25 = vor.u32 %v12269_v10, %v10707_v47  ;;  %v10827_v15 = vld [vmem:[#allocation6 + $0x128] sm:$0xf0] }
 0x53e   :  { %v5490_v54 = vpop.f32.mrf.mxu0  ;;  %v16045_v3 = vpack.c.bf16 %v5601_v29, %v5601_v29  ;;  %v5557_v22 = vadd.f32 %v5556_v2, %v5533_v49  ;;  %v5513_v27 = vpop.f32.mrf.mxu1  ;;  %6413 = vmatpush.bf16.msra.mxu0 %v10850_v55  ;;  %v5605_v13 = vmax.f32 %v5590_v48, 0.0  ;;  %v10699_v48 = vld [vmem:[#allocation6 + $0x28] sm:$0xf0]  ;;  %v12285_v56 = vld [vmem:[#allocation6 + $0xb4] sm:$0xf] }
 0x53f   :  { %v5514_v9 = vadd.f32 %v5513_v27, %v5490_v54  ;;  %v16049_v33 = vpack.c.bf16 %v5603_v20, %v5602_v16  ;;  %6432 = vmatpush.bf16.msra.mxu1 %v10726_v46  ;;  %6470 = vmatpush.bf16.msra.mxu3 %v10854_v45  ;;  %v10835_v16 = vld [vmem:[#allocation6 + $0x138] sm:$0xf0]  ;;  %v12287_v20 = vld [vmem:[#allocation6 + $0xc4] sm:$0xf]  ;;  %v10702_v45 = vor.u32 %v12267_v18, %v10699_v48  ;;  %v12265_v1 = vld [vmem:[#allocation6 + $0x14] sm:$0xf] }
 0x540   :  { %v5574_v44 = vadd.f32 %v5557_v22, %v5389_v34  ;;  %v5731_v39 = vunpack.c.l.b16 %v16045_v3  ;;  %v10838_v55 = vor.u32 %v12301_v23, %v10835_v16  ;;  %v12300_v34 = vld [vmem:[#allocation6 + $0x124] sm:$0xf0]  ;;  %v10782_v17 = vor.u32 %v12287_v20, %v10779_v11  ;;  %v10771_v4 = vld [vmem:[#allocation6 + $0xb8] sm:$0xf0]  ;;  %v10817_v3 = vld [vmem:[#allocation6 + $0x110] sm:$0xf] }
 0x541   :  { %v5576_v38 = vadd.f32 %v5514_v9, %v17448_v53  ;;  %v5732_v50 = vunpack.c.l.b16 %v16049_v33  ;;  %v5733_v57 = vunpack.c.h.b16 %v16049_v33  ;;  %6450 = vmatpush.bf16.msra.mxu2 %v10798_v42  ;;  %v17449_v22 = vld [vmem:[#allocation44_spill] sm:$0xff]  ;;  %v10826_v19 = vor.u32 %v12300_v34, %v10825_v8  ;;  %v12299_v9 = vld [vmem:[#allocation6 + $0x124] sm:$0xf]  ;;  %v10691_v26 = vld [vmem:[#allocation6 + $0x18] sm:$0xf0] }
 0x542   :  { %v5589_v12 = vadd.f32 %v5574_v44, %v15063_v31  ;;  %v16060_v63 = vpack.c.b16 %v5731_v39, %v5728_v30  ;;  %6414 = vmatpush.bf16.msra.mxu0 %v10842_v52  ;;  %v10830_v52 = vor.u32 %v12299_v9, %v10827_v15  ;;  %v10774_v59 = vor.u32 %v12285_v56, %v10771_v4  ;;  %v10763_v33 = vld [vmem:[#allocation6 + $0xa8] sm:$0xf0]  ;;  %v10929_v16 = vld [vmem:[#allocation6 + $0x370] sm:$0xf]  ;;  %v12374_v20 = vld [vmem:[#allocation6 + $0x374] sm:$0xf0] }
 0x543   :  { %v5591_v41 = vadd.f32 %v5576_v38, %v15049_v36  ;;  %v5738_v35 = vpack.c.b16 %v5732_v50, %v5729_v37  ;;  %v16071_v14 = vpack.c.b16 %v5733_v57, %v5730_v62  ;;  %6433 = vmatpush.bf16.msra.mxu1 %v10718_v28  ;;  %v10834_v37 = vor.u32 %v12302_v32, %v10833_v61  ;;  %v12296_v61 = vld [vmem:[#allocation6 + $0x104] sm:$0xf0]  ;;  %v12263_v32 = vld [vmem:[#allocation6 + $0x4] sm:$0xf]  ;;  %v12373_v11 = vld [vmem:[#allocation6 + $0x374] sm:$0xf] }
 0x544   :  { %v5604_v40 = vmax.f32 %v5589_v12, 0.0  ;;  %6471 = vmatpush.bf16.msra.mxu3 %v10846_v5  ;;  %v12297_v12 = vld [vmem:[#allocation6 + $0x114] sm:$0xf]  ;;  %v12283_v5 = vld [vmem:[#allocation6 + $0xa4] sm:$0xf]  ;;  %v17451_v4 = vld [vmem:[#allocation24_spill] sm:$0xff] }
 0x545   :  { %v5536_v30 = vpop.f32.mrf.mxu2  ;;  %v5606_v36 = vmax.f32 %v5591_v41, 0.0  ;;  %v5559_v60 = vpop.f32.mrf.mxu3  ;;  %6000 = vmatmul.bf16.gmra.mxu0 %v5738_v35  ;;  %6019 = vmatmul.bf16.gmra.mxu1 %v16071_v14  ;;  %v10931_v8 = vld [vmem:[#allocation6 + $0x378] sm:$0xf0]  ;;  %v17450_v34 = vld [vmem:[#allocation27_spill] sm:$0xff] }
 0x546   :  { %v5492_v29 = vpop.f32.mrf.mxu0  ;;  %v5560_v49 = vadd.f32 %v5559_v60, %v5536_v30  ;;  %6057 = vmatmul.bf16.gmra.mxu3 %v5738_v35  ;;  %v16074_v62 = vpack.c.bf16 %v5604_v40, %v5604_v40  ;;  %6451 = vmatpush.bf16.msra.mxu2 %v10790_v6  ;;  %v5515_v2 = vpop.f32.mrf.mxu1  ;;  %v10819_v35 = vld [vmem:[#allocation6 + $0x118] sm:$0xf0]  ;;  %v10766_v40 = vor.u32 %v12283_v5, %v10763_v33  ;;  %v10809_v30 = vld [vmem:[#allocation6 + $0x100] sm:$0xf]  ;;  %v12295_v60 = vld [vmem:[#allocation6 + $0x104] sm:$0xf] }
 0x547   :  { %v5616_v54 = vpack.c.bf16 %v5606_v36, %v5605_v13  ;;  %6415 = vmatpush.bf16.msra.mxu0 %v10834_v37  ;;  %6434 = vmatpush.bf16.msra.mxu1 %v10710_v25  ;;  %v10810_v13 = vor.u32 %v12296_v61, %v10809_v30  ;;  %v10683_v36 = vld [vmem:[#allocation6 + $0x8] sm:$0xf0]  ;;  %v12281_v29 = vld [vmem:[#allocation6 + $0x94] sm:$0xf]  ;;  %v10993_v2 = vld [vmem:[#allocation6 + $0x3f0] sm:$0xf] }
 0x548   :  { %v5577_v27 = vadd.f32 %v5560_v49, %v17449_v22  ;;  %v5734_v46 = vunpack.c.l.b16 %v16074_v62  ;;  %6472 = vmatpush.bf16.msra.mxu3 %v10838_v55  ;;  %v10811_v37 = vld [vmem:[#allocation6 + $0x108] sm:$0xf0]  ;;  %v10686_v47 = vor.u32 %v12263_v32, %v10683_v36  ;;  %v10755_v49 = vld [vmem:[#allocation6 + $0x98] sm:$0xf0]  ;;  %v12390_v55 = vld [vmem:[#allocation6 + $0x3f4] sm:$0xf0] }
 0x549   :  { %v6967_v21 = vunpack.c.h.b16 %v5616_v54  ;;  %v6966_v24 = vunpack.c.l.b16 %v5616_v54  ;;  %v10758_v62 = vor.u32 %v12281_v29, %v10755_v49  ;;  %v10814_v23 = vor.u32 %v12295_v60, %v10811_v37  ;;  %v12372_v48 = vld [vmem:[#allocation6 + $0x364] sm:$0xf0]  ;;  %v10985_v9 = vld [vmem:[#allocation6 + $0x3e0] sm:$0xf]  ;;  %v12371_v15 = vld [vmem:[#allocation6 + $0x364] sm:$0xf] }
 0x54a   :  { %v5592_v44 = vadd.f32 %v5577_v27, %v15063_v31  ;;  %v16081_v42 = vpack.c.b16 %v5734_v46, %v5731_v39  ;;  %6452 = vmatpush.bf16.msra.mxu2 %v10782_v17  ;;  %v12298_v39 = vld [vmem:[#allocation6 + $0x114] sm:$0xf0]  ;;  %v10930_v54 = vor.u32 %v12374_v20, %v10929_v16  ;;  %v10994_v22 = vor.u32 %v12390_v55, %v10993_v2  ;;  %v10747_v17 = vld [vmem:[#allocation6 + $0x88] sm:$0xf0]  ;;  %v12368_v5 = vld [vmem:[#allocation6 + $0x344] sm:$0xf0] }
 0x54b   :  { %6416 = vmatpush.bf16.msra.mxu0 %v10826_v19  ;;  %v16085_v53 = vpack.c.b16 %v6967_v21, %v5733_v57  ;;  %v16089_v38 = vpack.c.b16 %v6966_v24, %v5732_v50  ;;  %6435 = vmatpush.bf16.msra.mxu1 %v10702_v45  ;;  %v10818_v51 = vor.u32 %v12298_v39, %v10817_v3  ;;  %v10921_v19 = vld [vmem:[#allocation6 + $0x360] sm:$0xf]  ;;  %v10923_v21 = vld [vmem:[#allocation6 + $0x368] sm:$0xf0]  ;;  %v10977_v3 = vld [vmem:[#allocation6 + $0x3d0] sm:$0xf] }
 0x54c   :  { %v5607_v31 = vmax.f32 %v5592_v44, 0.0  ;;  %6038 = vmatmul.bf16.gmra.mxu2 %v16081_v42  ;;  %v10694_v57 = vor.u32 %v12265_v1, %v10691_v26  ;;  %6473 = vmatpush.bf16.msra.mxu3 %v10830_v52  ;;  %v10822_v50 = vor.u32 %v12297_v12, %v10819_v35  ;;  %v10934_v27 = vor.u32 %v12373_v11, %v10931_v8  ;;  %v11057_v44 = vld [vmem:[#allocation6 + $0x470] sm:$0xf]  ;;  %v12406_v52 = vld [vmem:[#allocation6 + $0x474] sm:$0xf0] }
 0x54d   :  { %v5538_v28 = vpop.f32.mrf.mxu2  ;;  %v5561_v6 = vpop.f32.mrf.mxu3  ;;  %v10926_v24 = vor.u32 %v12371_v15, %v10923_v21  ;;  %v11058_v56 = vor.u32 %v12406_v52, %v11057_v44  ;;  %v10915_v1 = vld [vmem:[#allocation6 + $0x358] sm:$0xf0]  ;;  %v10969_v33 = vld [vmem:[#allocation6 + $0x3c0] sm:$0xf]  ;;  %v12367_v61 = vld [vmem:[#allocation6 + $0x344] sm:$0xf] }
 0x54e   :  { %v5617_v41 = vpack.c.bf16 %v5607_v31, %v5607_v31  ;;  %6453 = vmatpush.bf16.msra.mxu2 %v10774_v59  ;;  %v10913_v59 = vld [vmem:[#allocation6 + $0x350] sm:$0xf]  ;;  %v12370_v31 = vld [vmem:[#allocation6 + $0x354] sm:$0xf0]  ;;  %v11049_v6 = vld [vmem:[#allocation6 + $0x460] sm:$0xf] }
 0x54f   :  { %6417 = vmatpush.bf16.msra.mxu0 %v10818_v51  ;;  %6436 = vmatpush.bf16.msra.mxu1 %v10694_v57  ;;  %v10914_v39 = vor.u32 %v12370_v31, %v10913_v59  ;;  %v12386_v28 = vld [vmem:[#allocation6 + $0x3d4] sm:$0xf0]  ;;  %v12369_v51 = vld [vmem:[#allocation6 + $0x354] sm:$0xf]  ;;  %v10905_v57 = vld [vmem:[#allocation6 + $0x340] sm:$0xf] }
 0x550   :  { %v6968_v10 = vunpack.c.l.b16 %v5617_v41  ;;  %6474 = vmatpush.bf16.msra.mxu3 %v10822_v50  ;;  %v10978_v26 = vor.u32 %v12386_v28, %v10977_v3  ;;  %v10918_v12 = vor.u32 %v12369_v51, %v10915_v1  ;;  %v12404_v41 = vld [vmem:[#allocation6 + $0x464] sm:$0xf0]  ;;  %v10907_v32 = vld [vmem:[#allocation6 + $0x348] sm:$0xf0]  ;;  %v12402_v36 = vld [vmem:[#allocation6 + $0x454] sm:$0xf0] }
 0x551   :  { %v11050_v35 = vor.u32 %v12404_v41, %v11049_v6  ;;  %v12384_v50 = vld [vmem:[#allocation6 + $0x3c4] sm:$0xf0]  ;;  %v10910_v37 = vor.u32 %v12367_v61, %v10907_v32  ;;  %v10961_v29 = vld [vmem:[#allocation6 + $0x3b0] sm:$0xf]  ;;  %v10899_v16 = vld [vmem:[#allocation6 + $0x338] sm:$0xf0] }
 0x552   :  { %6454 = vmatpush.bf16.msra.mxu2 %v10766_v40  ;;  %v16092_v25 = vpack.c.b16 %v6968_v10, %v5734_v46  ;;  %v12279_v46 = vld [vmem:[#allocation6 + $0x84] sm:$0xf]  ;;  %v10906_v40 = vor.u32 %v12368_v5, %v10905_v57  ;;  %v10970_v30 = vor.u32 %v12384_v50, %v10969_v33  ;;  %v10897_v10 = vld [vmem:[#allocation6 + $0x330] sm:$0xf]  ;;  %v12400_v55 = vld [vmem:[#allocation6 + $0x444] sm:$0xf0] }
 0x553   :  { %6418 = vmatpush.bf16.msra.mxu0 %v10810_v13  ;;  %6437 = vmatpush.bf16.msra.mxu1 %v10686_v47  ;;  %v10750_v18 = vor.u32 %v12279_v46, %v10747_v17  ;;  %v11041_v13 = vld [vmem:[#allocation6 + $0x450] sm:$0xf]  ;;  %v12366_v47 = vld [vmem:[#allocation6 + $0x334] sm:$0xf0]  ;;  %v10889_v11 = vld [vmem:[#allocation6 + $0x320] sm:$0xf] }
 0x554   :  { %6475 = vmatpush.bf16.msra.mxu3 %v10814_v23  ;;  %v11042_v60 = vor.u32 %v12402_v36, %v11041_v13  ;;  %v10898_v49 = vor.u32 %v12366_v47, %v10897_v10  ;;  %v12365_v23 = vld [vmem:[#allocation6 + $0x334] sm:$0xf]  ;;  %v17452_v20 = vld [vmem:[#allocation32_spill] sm:$0xff]  ;;  %v10953_v46 = vld [vmem:[#allocation6 + $0x3a0] sm:$0xf] }
 0x555   :  { %6071 = vmatmul.bf16.vlgmr.msrb.gmra.mxu0 %v16005_v0  ;;  %6090 = vmatmul.bf16.vlgmr.msrb.gmra.mxu1 %v16026_v7  ;;  %v12388_v0 = vld [vmem:[#allocation6 + $0x3e4] sm:$0xf0]  ;;  %v10922_v7 = vor.u32 %v12372_v48, %v10921_v19  ;;  %v10902_v8 = vor.u32 %v12365_v23, %v10899_v16  ;;  %v12363_v19 = vld [vmem:[#allocation6 + $0x324] sm:$0xf]  ;;  %v11025_v48 = vld [vmem:[#allocation6 + $0x430] sm:$0xf] }
 0x556   :  { %6400 = vmatmul.bf16.vlgmr.msrb.gmra.mxu3 %v17450_v34  ;;  %6455 = vmatpush.bf16.msra.mxu2 %v10758_v62  ;;  %v10986_v45 = vor.u32 %v12388_v0, %v10985_v9  ;;  %v12382_v62 = vld [vmem:[#allocation6 + $0x3b4] sm:$0xf0]  ;;  %v10881_v15 = vld [vmem:[#allocation6 + $0x310] sm:$0xf]  ;;  %v10883_v59 = vld [vmem:[#allocation6 + $0x318] sm:$0xf0] }
 0x557   :  { %6793 = vmatpush.bf16.msrb.mxu0 %v10930_v54  ;;  %6812 = vmatpush.bf16.msrb.mxu1 %v10994_v22  ;;  %v10962_v2 = vor.u32 %v12382_v62, %v10961_v29  ;;  %v11033_v54 = vld [vmem:[#allocation6 + $0x440] sm:$0xf]  ;;  %v12398_v9 = vld [vmem:[#allocation6 + $0x434] sm:$0xf0]  ;;  %v12376_v6 = vld [vmem:[#allocation6 + $0x384] sm:$0xf0] }
 0x558   :  { %6850 = vmatpush.bf16.msrb.mxu3 %v10934_v27  ;;  %v11034_v22 = vor.u32 %v12400_v55, %v11033_v54  ;;  %v12364_v27 = vld [vmem:[#allocation6 + $0x324] sm:$0xf0]  ;;  %v12362_v21 = vld [vmem:[#allocation6 + $0x314] sm:$0xf0]  ;;  %v11017_v3 = vld [vmem:[#allocation6 + $0x420] sm:$0xf] }
 0x559   :  { %v10882_v44 = vor.u32 %v12362_v21, %v10881_v15  ;;  %v12378_v52 = vld [vmem:[#allocation6 + $0x394] sm:$0xf0]  ;;  %v10873_v28 = vld [vmem:[#allocation6 + $0x300] sm:$0xf]  ;;  %v10875_v5 = vld [vmem:[#allocation6 + $0x308] sm:$0xf0] }
 0x55a   :  { %6456 = vmatpush.bf16.msra.mxu2 %v10750_v18  ;;  %v10891_v18 = vld [vmem:[#allocation6 + $0x328] sm:$0xf0]  ;;  %v11009_v33 = vld [vmem:[#allocation6 + $0x410] sm:$0xf]  ;;  %v12394_v50 = vld [vmem:[#allocation6 + $0x414] sm:$0xf0] }
 0x55b   :  { %6794 = vmatpush.bf16.msrb.mxu0 %v10922_v7  ;;  %6813 = vmatpush.bf16.msrb.mxu1 %v10986_v45  ;;  %v10894_v0 = vor.u32 %v12363_v19, %v10891_v18  ;;  %v11026_v7 = vor.u32 %v12398_v9, %v11025_v48  ;;  %v17453_v45 = vld [vmem:[#allocation29_spill] sm:$0xff]  ;;  %v10995_v32 = vld [vmem:[#allocation6 + $0x3f8] sm:$0xf0]  ;;  %v17454_v36 = vld [vmem:[#allocation28_spill] sm:$0xff] }
 0x55c   :  { %6381 = vmatmul.bf16.vlgmr.msrb.gmra.mxu2 %v17451_v4  ;;  %6851 = vmatpush.bf16.msrb.mxu3 %v10926_v24  ;;  %v10945_v24 = vld [vmem:[#allocation6 + $0x390] sm:$0xf]  ;;  %v12389_v61 = vld [vmem:[#allocation6 + $0x3f4] sm:$0xf]  ;;  %v12438_v47 = vld [vmem:[#allocation6 + $0x574] sm:$0xf0] }
 0x55d   :  { %v10946_v31 = vor.u32 %v12378_v52, %v10945_v24  ;;  %v12405_v13 = vld [vmem:[#allocation6 + $0x474] sm:$0xf]  ;;  %v11185_v10 = vld [vmem:[#allocation6 + $0x570] sm:$0xf]  ;;  %v11001_v62 = vld [vmem:[#allocation6 + $0x400] sm:$0xf] }
 0x55e   :  { %6831 = vmatpush.bf16.msrb.mxu2 %v11058_v56  ;;  %v12361_v56 = vld [vmem:[#allocation6 + $0x314] sm:$0xf]  ;;  %v12392_v23 = vld [vmem:[#allocation6 + $0x404] sm:$0xf0]  ;;  %v12387_v16 = vld [vmem:[#allocation6 + $0x3e4] sm:$0xf] }
 0x55f   :  { %6795 = vmatpush.bf16.msrb.mxu0 %v10914_v39  ;;  %6814 = vmatpush.bf16.msrb.mxu1 %v10978_v26  ;;  %v12396_v39 = vld [vmem:[#allocation6 + $0x424] sm:$0xf0]  ;;  %v10886_v51 = vor.u32 %v12361_v56, %v10883_v59  ;;  %v10987_v54 = vld [vmem:[#allocation6 + $0x3e8] sm:$0xf0]  ;;  %v12403_v55 = vld [vmem:[#allocation6 + $0x464] sm:$0xf] }
 0x560   :  { %6852 = vmatpush.bf16.msrb.mxu3 %v10918_v12  ;;  %v11018_v1 = vor.u32 %v12396_v39, %v11017_v3  ;;  %v12360_v26 = vld [vmem:[#allocation6 + $0x304] sm:$0xf0]  ;;  %v10937_v12 = vld [vmem:[#allocation6 + $0x380] sm:$0xf]  ;;  %v12385_v19 = vld [vmem:[#allocation6 + $0x3d4] sm:$0xf] }
 0x561   :  { %v10874_v41 = vor.u32 %v12360_v26, %v10873_v28  ;;  %v10938_v57 = vor.u32 %v12376_v6, %v10937_v12  ;;  %v10979_v18 = vld [vmem:[#allocation6 + $0x3d8] sm:$0xf0]  ;;  %v12401_v48 = vld [vmem:[#allocation6 + $0x454] sm:$0xf]  ;;  %v12434_v15 = vld [vmem:[#allocation6 + $0x554] sm:$0xf0] }
 0x562   :  { %6832 = vmatpush.bf16.msrb.mxu2 %v11050_v35  ;;  %v12359_v35 = vld [vmem:[#allocation6 + $0x304] sm:$0xf]  ;;  %v10982_v9 = vor.u32 %v12385_v19, %v10979_v18  ;;  %v12420_v52 = vld [vmem:[#allocation6 + $0x4e4] sm:$0xf0]  ;;  %v11105_v26 = vld [vmem:[#allocation6 + $0x4d0] sm:$0xf] }
 0x563   :  { %6796 = vmatpush.bf16.msrb.mxu0 %v10906_v40  ;;  %6815 = vmatpush.bf16.msrb.mxu1 %v10970_v30  ;;  %v11010_v40 = vor.u32 %v12394_v50, %v11009_v33  ;;  %v10878_v30 = vor.u32 %v12359_v35, %v10875_v5  ;;  %v12383_v56 = vld [vmem:[#allocation6 + $0x3c4] sm:$0xf]  ;;  %v12418_v12 = vld [vmem:[#allocation6 + $0x4d4] sm:$0xf0]  ;;  %v10963_v35 = vld [vmem:[#allocation6 + $0x3b8] sm:$0xf0] }
 0x564   :  { %6853 = vmatpush.bf16.msrb.mxu3 %v10910_v37  ;;  %v11059_v37 = vld [vmem:[#allocation6 + $0x478] sm:$0xf0]  ;;  %v12399_v3 = vld [vmem:[#allocation6 + $0x444] sm:$0xf]  ;;  %v11106_v6 = vor.u32 %v12418_v12, %v11105_v26  ;;  %v12397_v5 = vld [vmem:[#allocation6 + $0x434] sm:$0xf] }
 0x565   :  { %6076 = vmatmul.bf16.gmra.mxu0 %v16071_v14  ;;  %6095 = vmatmul.bf16.gmra.mxu1 %v16081_v42  ;;  %v12380_v14 = vld [vmem:[#allocation6 + $0x3a4] sm:$0xf0]  ;;  %v10890_v42 = vor.u32 %v12364_v27, %v10889_v11  ;;  %v11062_v29 = vor.u32 %v12405_v13, %v11059_v37  ;;  %v11051_v11 = vld [vmem:[#allocation6 + $0x468] sm:$0xf0]  ;;  %v17455_v33 = vld [vmem:[#allocation30_spill] sm:$0xff] }
 0x566   :  { %6405 = vmatmul.bf16.gmra.mxu3 %v17452_v20  ;;  %6833 = vmatpush.bf16.msrb.mxu2 %v11042_v60  ;;  %v10954_v17 = vor.u32 %v12380_v14, %v10953_v46  ;;  %v10998_v60 = vor.u32 %v12389_v61, %v10995_v32  ;;  %v12436_v27 = vld [vmem:[#allocation6 + $0x564] sm:$0xf0]  ;;  %v11121_v14 = vld [vmem:[#allocation6 + $0x4f0] sm:$0xf]  ;;  %v12430_v61 = vld [vmem:[#allocation6 + $0x534] sm:$0xf0] }
 0x567   :  { %6797 = vmatpush.bf16.msrb.mxu0 %v10898_v49  ;;  %6816 = vmatpush.bf16.msrb.mxu1 %v10962_v2  ;;  %v11186_v49 = vor.u32 %v12438_v47, %v11185_v10  ;;  %v11002_v2 = vor.u32 %v12392_v23, %v11001_v62  ;;  %v11097_v13 = vld [vmem:[#allocation6 + $0x4c0] sm:$0xf]  ;;  %v10955_v47 = vld [vmem:[#allocation6 + $0x3a8] sm:$0xf0]  ;;  %v12412_v18 = vld [vmem:[#allocation6 + $0x4a4] sm:$0xf0] }
 0x568   :  { %6854 = vmatpush.bf16.msrb.mxu3 %v10902_v8  ;;  %v11054_v8 = vor.u32 %v12403_v55, %v11051_v11  ;;  %v11145_v23 = vld [vmem:[#allocation6 + $0x520] sm:$0xf]  ;;  %v11123_v12 = vld [vmem:[#allocation6 + $0x4f8] sm:$0xf0] }
 0x569   :  { %v11081_v19 = vld [vmem:[#allocation6 + $0x4a0] sm:$0xf] }
 0x56a   :  { %6834 = vmatpush.bf16.msrb.mxu2 %v11034_v22  ;;  %v11177_v22 = vld [vmem:[#allocation6 + $0x560] sm:$0xf] }
 0x56b   :  { %6798 = vmatpush.bf16.msrb.mxu0 %v10890_v42  ;;  %6817 = vmatpush.bf16.msrb.mxu1 %v10954_v17  ;;  %v11178_v46 = vor.u32 %v12436_v27, %v11177_v22  ;;  %v12422_v42 = vld [vmem:[#allocation6 + $0x4f4] sm:$0xf0]  ;;  %v12393_v22 = vld [vmem:[#allocation6 + $0x414] sm:$0xf] }
 0x56c   :  { %6386 = vmatmul.bf16.gmra.mxu2 %v17453_v45  ;;  %6855 = vmatpush.bf16.msrb.mxu3 %v10894_v0  ;;  %v11122_v17 = vor.u32 %v12422_v42, %v11121_v14  ;;  %v11043_v0 = vld [vmem:[#allocation6 + $0x458] sm:$0xf0]  ;;  %v11137_v14 = vld [vmem:[#allocation6 + $0x510] sm:$0xf]  ;;  %v12426_v42 = vld [vmem:[#allocation6 + $0x514] sm:$0xf0] }
 0x56d   :  { %v11046_v21 = vor.u32 %v12401_v48, %v11043_v0  ;;  %v11138_v48 = vor.u32 %v12426_v42, %v11137_v14  ;;  %v12375_v0 = vld [vmem:[#allocation6 + $0x384] sm:$0xf]  ;;  %v11225_v14 = vld [vmem:[#allocation6 + $0x5c0] sm:$0xf]  ;;  %v12448_v42 = vld [vmem:[#allocation6 + $0x5c4] sm:$0xf0] }
 0x56e   :  { %6835 = vmatpush.bf16.msrb.mxu2 %v11026_v7  ;;  %v11169_v7 = vld [vmem:[#allocation6 + $0x550] sm:$0xf] }
 0x56f   :  { %6799 = vmatpush.bf16.msrb.mxu0 %v10882_v44  ;;  %6818 = vmatpush.bf16.msrb.mxu1 %v10946_v31  ;;  %v11170_v24 = vor.u32 %v12434_v15, %v11169_v7  ;;  %v11113_v44 = vld [vmem:[#allocation6 + $0x4e0] sm:$0xf]  ;;  %v10971_v31 = vld [vmem:[#allocation6 + $0x3c8] sm:$0xf0] }
 0x570   :  { %6856 = vmatpush.bf16.msrb.mxu3 %v10886_v51  ;;  %v11114_v59 = vor.u32 %v12420_v52, %v11113_v44  ;;  %v10974_v39 = vor.u32 %v12383_v56, %v10971_v31  ;;  %v11161_v51 = vld [vmem:[#allocation6 + $0x540] sm:$0xf]  ;;  %v10939_v7 = vld [vmem:[#allocation6 + $0x388] sm:$0xf0]  ;;  %v12424_v44 = vld [vmem:[#allocation6 + $0x504] sm:$0xf0] }
 0x571   :  { %v10942_v15 = vor.u32 %v12375_v0, %v10939_v7  ;;  %v11073_v56 = vld [vmem:[#allocation6 + $0x490] sm:$0xf]  ;;  %v12433_v7 = vld [vmem:[#allocation6 + $0x554] sm:$0xf] }
 0x572   :  { %6836 = vmatpush.bf16.msrb.mxu2 %v11018_v1  ;;  %v12432_v1 = vld [vmem:[#allocation6 + $0x544] sm:$0xf0] }
 0x573   :  { %6800 = vmatpush.bf16.msrb.mxu0 %v10874_v41  ;;  %6819 = vmatpush.bf16.msrb.mxu1 %v10938_v57  ;;  %v11162_v41 = vor.u32 %v12432_v1, %v11161_v51  ;;  %v12381_v57 = vld [vmem:[#allocation6 + $0x3b4] sm:$0xf]  ;;  %v17456_v51 = vld [vmem:[#allocation31_spill] sm:$0xff] }
 0x574   :  { %6857 = vmatpush.bf16.msrb.mxu3 %v10878_v30  ;;  %v10966_v50 = vor.u32 %v12381_v57, %v10963_v35  ;;  %v11153_v30 = vld [vmem:[#allocation6 + $0x530] sm:$0xf] }
 0x575   :  { %6419 = vmatmul.bf16.vlgmr.msra.gmra.mxu0 %v17454_v36  ;;  %6438 = vmatmul.bf16.vlgmr.msra.gmra.mxu1 %v17451_v4  ;;  %v10990_v4 = vor.u32 %v12387_v16, %v10987_v54  ;;  %v11154_v37 = vor.u32 %v12430_v61, %v11153_v30  ;;  %v12428_v16 = vld [vmem:[#allocation6 + $0x524] sm:$0xf0]  ;;  %v12414_v54 = vld [vmem:[#allocation6 + $0x4b4] sm:$0xf0]  ;;  %v12419_v61 = vld [vmem:[#allocation6 + $0x4e4] sm:$0xf] }
 0x576   :  { %6476 = vmatmul.bf16.vlgmr.msra.gmra.mxu3 %v17454_v36  ;;  %6837 = vmatpush.bf16.msrb.mxu2 %v11010_v40  ;;  %v11027_v40 = vld [vmem:[#allocation6 + $0x438] sm:$0xf0]  ;;  %v12416_v36 = vld [vmem:[#allocation6 + $0x4c4] sm:$0xf0]  ;;  %v11146_v55 = vor.u32 %v12428_v16, %v11145_v23  ;;  %v17457_v1 = vld [vmem:[#allocation25_spill] sm:$0xff] }
 0x577   :  { %6869 = vmatpush.bf16.msra.mxu0 %v10998_v60  ;;  %6888 = vmatpush.bf16.msra.mxu1 %v11062_v29  ;;  %v11030_v32 = vor.u32 %v12397_v5, %v11027_v40  ;;  %v12379_v60 = vld [vmem:[#allocation6 + $0x3a4] sm:$0xf]  ;;  %v11098_v10 = vor.u32 %v12416_v36, %v11097_v13  ;;  %v11065_v5 = vld [vmem:[#allocation6 + $0x480] sm:$0xf]  ;;  %v12452_v30 = vld [vmem:[#allocation6 + $0x5e4] sm:$0xf0] }
 0x578   :  { %7240 = vmatpush.bf16.msra.mxu3 %v11186_v49  ;;  %v12395_v29 = vld [vmem:[#allocation6 + $0x424] sm:$0xf]  ;;  %v11019_v49 = vld [vmem:[#allocation6 + $0x428] sm:$0xf0]  ;;  %v11241_v40 = vld [vmem:[#allocation6 + $0x5e0] sm:$0xf] }
 0x579   :  { %v11022_v62 = vor.u32 %v12395_v29, %v11019_v49  ;;  %v11115_v13 = vld [vmem:[#allocation6 + $0x4e8] sm:$0xf0]  ;;  %v12451_v36 = vld [vmem:[#allocation6 + $0x5e4] sm:$0xf]  ;;  %v11187_v29 = vld [vmem:[#allocation6 + $0x578] sm:$0xf0] }
 0x57a   :  { %6838 = vmatpush.bf16.msrb.mxu2 %v11002_v2  ;;  %v11089_v2 = vld [vmem:[#allocation6 + $0x4b0] sm:$0xf]  ;;  %v12450_v23 = vld [vmem:[#allocation6 + $0x5d4] sm:$0xf0]  ;;  %v12417_v16 = vld [vmem:[#allocation6 + $0x4d4] sm:$0xf] }
 0x57b   :  { %6870 = vmatpush.bf16.msra.mxu0 %v10990_v4  ;;  %6889 = vmatpush.bf16.msra.mxu1 %v11054_v8  ;;  %v11090_v11 = vor.u32 %v12414_v54, %v11089_v2  ;;  %v12377_v4 = vld [vmem:[#allocation6 + $0x394] sm:$0xf]  ;;  %v10947_v8 = vld [vmem:[#allocation6 + $0x398] sm:$0xf0] }
 0x57c   :  { %6457 = vmatmul.bf16.vlgmr.msra.gmra.mxu2 %v17450_v34  ;;  %7241 = vmatpush.bf16.msra.mxu3 %v11178_v46  ;;  %v11035_v34 = vld [vmem:[#allocation6 + $0x448] sm:$0xf0]  ;;  %v10950_v27 = vor.u32 %v12377_v4, %v10947_v8  ;;  %v11011_v46 = vld [vmem:[#allocation6 + $0x418] sm:$0xf0] }
 0x57d   :  { %v11038_v28 = vor.u32 %v12399_v3, %v11035_v34  ;;  %v11249_v34 = vld [vmem:[#allocation6 + $0x5f0] sm:$0xf]  ;;  %v11107_v54 = vld [vmem:[#allocation6 + $0x4d8] sm:$0xf0] }
 0x57e   :  { %7221 = vmatpush.bf16.msra.mxu2 %v11122_v17  ;;  %v11014_v17 = vor.u32 %v12393_v22, %v11011_v46  ;;  %v11110_v4 = vor.u32 %v12417_v16, %v11107_v54  ;;  %v12435_v22 = vld [vmem:[#allocation6 + $0x564] sm:$0xf]  ;;  %v11147_v54 = vld [vmem:[#allocation6 + $0x528] sm:$0xf0] }
 0x57f   :  { %6871 = vmatpush.bf16.msra.mxu0 %v10982_v9  ;;  %6890 = vmatpush.bf16.msra.mxu1 %v11046_v21  ;;  %v11082_v9 = vor.u32 %v12412_v18, %v11081_v19  ;;  %v11003_v21 = vld [vmem:[#allocation6 + $0x408] sm:$0xf0]  ;;  %v11226_v19 = vor.u32 %v12448_v42, %v11225_v14  ;;  %v12439_v14 = vld [vmem:[#allocation6 + $0x584] sm:$0xf] }
 0x580   :  { %7242 = vmatpush.bf16.msra.mxu3 %v11170_v24  ;;  %v11129_v24 = vld [vmem:[#allocation6 + $0x500] sm:$0xf]  ;;  %v11099_v18 = vld [vmem:[#allocation6 + $0x4c8] sm:$0xf0] }
 0x581   :  { %v11130_v31 = vor.u32 %v12424_v44, %v11129_v24  ;;  %v11217_v24 = vld [vmem:[#allocation6 + $0x5b0] sm:$0xf]  ;;  %v12446_v44 = vld [vmem:[#allocation6 + $0x5b4] sm:$0xf0]  ;;  %v11195_v42 = vld [vmem:[#allocation6 + $0x588] sm:$0xf0] }
 0x582   :  { %7222 = vmatpush.bf16.msra.mxu2 %v11114_v59  ;;  %v12410_v59 = vld [vmem:[#allocation6 + $0x494] sm:$0xf0] }
 0x583   :  { %6872 = vmatpush.bf16.msra.mxu0 %v10974_v39  ;;  %6891 = vmatpush.bf16.msra.mxu1 %v11038_v28  ;;  %v11074_v3 = vor.u32 %v12410_v59, %v11073_v56  ;;  %v12454_v39 = vld [vmem:[#allocation6 + $0x5f4] sm:$0xf0]  ;;  %v12421_v28 = vld [vmem:[#allocation6 + $0x4f4] sm:$0xf]  ;;  %v17459_v56 = vld [vmem:[#allocation35_spill] sm:$0xff] }
 0x584   :  { %7243 = vmatpush.bf16.msra.mxu3 %v11162_v41  ;;  %v11250_v26 = vor.u32 %v12454_v39, %v11249_v34  ;;  %v11251_v41 = vld [vmem:[#allocation6 + $0x5f8] sm:$0xf0]  ;;  %v11126_v57 = vor.u32 %v12421_v28, %v11123_v12  ;;  %v17460_v59 = vld [vmem:[#allocation36_spill] sm:$0xff]  ;;  %v12445_v34 = vld [vmem:[#allocation6 + $0x5b4] sm:$0xf] }
 0x585   :  { %6424 = vmatmul.bf16.gmra.mxu0 %v17455_v33  ;;  %6443 = vmatmul.bf16.gmra.mxu1 %v17453_v45  ;;  %v10958_v45 = vor.u32 %v12379_v60, %v10955_v47  ;;  %v11243_v60 = vld [vmem:[#allocation6 + $0x5e8] sm:$0xf0]  ;;  %v12437_v47 = vld [vmem:[#allocation6 + $0x574] sm:$0xf]  ;;  %v11219_v39 = vld [vmem:[#allocation6 + $0x5b8] sm:$0xf0] }
 0x586   :  { %6481 = vmatmul.bf16.gmra.mxu3 %v17455_v33  ;;  %7223 = vmatpush.bf16.msra.mxu2 %v11106_v6  ;;  %v12453_v6 = vld [vmem:[#allocation6 + $0x5f4] sm:$0xf]  ;;  %v12408_v33 = vld [vmem:[#allocation6 + $0x484] sm:$0xf0]  ;;  %v11190_v49 = vor.u32 %v12437_v47, %v11187_v29  ;;  %v11222_v12 = vor.u32 %v12445_v34, %v11219_v39 }
 0x587   :  { %6873 = vmatpush.bf16.msra.mxu0 %v10966_v50  ;;  %6892 = vmatpush.bf16.msra.mxu1 %v11030_v32  ;;  %v11254_v35 = vor.u32 %v12453_v6, %v11251_v41  ;;  %v11066_v50 = vor.u32 %v12408_v33, %v11065_v5  ;;  %v11242_v32 = vor.u32 %v12452_v30, %v11241_v40  ;;  %v11209_v41 = vld [vmem:[#allocation6 + $0x5a0] sm:$0xf]  ;;  %v11083_v33 = vld [vmem:[#allocation6 + $0x4a8] sm:$0xf0]  ;;  %v12409_v47 = vld [vmem:[#allocation6 + $0x494] sm:$0xf] }
 0x588   :  { %7244 = vmatpush.bf16.msra.mxu3 %v11154_v37  ;;  %v11118_v37 = vor.u32 %v12419_v61, %v11115_v13  ;;  %v11211_v40 = vld [vmem:[#allocation6 + $0x5a8] sm:$0xf0]  ;;  %v12429_v61 = vld [vmem:[#allocation6 + $0x534] sm:$0xf] }
 0x58a   :  { %7224 = vmatpush.bf16.msra.mxu2 %v11098_v10  ;;  %v11246_v10 = vor.u32 %v12451_v36, %v11243_v60  ;;  %v17461_v60 = vld [vmem:[#allocation33_spill] sm:$0xff] }
 0x58b   :  { %6874 = vmatpush.bf16.msra.mxu0 %v10958_v45  ;;  %6893 = vmatpush.bf16.msra.mxu1 %v11022_v62  ;;  %v17458_v45 = vld [vmem:[#allocation26_spill] sm:$0xff]  ;;  %v11233_v62 = vld [vmem:[#allocation6 + $0x5d0] sm:$0xf] }
 0x58c   :  { %6462 = vmatmul.bf16.gmra.mxu2 %v17452_v20  ;;  %7245 = vmatpush.bf16.msra.mxu3 %v11146_v55  ;;  %v12391_v20 = vld [vmem:[#allocation6 + $0x404] sm:$0xf]  ;;  %v11234_v2 = vor.u32 %v12450_v23, %v11233_v62  ;;  %v12449_v55 = vld [vmem:[#allocation6 + $0x5d4] sm:$0xf]  ;;  %v11203_v23 = vld [vmem:[#allocation6 + $0x598] sm:$0xf0] }
 0x58d   :  { %v11006_v52 = vor.u32 %v12391_v20, %v11003_v21  ;;  %v11171_v20 = vld [vmem:[#allocation6 + $0x558] sm:$0xf0]  ;;  %v12441_v62 = vld [vmem:[#allocation6 + $0x594] sm:$0xf] }
 0x58e   :  { %7225 = vmatpush.bf16.msra.mxu2 %v11090_v11  ;;  %v11235_v11 = vld [vmem:[#allocation6 + $0x5d8] sm:$0xf0]  ;;  %v11174_v21 = vor.u32 %v12433_v7, %v11171_v20  ;;  %v11198_v7 = vor.u32 %v12439_v14, %v11195_v42 }
 0x58f   :  { %6875 = vmatpush.bf16.msra.mxu0 %v10950_v27  ;;  %6894 = vmatpush.bf16.msra.mxu1 %v11014_v17  ;;  %v11238_v8 = vor.u32 %v12449_v55, %v11235_v11  ;;  %v11179_v27 = vld [vmem:[#allocation6 + $0x568] sm:$0xf0]  ;;  %v12415_v17 = vld [vmem:[#allocation6 + $0x4c4] sm:$0xf]  ;;  %v11206_v55 = vor.u32 %v12441_v62, %v11203_v23 }
 0x590   :  { %7246 = vmatpush.bf16.msra.mxu3 %v11138_v48  ;;  %v11182_v46 = vor.u32 %v12435_v22, %v11179_v27  ;;  %v12447_v48 = vld [vmem:[#allocation6 + $0x5c4] sm:$0xf]  ;;  %v11102_v0 = vor.u32 %v12415_v17, %v11099_v18 }
 0x591   :  { %v12407_v22 = vld [vmem:[#allocation6 + $0x484] sm:$0xf] }
 0x592   :  { %7226 = vmatpush.bf16.msra.mxu2 %v11082_v9  ;;  %v11227_v9 = vld [vmem:[#allocation6 + $0x5c8] sm:$0xf0] }
 0x593   :  { %6876 = vmatpush.bf16.msra.mxu0 %v10942_v15  ;;  %6895 = vmatpush.bf16.msra.mxu1 %v11006_v52  ;;  %v11230_v15 = vor.u32 %v12447_v48, %v11227_v9  ;;  %v12413_v52 = vld [vmem:[#allocation6 + $0x4b4] sm:$0xf]  ;;  %v11139_v9 = vld [vmem:[#allocation6 + $0x518] sm:$0xf0] }
 0x594   :  { %7247 = vmatpush.bf16.msra.mxu3 %v11130_v31  ;;  %v11218_v31 = vor.u32 %v12446_v44, %v11217_v24  ;;  %v12425_v48 = vld [vmem:[#allocation6 + $0x514] sm:$0xf] }
 0x595   :  { %6801 = vmatmul.bf16.vlgmr.msrb.gmra.mxu0 %v17456_v51  ;;  %6820 = vmatmul.bf16.vlgmr.msrb.gmra.mxu1 %v17457_v1  ;;  %v11142_v20 = vor.u32 %v12425_v48, %v11139_v9 }
 0x596   :  { %6858 = vmatmul.bf16.vlgmr.msrb.gmra.mxu3 %v17456_v51  ;;  %7227 = vmatpush.bf16.msra.mxu2 %v11074_v3  ;;  %v11091_v3 = vld [vmem:[#allocation6 + $0x4b8] sm:$0xf0]  ;;  %v12431_v51 = vld [vmem:[#allocation6 + $0x544] sm:$0xf] }
 0x597   :  { %7259 = vmatpush.bf16.msrb.mxu0 %v11250_v26  ;;  %7278 = vmatpush.bf16.msrb.mxu1 %v11126_v57  ;;  %v11094_v28 = vor.u32 %v12413_v52, %v11091_v3  ;;  %v11163_v26 = vld [vmem:[#allocation6 + $0x548] sm:$0xf0]  ;;  %v12444_v57 = vld [vmem:[#allocation6 + $0x5a4] sm:$0xf0] }
 0x598   :  { %7316 = vmatpush.bf16.msrb.mxu3 %v11254_v35  ;;  %v11166_v6 = vor.u32 %v12431_v51, %v11163_v26  ;;  %v12411_v35 = vld [vmem:[#allocation6 + $0x4a4] sm:$0xf]  ;;  %v11210_v5 = vor.u32 %v12444_v57, %v11209_v41 }
 0x599   :  { %v11086_v30 = vor.u32 %v12411_v35, %v11083_v33 }
 0x59a   :  { %7228 = vmatpush.bf16.msra.mxu2 %v11066_v50  ;;  %v12443_v50 = vld [vmem:[#allocation6 + $0x5a4] sm:$0xf] }
 0x59b   :  { %7260 = vmatpush.bf16.msrb.mxu0 %v11242_v32  ;;  %7279 = vmatpush.bf16.msrb.mxu1 %v11118_v37  ;;  %v11155_v32 = vld [vmem:[#allocation6 + $0x538] sm:$0xf0]  ;;  %v11214_v13 = vor.u32 %v12443_v50, %v11211_v40  ;;  %v11201_v37 = vld [vmem:[#allocation6 + $0x590] sm:$0xf] }
 0x59c   :  { %6839 = vmatmul.bf16.vlgmr.msrb.gmra.mxu2 %v17458_v45  ;;  %7317 = vmatpush.bf16.msrb.mxu3 %v11246_v10  ;;  %v11158_v36 = vor.u32 %v12429_v61, %v11155_v32  ;;  %v12442_v10 = vld [vmem:[#allocation6 + $0x594] sm:$0xf0] }
 0x59d   :  { %v11202_v29 = vor.u32 %v12442_v10, %v11201_v37 }
 0x59e   :  { %7297 = vmatpush.bf16.msrb.mxu2 %v11190_v49  ;;  %v11075_v49 = vld [vmem:[#allocation6 + $0x498] sm:$0xf0] }
 0x59f   :  { %7261 = vmatpush.bf16.msrb.mxu0 %v11234_v2  ;;  %7280 = vmatpush.bf16.msrb.mxu1 %v11110_v4  ;;  %v11078_v16 = vor.u32 %v12409_v47, %v11075_v49  ;;  %v12427_v2 = vld [vmem:[#allocation6 + $0x524] sm:$0xf]  ;;  %v11193_v4 = vld [vmem:[#allocation6 + $0x580] sm:$0xf] }
 0x5a0   :  { %7318 = vmatpush.bf16.msrb.mxu3 %v11238_v8  ;;  %v11150_v11 = vor.u32 %v12427_v2, %v11147_v54  ;;  %v12440_v8 = vld [vmem:[#allocation6 + $0x584] sm:$0xf0] }
 0x5a1   :  { %v11194_v27 = vor.u32 %v12440_v8, %v11193_v4 }
 0x5a2   :  { %7298 = vmatpush.bf16.msrb.mxu2 %v11182_v46  ;;  %v11067_v46 = vld [vmem:[#allocation6 + $0x488] sm:$0xf0] }
 0x5a3   :  { %7262 = vmatpush.bf16.msrb.mxu0 %v11226_v19  ;;  %7281 = vmatpush.bf16.msrb.mxu1 %v11102_v0  ;;  %v11070_v18 = vor.u32 %v12407_v22, %v11067_v46 }
 0x5a4   :  { %7319 = vmatpush.bf16.msrb.mxu3 %v11230_v15  ;;  %v12423_v15 = vld [vmem:[#allocation6 + $0x504] sm:$0xf] }
 0x5a5   :  { %6806 = vmatmul.bf16.gmra.mxu0 %v17459_v56  ;;  %6825 = vmatmul.bf16.gmra.mxu1 %v17460_v59 }
 0x5a6   :  { %6863 = vmatmul.bf16.gmra.mxu3 %v17459_v56  ;;  %7299 = vmatpush.bf16.msrb.mxu2 %v11174_v21  ;;  %v11131_v21 = vld [vmem:[#allocation6 + $0x508] sm:$0xf0] }
 0x5a7   :  { %7263 = vmatpush.bf16.msrb.mxu0 %v11218_v31  ;;  %7282 = vmatpush.bf16.msrb.mxu1 %v11094_v28  ;;  %v11134_v24 = vor.u32 %v12423_v15, %v11131_v21 }
 0x5a8   :  { %7320 = vmatpush.bf16.msrb.mxu3 %v11222_v12 }
 0x5aa   :  { %7300 = vmatpush.bf16.msrb.mxu2 %v11166_v6 }
 0x5ab   :  { %7264 = vmatpush.bf16.msrb.mxu0 %v11210_v5  ;;  %7283 = vmatpush.bf16.msrb.mxu1 %v11086_v30 }
 0x5ac   :  { %6844 = vmatmul.bf16.gmra.mxu2 %v17461_v60  ;;  %7321 = vmatpush.bf16.msrb.mxu3 %v11214_v13 }
 0x5ae   :  { %7301 = vmatpush.bf16.msrb.mxu2 %v11158_v36 }
 0x5af   :  { %7265 = vmatpush.bf16.msrb.mxu0 %v11202_v29  ;;  %7284 = vmatpush.bf16.msrb.mxu1 %v11078_v16 }
 0x5b0   :  { %7322 = vmatpush.bf16.msrb.mxu3 %v11206_v55 }
 0x5b2   :  { %v5996_v17 = vpop.f32.mrf.mxu0  ;;  %v6015_v19 = vpop.f32.mrf.mxu1  ;;  %7302 = vmatpush.bf16.msrb.mxu2 %v11150_v11 }
 0x5b3   :  { %v6016_v0 = vadd.f32 %v6015_v19, %v5996_v17  ;;  %7266 = vmatpush.bf16.msrb.mxu0 %v11194_v27  ;;  %7285 = vmatpush.bf16.msrb.mxu1 %v11070_v18 }
 0x5b4   :  { %7323 = vmatpush.bf16.msrb.mxu3 %v11198_v7 }
 0x5b5   :  { %6877 = vmatmul.bf16.vlgmr.msra.gmra.mxu0 %v17457_v1  ;;  %6896 = vmatmul.bf16.vlgmr.msra.gmra.mxu1 %v17458_v45 }
 0x5b6   :  { %7248 = vmatmul.bf16.vlgmr.msra.gmra.mxu3 %v16040_v58  ;;  %7303 = vmatpush.bf16.msrb.mxu2 %v11142_v20 }
 0x5b9   :  { %v6053_v44 = vpop.f32.mrf.mxu3 }
 0x5ba   :  { %v16121_v52 = vpop.f32.mrf.mxu0  ;;  %v16123_v56 = vpop.f32.mrf.mxu1  ;;  %7304 = vmatpush.bf16.msrb.mxu2 %v11134_v24 }
 0x5bc   :  { %7229 = vmatmul.bf16.vlgmr.msra.gmra.mxu2 %v16034_v43 }
 0x5bf   :  { %v6034_v31 = vpop.f32.mrf.mxu2 }
 0x5c0   :  { %v6035_v3 = vadd.f32 %v6034_v31, %v6016_v0 }
 0x5c1   :  { %v6055_v1 = vpop.f32.mrf.mxu3 }
 0x5c2   :  { %v6001_v34 = vpop.f32.mrf.mxu0  ;;  %v6020_v45 = vpop.f32.mrf.mxu1 }
 0x5c3   :  { %v6021_v39 = vadd.f32 %v6020_v45, %v6001_v34 }
 0x5c5   :  { %6882 = vmatmul.bf16.gmra.mxu0 %v17460_v59  ;;  %6901 = vmatmul.bf16.gmra.mxu1 %v17461_v60 }
 0x5c6   :  { %7253 = vmatmul.bf16.gmra.mxu3 %v16085_v53 }
 0x5c7   :  { %v16129_v28 = vpop.f32.mrf.mxu2 }
 0x5c9   :  { %v6058_v51 = vpop.f32.mrf.mxu3 }
 0x5ca   :  { %v16131_v26 = vpop.f32.mrf.mxu0  ;;  %v16133_v12 = vpop.f32.mrf.mxu1 }
 0x5cc   :  { %7234 = vmatmul.bf16.gmra.mxu2 %v16089_v38 }
 0x5cf   :  { %v6039_v6 = vpop.f32.mrf.mxu2 }
 0x5d0   :  { %v6040_v41 = vadd.f32 %v6039_v6, %v6021_v39 }
 0x5d1   :  { %v6060_v57 = vpop.f32.mrf.mxu3 }
 0x5d2   :  { %v6072_v35 = vpop.f32.mrf.mxu0  ;;  %v6091_v5 = vpop.f32.mrf.mxu1 }
 0x5d3   :  { %v6073_v33 = vadd.f32 %v6072_v35, %v6053_v44 }
 0x5d5   :  { %v6092_v59 = vadd.f32 %v6091_v5, %v6073_v33  ;;  %7267 = vmatmul.bf16.vlgmr.msrb.gmra.mxu0 %v16060_v63  ;;  %7286 = vmatmul.bf16.vlgmr.msrb.gmra.mxu1 %v16034_v43 }
 0x5d6   :  { %7324 = vmatmul.bf16.vlgmr.msrb.gmra.mxu3 %v16060_v63 }
 0x5d7   :  { %v16139_v50 = vpop.f32.mrf.mxu2 }
 0x5d9   :  { %v6401_v40 = vpop.f32.mrf.mxu3 }
 0x5da   :  { %v6074_v30 = vpop.f32.mrf.mxu0  ;;  %v6093_v61 = vpop.f32.mrf.mxu1 }
 0x5db   :  { %v6075_v46 = vadd.f32 %v6074_v30, %v6055_v1 }
 0x5dc   :  { %7305 = vmatmul.bf16.vlgmr.msrb.gmra.mxu2 %v16040_v58 }
 0x5dd   :  { %v6094_v9 = vadd.f32 %v6093_v61, %v6075_v46  ;;  %v12478_v46 = vld [vmem:[#allocation9 + $0xb8] sm:$0xff] }
 0x5de   :  { %7540 = vmatpush.bf16.msra.mxu0 %v12478_v46  ;;  %v12471_v46 = vld [vmem:[#allocation9 + $0x80] sm:$0xff] }
 0x5df   :  { %v6382_v32 = vpop.f32.mrf.mxu2 }
 0x5e0   :  { %v6383_v13 = vadd.f32 %v6382_v32, %v6035_v3 }
 0x5e1   :  { %v16142_v36 = vpop.f32.mrf.mxu3 }
 0x5e2   :  { %v6077_v60 = vpop.f32.mrf.mxu0  ;;  %v6096_v37 = vpop.f32.mrf.mxu1  ;;  %v6402_v10 = vadd.f32 %v6401_v40, %v6383_v13 }
 0x5e3   :  { %v6078_v47 = vadd.f32 %v6077_v60, %v6058_v51 }
 0x5e5   :  { %v6097_v29 = vadd.f32 %v6096_v37, %v6078_v47  ;;  %7272 = vmatmul.bf16.gmra.mxu0 %v16092_v25  ;;  %7291 = vmatmul.bf16.gmra.mxu1 %v16089_v38 }
 0x5e6   :  { %7329 = vmatmul.bf16.gmra.mxu3 %v16092_v25 }
 0x5e7   :  { %v16147_v43 = vpop.f32.mrf.mxu2 }
 0x5e9   :  { %v6406_v63 = vpop.f32.mrf.mxu3 }
 0x5ea   :  { %v6079_v49 = vpop.f32.mrf.mxu0  ;;  %v6098_v58 = vpop.f32.mrf.mxu1 }
 0x5eb   :  { %v6080_v3 = vadd.f32 %v6079_v49, %v6060_v57 }
 0x5ec   :  { %7310 = vmatmul.bf16.gmra.mxu2 %v16085_v53 }
 0x5ef   :  { %v6387_v62 = vpop.f32.mrf.mxu2 }
 0x5f0   :  { %v6388_v23 = vadd.f32 %v6387_v62, %v6040_v41  ;;  %v6099_v41 = vadd.f32 %v6098_v58, %v6080_v3  ;;  %v6023_v62 = vadd.f32 %v16133_v12, %v16131_v26  ;;  %v12477_v12 = vld [vmem:[#allocation9 + $0xb0] sm:$0xff] }
 0x5f1   :  { %v16150_v16 = vpop.f32.mrf.mxu3  ;;  %7541 = vmatpush.bf16.msra.mxu0 %v12477_v12  ;;  %v12469_v3 = vld [vmem:[#allocation9 + $0x70] sm:$0xff]  ;;  %v12464_v12 = vld [vmem:[#allocation9 + $0x48] sm:$0xff] }
 0x5f2   :  { %v6420_v2 = vpop.f32.mrf.mxu0  ;;  %v6439_v54 = vpop.f32.mrf.mxu1  ;;  %v6407_v55 = vadd.f32 %v6406_v63, %v6388_v23 }
 0x5f3   :  { %v6421_v11 = vadd.f32 %v6420_v2, %v6402_v10  ;;  %v6440_v4 = vadd.f32 %v6439_v54, %v6092_v59  ;;  %v6042_v54 = vadd.f32 %v16139_v50, %v6023_v62 }
 0x5f7   :  { %v6389_v8 = vpop.f32.mrf.mxu2 }
 0x5f9   :  { %v6477_v38 = vpop.f32.mrf.mxu3 }
 0x5fa   :  { %v16152_v22 = vpop.f32.mrf.mxu0  ;;  %v6441_v25 = vpop.f32.mrf.mxu1 }
 0x5fb   :  { %v6442_v0 = vadd.f32 %v6441_v25, %v6094_v9  ;;  %v12462_v9 = vld [vmem:[#allocation9 + $0x38] sm:$0xff] }
 0x5fc   :  { %7671 = vmatpush.bf16.msra.mxu2 %v12462_v9 }
 0x5ff   :  { %v6458_v27 = vpop.f32.mrf.mxu2 }
 0x600   :  { %v6459_v14 = vadd.f32 %v6458_v27, %v6440_v4 }
 0x601   :  { %v6479_v42 = vpop.f32.mrf.mxu3 }
 0x602   :  { %v6478_v17 = vadd.f32 %v6477_v38, %v6459_v14  ;;  %v6425_v53 = vpop.f32.mrf.mxu0  ;;  %v6444_v19 = vpop.f32.mrf.mxu1  ;;  %v12486_v14 = vld [vmem:[#allocation9 + $0xf8] sm:$0xff] }
 0x603   :  { %v6426_v18 = vadd.f32 %v6425_v53, %v6407_v55  ;;  %v6445_v48 = vadd.f32 %v6444_v19, %v6097_v29  ;;  %7554 = vmatpush.bf16.msra.mxu1 %v12486_v14  ;;  %v12485_v19 = vld [vmem:[#allocation9 + $0xf0] sm:$0xff]  ;;  %v12479_v14 = vld [vmem:[#allocation9 + $0xc0] sm:$0xff] }
 0x607   :  { %v6460_v7 = vpop.f32.mrf.mxu2  ;;  %7555 = vmatpush.bf16.msra.mxu1 %v12485_v19  ;;  %v12494_v19 = vld [vmem:[#allocation9 + $0x138] sm:$0xff] }
 0x608   :  { %v6461_v20 = vadd.f32 %v6460_v7, %v6442_v0  ;;  %v12470_v0 = vld [vmem:[#allocation9 + $0x78] sm:$0xff] }
 0x609   :  { %v6482_v15 = vpop.f32.mrf.mxu3  ;;  %7685 = vmatpush.bf16.msra.mxu3 %v12470_v0  ;;  %v12455_v0 = vld [vmem:[#allocation9] sm:$0xff] }
 0x60a   :  { %v16154_v21 = vadd.f32 %v6479_v42, %v6461_v20  ;;  %v6427_v24 = vpop.f32.mrf.mxu0  ;;  %v6446_v44 = vpop.f32.mrf.mxu1 }
 0x60b   :  { %v6447_v35 = vadd.f32 %v6446_v44, %v6099_v41  ;;  %v12476_v44 = vld [vmem:[#allocation9 + $0xa8] sm:$0xff] }
 0x60c   :  { %7542 = vmatpush.bf16.msra.mxu0 %v12476_v44 }
 0x60d   :  { %7686 = vmatpush.bf16.msra.mxu3 %v12469_v3  ;;  %v6018_v3 = vadd.f32 %v16123_v56, %v16121_v52  ;;  %v12490_v52 = vld [vmem:[#allocation9 + $0x118] sm:$0xff] }
 0x60e   :  { %v12498_v56 = vld [vmem:[#allocation9 + $0x158] sm:$0xff] }
 0x60f   :  { %v6463_v31 = vpop.f32.mrf.mxu2 }
 0x610   :  { %v6464_v34 = vadd.f32 %v6463_v31, %v6445_v48  ;;  %v12461_v31 = vld [vmem:[#allocation9 + $0x30] sm:$0xff] }
 0x611   :  { %v6484_v1 = vpop.f32.mrf.mxu3  ;;  %7672 = vmatpush.bf16.msra.mxu2 %v12461_v31  ;;  %v12500_v31 = vld [vmem:[#allocation9 + $0x168] sm:$0xff] }
 0x612   :  { %v16156_v45 = vadd.f32 %v6482_v15, %v6464_v34  ;;  %v6802_v39 = vpop.f32.mrf.mxu0  ;;  %v6821_v51 = vpop.f32.mrf.mxu1  ;;  %v12483_v34 = vld [vmem:[#allocation9 + $0xe0] sm:$0xff] }
 0x613   :  { %v6822_v6 = vadd.f32 %v6821_v51, %v6802_v39  ;;  %v12460_v39 = vld [vmem:[#allocation9 + $0x28] sm:$0xff] }
 0x614   :  { %v12468_v51 = vld [vmem:[#allocation9 + $0x68] sm:$0xff] }
 0x615   :  { %7673 = vmatpush.bf16.msra.mxu2 %v12460_v39  ;;  %7687 = vmatpush.bf16.msra.mxu3 %v12468_v51  ;;  %v6037_v39 = vadd.f32 %v16129_v28, %v6018_v3 }
 0x617   :  { %v6465_v5 = vpop.f32.mrf.mxu2 }
 0x618   :  { %v6466_v33 = vadd.f32 %v6465_v5, %v6447_v35  ;;  %v12474_v5 = vld [vmem:[#allocation9 + $0x98] sm:$0xff] }
 0x619   :  { %v6859_v59 = vpop.f32.mrf.mxu3 }
 0x61a   :  { %v16158_v40 = vadd.f32 %v6484_v1, %v6466_v33  ;;  %v16160_v30 = vpop.f32.mrf.mxu0  ;;  %v16162_v61 = vpop.f32.mrf.mxu1  ;;  %v12482_v33 = vld [vmem:[#allocation9 + $0xd8] sm:$0xff] }
 0x61f   :  { %v6840_v32 = vpop.f32.mrf.mxu2 }
 0x620   :  { %v6841_v57 = vadd.f32 %v6840_v32, %v6822_v6  ;;  %v12467_v32 = vld [vmem:[#allocation9 + $0x60] sm:$0xff] }
 0x621   :  { %v16164_v13 = vpop.f32.mrf.mxu3  ;;  %7688 = vmatpush.bf16.msra.mxu3 %v12467_v32 }
 0x622   :  { %v16166_v60 = vadd.f32 %v6841_v57, %v6421_v11  ;;  %v6807_v37 = vpop.f32.mrf.mxu0  ;;  %v6826_v10 = vpop.f32.mrf.mxu1  ;;  %v6390_v11 = vadd.f32 %v6389_v8, %v6042_v54  ;;  %v12473_v57 = vld [vmem:[#allocation9 + $0x90] sm:$0xff] }
 0x623   :  { %v6827_v23 = vadd.f32 %v6826_v10, %v6807_v37  ;;  %v12481_v37 = vld [vmem:[#allocation9 + $0xd0] sm:$0xff] }
 0x624   :  { %v6409_v26 = vadd.f32 %v16150_v16, %v6390_v11  ;;  %v12465_v11 = vld [vmem:[#allocation9 + $0x50] sm:$0xff] }
 0x626   :  { %v6428_v8 = vadd.f32 %v6427_v24, %v6409_v26  ;;  %v12475_v24 = vld [vmem:[#allocation9 + $0xa0] sm:$0xff]  ;;  %v12456_v26 = vld [vmem:[#allocation9 + $0x8] sm:$0xff] }
 0x627   :  { %v16168_v47 = vpop.f32.mrf.mxu2  ;;  %7543 = vmatpush.bf16.msra.mxu0 %v12475_v24 }
 0x629   :  { %v16170_v29 = vpop.f32.mrf.mxu3 }
 0x62a   :  { %v6809_v63 = vpop.f32.mrf.mxu0  ;;  %v6828_v49 = vpop.f32.mrf.mxu1 }
 0x62b   :  { %v6829_v58 = vadd.f32 %v6828_v49, %v6809_v63  ;;  %7544 = vmatpush.bf16.msra.mxu0 %v12474_v5  ;;  %v12458_v63 = vld [vmem:[#allocation9 + $0x18] sm:$0xff]  ;;  %v12491_v5 = vld [vmem:[#allocation9 + $0x120] sm:$0xff] }
 0x62c   :  { %v12466_v49 = vld [vmem:[#allocation9 + $0x58] sm:$0xff] }
 0x62d   :  { %7689 = vmatpush.bf16.msra.mxu3 %v12466_v49 }
 0x62f   :  { %v6845_v2 = vpop.f32.mrf.mxu2  ;;  %7545 = vmatpush.bf16.msra.mxu0 %v12473_v57  ;;  %v6385_v57 = vadd.f32 %v16147_v43, %v6037_v39 }
 0x630   :  { %v6846_v55 = vadd.f32 %v6845_v2, %v6827_v23  ;;  %v12472_v23 = vld [vmem:[#allocation9 + $0x88] sm:$0xff] }
 0x631   :  { %v16175_v4 = vpop.f32.mrf.mxu3  ;;  %v12480_v2 = vld [vmem:[#allocation9 + $0xc8] sm:$0xff]  ;;  %7690 = vmatpush.bf16.msra.mxu3 %v12465_v11 }
 0x632   :  { %v16177_v38 = vadd.f32 %v6846_v55, %v6426_v18  ;;  %v6878_v25 = vpop.f32.mrf.mxu0  ;;  %v6897_v27 = vpop.f32.mrf.mxu1  ;;  %v12457_v55 = vld [vmem:[#allocation9 + $0x10] sm:$0xff] }
 0x633   :  { %v6879_v42 = vadd.f32 %v6878_v25, %v6859_v59  ;;  %v12459_v59 = vld [vmem:[#allocation9 + $0x20] sm:$0xff]  ;;  %7546 = vmatpush.bf16.msra.mxu0 %v12472_v23 }
 0x634   :  { %7674 = vmatpush.bf16.msra.mxu2 %v12459_v59 }
 0x635   :  { %v6898_v53 = vadd.f32 %v6897_v27, %v6879_v42  ;;  %7691 = vmatpush.bf16.msra.mxu3 %v12464_v12 }
 0x637   :  { %v16180_v48 = vadd.f32 %v6898_v53, %v6478_v17  ;;  %v6847_v50 = vpop.f32.mrf.mxu2  ;;  %v12484_v17 = vld [vmem:[#allocation9 + $0xe8] sm:$0xff]  ;;  %7547 = vmatpush.bf16.msra.mxu0 %v12471_v46 }
 0x638   :  { %v6848_v18 = vadd.f32 %v6847_v50, %v6829_v58  ;;  %7556 = vmatpush.bf16.msra.mxu1 %v12484_v17  ;;  %7675 = vmatpush.bf16.msra.mxu2 %v12458_v63  ;;  %v12492_v17 = vld [vmem:[#allocation9 + $0x128] sm:$0xff] }
 0x639   :  { %v16182_v7 = vpop.f32.mrf.mxu3  ;;  %v12488_v46 = vld [vmem:[#allocation9 + $0x108] sm:$0xff] }
 0x63a   :  { %v16184_v20 = vadd.f32 %v6848_v18, %v6428_v8  ;;  %v16186_v15 = vpop.f32.mrf.mxu0  ;;  %v16188_v16 = vpop.f32.mrf.mxu1  ;;  %v12463_v8 = vld [vmem:[#allocation9 + $0x40] sm:$0xff]  ;;  %v12493_v18 = vld [vmem:[#allocation9 + $0x130] sm:$0xff] }
 0x63b   :  { %7835 = vmatpush.bf16.msrb.mxu0 %v12494_v19  ;;  %7692 = vmatpush.bf16.msra.mxu3 %v12463_v8  ;;  %v6881_v23 = vadd.f32 %v16186_v15, %v16164_v13 }
 0x63c   :  { %7557 = vmatpush.bf16.msra.mxu1 %v12483_v34  ;;  %7676 = vmatpush.bf16.msra.mxu2 %v12457_v55 }
 0x63f   :  { %v16190_v1 = vpop.f32.mrf.mxu2  ;;  %7836 = vmatpush.bf16.msrb.mxu0 %v12493_v18  ;;  %v12487_v18 = vld [vmem:[#allocation9 + $0x100] sm:$0xff] }
 0x640   :  { %7558 = vmatpush.bf16.msra.mxu1 %v12482_v33  ;;  %7677 = vmatpush.bf16.msra.mxu2 %v12456_v26  ;;  %v7250_v34 = vadd.f32 %v16182_v7, %v16190_v1  ;;  %v12499_v33 = vld [vmem:[#allocation9 + $0x160] sm:$0xff]  ;;  %v6824_v7 = vadd.f32 %v16162_v61, %v16160_v30  ;;  %v12489_v61 = vld [vmem:[#allocation9 + $0x110] sm:$0xff] }
 0x641   :  { %v16192_v6 = vpop.f32.mrf.mxu3 }
 0x642   :  { %v16194_v41 = vpop.f32.mrf.mxu0  ;;  %v16196_v35 = vpop.f32.mrf.mxu1  ;;  %v6843_v43 = vadd.f32 %v16168_v47, %v6824_v7  ;;  %v6900_v47 = vadd.f32 %v16188_v16, %v6881_v23  ;;  %v12561_v23 = vld [vmem:[#allocation12 + $0x1cc] sm:$0xf0] }
 0x643   :  { %7837 = vmatpush.bf16.msrb.mxu0 %v12492_v17  ;;  %v6884_v16 = vadd.f32 %v16194_v41, %v16170_v29 }
 0x644   :  { %7559 = vmatpush.bf16.msra.mxu1 %v12481_v37  ;;  %7678 = vmatpush.bf16.msra.mxu2 %v12455_v0  ;;  %v7343_v37 = vld [vmem:[#allocation7] sm:$0x3] }
 0x645   :  { %v16221_v49 = vperm.slane %v7343_v37, 0  ;;  %v16229_v55 = vperm.slane %v7343_v37, 1  ;;  %v12563_v37 = vld [vmem:[#allocation12 + $0x1e4] sm:$0xf] }
 0x647   :  { %v16198_v10 = vpop.f32.mrf.mxu2  ;;  %7838 = vmatpush.bf16.msrb.mxu0 %v12491_v5 }
 0x648   :  { %7560 = vmatpush.bf16.msra.mxu1 %v12480_v2  ;;  %v7252_v2 = vadd.f32 %v16192_v6, %v16198_v10 }
 0x649   :  { %v16200_v58 = vpop.f32.mrf.mxu3 }
 0x64a   :  { %v6885_v62 = vpop.f32.mrf.mxu0  ;;  %v6904_v25 = vpop.f32.mrf.mxu1 }
 0x64b   :  { %v6886_v54 = vadd.f32 %v6885_v62, %v16175_v4  ;;  %v12502_v4 = vld [vmem:[#allocation9 + $0x178] sm:$0xff]  ;;  %v6404_v62 = vadd.f32 %v16142_v36, %v6385_v57  ;;  %7839 = vmatpush.bf16.msrb.mxu0 %v12490_v52 }
 0x64c   :  { %7561 = vmatpush.bf16.msra.mxu1 %v12479_v14  ;;  %v12496_v14 = vld [vmem:[#allocation9 + $0x148] sm:$0xff] }
 0x64d   :  { %v6905_v27 = vadd.f32 %v6904_v25, %v6886_v54  ;;  %v6423_v11 = vadd.f32 %v16152_v22, %v6404_v62  ;;  %v11545_v62 = vld [vmem:[#allocation12 + $0x1c0] sm:$0xf] }
 0x64f   :  { %v16204_v42 = vadd.f32 %v6905_v27, %v16158_v40  ;;  %v16206_v53 = vpop.f32.mrf.mxu2  ;;  %v12501_v40 = vld [vmem:[#allocation9 + $0x170] sm:$0xff]  ;;  %v6909_v27 = vadd.f32 %v6843_v43, %v6423_v11  ;;  %7840 = vmatpush.bf16.msrb.mxu0 %v12489_v61  ;;  %v11546_v61 = vor.u32 %v12561_v23, %v11545_v62  ;;  %v11521_v23 = vld [vmem:[#allocation12 + $0x188] sm:$0xf] }
 0x650   :  { %7849 = vmatpush.bf16.msrb.mxu1 %v12502_v4  ;;  %v11515_v62 = vld [vmem:[#allocation12 + $0x190] sm:$0xf0] }
 0x651   :  { %v16208_v50 = vpop.f32.mrf.mxu3 }
 0x652   :  { %v7268_v9 = vpop.f32.mrf.mxu0  ;;  %v7287_v24 = vpop.f32.mrf.mxu1 }
 0x653   :  { %v7269_v59 = vadd.f32 %v7268_v9, %v7250_v34  ;;  %v6910_v9 = vadd.f32 %v6900_v47, %v16154_v21  ;;  %7841 = vmatpush.bf16.msrb.mxu0 %v12488_v46  ;;  %v6903_v34 = vadd.f32 %v16196_v35, %v6884_v16  ;;  %v11563_v35 = vld [vmem:[#allocation12 + $0x1f0] sm:$0xf0]  ;;  %v11569_v46 = vld [vmem:[#allocation12 + $0x1e8] sm:$0xf] }
 0x654   :  { %7850 = vmatpush.bf16.msrb.mxu1 %v12501_v40  ;;  %v12495_v40 = vld [vmem:[#allocation9 + $0x140] sm:$0xff]  ;;  %v11566_v7 = vor.u32 %v12563_v37, %v11563_v35 }
 0x655   :  { %v7335_v1 = vadd.f32 %v7269_v59, %v16166_v60  ;;  %v12497_v60 = vld [vmem:[#allocation9 + $0x150] sm:$0xff] }
 0x656   :  { %v12565_v59 = vld [vmem:[#allocation12 + $0x1ec] sm:$0xf0]  ;;  %8113 = vmatpush.bf16.msrb.mxu3 %v11566_v7  ;;  %v11513_v7 = vld [vmem:[#allocation12 + $0x180] sm:$0xf] }
 0x657   :  { %v16210_v44 = vpop.f32.mrf.mxu2  ;;  %v7349_v36 = vadd.f32 %v16221_v49, %v7335_v1  ;;  %7842 = vmatpush.bf16.msrb.mxu0 %v12487_v18 }
 0x658   :  { %7851 = vmatpush.bf16.msrb.mxu1 %v12500_v31 }
 0x659   :  { %v7325_v51 = vpop.f32.mrf.mxu3  ;;  %v7357_v12 = vmax.f32 %v7349_v36, 0.0 }
 0x65a   :  { %v7270_v32 = vpop.f32.mrf.mxu0  ;;  %v7289_v30 = vpop.f32.mrf.mxu1 }
 0x65b   :  { %v7271_v25 = vadd.f32 %v7270_v32, %v7252_v2  ;;  %v7257_v32 = vadd.f32 %v16208_v50, %v16210_v44  ;;  %v12559_v50 = vld [vmem:[#allocation12 + $0x1c4] sm:$0xf]  ;;  %v11547_v44 = vld [vmem:[#allocation12 + $0x1d0] sm:$0xf0] }
 0x65c   :  { %7852 = vmatpush.bf16.msrb.mxu1 %v12499_v33  ;;  %v11561_v33 = vld [vmem:[#allocation12 + $0x1e0] sm:$0xf] }
 0x65d   :  { %v7337_v19 = vadd.f32 %v7271_v25, %v6909_v27  ;;  %v11562_v57 = vor.u32 %v12565_v59, %v11561_v33  ;;  %v11531_v59 = vld [vmem:[#allocation12 + $0x1b0] sm:$0xf0] }
 0x65f   :  { %v7306_v63 = vpop.f32.mrf.mxu2  ;;  %v7351_v31 = vadd.f32 %v16221_v49, %v7337_v19  ;;  %8100 = vmatpush.bf16.msrb.mxu2 %v11562_v57  ;;  %v12564_v19 = vld [vmem:[#allocation12 + $0x1ec] sm:$0xf]  ;;  %v12558_v57 = vld [vmem:[#allocation12 + $0x1b4] sm:$0xf0] }
 0x660   :  { %v7307_v28 = vadd.f32 %v7306_v63, %v7287_v24  ;;  %7853 = vmatpush.bf16.msrb.mxu1 %v12498_v56  ;;  %v6912_v63 = vadd.f32 %v6903_v34, %v16156_v45 }
 0x661   :  { %v7327_v15 = vpop.f32.mrf.mxu3 }
 0x662   :  { %v7326_v54 = vadd.f32 %v7325_v51, %v7307_v28  ;;  %v7273_v10 = vpop.f32.mrf.mxu0  ;;  %v7292_v24 = vpop.f32.mrf.mxu1 }
 0x663   :  { %8101 = vmatpush.bf16.msrb.mxu2 %v11546_v61  ;;  %v11497_v61 = vld [vmem:[#allocation12 + $0x160] sm:$0xf] }
 0x664   :  { %v7336_v13 = vadd.f32 %v7326_v54, %v16180_v48  ;;  %7854 = vmatpush.bf16.msrb.mxu1 %v12497_v60  ;;  %v7255_v48 = vadd.f32 %v16200_v58, %v16206_v53  ;;  %v7359_v53 = vmax.f32 %v7351_v31, 0.0  ;;  %v11550_v60 = vor.u32 %v12559_v50, %v11547_v44  ;;  %v12562_v31 = vld [vmem:[#allocation12 + $0x1d4] sm:$0xf0]  ;;  %v11523_v50 = vld [vmem:[#allocation12 + $0x198] sm:$0xf0] }
 0x666   :  { %v7350_v6 = vadd.f32 %v16229_v55, %v7336_v13  ;;  %v7274_v17 = vadd.f32 %v7273_v10, %v7255_v48  ;;  %8114 = vmatpush.bf16.msrb.mxu3 %v11550_v60  ;;  %v12549_v60 = vld [vmem:[#allocation12 + $0x16c] sm:$0xf0] }
 0x667   :  { %v7308_v26 = vpop.f32.mrf.mxu2 }
 0x668   :  { %v7358_v22 = vmax.f32 %v7350_v6, 0.0  ;;  %v7309_v4 = vadd.f32 %v7308_v26, %v7289_v30  ;;  %7855 = vmatpush.bf16.msrb.mxu1 %v12496_v14  ;;  %v7339_v58 = vadd.f32 %v7274_v17, %v16177_v38 }
 0x669   :  { %v7330_v29 = vpop.f32.mrf.mxu3 }
 0x66a   :  { %v7365_v0 = vpack.c.bf16 %v7358_v22, %v7357_v12  ;;  %v7328_v8 = vadd.f32 %v7327_v15, %v7309_v4  ;;  %v7275_v51 = vpop.f32.mrf.mxu0  ;;  %v7353_v1 = vadd.f32 %v16221_v49, %v7339_v58  ;;  %v7294_v25 = vpop.f32.mrf.mxu1  ;;  %v12566_v12 = vld [vmem:[#allocation12 + $0x1f4] sm:$0xf0]  ;;  %v11571_v22 = vld [vmem:[#allocation12 + $0x1f8] sm:$0xf0] }
 0x66b   :  { %v7276_v28 = vadd.f32 %v7275_v51, %v7257_v32  ;;  %v12557_v51 = vld [vmem:[#allocation12 + $0x1ac] sm:$0xf0]  ;;  %v11537_v32 = vld [vmem:[#allocation12 + $0x1a8] sm:$0xf] }
 0x66c   :  { %v7338_v3 = vadd.f32 %v7328_v8, %v6910_v9  ;;  %7856 = vmatpush.bf16.msrb.mxu1 %v12495_v40  ;;  %v7569_v38 = vunpack.c.l.b16 %v7365_v0  ;;  %v7570_v43 = vunpack.c.h.b16 %v7365_v0  ;;  %v7361_v47 = vmax.f32 %v7353_v1, 0.0  ;;  %v11553_v8 = vld [vmem:[#allocation12 + $0x1c8] sm:$0xf]  ;;  %v12551_v1 = vld [vmem:[#allocation12 + $0x184] sm:$0xf] }
 0x66d   :  { %v7341_v15 = vadd.f32 %v7276_v28, %v16184_v20  ;;  %v11570_v0 = vor.u32 %v12566_v12, %v11569_v46  ;;  %v11574_v20 = vor.u32 %v12564_v19, %v11571_v22  ;;  %v11538_v35 = vor.u32 %v12558_v57, %v11537_v32  ;;  %v11481_v46 = vld [vmem:[#allocation12 + $0x140] sm:$0xf]  ;;  %v11483_v19 = vld [vmem:[#allocation12 + $0x150] sm:$0xf0]  ;;  %v11489_v22 = vld [vmem:[#allocation12 + $0x148] sm:$0xf] }
 0x66e   :  { %v7352_v21 = vadd.f32 %v16229_v55, %v7338_v3  ;;  %v12560_v3 = vld [vmem:[#allocation12 + $0x1cc] sm:$0xf]  ;;  %v11459_v57 = vld [vmem:[#allocation12 + $0x118] sm:$0xf0] }
 0x66f   :  { %v7311_v41 = vpop.f32.mrf.mxu2  ;;  %v7355_v4 = vadd.f32 %v16221_v49, %v7341_v15  ;;  %v11554_v49 = vor.u32 %v12562_v31, %v11553_v8  ;;  %v11465_v8 = vld [vmem:[#allocation12 + $0x120] sm:$0xf]  ;;  %v11467_v31 = vld [vmem:[#allocation12 + $0x130] sm:$0xf0]  ;;  %v12536_v32 = vld [vmem:[#allocation12 + $0x10c] sm:$0xf] }
 0x670   :  { %v7360_v39 = vmax.f32 %v7352_v21, 0.0  ;;  %v7312_v5 = vadd.f32 %v7311_v41, %v7292_v24  ;;  %v11555_v24 = vld [vmem:[#allocation12 + $0x1d8] sm:$0xf0] }
 0x671   :  { %v7332_v10 = vpop.f32.mrf.mxu3  ;;  %v7363_v34 = vmax.f32 %v7355_v4, 0.0  ;;  %v11558_v58 = vor.u32 %v12560_v3, %v11555_v24  ;;  %v12546_v4 = vld [vmem:[#allocation12 + $0x154] sm:$0xf0]  ;;  %v11473_v3 = vld [vmem:[#allocation12 + $0x128] sm:$0xf] }
 0x672   :  { %v7366_v52 = vpack.c.bf16 %v7360_v39, %v7359_v53  ;;  %v7331_v56 = vadd.f32 %v7330_v29, %v7312_v5  ;;  %v11529_v39 = vld [vmem:[#allocation12 + $0x1a0] sm:$0xf]  ;;  %v12555_v5 = vld [vmem:[#allocation12 + $0x1a4] sm:$0xf]  ;;  %v12542_v24 = vld [vmem:[#allocation12 + $0x134] sm:$0xf0] }
 0x673   :  { %v11530_v33 = vor.u32 %v12557_v51, %v11529_v39  ;;  %v11534_v37 = vor.u32 %v12555_v5, %v11531_v59  ;;  %v11451_v39 = vld [vmem:[#allocation12 + $0x110] sm:$0xf0]  ;;  %v11457_v51 = vld [vmem:[#allocation12 + $0x108] sm:$0xf]  ;;  %v12538_v5 = vld [vmem:[#allocation12 + $0x114] sm:$0xf0] }
 0x674   :  { %v7436_v2 = vunpack.c.l.b16 %v7366_v52  ;;  %v7437_v54 = vunpack.c.h.b16 %v7366_v52  ;;  %v7340_v30 = vadd.f32 %v7331_v56, %v6912_v63  ;;  %v12556_v63 = vld [vmem:[#allocation12 + $0x1ac] sm:$0xf]  ;;  %v11539_v52 = vld [vmem:[#allocation12 + $0x1b8] sm:$0xf0]  ;;  %v11458_v59 = vor.u32 %v12538_v5, %v11457_v51 }
 0x675   :  { %8102 = vmatpush.bf16.msrb.mxu2 %v11530_v33  ;;  %v11542_v56 = vor.u32 %v12556_v63, %v11539_v52  ;;  %8115 = vmatpush.bf16.msrb.mxu3 %v11534_v37  ;;  %v11689_v37 = vld [vmem:[#allocation12 + $0xe0] sm:$0xf]  ;;  %v12533_v63 = vld [vmem:[#allocation12 + $0xec] sm:$0xf0]  ;;  %v12531_v52 = vld [vmem:[#allocation12 + $0xe4] sm:$0xf] }
 0x676   :  { %v7354_v45 = vadd.f32 %v16229_v55, %v7340_v30  ;;  %v7571_v11 = vpack.c.b16 %v7436_v2, %v7569_v38  ;;  %v7572_v36 = vpack.c.b16 %v7437_v54, %v7570_v43  ;;  %v12553_v38 = vld [vmem:[#allocation12 + $0x18c] sm:$0xf0]  ;;  %v12554_v43 = vld [vmem:[#allocation12 + $0x194] sm:$0xf0]  ;;  %v12552_v30 = vld [vmem:[#allocation12 + $0x18c] sm:$0xf] }
 0x677   :  { %v7313_v13 = vpop.f32.mrf.mxu2  ;;  %v11514_v28 = vor.u32 %v12553_v38, %v11513_v7  ;;  %v11526_v44 = vor.u32 %v12552_v30, %v11523_v50  ;;  %v11691_v7 = vld [vmem:[#allocation12 + $0xf0] sm:$0xf0]  ;;  %v11697_v38 = vld [vmem:[#allocation12 + $0xe8] sm:$0xf]  ;;  %v12529_v30 = vld [vmem:[#allocation12 + $0xcc] sm:$0xf0] }
 0x678   :  { %v7362_v27 = vmax.f32 %v7354_v45, 0.0  ;;  %v7314_v6 = vadd.f32 %v7313_v13, %v7294_v25  ;;  %7679 = vmatmul.bf16.vlgmr.msra.gmra.mxu2 %v7571_v11  ;;  %7693 = vmatmul.bf16.vlgmr.msra.gmra.mxu3 %v7572_v36  ;;  %v12547_v45 = vld [vmem:[#allocation12 + $0x164] sm:$0xf]  ;;  %v11498_v11 = vor.u32 %v12549_v60, %v11497_v61  ;;  %v11499_v36 = vld [vmem:[#allocation12 + $0x170] sm:$0xf0] }
 0x679   :  { %8103 = vmatpush.bf16.msrb.mxu2 %v11514_v28  ;;  %v11505_v25 = vld [vmem:[#allocation12 + $0x168] sm:$0xf]  ;;  %v12550_v13 = vld [vmem:[#allocation12 + $0x174] sm:$0xf0]  ;;  %v11694_v28 = vor.u32 %v12531_v52, %v11691_v7  ;;  %v12527_v50 = vld [vmem:[#allocation12 + $0xc4] sm:$0xf] }
 0x67a   :  { %v7367_v14 = vpack.c.bf16 %v7362_v27, %v7361_v47  ;;  %v7333_v26 = vadd.f32 %v7332_v10, %v7314_v6  ;;  %v11502_v47 = vor.u32 %v12547_v45, %v11499_v36  ;;  %v11506_v15 = vor.u32 %v12550_v13, %v11505_v25  ;;  %v12548_v27 = vld [vmem:[#allocation12 + $0x16c] sm:$0xf]  ;;  %v11507_v6 = vld [vmem:[#allocation12 + $0x178] sm:$0xf0]  ;;  %v11681_v45 = vld [vmem:[#allocation12 + $0xc8] sm:$0xf] }
 0x67b   :  { %v11510_v10 = vor.u32 %v12548_v27, %v11507_v6  ;;  %v12528_v36 = vld [vmem:[#allocation12 + $0xcc] sm:$0xf]  ;;  %v11683_v13 = vld [vmem:[#allocation12 + $0xd8] sm:$0xf0]  ;;  %v12525_v27 = vld [vmem:[#allocation12 + $0xac] sm:$0xf0] }
 0x67c   :  { %v7438_v9 = vunpack.c.l.b16 %v7367_v14  ;;  %v7439_v48 = vunpack.c.h.b16 %v7367_v14  ;;  %v7342_v16 = vadd.f32 %v7333_v26, %v16204_v42  ;;  %v12545_v14 = vld [vmem:[#allocation12 + $0x14c] sm:$0xf0]  ;;  %v12543_v26 = vld [vmem:[#allocation12 + $0x144] sm:$0xf]  ;;  %v12514_v7 = vld [vmem:[#allocation12 + $0x54] sm:$0xf0] }
 0x67d   :  { %8104 = vmatpush.bf16.msrb.mxu2 %v11498_v11  ;;  %v11482_v12 = vor.u32 %v12545_v14, %v11481_v46  ;;  %v12530_v11 = vld [vmem:[#allocation12 + $0xd4] sm:$0xf0]  ;;  %v12523_v6 = vld [vmem:[#allocation12 + $0xa4] sm:$0xf]  ;;  %v11659_v46 = vld [vmem:[#allocation12 + $0xb0] sm:$0xf0] }
 0x67e   :  { %v7356_v18 = vadd.f32 %v16229_v55, %v7342_v16  ;;  %v7440_v40 = vpack.c.b16 %v7438_v9, %v7436_v2  ;;  %v7441_v17 = vpack.c.b16 %v7439_v48, %v7437_v54  ;;  %v11518_v2 = vor.u32 %v12551_v1, %v11515_v62  ;;  %v12544_v16 = vld [vmem:[#allocation12 + $0x14c] sm:$0xf]  ;;  %v12534_v1 = vld [vmem:[#allocation12 + $0xf4] sm:$0xf0]  ;;  %v11665_v14 = vld [vmem:[#allocation12 + $0xa8] sm:$0xf] }
 0x67f   :  { %v11522_v54 = vor.u32 %v12554_v43, %v11521_v23  ;;  %v11698_v62 = vor.u32 %v12534_v1, %v11697_v38  ;;  %v12532_v23 = vld [vmem:[#allocation12 + $0xec] sm:$0xf]  ;;  %v11699_v43 = vld [vmem:[#allocation12 + $0xf8] sm:$0xf0]  ;;  %v11682_v25 = vor.u32 %v12530_v11, %v11681_v45 }
 0x680   :  { %v7364_v21 = vmax.f32 %v7356_v18, 0.0  ;;  %7548 = vmatmul.bf16.vlgmr.msra.gmra.mxu0 %v7440_v40  ;;  %7562 = vmatmul.bf16.vlgmr.msra.gmra.mxu1 %v7441_v17  ;;  %v12541_v18 = vld [vmem:[#allocation12 + $0x12c] sm:$0xf0]  ;;  %v12539_v40 = vld [vmem:[#allocation12 + $0x124] sm:$0xf] }
 0x681   :  { %8126 = vmatpush.bf16.msra.mxu0 %v11570_v0  ;;  %8139 = vmatpush.bf16.msra.mxu1 %v11574_v20  ;;  %v11491_v0 = vld [vmem:[#allocation12 + $0x158] sm:$0xf0]  ;;  %v11466_v17 = vor.u32 %v12541_v18, %v11465_v8  ;;  %v11643_v8 = vld [vmem:[#allocation12 + $0x90] sm:$0xf0]  ;;  %v11649_v18 = vld [vmem:[#allocation12 + $0x88] sm:$0xf] }
 0x682   :  { %v7368_v29 = vpack.c.bf16 %v7364_v21, %v7363_v34  ;;  %8116 = vmatpush.bf16.msrb.mxu3 %v11518_v2  ;;  %8105 = vmatpush.bf16.msrb.mxu2 %v11482_v12  ;;  %v11494_v20 = vor.u32 %v12544_v16, %v11491_v0  ;;  %v11470_v34 = vor.u32 %v12539_v40, %v11467_v31  ;;  %v11673_v2 = vld [vmem:[#allocation12 + $0xc0] sm:$0xf]  ;;  %v12521_v16 = vld [vmem:[#allocation12 + $0x8c] sm:$0xf0]  ;;  %v12519_v0 = vld [vmem:[#allocation12 + $0x84] sm:$0xf] }
 0x683   :  { %v11474_v21 = vor.u32 %v12542_v24, %v11473_v3  ;;  %v11674_v61 = vor.u32 %v12529_v30, %v11673_v2  ;;  %v11662_v12 = vor.u32 %v12523_v6, %v11659_v46  ;;  %v12522_v40 = vld [vmem:[#allocation12 + $0x94] sm:$0xf0]  ;;  %v12520_v3 = vld [vmem:[#allocation12 + $0x8c] sm:$0xf]  ;;  %v11651_v24 = vld [vmem:[#allocation12 + $0x98] sm:$0xf0] }
 0x684   :  { %v7733_v42 = vunpack.c.l.b16 %v7368_v29  ;;  %v7734_v41 = vunpack.c.h.b16 %v7368_v29  ;;  %v11650_v31 = vor.u32 %v12522_v40, %v11649_v18  ;;  %v12512_v38 = vld [vmem:[#allocation12 + $0x4c] sm:$0xf]  ;;  %v11603_v11 = vld [vmem:[#allocation12 + $0x38] sm:$0xf0]  ;;  %v12503_v6 = vld [vmem:[#allocation12 + $0x4] sm:$0xf] }
 0x685   :  { %8127 = vmatpush.bf16.msra.mxu0 %v11554_v49  ;;  %8140 = vmatpush.bf16.msra.mxu1 %v11558_v58  ;;  %v12540_v49 = vld [vmem:[#allocation12 + $0x12c] sm:$0xf]  ;;  %v11475_v58 = vld [vmem:[#allocation12 + $0x138] sm:$0xf0]  ;;  %v11579_v46 = vld [vmem:[#allocation12 + $0x10] sm:$0xf0] }
 0x686   :  { %v7735_v53 = vpack.c.b16 %v7733_v42, %v7438_v9  ;;  %v7736_v55 = vpack.c.b16 %v7734_v41, %v7439_v48  ;;  %8117 = vmatpush.bf16.msrb.mxu3 %v11502_v47  ;;  %v11486_v9 = vor.u32 %v12543_v26, %v11483_v19  ;;  %v11490_v48 = vor.u32 %v12546_v4, %v11489_v22  ;;  %v11449_v42 = vld [vmem:[#allocation12 + $0x100] sm:$0xf]  ;;  %v12537_v41 = vld [vmem:[#allocation12 + $0x10c] sm:$0xf0]  ;;  %v12526_v26 = vld [vmem:[#allocation12 + $0xb4] sm:$0xf0] }
 0x687   :  { %v11478_v29 = vor.u32 %v12540_v49, %v11475_v58  ;;  %8106 = vmatpush.bf16.msrb.mxu2 %v11466_v17  ;;  %v11686_v47 = vor.u32 %v12528_v36, %v11683_v13  ;;  %v11666_v19 = vor.u32 %v12526_v26, %v11665_v14  ;;  %v12524_v22 = vld [vmem:[#allocation12 + $0xac] sm:$0xf]  ;;  %v11667_v4 = vld [vmem:[#allocation12 + $0xb8] sm:$0xf0]  ;;  %v11646_v17 = vor.u32 %v12519_v0, %v11643_v8  ;;  %v11625_v58 = vld [vmem:[#allocation12 + $0x60] sm:$0xf] }
 0x688   :  { %v11654_v49 = vor.u32 %v12520_v3, %v11651_v24  ;;  %v12508_v45 = vld [vmem:[#allocation12 + $0x2c] sm:$0xf]  ;;  %v11585_v14 = vld [vmem:[#allocation12 + $0x8] sm:$0xf]  ;;  %v12506_v26 = vld [vmem:[#allocation12 + $0x14] sm:$0xf0] }
 0x689   :  { %8128 = vmatpush.bf16.msra.mxu0 %v11538_v35  ;;  %8141 = vmatpush.bf16.msra.mxu1 %v11542_v56  ;;  %v11462_v35 = vor.u32 %v12536_v32, %v11459_v57  ;;  %v11690_v56 = vor.u32 %v12533_v63, %v11689_v37  ;;  %v11609_v32 = vld [vmem:[#allocation12 + $0x40] sm:$0xf]  ;;  %v12513_v37 = vld [vmem:[#allocation12 + $0x4c] sm:$0xf0]  ;;  %v11611_v63 = vld [vmem:[#allocation12 + $0x50] sm:$0xf0] }
 0x68a   :  { %8118 = vmatpush.bf16.msrb.mxu3 %v11486_v9  ;;  %v11670_v9 = vor.u32 %v12524_v22, %v11667_v4  ;;  %v11610_v52 = vor.u32 %v12513_v37, %v11609_v32  ;;  %v11587_v22 = vld [vmem:[#allocation12 + $0x18] sm:$0xf0]  ;;  %v12597_v37 = vld [vmem:[#allocation15 + $0xf0] sm:$0xff] }
 0x68d   :  { %8129 = vmatpush.bf16.msra.mxu0 %v11522_v54  ;;  %8142 = vmatpush.bf16.msra.mxu1 %v11526_v44  ;;  %v11702_v54 = vor.u32 %v12532_v23, %v11699_v43  ;;  %v11675_v44 = vld [vmem:[#allocation12 + $0xd0] sm:$0xf0]  ;;  %v11593_v23 = vld [vmem:[#allocation12 + $0x20] sm:$0xf]  ;;  %v12509_v43 = vld [vmem:[#allocation12 + $0x2c] sm:$0xf0] }
 0x68e   :  { %8119 = vmatpush.bf16.msrb.mxu3 %v11470_v34  ;;  %v11678_v60 = vor.u32 %v12527_v50, %v11675_v44  ;;  %v12507_v50 = vld [vmem:[#allocation12 + $0x24] sm:$0xf]  ;;  %v11595_v44 = vld [vmem:[#allocation12 + $0x30] sm:$0xf0] }
 0x68f   :  { %v11598_v13 = vor.u32 %v12507_v50, %v11595_v44  ;;  %v12579_v50 = vld [vmem:[#allocation15 + $0x60] sm:$0xff]  ;;  %v12585_v44 = vld [vmem:[#allocation15 + $0x90] sm:$0xff] }
 0x690   :  { %7843 = vmatmul.bf16.vlgmr.msrb.gmra.mxu0 %v7735_v53  ;;  %7857 = vmatmul.bf16.vlgmr.msrb.gmra.mxu1 %v7736_v55  ;;  %v12535_v53 = vld [vmem:[#allocation12 + $0x104] sm:$0xf]  ;;  %v11450_v55 = vor.u32 %v12537_v41, %v11449_v42 }
 0x691   :  { %8130 = vmatpush.bf16.msra.mxu0 %v11506_v15  ;;  %8143 = vmatpush.bf16.msra.mxu1 %v11510_v10  ;;  %v11454_v33 = vor.u32 %v12535_v53, %v11451_v39  ;;  %v11657_v15 = vld [vmem:[#allocation12 + $0xa0] sm:$0xf]  ;;  %v12515_v42 = vld [vmem:[#allocation12 + $0x64] sm:$0xf]  ;;  %v11627_v53 = vld [vmem:[#allocation12 + $0x70] sm:$0xf0] }
 0x692   :  { %8107 = vmatpush.bf16.msrb.mxu2 %v11450_v55  ;;  %v11658_v10 = vor.u32 %v12525_v27, %v11657_v15  ;;  %v11633_v55 = vld [vmem:[#allocation12 + $0x68] sm:$0xf]  ;;  %v12518_v39 = vld [vmem:[#allocation12 + $0x74] sm:$0xf0]  ;;  %v11630_v51 = vor.u32 %v12515_v42, %v11627_v53  ;;  %v11577_v15 = vld [vmem:[#allocation12] sm:$0xf] }
 0x693   :  { %8120 = vmatpush.bf16.msrb.mxu3 %v11454_v33  ;;  %v11634_v5 = vor.u32 %v12518_v39, %v11633_v55  ;;  %v12516_v33 = vld [vmem:[#allocation12 + $0x6c] sm:$0xf]  ;;  %v12505_v27 = vld [vmem:[#allocation12 + $0xc] sm:$0xf0] }
 0x694   :  { %v11578_v4 = vor.u32 %v12505_v27, %v11577_v15  ;;  %v12591_v15 = vld [vmem:[#allocation15 + $0xc0] sm:$0xff]  ;;  %v12568_v27 = vld [vmem:[#allocation15 + $0x8] sm:$0xff] }
 0x695   :  { %8131 = vmatpush.bf16.msra.mxu0 %v11490_v48  ;;  %8144 = vmatpush.bf16.msra.mxu1 %v11494_v20  ;;  %v11641_v48 = vld [vmem:[#allocation12 + $0x80] sm:$0xf] }
 0x696   :  { %8312 = vmatpush.bf16.msra.mxu2 %v11690_v56  ;;  %v11642_v20 = vor.u32 %v12521_v16, %v11641_v48  ;;  %v11617_v56 = vld [vmem:[#allocation12 + $0x48] sm:$0xf]  ;;  %v11586_v48 = vor.u32 %v12506_v26, %v11585_v14 }
 0x697   :  { %8325 = vmatpush.bf16.msra.mxu3 %v11694_v28  ;;  %v11618_v28 = vor.u32 %v12514_v7, %v11617_v56  ;;  %v12588_v56 = vld [vmem:[#allocation15 + $0xa8] sm:$0xff] }
 0x698   :  { %v12596_v7 = vld [vmem:[#allocation15 + $0xe8] sm:$0xff] }
 0x699   :  { %8132 = vmatpush.bf16.msra.mxu0 %v11474_v21  ;;  %8145 = vmatpush.bf16.msra.mxu1 %v11478_v29  ;;  %v12517_v29 = vld [vmem:[#allocation12 + $0x6c] sm:$0xf0] }
 0x69a   :  { %8313 = vmatpush.bf16.msra.mxu2 %v11674_v61  ;;  %v11626_v41 = vor.u32 %v12517_v29, %v11625_v58  ;;  %v11601_v61 = vld [vmem:[#allocation12 + $0x28] sm:$0xf]  ;;  %v12617_v29 = vld [vmem:[#allocation10] ss:$0 sm:$0xff] }
 0x69b   :  { %8326 = vmatpush.bf16.msra.mxu3 %v11678_v60  ;;  %v12510_v60 = vld [vmem:[#allocation12 + $0x34] sm:$0xf0] }
 0x69d   :  { %8133 = vmatpush.bf16.msra.mxu0 %v11458_v59  ;;  %8146 = vmatpush.bf16.msra.mxu1 %v11462_v35  ;;  %v11635_v59 = vld [vmem:[#allocation12 + $0x78] sm:$0xf0]  ;;  %v12511_v35 = vld [vmem:[#allocation12 + $0x44] sm:$0xf] }
 0x69e   :  { %8314 = vmatpush.bf16.msra.mxu2 %v11658_v10  ;;  %v11638_v57 = vor.u32 %v12516_v33, %v11635_v59  ;;  %v11614_v1 = vor.u32 %v12511_v35, %v11611_v63  ;;  %v11606_v10 = vor.u32 %v12508_v45, %v11603_v11  ;;  %v12598_v33 = vld [vmem:[#allocation15 + $0xf8] sm:$0xff]  ;;  %v12584_v11 = vld [vmem:[#allocation15 + $0x88] sm:$0xff] }
 0x69f   :  { %8327 = vmatpush.bf16.msra.mxu3 %v11662_v12  ;;  %v12574_v63 = vld [vmem:[#allocation15 + $0x38] sm:$0xff] }
 0x6a0   :  { %v12578_v45 = vld [vmem:[#allocation15 + $0x58] sm:$0xff] }
 0x6a1   :  { %8338 = vmatpush.bf16.msrb.mxu0 %v11698_v62  ;;  %8351 = vmatpush.bf16.msrb.mxu1 %v11702_v54  ;;  %v11619_v62 = vld [vmem:[#allocation12 + $0x58] sm:$0xf0] }
 0x6a2   :  { %8315 = vmatpush.bf16.msra.mxu2 %v11642_v20  ;;  %v11622_v30 = vor.u32 %v12512_v38, %v11619_v62  ;;  %v12573_v38 = vld [vmem:[#allocation15 + $0x30] sm:$0xff]  ;;  %v12595_v62 = vld [vmem:[#allocation15 + $0xe0] sm:$0xff] }
 0x6a3   :  { %8328 = vmatpush.bf16.msra.mxu3 %v11646_v17 }
 0x6a5   :  { %8339 = vmatpush.bf16.msrb.mxu0 %v11682_v25  ;;  %8352 = vmatpush.bf16.msrb.mxu1 %v11686_v47  ;;  %v11594_v25 = vor.u32 %v12509_v43, %v11593_v23  ;;  %v11602_v47 = vor.u32 %v12510_v60, %v11601_v61  ;;  %v12572_v23 = vld [vmem:[#allocation15 + $0x28] sm:$0xff]  ;;  %v12593_v61 = vld [vmem:[#allocation15 + $0xd0] sm:$0xff]  ;;  %v12570_v60 = vld [vmem:[#allocation15 + $0x18] sm:$0xff] }
 0x6a6   :  { %8316 = vmatpush.bf16.msra.mxu2 %v11626_v41  ;;  %v12580_v43 = vld [vmem:[#allocation15 + $0x68] sm:$0xff] }
 0x6a7   :  { %8329 = vmatpush.bf16.msra.mxu3 %v11630_v51 }
 0x6a9   :  { %8340 = vmatpush.bf16.msrb.mxu0 %v11666_v19  ;;  %8353 = vmatpush.bf16.msrb.mxu1 %v11670_v9  ;;  %v12504_v19 = vld [vmem:[#allocation12 + $0xc] sm:$0xf]  ;;  %v11582_v9 = vor.u32 %v12503_v6, %v11579_v46  ;;  %v12575_v46 = vld [vmem:[#allocation15 + $0x40] sm:$0xff] }
 0x6aa   :  { %8317 = vmatpush.bf16.msra.mxu2 %v11610_v52  ;;  %v11590_v20 = vor.u32 %v12504_v19, %v11587_v22  ;;  %v12582_v52 = vld [vmem:[#allocation15 + $0x78] sm:$0xff]  ;;  %v12576_v6 = vld [vmem:[#allocation15 + $0x48] sm:$0xff] }
 0x6ab   :  { %8330 = vmatpush.bf16.msra.mxu3 %v11614_v1  ;;  %v12581_v1 = vld [vmem:[#allocation15 + $0x70] sm:$0xff] }
 0x6ad   :  { %8341 = vmatpush.bf16.msrb.mxu0 %v11650_v31  ;;  %8354 = vmatpush.bf16.msrb.mxu1 %v11654_v49 }
 0x6ae   :  { %8318 = vmatpush.bf16.msra.mxu2 %v11594_v25  ;;  %v12569_v25 = vld [vmem:[#allocation15 + $0x10] sm:$0xff] }
 0x6af   :  { %8331 = vmatpush.bf16.msra.mxu3 %v11598_v13  ;;  %v12577_v13 = vld [vmem:[#allocation15 + $0x50] sm:$0xff] }
 0x6b1   :  { %8342 = vmatpush.bf16.msrb.mxu0 %v11634_v5  ;;  %8355 = vmatpush.bf16.msrb.mxu1 %v11638_v57  ;;  %v12590_v5 = vld [vmem:[#allocation15 + $0xb8] sm:$0xff]  ;;  %v12589_v57 = vld [vmem:[#allocation15 + $0xb0] sm:$0xff] }
 0x6b2   :  { %8319 = vmatpush.bf16.msra.mxu2 %v11578_v4 }
 0x6b3   :  { %8332 = vmatpush.bf16.msra.mxu3 %v11582_v9  ;;  %v8364_v9 = vld [vmem:[#allocation13] sm:$0xf] }
 0x6b5   :  { %8343 = vmatpush.bf16.msrb.mxu0 %v11618_v28  ;;  %8356 = vmatpush.bf16.msrb.mxu1 %v11622_v30  ;;  %v12587_v28 = vld [vmem:[#allocation15 + $0xa0] sm:$0xff] }
 0x6b6   :  { %v12571_v30 = vld [vmem:[#allocation15 + $0x20] sm:$0xff] }
 0x6b9   :  { %8344 = vmatpush.bf16.msrb.mxu0 %v11602_v47  ;;  %8357 = vmatpush.bf16.msrb.mxu1 %v11606_v10  ;;  %v12583_v47 = vld [vmem:[#allocation15 + $0x80] sm:$0xff] }
 0x6ba   :  { %v12567_v10 = vld [vmem:[#allocation15] sm:$0xff] }
 0x6bd   :  { %8345 = vmatpush.bf16.msrb.mxu0 %v11586_v48  ;;  %8358 = vmatpush.bf16.msrb.mxu1 %v11590_v20  ;;  %v8369_v20 = vperm.slane %v8364_v9, 3 }
 0x6fb   :  { %v7680_v36 = vpop.f32.mrf.mxu2  ;;  %v7694_v12 = vpop.f32.mrf.mxu3 }
 0x6fd   :  { %v16254_v34 = vpop.f32.mrf.mxu0  ;;  %v16256_v21 = vpop.f32.mrf.mxu1 }
 0x6fe   :  { %v7564_v58 = vadd.f32 %v16256_v21, %v16254_v34 }
 0x700   :  { %v7681_v53 = vadd.f32 %v7680_v36, %v7564_v58  ;;  %v12592_v36 = vld [vmem:[#allocation15 + $0xc8] sm:$0xff] }
 0x702   :  { %v7695_v59 = vadd.f32 %v7694_v12, %v7681_v53 }
 0x703   :  { %v7682_v18 = vpop.f32.mrf.mxu2  ;;  %v7696_v17 = vpop.f32.mrf.mxu3 }
 0x705   :  { %v7551_v2 = vpop.f32.mrf.mxu0  ;;  %v7565_v54 = vpop.f32.mrf.mxu1 }
 0x706   :  { %v7566_v8 = vadd.f32 %v7565_v54, %v7551_v2  ;;  %v12586_v2 = vld [vmem:[#allocation15 + $0x98] sm:$0xff] }
 0x707   :  { %v12594_v54 = vld [vmem:[#allocation15 + $0xd8] sm:$0xff] }
 0x708   :  { %v7683_v40 = vadd.f32 %v7682_v18, %v7566_v8 }
 0x70a   :  { %v7697_v24 = vadd.f32 %v7696_v17, %v7683_v40 }
 0x70d   :  { %v7844_v16 = vpop.f32.mrf.mxu0  ;;  %v7858_v0 = vpop.f32.mrf.mxu1 }
 0x70e   :  { %v7859_v39 = vadd.f32 %v7858_v0, %v7844_v16  ;;  %v8368_v0 = vperm.slane %v8364_v9, 2 }
 0x710   :  { %v7863_v32 = vadd.f32 %v7859_v39, %v7695_v59 }
 0x712   :  { %v7869_v34 = vadd.f32 %v12617_v29, %v7863_v32 }
 0x714   :  { %v7871_v21 = vmax.f32 %v7869_v34, 0.0 }
 0x715   :  { %v7846_v31 = vpop.f32.mrf.mxu0  ;;  %v7860_v3 = vpop.f32.mrf.mxu1 }
 0x716   :  { %v7861_v49 = vadd.f32 %v7860_v3, %v7846_v31  ;;  %v7873_v35 = vpack.c.bf16 %v7871_v21, %v7871_v21 }
 0x718   :  { %v7864_v42 = vadd.f32 %v7861_v49, %v7697_v24  ;;  %v8366_v24 = vperm.slane %v8364_v9, 0  ;;  %v8367_v49 = vperm.slane %v8364_v9, 1 }
 0x71a   :  { %v7870_v41 = vadd.f32 %v12617_v29, %v7864_v42 }
 0x71c   :  { %v7872_v55 = vmax.f32 %v7870_v41, 0.0 }
 0x71e   :  { %v7874_v51 = vpack.c.bf16 %v7872_v55, %v7872_v55 }
 0x720   :  { %8108 = vmatmul.bf16.vlgmr.msrb.gmra.mxu2 %v7874_v51  ;;  %8121 = vmatmul.bf16.vlgmr.msrb.gmra.mxu3 %v7874_v51 }
 0x721   :  { %8134 = vmatmul.bf16.vlgmr.msra.gmra.mxu0 %v7874_v51  ;;  %8147 = vmatmul.bf16.vlgmr.msra.gmra.mxu1 %v7874_v51 }
 0x722   :  { %8672 = vmatpush.bf16.msra.mxu0 %v12590_v5  ;;  %8685 = vmatpush.bf16.msra.mxu1 %v12598_v33 }
 0x723   :  { %8646 = vmatpush.bf16.msrb.mxu2 %v12574_v63  ;;  %8659 = vmatpush.bf16.msrb.mxu3 %v12582_v52 }
 0x726   :  { %8673 = vmatpush.bf16.msra.mxu0 %v12589_v57  ;;  %8686 = vmatpush.bf16.msra.mxu1 %v12597_v37 }
 0x727   :  { %8647 = vmatpush.bf16.msrb.mxu2 %v12573_v38  ;;  %8660 = vmatpush.bf16.msrb.mxu3 %v12581_v1  ;;  %v12618_v1 = vld [vmem:[#allocation16] ss:$0 sm:$0xff] }
 0x72a   :  { %8674 = vmatpush.bf16.msra.mxu0 %v12588_v56  ;;  %8687 = vmatpush.bf16.msra.mxu1 %v12596_v7 }
 0x72b   :  { %8648 = vmatpush.bf16.msrb.mxu2 %v12572_v23  ;;  %8661 = vmatpush.bf16.msrb.mxu3 %v12580_v43 }
 0x72e   :  { %8675 = vmatpush.bf16.msra.mxu0 %v12587_v28  ;;  %8688 = vmatpush.bf16.msra.mxu1 %v12595_v62 }
 0x72f   :  { %8649 = vmatpush.bf16.msrb.mxu2 %v12571_v30  ;;  %8662 = vmatpush.bf16.msrb.mxu3 %v12579_v50 }
 0x730   :  { %8320 = vmatmul.bf16.vlgmr.msra.gmra.mxu2 %v7873_v35  ;;  %8333 = vmatmul.bf16.vlgmr.msra.gmra.mxu3 %v7873_v35 }
 0x731   :  { %8346 = vmatmul.bf16.vlgmr.msrb.gmra.mxu0 %v7873_v35  ;;  %8359 = vmatmul.bf16.vlgmr.msrb.gmra.mxu1 %v7873_v35 }
 0x732   :  { %8676 = vmatpush.bf16.msra.mxu0 %v12586_v2  ;;  %8689 = vmatpush.bf16.msra.mxu1 %v12594_v54 }
 0x733   :  { %8650 = vmatpush.bf16.msrb.mxu2 %v12570_v60  ;;  %8663 = vmatpush.bf16.msrb.mxu3 %v12578_v45 }
 0x736   :  { %8677 = vmatpush.bf16.msra.mxu0 %v12585_v44  ;;  %8690 = vmatpush.bf16.msra.mxu1 %v12593_v61 }
 0x737   :  { %8651 = vmatpush.bf16.msrb.mxu2 %v12569_v25  ;;  %8664 = vmatpush.bf16.msrb.mxu3 %v12577_v13 }
 0x73a   :  { %8678 = vmatpush.bf16.msra.mxu0 %v12584_v11  ;;  %8691 = vmatpush.bf16.msra.mxu1 %v12592_v36 }
 0x73b   :  { %8652 = vmatpush.bf16.msrb.mxu2 %v12568_v27  ;;  %8665 = vmatpush.bf16.msrb.mxu3 %v12576_v6 }
 0x73e   :  { %8679 = vmatpush.bf16.msra.mxu0 %v12583_v47  ;;  %8692 = vmatpush.bf16.msra.mxu1 %v12591_v15 }
 0x73f   :  { %8653 = vmatpush.bf16.msrb.mxu2 %v12567_v10  ;;  %8666 = vmatpush.bf16.msrb.mxu3 %v12575_v46 }
 0x79e   :  { %v8135_v14 = vpop.f32.mrf.mxu0  ;;  %v8148_v26 = vpop.f32.mrf.mxu1 }
 0x7a3   :  { %v8109_v12 = vpop.f32.mrf.mxu2  ;;  %v8122_v19 = vpop.f32.mrf.mxu3 }
 0x7a6   :  { %v8137_v22 = vpop.f32.mrf.mxu0  ;;  %v8150_v4 = vpop.f32.mrf.mxu1 }
 0x7ab   :  { %v8111_v48 = vpop.f32.mrf.mxu2  ;;  %v8124_v16 = vpop.f32.mrf.mxu3 }
 0x7ae   :  { %v8347_v8 = vpop.f32.mrf.mxu0  ;;  %v8360_v18 = vpop.f32.mrf.mxu1 }
 0x7af   :  { %v8348_v40 = vadd.f32 %v8347_v8, %v8135_v14  ;;  %v8361_v17 = vadd.f32 %v8360_v18, %v8148_v26 }
 0x7b1   :  { %v8376_v31 = vadd.f32 %v8368_v0, %v8348_v40  ;;  %v8377_v3 = vadd.f32 %v8369_v20, %v8361_v17 }
 0x7b3   :  { %v8380_v58 = vmax.f32 %v8376_v31, 0.0  ;;  %v8381_v29 = vmax.f32 %v8377_v3, 0.0  ;;  %v8321_v42 = vpop.f32.mrf.mxu2  ;;  %v8334_v41 = vpop.f32.mrf.mxu3 }
 0x7b4   :  { %v8322_v53 = vadd.f32 %v8321_v42, %v8109_v12  ;;  %v8335_v55 = vadd.f32 %v8334_v41, %v8122_v19 }
 0x7b5   :  { %v8384_v39 = vpack.c.bf16 %v8380_v58, %v8380_v58  ;;  %v8385_v51 = vpack.c.bf16 %v8381_v29, %v8381_v29 }
 0x7b6   :  { %v8374_v5 = vadd.f32 %v8366_v24, %v8322_v53  ;;  %v8375_v33 = vadd.f32 %v8367_v49, %v8335_v55  ;;  %v8349_v59 = vpop.f32.mrf.mxu0  ;;  %v8362_v32 = vpop.f32.mrf.mxu1 }
 0x7b7   :  { %8680 = vmatmul.bf16.vlgmr.msra.gmra.mxu0 %v8384_v39  ;;  %8693 = vmatmul.bf16.vlgmr.msra.gmra.mxu1 %v8385_v51 }
 0x7b8   :  { %v8378_v57 = vmax.f32 %v8374_v5, 0.0  ;;  %v8379_v37 = vmax.f32 %v8375_v33, 0.0 }
 0x7ba   :  { %v8382_v34 = vpack.c.bf16 %v8378_v57, %v8378_v57  ;;  %v8383_v21 = vpack.c.bf16 %v8379_v37, %v8379_v37 }
 0x7bb   :  { %v8323_v35 = vpop.f32.mrf.mxu2  ;;  %v8336_v63 = vpop.f32.mrf.mxu3 }
 0x7bc   :  { %8654 = vmatmul.bf16.vlgmr.msrb.gmra.mxu2 %v8382_v34  ;;  %8667 = vmatmul.bf16.vlgmr.msrb.gmra.mxu3 %v8383_v21 }
 0x834   :  { %v8681_v52 = vpop.f32.mrf.mxu0  ;;  %v8694_v56 = vpop.f32.mrf.mxu1 }
 0x83c   :  { %v8683_v7 = vpop.f32.mrf.mxu0  ;;  %v8696_v38 = vpop.f32.mrf.mxu1 }
 0x83f   :  { %v8655_v28 = vpop.f32.mrf.mxu2  ;;  %v8668_v62 = vpop.f32.mrf.mxu3 }
 0x840   :  { %v8656_v23 = vadd.f32 %v12618_v1, %v8655_v28 }
 0x842   :  { %v8669_v43 = vadd.f32 %v8668_v62, %v8656_v23 }
 0x844   :  { %v8682_v2 = vadd.f32 %v8681_v52, %v8669_v43 }
 0x846   :  { %v8695_v54 = vadd.f32 %v8694_v56, %v8682_v2 }
 0x847   :  { %v8657_v30 = vpop.f32.mrf.mxu2  ;;  %v8670_v50 = vpop.f32.mrf.mxu3 }
 0x848   :  { %8698 = vst [vmem:[%s16274_s11] sm:$0xff] %v8695_v54 }
 0x849   :  { %8703 = vsyncpa [#allocation3], 1 }
 0x84a   :  { %8704 = vsyncpa [#allocation5], 1 }
 0x84b   :  { %8705 = vsyncpa [#allocation8], 1 }
 0x84c   :  { %8706 = vsyncpa [#allocation11], 1 }
 0x84d   :  { %8707 = vsyncpa [#allocation14], 1 }
 0x84e   :  { %8708 = vsyncpa [#allocation17], 1 }

</bundles_post_ra>
